<compile_context>
chip_gen: v7x
topology: tpu7x:2x2x1
jax: 0.10.0
libtpu: 0.0.40
codegen_flags: <defaults>
</compile_context>

<pallas_src>
import jax
import jax.numpy as jnp
from jax.experimental import pallas as pl
from jax.experimental.pallas import tpu as pltpu

_VMEM_SPEC = pl.BlockSpec(memory_space=pltpu.MemorySpace.VMEM)
_VMEM_LIMIT = 32 * 1024 * 1024  # stays under v7x's 64 MiB physical VMEM


# --------------------------- fused conv-stage kernels ---------------------------

def _conv_stage_kernel(xp_ref, w_ref, b_ref, feat_ref, l1_ref):
    # One grid step = one batch element carrying BOTH streams (x, x_hat).
    # xp_ref: (2, H+2, W+2, Cin) bf16 padded input tile
    # w_ref : (9*Cin, Cout) bf16   b_ref: (1, Cout) f32
    # feat_ref: (2, H, W, Cout) bf16   l1_ref: (1, 1) f32 (per-batch L1 partial sum)
    S, Hp, Wp, Cin = xp_ref.shape
    H, W = Hp - 2, Wp - 2
    Cout = w_ref.shape[1]
    xp = xp_ref[...].astype(jnp.float32)        # slice/concat in f32 (v5e-safe VPU path)
    # in-kernel im2col: 9 shifted windows of the resident VMEM tile, lane-concatenated
    taps = [xp[:, dy:dy + H, dx:dx + W, :] for dy in range(3) for dx in range(3)]
    patches = jnp.concatenate(taps, axis=-1)                     # (2, H, W, 9*Cin)
    lhs = patches.reshape(S * H * W, 9 * Cin).astype(jnp.bfloat16)
    acc = jnp.dot(lhs, w_ref[...], preferred_element_type=jnp.float32)  # single big-K GEMM
    act = jnp.maximum(acc + b_ref[...], 0.0)                     # (2*H*W, Cout) f32
    hw = H * W
    l1_ref[...] = jnp.sum(jnp.abs(act[:hw, :] - act[hw:, :]),
                          axis=(0, 1), keepdims=True)
    # TODO(synk): Cout < 128 at these toy widths -> masked stores; pad Cout (or fold W
    # into lanes) for fully lane-dense stores at real VGG channel counts.
    feat_ref[...] = act.reshape(S, H, W, Cout).astype(feat_ref.dtype)


def _conv_stage_fused(xp_pair, w2, b2, cout):
    B, S, Hp, Wp, Cin = xp_pair.shape
    H, W = Hp - 2, Wp - 2
    k9 = 9 * Cin
    m_total = B * S * H * W
    cost = pl.CostEstimate(
        flops=2 * m_total * k9 * cout,
        transcendentals=0,
        bytes_accessed=(xp_pair.size * 2 + k9 * cout * 2 + m_total * cout * 2
                        + 4 * cout + 4 * B))
    feats, l1p = pl.pallas_call(
        _conv_stage_kernel,
        grid=(B,),
        in_specs=[
            pl.BlockSpec((None, S, Hp, Wp, Cin), lambda b: (b, 0, 0, 0, 0)),
            pl.BlockSpec((k9, cout), lambda b: (0, 0)),
            pl.BlockSpec((1, cout), lambda b: (0, 0)),
        ],
        out_specs=[
            pl.BlockSpec((None, S, H, W, cout), lambda b: (b, 0, 0, 0, 0)),
            pl.BlockSpec((None, 1, 1), lambda b: (b, 0, 0)),
        ],
        out_shape=(
            jax.ShapeDtypeStruct((B, S, H, W, cout), jnp.bfloat16),
            jax.ShapeDtypeStruct((B, 1, 1), jnp.float32),
        ),
        compiler_params=pltpu.CompilerParams(
            dimension_semantics=("parallel",),
            vmem_limit_bytes=_VMEM_LIMIT),
        cost_estimate=cost,
    )(xp_pair, w2, b2)
    return feats, jnp.sum(l1p)


def _conv_pair_gemm_kernel(lx_ref, lh_ref, w_ref, b_ref, fx_ref, fh_ref, l1_ref):
    # Tail stages: GEMM + bias + ReLU for both streams + fused L1 partial, one block.
    w = w_ref[...]
    bias = b_ref[...]
    ax = jnp.maximum(jnp.dot(lx_ref[...], w, preferred_element_type=jnp.float32) + bias, 0.0)
    ah = jnp.maximum(jnp.dot(lh_ref[...], w, preferred_element_type=jnp.float32) + bias, 0.0)
    l1_ref[...] = jnp.sum(jnp.abs(ax - ah), axis=(0, 1), keepdims=True)
    fx_ref[...] = ax.astype(fx_ref.dtype)
    fh_ref[...] = ah.astype(fh_ref.dtype)


def _conv_stage_small(xp_pair, w2, b2, cout):
    # Tiny tail stages (W not a multiple of 8, a few KB of data): im2col stays in XLA,
    # a single-block Pallas GEMM+ReLU+L1 handles both streams.
    B, S, Hp, Wp, Cin = xp_pair.shape
    H, W = Hp - 2, Wp - 2
    taps = [xp_pair[:, :, dy:dy + H, dx:dx + W, :] for dy in range(3) for dx in range(3)]
    pat = jnp.concatenate(taps, axis=-1)                          # (B, 2, H, W, 9*Cin)
    pat = jnp.transpose(pat, (1, 0, 2, 3, 4)).reshape(S, B * H * W, 9 * Cin)
    mh = B * H * W
    fx, fh, l1 = pl.pallas_call(
        _conv_pair_gemm_kernel,
        out_shape=(
            jax.ShapeDtypeStruct((mh, cout), jnp.bfloat16),
            jax.ShapeDtypeStruct((mh, cout), jnp.bfloat16),
            jax.ShapeDtypeStruct((1, 1), jnp.float32),
        ),
        in_specs=[_VMEM_SPEC] * 4,
        out_specs=[_VMEM_SPEC] * 3,
        compiler_params=pltpu.CompilerParams(vmem_limit_bytes=_VMEM_LIMIT),
    )(pat[0], pat[1], w2, b2)
    feats = jnp.stack([fx, fh], axis=0).reshape(S, B, H, W, cout)
    return jnp.transpose(feats, (1, 0, 2, 3, 4)), l1[0, 0]


# --------------------------- mini-VGG stand-in ---------------------------

def make_vgg_params(seed, cin, channels):
    key = jax.random.PRNGKey(seed)
    params = []
    for cout in channels:
        key, kw, kb = jax.random.split(key, 3)
        fan_in = 9 * cin
        w = jax.random.normal(kw, (3, 3, cin, cout), jnp.float32) * jnp.sqrt(2.0 / fan_in)
        b = jax.random.normal(kb, (cout,), jnp.float32) * 0.01
        # (dy, dx, ci)-major rows match the in-kernel tap-concat order; the reshape/cast
        # is hoisted here so weights stay resident across x/x_hat and stage invocations.
        params.append((w.reshape(9 * cin, cout).astype(jnp.bfloat16),
                       b.reshape(1, cout), cout))
        cin = cout
    return params


def _pad_pair(x):
    return jnp.pad(x, ((0, 0), (0, 0), (1, 1), (1, 1), (0, 0)))


def _maxpool2x2_pair(x):
    # 2x2 max-pool between stages (assumes even H, W); cheap XLA glue.
    B, S, H, W, C = x.shape
    return x.reshape(B, S, H // 2, 2, W // 2, 2, C).max(axis=(3, 5))


def vgg_pair_l1(x_pair, params):
    # x_pair: (B, 2, H, W, 3) normalized f32; returns sum over stages of mean|f(x)-f(x_hat)|
    h = x_pair.astype(jnp.bfloat16)     # bf16 activations between stages (halves HBM traffic)
    total = jnp.float32(0.0)
    for idx, (w2, b2, cout) in enumerate(params):
        B, S, H, W, _ = h.shape
        xp = _pad_pair(h)
        if W % 8 == 0:
            feats, l1sum = _conv_stage_fused(xp, w2, b2, cout)
        else:
            feats, l1sum = _conv_stage_small(xp, w2, b2, cout)
        total = total + l1sum / float(B * H * W * cout)
        if idx < len(params) - 1:
            h = _maxpool2x2_pair(feats)
    return total


# --------------------------- tiled reductions (LossAdv) ---------------------------

def _l1_sum_tile_kernel(a_ref, b_ref, o_ref):
    o_ref[...] = jnp.sum(jnp.abs(a_ref[...] - b_ref[...]), axis=(0, 1), keepdims=True)


def _sum_tile_kernel(a_ref, o_ref):
    o_ref[...] = jnp.sum(a_ref[...], axis=(0, 1), keepdims=True)


def _as_tiled_2d(vec, max_tile_rows=512):
    # flatten to a lane-dense (rows, 128) matrix padded to a whole number of tiles
    n = vec.shape[0]
    rows = -(-n // 128)
    tile = min(max_tile_rows, -(-rows // 8) * 8)
    rows_p = -(-rows // tile) * tile
    v2 = jnp.pad(vec, (0, rows_p * 128 - n)).reshape(rows_p, 128)
    return v2, tile, rows_p // tile


def _reduce_partials(kernel, args, tile, grid):
    return pl.pallas_call(
        kernel,
        grid=(grid,),
        in_specs=[pl.BlockSpec((tile, 128), lambda i: (i, 0)) for _ in args],
        out_specs=pl.BlockSpec((None, 1, 1), lambda i: (i, 0, 0)),
        out_shape=jax.ShapeDtypeStruct((grid, 1, 1), jnp.float32),
        compiler_params=pltpu.CompilerParams(
            dimension_semantics=("parallel",), vmem_limit_bytes=_VMEM_LIMIT),
    )(*args)


def l1_mean(a, b):
    n = a.size
    a2, tile, grid = _as_tiled_2d(a.reshape(-1).astype(jnp.float32))
    b2, _, _ = _as_tiled_2d(b.reshape(-1).astype(jnp.float32))
    parts = _reduce_partials(_l1_sum_tile_kernel, (a2, b2), tile, grid)
    return jnp.sum(parts) / float(n)


def neg_mean(r):
    n = r.size
    r2, tile, grid = _as_tiled_2d(r.reshape(-1).astype(jnp.float32))
    parts = _reduce_partials(_sum_tile_kernel, (r2,), tile, grid)
    return -(jnp.sum(parts) / float(n))


# --------------------------- LossMatch ---------------------------

def _match_partial_kernel(e_ref, w_ref, o_ref):
    # e_ref: (K, D), w_ref: (1, D) -> per-batch partial sum of |e - W[:, i[b]]|
    o_ref[...] = jnp.sum(jnp.abs(e_ref[...] - w_ref[...]), axis=(0, 1), keepdims=True)


def loss_match(e_vectors, W, i, match_weight=80.0):
    B, K = e_vectors.shape[0], e_vectors.shape[1]
    e3 = e_vectors.reshape(B, K, -1).astype(jnp.float32)          # (B, K, D)
    D = e3.shape[-1]
    # TODO(synk): the W[:, i[b]] column gather stays in XLA (tiny); a scalar-prefetch
    # BlockSpec gather would be the all-Pallas alternative.
    wi = jnp.take(W.astype(jnp.float32), i, axis=1).T.reshape(B, 1, D)
    parts = pl.pallas_call(
        _match_partial_kernel,
        grid=(B,),
        in_specs=[pl.BlockSpec((None, K, D), lambda b: (b, 0, 0)),
                  pl.BlockSpec((None, 1, D), lambda b: (b, 0, 0))],
        out_specs=pl.BlockSpec((None, 1, 1), lambda b: (b, 0, 0)),
        out_shape=jax.ShapeDtypeStruct((B, 1, 1), jnp.float32),
        compiler_params=pltpu.CompilerParams(
            dimension_semantics=("parallel",), vmem_limit_bytes=_VMEM_LIMIT),
    )(e3, wi)
    return jnp.sum(parts) / float(B * K * D) * match_weight


# --------------------------- LossG ---------------------------

class LossG:
    """lossG = LossCnt(x, x_hat) + LossAdv(r_hat, D_res, D_hat_res) + LossMatch(e, W, i)."""

    def __init__(self, VGGFace_body_path=None, VGGFace_weight_path=None, device=None,
                 vgg19_weight=0.01, vggface_weight=0.002,
                 fm_weight=10.0, match_weight=80.0,
                 stage_channels=(8, 16, 32, 32, 32)):
        # TODO(synk): pretrained VGG19 / VGGFace checkpoints cannot be loaded here;
        # deterministic randomly-initialized mini-VGG stand-ins supply the hook activations.
        self.vgg19_params = make_vgg_params(1, 3, stage_channels)
        self.vggface_params = make_vgg_params(2, 3, stage_channels)
        self.vgg19_weight = vgg19_weight
        self.vggface_weight = vggface_weight
        self.fm_weight = fm_weight
        self.match_weight = match_weight
        self.img_mean = jnp.array([0.485, 0.456, 0.406], jnp.float32).reshape(1, 1, 1, 3)
        self.img_invstd = (1.0 / jnp.array([0.229, 0.224, 0.225], jnp.float32)).reshape(1, 1, 1, 3)

    def _loss_cnt(self, x_nchw, x_hat_nchw):
        x = jnp.transpose(x_nchw, (0, 2, 3, 1)).astype(jnp.float32)     # NCHW -> NHWC
        xh = jnp.transpose(x_hat_nchw, (0, 2, 3, 1)).astype(jnp.float32)
        # ImageNet normalization folded into input prep (no separate lane-sparse
        # Pallas launch / HBM roundtrip).
        x = (x - self.img_mean) * self.img_invstd
        xh = (xh - self.img_mean) * self.img_invstd
        pair = jnp.stack([x, xh], axis=1)                               # (B, 2, H, W, 3)
        return (vgg_pair_l1(pair, self.vgg19_params) * self.vgg19_weight +
                vgg_pair_l1(pair, self.vggface_params) * self.vggface_weight)

    def _loss_adv(self, r_hat, D_res_list, D_hat_res_list):
        loss_fm = jnp.float32(0.0)
        for res, res_hat in zip(D_res_list, D_hat_res_list):
            loss_fm = loss_fm + l1_mean(res, res_hat)
        return neg_mean(r_hat) + loss_fm * self.fm_weight

    def __call__(self, x, x_hat, r_hat, D_res_list, D_hat_res_list, e_vectors, W, i):
        return (self._loss_cnt(x, x_hat)
                + self._loss_adv(r_hat, D_res_list, D_hat_res_list)
                + loss_match(e_vectors, W, i, self.match_weight))


# --------------------------- main ---------------------------

if __name__ == "__main__":
    key = jax.random.PRNGKey(0)
    ks = jax.random.split(key, 12)
    B = 2
    x = jax.random.uniform(ks[0], (B, 3, 16, 16), jnp.float32)        # NCHW
    x_hat = jax.random.uniform(ks[1], (B, 3, 16, 16), jnp.float32)    # NCHW
    r_hat = jax.random.normal(ks[2], (B, 1), jnp.float32)             # discriminator score
    D_res_list = [
        jax.random.normal(ks[3], (B, 8, 16, 16), jnp.float32),
        jax.random.normal(ks[4], (B, 16, 8, 8), jnp.float32),
        jax.random.normal(ks[5], (B, 32, 4, 4), jnp.float32),
    ]
    D_hat_res_list = [
        jax.random.normal(ks[6], (B, 8, 16, 16), jnp.float32),
        jax.random.normal(ks[7], (B, 16, 8, 8), jnp.float32),
        jax.random.normal(ks[8], (B, 32, 4, 4), jnp.float32),
    ]
    e_vectors = jax.random.normal(ks[9], (B, 8, 512, 1), jnp.float32)  # embedding vectors
    W_bank = jax.random.normal(ks[10], (512, 4), jnp.float32)          # embedding matrix
    i_idx = jax.random.randint(ks[11], (B,), 0, 4, jnp.int32)          # video indices

    loss_fn = LossG()
    loss = jax.jit(loss_fn.__call__)(x, x_hat, r_hat, D_res_list, D_hat_res_list,
                                     e_vectors, W_bank, i_idx)
    jax.block_until_ready(loss)
    print("KERNEL_OK")
</pallas_src>

<mosaic_0001>
module attributes {stable_mosaic.version = 11 : i64} {
  func.func @_conv_stage_kernel(%arg0: i32, %arg1: memref<1x2x10x10x8xbf16, #tpu.memory_space<vmem>>, %arg2: memref<72x16xbf16, #tpu.memory_space<vmem>>, %arg3: memref<1x16xf32, #tpu.memory_space<vmem>>, %arg4: memref<1x2x8x8x16xbf16, #tpu.memory_space<vmem>>, %arg5: memref<1x1x1xf32, #tpu.memory_space<vmem>>) attributes {dimension_semantics = [#tpu.dimension_semantics<parallel>], iteration_bounds = array<i64: 2>, scalar_prefetch = 0 : i64, scratch_operands = 0 : i64, tpu.core_type = #tpu.core_type<tc>, window_params = [{transform_indices = @transform_0, window_bounds = array<i64: 1, 2, 10, 10, 8>}, {pipeline_mode = #tpu.pipeline_mode<synchronous>, transform_indices = @transform_1, window_bounds = array<i64: 72, 16>}, {pipeline_mode = #tpu.pipeline_mode<synchronous>, transform_indices = @transform_2, window_bounds = array<i64: 1, 16>}, {transform_indices = @transform_3, window_bounds = array<i64: 1, 2, 8, 8, 16>}, {transform_indices = @transform_4, window_bounds = array<i64: 1, 1, 1>}]} {
    %c0 = arith.constant 0 : index
    %c0_0 = arith.constant 0 : index
    %c0_1 = arith.constant 0 : index
    %c0_2 = arith.constant 0 : index
    %c0_3 = arith.constant 0 : index
    %0 = vector.load %arg1[%c0, %c0_0, %c0_1, %c0_2, %c0_3] : memref<1x2x10x10x8xbf16, #tpu.memory_space<vmem>>, vector<1x2x10x10x8xbf16>
    %1 = vector.shape_cast %0 : vector<1x2x10x10x8xbf16> to vector<2x10x10x8xbf16>
    %2 = arith.extf %1 : vector<2x10x10x8xbf16> to vector<2x10x10x8xf32>
    %3 = vector.extract_strided_slice %2 {offsets = [0, 0, 0, 0], sizes = [2, 8, 8, 8], strides = [1, 1, 1, 1]} : vector<2x10x10x8xf32> to vector<2x8x8x8xf32>
    %4 = vector.extract_strided_slice %2 {offsets = [0, 0, 1, 0], sizes = [2, 8, 8, 8], strides = [1, 1, 1, 1]} : vector<2x10x10x8xf32> to vector<2x8x8x8xf32>
    %5 = vector.extract_strided_slice %2 {offsets = [0, 0, 2, 0], sizes = [2, 8, 8, 8], strides = [1, 1, 1, 1]} : vector<2x10x10x8xf32> to vector<2x8x8x8xf32>
    %6 = vector.extract_strided_slice %2 {offsets = [0, 1, 0, 0], sizes = [2, 8, 8, 8], strides = [1, 1, 1, 1]} : vector<2x10x10x8xf32> to vector<2x8x8x8xf32>
    %7 = vector.extract_strided_slice %2 {offsets = [0, 1, 1, 0], sizes = [2, 8, 8, 8], strides = [1, 1, 1, 1]} : vector<2x10x10x8xf32> to vector<2x8x8x8xf32>
    %8 = vector.extract_strided_slice %2 {offsets = [0, 1, 2, 0], sizes = [2, 8, 8, 8], strides = [1, 1, 1, 1]} : vector<2x10x10x8xf32> to vector<2x8x8x8xf32>
    %9 = vector.extract_strided_slice %2 {offsets = [0, 2, 0, 0], sizes = [2, 8, 8, 8], strides = [1, 1, 1, 1]} : vector<2x10x10x8xf32> to vector<2x8x8x8xf32>
    %10 = vector.extract_strided_slice %2 {offsets = [0, 2, 1, 0], sizes = [2, 8, 8, 8], strides = [1, 1, 1, 1]} : vector<2x10x10x8xf32> to vector<2x8x8x8xf32>
    %11 = vector.extract_strided_slice %2 {offsets = [0, 2, 2, 0], sizes = [2, 8, 8, 8], strides = [1, 1, 1, 1]} : vector<2x10x10x8xf32> to vector<2x8x8x8xf32>
    %12 = tpu.concatenate %3, %4, %5, %6, %7, %8, %9, %10, %11 in 3 : vector<2x8x8x8xf32>, vector<2x8x8x8xf32>, vector<2x8x8x8xf32>, vector<2x8x8x8xf32>, vector<2x8x8x8xf32>, vector<2x8x8x8xf32>, vector<2x8x8x8xf32>, vector<2x8x8x8xf32>, vector<2x8x8x8xf32> -> vector<2x8x8x72xf32>
    %13 = vector.shape_cast %12 : vector<2x8x8x72xf32> to vector<128x72xf32>
    %14 = arith.truncf %13 : vector<128x72xf32> to vector<128x72xbf16>
    %c0_4 = arith.constant 0 : index
    %c0_5 = arith.constant 0 : index
    %15 = vector.load %arg2[%c0_4, %c0_5] : memref<72x16xbf16, #tpu.memory_space<vmem>>, vector<72x16xbf16>
    %cst = arith.constant dense<0.000000e+00> : vector<128x16xf32>
    %16 = tpu.matmul %14, %15, %cst {dimension_numbers = #tpu.dot_dimension_numbers<[1], [0], [0], [1], [0, 0, 1, 1], [], []>} : vector<128x72xbf16>, vector<72x16xbf16>, vector<128x16xf32> -> vector<128x16xf32>
    %c0_6 = arith.constant 0 : index
    %c0_7 = arith.constant 0 : index
    %17 = vector.load %arg3[%c0_6, %c0_7] : memref<1x16xf32, #tpu.memory_space<vmem>>, vector<1x16xf32>
    %18 = vector.broadcast %17 : vector<1x16xf32> to vector<128x16xf32>
    %19 = arith.addf %16, %18 : vector<128x16xf32>
    %cst_8 = arith.constant 0.000000e+00 : f32
    %20 = vector.broadcast %cst_8 : f32 to vector<128x16xf32>
    %21 = arith.maximumf %19, %20 : vector<128x16xf32>
    %22 = vector.extract_strided_slice %21 {offsets = [0, 0], sizes = [64, 16], strides = [1, 1]} : vector<128x16xf32> to vector<64x16xf32>
    %23 = vector.extract_strided_slice %21 {offsets = [64, 0], sizes = [64, 16], strides = [1, 1]} : vector<128x16xf32> to vector<64x16xf32>
    %24 = arith.subf %22, %23 : vector<64x16xf32>
    %25 = math.absf %24 : vector<64x16xf32>
    %26 = vector.shape_cast %25 : vector<64x16xf32> to vector<1x64x16xf32>
    %cst_9 = arith.constant dense<0.000000e+00> : vector<1xf32>
    %27 = vector.multi_reduction <add>, %26, %cst_9 [1, 2] : vector<1x64x16xf32> to vector<1xf32>
    %28 = vector.shape_cast %27 : vector<1xf32> to vector<1x1x1xf32>
    %29 = vector.extract %28[0, 0, 0] : f32 from vector<1x1x1xf32>
    %30 = vector.broadcast %29 : f32 to vector<1x1xf32>
    %c0_10 = arith.constant 0 : index
    %c0_11 = arith.constant 0 : index
    %c0_12 = arith.constant 0 : index
    %31 = vector.load %arg5[%c0_10, %c0_11, %c0_12] : memref<1x1x1xf32, #tpu.memory_space<vmem>>, vector<1x1x1xf32>
    %32 = vector.shape_cast %31 : vector<1x1x1xf32> to vector<1x1xf32>
    %33 = vector.shape_cast %30 : vector<1x1xf32> to vector<1x1x1xf32>
    tpu.vector_store %arg5[%c0_10, %c0_11, %c0_12], %33 {strides = array<i32>} : memref<1x1x1xf32, #tpu.memory_space<vmem>>, vector<1x1x1xf32>,
    %34 = vector.shape_cast %21 : vector<128x16xf32> to vector<2x8x8x16xf32>
    %35 = arith.truncf %34 : vector<2x8x8x16xf32> to vector<2x8x8x16xbf16>
    %c0_13 = arith.constant 0 : index
    %c0_14 = arith.constant 0 : index
    %c0_15 = arith.constant 0 : index
    %c0_16 = arith.constant 0 : index
    %c0_17 = arith.constant 0 : index
    %36 = vector.load %arg4[%c0_13, %c0_14, %c0_15, %c0_16, %c0_17] : memref<1x2x8x8x16xbf16, #tpu.memory_space<vmem>>, vector<1x2x8x8x16xbf16>
    %37 = vector.shape_cast %36 : vector<1x2x8x8x16xbf16> to vector<2x8x8x16xbf16>
    %38 = vector.shape_cast %35 : vector<2x8x8x16xbf16> to vector<1x2x8x8x16xbf16>
    tpu.vector_store %arg4[%c0_13, %c0_14, %c0_15, %c0_16, %c0_17], %38 {strides = array<i32>} : memref<1x2x8x8x16xbf16, #tpu.memory_space<vmem>>, vector<1x2x8x8x16xbf16>,
    return
  }
  func.func @transform_0(%arg0: i32) -> (i32, i32, i32, i32, i32) {
    %c0_i32 = arith.constant 0 : i32
    %c0_i32_0 = arith.constant 0 : i32
    %c0_i32_1 = arith.constant 0 : i32
    %c0_i32_2 = arith.constant 0 : i32
    %c0_i32_3 = arith.constant 0 : i32
    return %arg0, %c0_i32, %c0_i32_0, %c0_i32_1, %c0_i32_2 : i32, i32, i32, i32, i32
  }
  func.func @transform_1(%arg0: i32) -> (i32, i32) {
    %c0_i32 = arith.constant 0 : i32
    %c0_i32_0 = arith.constant 0 : i32
    %c0_i32_1 = arith.constant 0 : i32
    return %c0_i32, %c0_i32_0 : i32, i32
  }
  func.func @transform_2(%arg0: i32) -> (i32, i32) {
    %c0_i32 = arith.constant 0 : i32
    %c0_i32_0 = arith.constant 0 : i32
    %c0_i32_1 = arith.constant 0 : i32
    return %c0_i32, %c0_i32_0 : i32, i32
  }
  func.func @transform_3(%arg0: i32) -> (i32, i32, i32, i32, i32) {
    %c0_i32 = arith.constant 0 : i32
    %c0_i32_0 = arith.constant 0 : i32
    %c0_i32_1 = arith.constant 0 : i32
    %c0_i32_2 = arith.constant 0 : i32
    %c0_i32_3 = arith.constant 0 : i32
    return %arg0, %c0_i32, %c0_i32_0, %c0_i32_1, %c0_i32_2 : i32, i32, i32, i32, i32
  }
  func.func @transform_4(%arg0: i32) -> (i32, i32, i32) {
    %c0_i32 = arith.constant 0 : i32
    %c0_i32_0 = arith.constant 0 : i32
    %c0_i32_1 = arith.constant 0 : i32
    return %arg0, %c0_i32, %c0_i32_0 : i32, i32, i32
  }
}

module attributes {stable_mosaic.version = 11 : i64} {
  func.func @_conv_stage_kernel(%arg0: i32, %arg1: memref<1x2x18x18x3xbf16, #tpu.memory_space<vmem>>, %arg2: memref<27x8xbf16, #tpu.memory_space<vmem>>, %arg3: memref<1x8xf32, #tpu.memory_space<vmem>>, %arg4: memref<1x2x16x16x8xbf16, #tpu.memory_space<vmem>>, %arg5: memref<1x1x1xf32, #tpu.memory_space<vmem>>) attributes {dimension_semantics = [#tpu.dimension_semantics<parallel>], iteration_bounds = array<i64: 2>, scalar_prefetch = 0 : i64, scratch_operands = 0 : i64, tpu.core_type = #tpu.core_type<tc>, window_params = [{transform_indices = @transform_0, window_bounds = array<i64: 1, 2, 18, 18, 3>}, {pipeline_mode = #tpu.pipeline_mode<synchronous>, transform_indices = @transform_1, window_bounds = array<i64: 27, 8>}, {pipeline_mode = #tpu.pipeline_mode<synchronous>, transform_indices = @transform_2, window_bounds = array<i64: 1, 8>}, {transform_indices = @transform_3, window_bounds = array<i64: 1, 2, 16, 16, 8>}, {transform_indices = @transform_4, window_bounds = array<i64: 1, 1, 1>}]} {
    %c0 = arith.constant 0 : index
    %c0_0 = arith.constant 0 : index
    %c0_1 = arith.constant 0 : index
    %c0_2 = arith.constant 0 : index
    %c0_3 = arith.constant 0 : index
    %0 = vector.load %arg1[%c0, %c0_0, %c0_1, %c0_2, %c0_3] : memref<1x2x18x18x3xbf16, #tpu.memory_space<vmem>>, vector<1x2x18x18x3xbf16>
    %1 = vector.shape_cast %0 : vector<1x2x18x18x3xbf16> to vector<2x18x18x3xbf16>
    %2 = arith.extf %1 : vector<2x18x18x3xbf16> to vector<2x18x18x3xf32>
    %3 = vector.extract_strided_slice %2 {offsets = [0, 0, 0, 0], sizes = [2, 16, 16, 3], strides = [1, 1, 1, 1]} : vector<2x18x18x3xf32> to vector<2x16x16x3xf32>
    %4 = vector.extract_strided_slice %2 {offsets = [0, 0, 1, 0], sizes = [2, 16, 16, 3], strides = [1, 1, 1, 1]} : vector<2x18x18x3xf32> to vector<2x16x16x3xf32>
    %5 = vector.extract_strided_slice %2 {offsets = [0, 0, 2, 0], sizes = [2, 16, 16, 3], strides = [1, 1, 1, 1]} : vector<2x18x18x3xf32> to vector<2x16x16x3xf32>
    %6 = vector.extract_strided_slice %2 {offsets = [0, 1, 0, 0], sizes = [2, 16, 16, 3], strides = [1, 1, 1, 1]} : vector<2x18x18x3xf32> to vector<2x16x16x3xf32>
    %7 = vector.extract_strided_slice %2 {offsets = [0, 1, 1, 0], sizes = [2, 16, 16, 3], strides = [1, 1, 1, 1]} : vector<2x18x18x3xf32> to vector<2x16x16x3xf32>
    %8 = vector.extract_strided_slice %2 {offsets = [0, 1, 2, 0], sizes = [2, 16, 16, 3], strides = [1, 1, 1, 1]} : vector<2x18x18x3xf32> to vector<2x16x16x3xf32>
    %9 = vector.extract_strided_slice %2 {offsets = [0, 2, 0, 0], sizes = [2, 16, 16, 3], strides = [1, 1, 1, 1]} : vector<2x18x18x3xf32> to vector<2x16x16x3xf32>
    %10 = vector.extract_strided_slice %2 {offsets = [0, 2, 1, 0], sizes = [2, 16, 16, 3], strides = [1, 1, 1, 1]} : vector<2x18x18x3xf32> to vector<2x16x16x3xf32>
    %11 = vector.extract_strided_slice %2 {offsets = [0, 2, 2, 0], sizes = [2, 16, 16, 3], strides = [1, 1, 1, 1]} : vector<2x18x18x3xf32> to vector<2x16x16x3xf32>
    %12 = tpu.concatenate %3, %4, %5, %6, %7, %8, %9, %10, %11 in 3 : vector<2x16x16x3xf32>, vector<2x16x16x3xf32>, vector<2x16x16x3xf32>, vector<2x16x16x3xf32>, vector<2x16x16x3xf32>, vector<2x16x16x3xf32>, vector<2x16x16x3xf32>, vector<2x16x16x3xf32>, vector<2x16x16x3xf32> -> vector<2x16x16x27xf32>
    %13 = vector.shape_cast %12 : vector<2x16x16x27xf32> to vector<512x27xf32>
    %14 = arith.truncf %13 : vector<512x27xf32> to vector<512x27xbf16>
    %c0_4 = arith.constant 0 : index
    %c0_5 = arith.constant 0 : index
    %15 = vector.load %arg2[%c0_4, %c0_5] : memref<27x8xbf16, #tpu.memory_space<vmem>>, vector<27x8xbf16>
    %cst = arith.constant dense<0.000000e+00> : vector<512x8xf32>
    %16 = tpu.matmul %14, %15, %cst {dimension_numbers = #tpu.dot_dimension_numbers<[1], [0], [0], [1], [0, 0, 1, 1], [], []>} : vector<512x27xbf16>, vector<27x8xbf16>, vector<512x8xf32> -> vector<512x8xf32>
    %c0_6 = arith.constant 0 : index
    %c0_7 = arith.constant 0 : index
    %17 = vector.load %arg3[%c0_6, %c0_7] : memref<1x8xf32, #tpu.memory_space<vmem>>, vector<1x8xf32>
    %18 = vector.broadcast %17 : vector<1x8xf32> to vector<512x8xf32>
    %19 = arith.addf %16, %18 : vector<512x8xf32>
    %cst_8 = arith.constant 0.000000e+00 : f32
    %20 = vector.broadcast %cst_8 : f32 to vector<512x8xf32>
    %21 = arith.maximumf %19, %20 : vector<512x8xf32>
    %22 = vector.extract_strided_slice %21 {offsets = [0, 0], sizes = [256, 8], strides = [1, 1]} : vector<512x8xf32> to vector<256x8xf32>
    %23 = vector.extract_strided_slice %21 {offsets = [256, 0], sizes = [256, 8], strides = [1, 1]} : vector<512x8xf32> to vector<256x8xf32>
    %24 = arith.subf %22, %23 : vector<256x8xf32>
    %25 = math.absf %24 : vector<256x8xf32>
    %26 = vector.shape_cast %25 : vector<256x8xf32> to vector<1x256x8xf32>
    %cst_9 = arith.constant dense<0.000000e+00> : vector<1xf32>
    %27 = vector.multi_reduction <add>, %26, %cst_9 [1, 2] : vector<1x256x8xf32> to vector<1xf32>
    %28 = vector.shape_cast %27 : vector<1xf32> to vector<1x1x1xf32>
    %29 = vector.extract %28[0, 0, 0] : f32 from vector<1x1x1xf32>
    %30 = vector.broadcast %29 : f32 to vector<1x1xf32>
    %c0_10 = arith.constant 0 : index
    %c0_11 = arith.constant 0 : index
    %c0_12 = arith.constant 0 : index
    %31 = vector.load %arg5[%c0_10, %c0_11, %c0_12] : memref<1x1x1xf32, #tpu.memory_space<vmem>>, vector<1x1x1xf32>
    %32 = vector.shape_cast %31 : vector<1x1x1xf32> to vector<1x1xf32>
    %33 = vector.shape_cast %30 : vector<1x1xf32> to vector<1x1x1xf32>
    tpu.vector_store %arg5[%c0_10, %c0_11, %c0_12], %33 {strides = array<i32>} : memref<1x1x1xf32, #tpu.memory_space<vmem>>, vector<1x1x1xf32>,
    %34 = vector.shape_cast %21 : vector<512x8xf32> to vector<2x16x16x8xf32>
    %35 = arith.truncf %34 : vector<2x16x16x8xf32> to vector<2x16x16x8xbf16>
    %c0_13 = arith.constant 0 : index
    %c0_14 = arith.constant 0 : index
    %c0_15 = arith.constant 0 : index
    %c0_16 = arith.constant 0 : index
    %c0_17 = arith.constant 0 : index
    %36 = vector.load %arg4[%c0_13, %c0_14, %c0_15, %c0_16, %c0_17] : memref<1x2x16x16x8xbf16, #tpu.memory_space<vmem>>, vector<1x2x16x16x8xbf16>
    %37 = vector.shape_cast %36 : vector<1x2x16x16x8xbf16> to vector<2x16x16x8xbf16>
    %38 = vector.shape_cast %35 : vector<2x16x16x8xbf16> to vector<1x2x16x16x8xbf16>
    tpu.vector_store %arg4[%c0_13, %c0_14, %c0_15, %c0_16, %c0_17], %38 {strides = array<i32>} : memref<1x2x16x16x8xbf16, #tpu.memory_space<vmem>>, vector<1x2x16x16x8xbf16>,
    return
  }
  func.func @transform_0(%arg0: i32) -> (i32, i32, i32, i32, i32) {
    %c0_i32 = arith.constant 0 : i32
    %c0_i32_0 = arith.constant 0 : i32
    %c0_i32_1 = arith.constant 0 : i32
    %c0_i32_2 = arith.constant 0 : i32
    %c0_i32_3 = arith.constant 0 : i32
    return %arg0, %c0_i32, %c0_i32_0, %c0_i32_1, %c0_i32_2 : i32, i32, i32, i32, i32
  }
  func.func @transform_1(%arg0: i32) -> (i32, i32) {
    %c0_i32 = arith.constant 0 : i32
    %c0_i32_0 = arith.constant 0 : i32
    %c0_i32_1 = arith.constant 0 : i32
    return %c0_i32, %c0_i32_0 : i32, i32
  }
  func.func @transform_2(%arg0: i32) -> (i32, i32) {
    %c0_i32 = arith.constant 0 : i32
    %c0_i32_0 = arith.constant 0 : i32
    %c0_i32_1 = arith.constant 0 : i32
    return %c0_i32, %c0_i32_0 : i32, i32
  }
  func.func @transform_3(%arg0: i32) -> (i32, i32, i32, i32, i32) {
    %c0_i32 = arith.constant 0 : i32
    %c0_i32_0 = arith.constant 0 : i32
    %c0_i32_1 = arith.constant 0 : i32
    %c0_i32_2 = arith.constant 0 : i32
    %c0_i32_3 = arith.constant 0 : i32
    return %arg0, %c0_i32, %c0_i32_0, %c0_i32_1, %c0_i32_2 : i32, i32, i32, i32, i32
  }
  func.func @transform_4(%arg0: i32) -> (i32, i32, i32) {
    %c0_i32 = arith.constant 0 : i32
    %c0_i32_0 = arith.constant 0 : i32
    %c0_i32_1 = arith.constant 0 : i32
    return %arg0, %c0_i32, %c0_i32_0 : i32, i32, i32
  }
}

module attributes {stable_mosaic.version = 11 : i64} {
  func.func @_conv_pair_gemm_kernel(%arg0: memref<32x144xbf16, #tpu.memory_space<vmem>>, %arg1: memref<32x144xbf16, #tpu.memory_space<vmem>>, %arg2: memref<144x32xbf16, #tpu.memory_space<vmem>>, %arg3: memref<1x32xf32, #tpu.memory_space<vmem>>, %arg4: memref<32x32xbf16, #tpu.memory_space<vmem>>, %arg5: memref<32x32xbf16, #tpu.memory_space<vmem>>, %arg6: memref<1x1xf32, #tpu.memory_space<vmem>>) attributes {dimension_semantics = [], scalar_prefetch = 0 : i64, scratch_operands = 0 : i64, tpu.core_type = #tpu.core_type<tc>} {
    %c0 = arith.constant 0 : index
    %c0_0 = arith.constant 0 : index
    %0 = vector.load %arg2[%c0, %c0_0] : memref<144x32xbf16, #tpu.memory_space<vmem>>, vector<144x32xbf16>
    %c0_1 = arith.constant 0 : index
    %c0_2 = arith.constant 0 : index
    %1 = vector.load %arg3[%c0_1, %c0_2] : memref<1x32xf32, #tpu.memory_space<vmem>>, vector<1x32xf32>
    %c0_3 = arith.constant 0 : index
    %c0_4 = arith.constant 0 : index
    %2 = vector.load %arg0[%c0_3, %c0_4] : memref<32x144xbf16, #tpu.memory_space<vmem>>, vector<32x144xbf16>
    %cst = arith.constant dense<0.000000e+00> : vector<32x32xf32>
    %3 = tpu.matmul %2, %0, %cst {dimension_numbers = #tpu.dot_dimension_numbers<[1], [0], [0], [1], [0, 0, 1, 1], [], []>} : vector<32x144xbf16>, vector<144x32xbf16>, vector<32x32xf32> -> vector<32x32xf32>
    %4 = vector.broadcast %1 : vector<1x32xf32> to vector<32x32xf32>
    %5 = arith.addf %3, %4 : vector<32x32xf32>
    %cst_5 = arith.constant 0.000000e+00 : f32
    %6 = vector.broadcast %cst_5 : f32 to vector<32x32xf32>
    %7 = arith.maximumf %5, %6 : vector<32x32xf32>
    %c0_6 = arith.constant 0 : index
    %c0_7 = arith.constant 0 : index
    %8 = vector.load %arg1[%c0_6, %c0_7] : memref<32x144xbf16, #tpu.memory_space<vmem>>, vector<32x144xbf16>
    %cst_8 = arith.constant dense<0.000000e+00> : vector<32x32xf32>
    %9 = tpu.matmul %8, %0, %cst_8 {dimension_numbers = #tpu.dot_dimension_numbers<[1], [0], [0], [1], [0, 0, 1, 1], [], []>} : vector<32x144xbf16>, vector<144x32xbf16>, vector<32x32xf32> -> vector<32x32xf32>
    %10 = vector.broadcast %1 : vector<1x32xf32> to vector<32x32xf32>
    %11 = arith.addf %9, %10 : vector<32x32xf32>
    %cst_9 = arith.constant 0.000000e+00 : f32
    %12 = vector.broadcast %cst_9 : f32 to vector<32x32xf32>
    %13 = arith.maximumf %11, %12 : vector<32x32xf32>
    %14 = arith.subf %7, %13 : vector<32x32xf32>
    %15 = math.absf %14 : vector<32x32xf32>
    %16 = vector.shape_cast %15 : vector<32x32xf32> to vector<1x32x32xf32>
    %cst_10 = arith.constant dense<0.000000e+00> : vector<1xf32>
    %17 = vector.multi_reduction <add>, %16, %cst_10 [1, 2] : vector<1x32x32xf32> to vector<1xf32>
    %18 = vector.shape_cast %17 : vector<1xf32> to vector<1x1x1xf32>
    %19 = vector.extract %18[0, 0, 0] : f32 from vector<1x1x1xf32>
    %20 = vector.broadcast %19 : f32 to vector<1x1xf32>
    %c0_11 = arith.constant 0 : index
    %c0_12 = arith.constant 0 : index
    %21 = vector.load %arg6[%c0_11, %c0_12] : memref<1x1xf32, #tpu.memory_space<vmem>>, vector<1x1xf32>
    tpu.vector_store %arg6[%c0_11, %c0_12], %20 {strides = array<i32>} : memref<1x1xf32, #tpu.memory_space<vmem>>, vector<1x1xf32>,
    %22 = arith.truncf %7 : vector<32x32xf32> to vector<32x32xbf16>
    %c0_13 = arith.constant 0 : index
    %c0_14 = arith.constant 0 : index
    %23 = vector.load %arg4[%c0_13, %c0_14] : memref<32x32xbf16, #tpu.memory_space<vmem>>, vector<32x32xbf16>
    tpu.vector_store %arg4[%c0_13, %c0_14], %22 {strides = array<i32>} : memref<32x32xbf16, #tpu.memory_space<vmem>>, vector<32x32xbf16>,
    %24 = arith.truncf %13 : vector<32x32xf32> to vector<32x32xbf16>
    %c0_15 = arith.constant 0 : index
    %c0_16 = arith.constant 0 : index
    %25 = vector.load %arg5[%c0_15, %c0_16] : memref<32x32xbf16, #tpu.memory_space<vmem>>, vector<32x32xbf16>
    tpu.vector_store %arg5[%c0_15, %c0_16], %24 {strides = array<i32>} : memref<32x32xbf16, #tpu.memory_space<vmem>>, vector<32x32xbf16>,
    return
  }
}

module attributes {stable_mosaic.version = 11 : i64} {
  func.func @_conv_pair_gemm_kernel(%arg0: memref<8x288xbf16, #tpu.memory_space<vmem>>, %arg1: memref<8x288xbf16, #tpu.memory_space<vmem>>, %arg2: memref<288x32xbf16, #tpu.memory_space<vmem>>, %arg3: memref<1x32xf32, #tpu.memory_space<vmem>>, %arg4: memref<8x32xbf16, #tpu.memory_space<vmem>>, %arg5: memref<8x32xbf16, #tpu.memory_space<vmem>>, %arg6: memref<1x1xf32, #tpu.memory_space<vmem>>) attributes {dimension_semantics = [], scalar_prefetch = 0 : i64, scratch_operands = 0 : i64, tpu.core_type = #tpu.core_type<tc>} {
    %c0 = arith.constant 0 : index
    %c0_0 = arith.constant 0 : index
    %0 = vector.load %arg2[%c0, %c0_0] : memref<288x32xbf16, #tpu.memory_space<vmem>>, vector<288x32xbf16>
    %c0_1 = arith.constant 0 : index
    %c0_2 = arith.constant 0 : index
    %1 = vector.load %arg3[%c0_1, %c0_2] : memref<1x32xf32, #tpu.memory_space<vmem>>, vector<1x32xf32>
    %c0_3 = arith.constant 0 : index
    %c0_4 = arith.constant 0 : index
    %2 = vector.load %arg0[%c0_3, %c0_4] : memref<8x288xbf16, #tpu.memory_space<vmem>>, vector<8x288xbf16>
    %cst = arith.constant dense<0.000000e+00> : vector<8x32xf32>
    %3 = tpu.matmul %2, %0, %cst {dimension_numbers = #tpu.dot_dimension_numbers<[1], [0], [0], [1], [0, 0, 1, 1], [], []>} : vector<8x288xbf16>, vector<288x32xbf16>, vector<8x32xf32> -> vector<8x32xf32>
    %4 = vector.broadcast %1 : vector<1x32xf32> to vector<8x32xf32>
    %5 = arith.addf %3, %4 : vector<8x32xf32>
    %cst_5 = arith.constant 0.000000e+00 : f32
    %6 = vector.broadcast %cst_5 : f32 to vector<8x32xf32>
    %7 = arith.maximumf %5, %6 : vector<8x32xf32>
    %c0_6 = arith.constant 0 : index
    %c0_7 = arith.constant 0 : index
    %8 = vector.load %arg1[%c0_6, %c0_7] : memref<8x288xbf16, #tpu.memory_space<vmem>>, vector<8x288xbf16>
    %cst_8 = arith.constant dense<0.000000e+00> : vector<8x32xf32>
    %9 = tpu.matmul %8, %0, %cst_8 {dimension_numbers = #tpu.dot_dimension_numbers<[1], [0], [0], [1], [0, 0, 1, 1], [], []>} : vector<8x288xbf16>, vector<288x32xbf16>, vector<8x32xf32> -> vector<8x32xf32>
    %10 = vector.broadcast %1 : vector<1x32xf32> to vector<8x32xf32>
    %11 = arith.addf %9, %10 : vector<8x32xf32>
    %cst_9 = arith.constant 0.000000e+00 : f32
    %12 = vector.broadcast %cst_9 : f32 to vector<8x32xf32>
    %13 = arith.maximumf %11, %12 : vector<8x32xf32>
    %14 = arith.subf %7, %13 : vector<8x32xf32>
    %15 = math.absf %14 : vector<8x32xf32>
    %16 = vector.shape_cast %15 : vector<8x32xf32> to vector<1x8x32xf32>
    %cst_10 = arith.constant dense<0.000000e+00> : vector<1xf32>
    %17 = vector.multi_reduction <add>, %16, %cst_10 [1, 2] : vector<1x8x32xf32> to vector<1xf32>
    %18 = vector.shape_cast %17 : vector<1xf32> to vector<1x1x1xf32>
    %19 = vector.extract %18[0, 0, 0] : f32 from vector<1x1x1xf32>
    %20 = vector.broadcast %19 : f32 to vector<1x1xf32>
    %c0_11 = arith.constant 0 : index
    %c0_12 = arith.constant 0 : index
    %21 = vector.load %arg6[%c0_11, %c0_12] : memref<1x1xf32, #tpu.memory_space<vmem>>, vector<1x1xf32>
    tpu.vector_store %arg6[%c0_11, %c0_12], %20 {strides = array<i32>} : memref<1x1xf32, #tpu.memory_space<vmem>>, vector<1x1xf32>,
    %22 = arith.truncf %7 : vector<8x32xf32> to vector<8x32xbf16>
    %c0_13 = arith.constant 0 : index
    %c0_14 = arith.constant 0 : index
    %23 = vector.load %arg4[%c0_13, %c0_14] : memref<8x32xbf16, #tpu.memory_space<vmem>>, vector<8x32xbf16>
    tpu.vector_store %arg4[%c0_13, %c0_14], %22 {strides = array<i32>} : memref<8x32xbf16, #tpu.memory_space<vmem>>, vector<8x32xbf16>,
    %24 = arith.truncf %13 : vector<8x32xf32> to vector<8x32xbf16>
    %c0_15 = arith.constant 0 : index
    %c0_16 = arith.constant 0 : index
    %25 = vector.load %arg5[%c0_15, %c0_16] : memref<8x32xbf16, #tpu.memory_space<vmem>>, vector<8x32xbf16>
    tpu.vector_store %arg5[%c0_15, %c0_16], %24 {strides = array<i32>} : memref<8x32xbf16, #tpu.memory_space<vmem>>, vector<8x32xbf16>,
    return
  }
}

module attributes {stable_mosaic.version = 11 : i64} {
  func.func @_conv_pair_gemm_kernel(%arg0: memref<2x288xbf16, #tpu.memory_space<vmem>>, %arg1: memref<2x288xbf16, #tpu.memory_space<vmem>>, %arg2: memref<288x32xbf16, #tpu.memory_space<vmem>>, %arg3: memref<1x32xf32, #tpu.memory_space<vmem>>, %arg4: memref<2x32xbf16, #tpu.memory_space<vmem>>, %arg5: memref<2x32xbf16, #tpu.memory_space<vmem>>, %arg6: memref<1x1xf32, #tpu.memory_space<vmem>>) attributes {dimension_semantics = [], scalar_prefetch = 0 : i64, scratch_operands = 0 : i64, tpu.core_type = #tpu.core_type<tc>} {
    %c0 = arith.constant 0 : index
    %c0_0 = arith.constant 0 : index
    %0 = vector.load %arg2[%c0, %c0_0] : memref<288x32xbf16, #tpu.memory_space<vmem>>, vector<288x32xbf16>
    %c0_1 = arith.constant 0 : index
    %c0_2 = arith.constant 0 : index
    %1 = vector.load %arg3[%c0_1, %c0_2] : memref<1x32xf32, #tpu.memory_space<vmem>>, vector<1x32xf32>
    %c0_3 = arith.constant 0 : index
    %c0_4 = arith.constant 0 : index
    %2 = vector.load %arg0[%c0_3, %c0_4] : memref<2x288xbf16, #tpu.memory_space<vmem>>, vector<2x288xbf16>
    %cst = arith.constant dense<0.000000e+00> : vector<2x32xf32>
    %3 = tpu.matmul %2, %0, %cst {dimension_numbers = #tpu.dot_dimension_numbers<[1], [0], [0], [1], [0, 0, 1, 1], [], []>} : vector<2x288xbf16>, vector<288x32xbf16>, vector<2x32xf32> -> vector<2x32xf32>
    %4 = vector.broadcast %1 : vector<1x32xf32> to vector<2x32xf32>
    %5 = arith.addf %3, %4 : vector<2x32xf32>
    %cst_5 = arith.constant 0.000000e+00 : f32
    %6 = vector.broadcast %cst_5 : f32 to vector<2x32xf32>
    %7 = arith.maximumf %5, %6 : vector<2x32xf32>
    %c0_6 = arith.constant 0 : index
    %c0_7 = arith.constant 0 : index
    %8 = vector.load %arg1[%c0_6, %c0_7] : memref<2x288xbf16, #tpu.memory_space<vmem>>, vector<2x288xbf16>
    %cst_8 = arith.constant dense<0.000000e+00> : vector<2x32xf32>
    %9 = tpu.matmul %8, %0, %cst_8 {dimension_numbers = #tpu.dot_dimension_numbers<[1], [0], [0], [1], [0, 0, 1, 1], [], []>} : vector<2x288xbf16>, vector<288x32xbf16>, vector<2x32xf32> -> vector<2x32xf32>
    %10 = vector.broadcast %1 : vector<1x32xf32> to vector<2x32xf32>
    %11 = arith.addf %9, %10 : vector<2x32xf32>
    %cst_9 = arith.constant 0.000000e+00 : f32
    %12 = vector.broadcast %cst_9 : f32 to vector<2x32xf32>
    %13 = arith.maximumf %11, %12 : vector<2x32xf32>
    %14 = arith.subf %7, %13 : vector<2x32xf32>
    %15 = math.absf %14 : vector<2x32xf32>
    %16 = vector.shape_cast %15 : vector<2x32xf32> to vector<1x2x32xf32>
    %cst_10 = arith.constant dense<0.000000e+00> : vector<1xf32>
    %17 = vector.multi_reduction <add>, %16, %cst_10 [1, 2] : vector<1x2x32xf32> to vector<1xf32>
    %18 = vector.shape_cast %17 : vector<1xf32> to vector<1x1x1xf32>
    %19 = vector.extract %18[0, 0, 0] : f32 from vector<1x1x1xf32>
    %20 = vector.broadcast %19 : f32 to vector<1x1xf32>
    %c0_11 = arith.constant 0 : index
    %c0_12 = arith.constant 0 : index
    %21 = vector.load %arg6[%c0_11, %c0_12] : memref<1x1xf32, #tpu.memory_space<vmem>>, vector<1x1xf32>
    tpu.vector_store %arg6[%c0_11, %c0_12], %20 {strides = array<i32>} : memref<1x1xf32, #tpu.memory_space<vmem>>, vector<1x1xf32>,
    %22 = arith.truncf %7 : vector<2x32xf32> to vector<2x32xbf16>
    %c0_13 = arith.constant 0 : index
    %c0_14 = arith.constant 0 : index
    %23 = vector.load %arg4[%c0_13, %c0_14] : memref<2x32xbf16, #tpu.memory_space<vmem>>, vector<2x32xbf16>
    tpu.vector_store %arg4[%c0_13, %c0_14], %22 {strides = array<i32>} : memref<2x32xbf16, #tpu.memory_space<vmem>>, vector<2x32xbf16>,
    %24 = arith.truncf %13 : vector<2x32xf32> to vector<2x32xbf16>
    %c0_15 = arith.constant 0 : index
    %c0_16 = arith.constant 0 : index
    %25 = vector.load %arg5[%c0_15, %c0_16] : memref<2x32xbf16, #tpu.memory_space<vmem>>, vector<2x32xbf16>
    tpu.vector_store %arg5[%c0_15, %c0_16], %24 {strides = array<i32>} : memref<2x32xbf16, #tpu.memory_space<vmem>>, vector<2x32xbf16>,
    return
  }
}

module attributes {stable_mosaic.version = 11 : i64} {
  func.func @_l1_sum_tile_kernel(%arg0: i32, %arg1: memref<16x128xf32, #tpu.memory_space<vmem>>, %arg2: memref<16x128xf32, #tpu.memory_space<vmem>>, %arg3: memref<1x1x1xf32, #tpu.memory_space<vmem>>) attributes {dimension_semantics = [#tpu.dimension_semantics<parallel>], iteration_bounds = array<i64: 1>, scalar_prefetch = 0 : i64, scratch_operands = 0 : i64, tpu.core_type = #tpu.core_type<tc>, window_params = [{transform_indices = @transform_0, window_bounds = array<i64: 16, 128>}, {transform_indices = @transform_1, window_bounds = array<i64: 16, 128>}, {transform_indices = @transform_2, window_bounds = array<i64: 1, 1, 1>}]} {
    %c0 = arith.constant 0 : index
    %c0_0 = arith.constant 0 : index
    %0 = vector.load %arg1[%c0, %c0_0] : memref<16x128xf32, #tpu.memory_space<vmem>>, vector<16x128xf32>
    %c0_1 = arith.constant 0 : index
    %c0_2 = arith.constant 0 : index
    %1 = vector.load %arg2[%c0_1, %c0_2] : memref<16x128xf32, #tpu.memory_space<vmem>>, vector<16x128xf32>
    %2 = arith.subf %0, %1 : vector<16x128xf32>
    %3 = math.absf %2 : vector<16x128xf32>
    %4 = vector.shape_cast %3 : vector<16x128xf32> to vector<1x16x128xf32>
    %cst = arith.constant dense<0.000000e+00> : vector<1xf32>
    %5 = vector.multi_reduction <add>, %4, %cst [1, 2] : vector<1x16x128xf32> to vector<1xf32>
    %6 = vector.shape_cast %5 : vector<1xf32> to vector<1x1x1xf32>
    %7 = vector.extract %6[0, 0, 0] : f32 from vector<1x1x1xf32>
    %8 = vector.broadcast %7 : f32 to vector<1x1xf32>
    %c0_3 = arith.constant 0 : index
    %c0_4 = arith.constant 0 : index
    %c0_5 = arith.constant 0 : index
    %9 = vector.load %arg3[%c0_3, %c0_4, %c0_5] : memref<1x1x1xf32, #tpu.memory_space<vmem>>, vector<1x1x1xf32>
    %10 = vector.shape_cast %9 : vector<1x1x1xf32> to vector<1x1xf32>
    %11 = vector.shape_cast %8 : vector<1x1xf32> to vector<1x1x1xf32>
    tpu.vector_store %arg3[%c0_3, %c0_4, %c0_5], %11 {strides = array<i32>} : memref<1x1x1xf32, #tpu.memory_space<vmem>>, vector<1x1x1xf32>,
    return
  }
  func.func @transform_0(%arg0: i32) -> (i32, i32) {
    %c0_i32 = arith.constant 0 : i32
    %c0_i32_0 = arith.constant 0 : i32
    return %arg0, %c0_i32 : i32, i32
  }
  func.func @transform_1(%arg0: i32) -> (i32, i32) {
    %c0_i32 = arith.constant 0 : i32
    %c0_i32_0 = arith.constant 0 : i32
    return %arg0, %c0_i32 : i32, i32
  }
  func.func @transform_2(%arg0: i32) -> (i32, i32, i32) {
    %c0_i32 = arith.constant 0 : i32
    %c0_i32_0 = arith.constant 0 : i32
    %c0_i32_1 = arith.constant 0 : i32
    return %arg0, %c0_i32, %c0_i32_0 : i32, i32, i32
  }
}

module attributes {stable_mosaic.version = 11 : i64} {
  func.func @_l1_sum_tile_kernel(%arg0: i32, %arg1: memref<32x128xf32, #tpu.memory_space<vmem>>, %arg2: memref<32x128xf32, #tpu.memory_space<vmem>>, %arg3: memref<1x1x1xf32, #tpu.memory_space<vmem>>) attributes {dimension_semantics = [#tpu.dimension_semantics<parallel>], iteration_bounds = array<i64: 1>, scalar_prefetch = 0 : i64, scratch_operands = 0 : i64, tpu.core_type = #tpu.core_type<tc>, window_params = [{transform_indices = @transform_0, window_bounds = array<i64: 32, 128>}, {transform_indices = @transform_1, window_bounds = array<i64: 32, 128>}, {transform_indices = @transform_2, window_bounds = array<i64: 1, 1, 1>}]} {
    %c0 = arith.constant 0 : index
    %c0_0 = arith.constant 0 : index
    %0 = vector.load %arg1[%c0, %c0_0] : memref<32x128xf32, #tpu.memory_space<vmem>>, vector<32x128xf32>
    %c0_1 = arith.constant 0 : index
    %c0_2 = arith.constant 0 : index
    %1 = vector.load %arg2[%c0_1, %c0_2] : memref<32x128xf32, #tpu.memory_space<vmem>>, vector<32x128xf32>
    %2 = arith.subf %0, %1 : vector<32x128xf32>
    %3 = math.absf %2 : vector<32x128xf32>
    %4 = vector.shape_cast %3 : vector<32x128xf32> to vector<1x32x128xf32>
    %cst = arith.constant dense<0.000000e+00> : vector<1xf32>
    %5 = vector.multi_reduction <add>, %4, %cst [1, 2] : vector<1x32x128xf32> to vector<1xf32>
    %6 = vector.shape_cast %5 : vector<1xf32> to vector<1x1x1xf32>
    %7 = vector.extract %6[0, 0, 0] : f32 from vector<1x1x1xf32>
    %8 = vector.broadcast %7 : f32 to vector<1x1xf32>
    %c0_3 = arith.constant 0 : index
    %c0_4 = arith.constant 0 : index
    %c0_5 = arith.constant 0 : index
    %9 = vector.load %arg3[%c0_3, %c0_4, %c0_5] : memref<1x1x1xf32, #tpu.memory_space<vmem>>, vector<1x1x1xf32>
    %10 = vector.shape_cast %9 : vector<1x1x1xf32> to vector<1x1xf32>
    %11 = vector.shape_cast %8 : vector<1x1xf32> to vector<1x1x1xf32>
    tpu.vector_store %arg3[%c0_3, %c0_4, %c0_5], %11 {strides = array<i32>} : memref<1x1x1xf32, #tpu.memory_space<vmem>>, vector<1x1x1xf32>,
    return
  }
  func.func @transform_0(%arg0: i32) -> (i32, i32) {
    %c0_i32 = arith.constant 0 : i32
    %c0_i32_0 = arith.constant 0 : i32
    return %arg0, %c0_i32 : i32, i32
  }
  func.func @transform_1(%arg0: i32) -> (i32, i32) {
    %c0_i32 = arith.constant 0 : i32
    %c0_i32_0 = arith.constant 0 : i32
    return %arg0, %c0_i32 : i32, i32
  }
  func.func @transform_2(%arg0: i32) -> (i32, i32, i32) {
    %c0_i32 = arith.constant 0 : i32
    %c0_i32_0 = arith.constant 0 : i32
    %c0_i32_1 = arith.constant 0 : i32
    return %arg0, %c0_i32, %c0_i32_0 : i32, i32, i32
  }
}

module attributes {stable_mosaic.version = 11 : i64} {
  func.func @_l1_sum_tile_kernel(%arg0: i32, %arg1: memref<8x128xf32, #tpu.memory_space<vmem>>, %arg2: memref<8x128xf32, #tpu.memory_space<vmem>>, %arg3: memref<1x1x1xf32, #tpu.memory_space<vmem>>) attributes {dimension_semantics = [#tpu.dimension_semantics<parallel>], iteration_bounds = array<i64: 1>, scalar_prefetch = 0 : i64, scratch_operands = 0 : i64, tpu.core_type = #tpu.core_type<tc>, window_params = [{transform_indices = @transform_0, window_bounds = array<i64: 8, 128>}, {transform_indices = @transform_1, window_bounds = array<i64: 8, 128>}, {transform_indices = @transform_2, window_bounds = array<i64: 1, 1, 1>}]} {
    %c0 = arith.constant 0 : index
    %c0_0 = arith.constant 0 : index
    %0 = vector.load %arg1[%c0, %c0_0] : memref<8x128xf32, #tpu.memory_space<vmem>>, vector<8x128xf32>
    %c0_1 = arith.constant 0 : index
    %c0_2 = arith.constant 0 : index
    %1 = vector.load %arg2[%c0_1, %c0_2] : memref<8x128xf32, #tpu.memory_space<vmem>>, vector<8x128xf32>
    %2 = arith.subf %0, %1 : vector<8x128xf32>
    %3 = math.absf %2 : vector<8x128xf32>
    %4 = vector.shape_cast %3 : vector<8x128xf32> to vector<1x8x128xf32>
    %cst = arith.constant dense<0.000000e+00> : vector<1xf32>
    %5 = vector.multi_reduction <add>, %4, %cst [1, 2] : vector<1x8x128xf32> to vector<1xf32>
    %6 = vector.shape_cast %5 : vector<1xf32> to vector<1x1x1xf32>
    %7 = vector.extract %6[0, 0, 0] : f32 from vector<1x1x1xf32>
    %8 = vector.broadcast %7 : f32 to vector<1x1xf32>
    %c0_3 = arith.constant 0 : index
    %c0_4 = arith.constant 0 : index
    %c0_5 = arith.constant 0 : index
    %9 = vector.load %arg3[%c0_3, %c0_4, %c0_5] : memref<1x1x1xf32, #tpu.memory_space<vmem>>, vector<1x1x1xf32>
    %10 = vector.shape_cast %9 : vector<1x1x1xf32> to vector<1x1xf32>
    %11 = vector.shape_cast %8 : vector<1x1xf32> to vector<1x1x1xf32>
    tpu.vector_store %arg3[%c0_3, %c0_4, %c0_5], %11 {strides = array<i32>} : memref<1x1x1xf32, #tpu.memory_space<vmem>>, vector<1x1x1xf32>,
    return
  }
  func.func @transform_0(%arg0: i32) -> (i32, i32) {
    %c0_i32 = arith.constant 0 : i32
    %c0_i32_0 = arith.constant 0 : i32
    return %arg0, %c0_i32 : i32, i32
  }
  func.func @transform_1(%arg0: i32) -> (i32, i32) {
    %c0_i32 = arith.constant 0 : i32
    %c0_i32_0 = arith.constant 0 : i32
    return %arg0, %c0_i32 : i32, i32
  }
  func.func @transform_2(%arg0: i32) -> (i32, i32, i32) {
    %c0_i32 = arith.constant 0 : i32
    %c0_i32_0 = arith.constant 0 : i32
    %c0_i32_1 = arith.constant 0 : i32
    return %arg0, %c0_i32, %c0_i32_0 : i32, i32, i32
  }
}

module attributes {stable_mosaic.version = 11 : i64} {
  func.func @_sum_tile_kernel(%arg0: i32, %arg1: memref<8x128xf32, #tpu.memory_space<vmem>>, %arg2: memref<1x1x1xf32, #tpu.memory_space<vmem>>) attributes {dimension_semantics = [#tpu.dimension_semantics<parallel>], iteration_bounds = array<i64: 1>, scalar_prefetch = 0 : i64, scratch_operands = 0 : i64, tpu.core_type = #tpu.core_type<tc>, window_params = [{transform_indices = @transform_0, window_bounds = array<i64: 8, 128>}, {transform_indices = @transform_1, window_bounds = array<i64: 1, 1, 1>}]} {
    %c0 = arith.constant 0 : index
    %c0_0 = arith.constant 0 : index
    %0 = vector.load %arg1[%c0, %c0_0] : memref<8x128xf32, #tpu.memory_space<vmem>>, vector<8x128xf32>
    %1 = vector.shape_cast %0 : vector<8x128xf32> to vector<1x8x128xf32>
    %cst = arith.constant dense<0.000000e+00> : vector<1xf32>
    %2 = vector.multi_reduction <add>, %1, %cst [1, 2] : vector<1x8x128xf32> to vector<1xf32>
    %3 = vector.shape_cast %2 : vector<1xf32> to vector<1x1x1xf32>
    %4 = vector.extract %3[0, 0, 0] : f32 from vector<1x1x1xf32>
    %5 = vector.broadcast %4 : f32 to vector<1x1xf32>
    %c0_1 = arith.constant 0 : index
    %c0_2 = arith.constant 0 : index
    %c0_3 = arith.constant 0 : index
    %6 = vector.load %arg2[%c0_1, %c0_2, %c0_3] : memref<1x1x1xf32, #tpu.memory_space<vmem>>, vector<1x1x1xf32>
    %7 = vector.shape_cast %6 : vector<1x1x1xf32> to vector<1x1xf32>
    %8 = vector.shape_cast %5 : vector<1x1xf32> to vector<1x1x1xf32>
    tpu.vector_store %arg2[%c0_1, %c0_2, %c0_3], %8 {strides = array<i32>} : memref<1x1x1xf32, #tpu.memory_space<vmem>>, vector<1x1x1xf32>,
    return
  }
  func.func @transform_0(%arg0: i32) -> (i32, i32) {
    %c0_i32 = arith.constant 0 : i32
    %c0_i32_0 = arith.constant 0 : i32
    return %arg0, %c0_i32 : i32, i32
  }
  func.func @transform_1(%arg0: i32) -> (i32, i32, i32) {
    %c0_i32 = arith.constant 0 : i32
    %c0_i32_0 = arith.constant 0 : i32
    %c0_i32_1 = arith.constant 0 : i32
    return %arg0, %c0_i32, %c0_i32_0 : i32, i32, i32
  }
}

module attributes {stable_mosaic.version = 11 : i64} {
  func.func @_match_partial_kernel(%arg0: i32, %arg1: memref<1x8x512xf32, #tpu.memory_space<vmem>>, %arg2: memref<1x1x512xf32, #tpu.memory_space<vmem>>, %arg3: memref<1x1x1xf32, #tpu.memory_space<vmem>>) attributes {dimension_semantics = [#tpu.dimension_semantics<parallel>], iteration_bounds = array<i64: 2>, scalar_prefetch = 0 : i64, scratch_operands = 0 : i64, tpu.core_type = #tpu.core_type<tc>, window_params = [{transform_indices = @transform_0, window_bounds = array<i64: 1, 8, 512>}, {transform_indices = @transform_1, window_bounds = array<i64: 1, 1, 512>}, {transform_indices = @transform_2, window_bounds = array<i64: 1, 1, 1>}]} {
    %c0 = arith.constant 0 : index
    %c0_0 = arith.constant 0 : index
    %c0_1 = arith.constant 0 : index
    %0 = vector.load %arg1[%c0, %c0_0, %c0_1] : memref<1x8x512xf32, #tpu.memory_space<vmem>>, vector<1x8x512xf32>
    %1 = vector.shape_cast %0 : vector<1x8x512xf32> to vector<8x512xf32>
    %c0_2 = arith.constant 0 : index
    %c0_3 = arith.constant 0 : index
    %c0_4 = arith.constant 0 : index
    %2 = vector.load %arg2[%c0_2, %c0_3, %c0_4] : memref<1x1x512xf32, #tpu.memory_space<vmem>>, vector<1x1x512xf32>
    %3 = vector.shape_cast %2 : vector<1x1x512xf32> to vector<1x512xf32>
    %4 = vector.broadcast %3 : vector<1x512xf32> to vector<8x512xf32>
    %5 = arith.subf %1, %4 : vector<8x512xf32>
    %6 = math.absf %5 : vector<8x512xf32>
    %7 = vector.shape_cast %6 : vector<8x512xf32> to vector<1x8x512xf32>
    %cst = arith.constant dense<0.000000e+00> : vector<1xf32>
    %8 = vector.multi_reduction <add>, %7, %cst [1, 2] : vector<1x8x512xf32> to vector<1xf32>
    %9 = vector.shape_cast %8 : vector<1xf32> to vector<1x1x1xf32>
    %10 = vector.extract %9[0, 0, 0] : f32 from vector<1x1x1xf32>
    %11 = vector.broadcast %10 : f32 to vector<1x1xf32>
    %c0_5 = arith.constant 0 : index
    %c0_6 = arith.constant 0 : index
    %c0_7 = arith.constant 0 : index
    %12 = vector.load %arg3[%c0_5, %c0_6, %c0_7] : memref<1x1x1xf32, #tpu.memory_space<vmem>>, vector<1x1x1xf32>
    %13 = vector.shape_cast %12 : vector<1x1x1xf32> to vector<1x1xf32>
    %14 = vector.shape_cast %11 : vector<1x1xf32> to vector<1x1x1xf32>
    tpu.vector_store %arg3[%c0_5, %c0_6, %c0_7], %14 {strides = array<i32>} : memref<1x1x1xf32, #tpu.memory_space<vmem>>, vector<1x1x1xf32>,
    return
  }
  func.func @transform_0(%arg0: i32) -> (i32, i32, i32) {
    %c0_i32 = arith.constant 0 : i32
    %c0_i32_0 = arith.constant 0 : i32
    %c0_i32_1 = arith.constant 0 : i32
    return %arg0, %c0_i32, %c0_i32_0 : i32, i32, i32
  }
  func.func @transform_1(%arg0: i32) -> (i32, i32, i32) {
    %c0_i32 = arith.constant 0 : i32
    %c0_i32_0 = arith.constant 0 : i32
    %c0_i32_1 = arith.constant 0 : i32
    return %arg0, %c0_i32, %c0_i32_0 : i32, i32, i32
  }
  func.func @transform_2(%arg0: i32) -> (i32, i32, i32) {
    %c0_i32 = arith.constant 0 : i32
    %c0_i32_0 = arith.constant 0 : i32
    %c0_i32_1 = arith.constant 0 : i32
    return %arg0, %c0_i32, %c0_i32_0 : i32, i32, i32
  }
}

</mosaic_0001>

<bundles_post_ra>
// kernel: a_call__.21
= control target key start
LH: loop header
LB: loop body
LE: loop exit
PB: predicated region body
PF: predicated region fallthrough
CT: control target
= control target key end

     0   :  { %s1780_s15 = smov 0   ;;  %s2635_s0 = inlined_call_operand.vmem [shape: bf16[2,2,10,10,8], index: 0, kind: input, shape index: {}]   ;;  %s2636_s1 = inlined_call_operand.vmem [shape: bf16[72,16], index: 1, kind: input, shape index: {}]   ;;  %s2637_s2 = inlined_call_operand.vmem [shape: f32[1,16], index: 2, kind: input, shape index: {}]   ;;  %s2638_s3 = inlined_call_operand.vmem [shape: bf16[2,2,8,8,16], index: 3, kind: output, shape index: {0}]   ;;  %s2639_s4 = inlined_call_operand.vmem [shape: f32[2,1,1], index: 4, kind: output, shape index: {1}]  }
   0x1 LB: > { %s1319_s16 = sadd.s32 4294967295, %s1745_s15   ;;  %p1323_p0 = scmp.ge.s32.totalorder %s1745_s15, 1  ;;  %s1745_s15 = sphi %s1780_s15, %s15_s15  }
   0x2   : > { %p165_p1 = scmp.lt.s32.totalorder %s1745_s15, 3 }
   0x4   : > { %p166_p2 = pnand %p1323_p0, %p165_p1 }
   0x6   : > { %169 = sbr.rel (%p166_p2) target bundleno = 711 (0x2c7), region = 32 }
   0xd   : > { %p194_p3 = scmp.lt.s32.totalorder %s1319_s16, 1  ;;  %vm320_vm0 = vcmask 1046528   ;;  %vm417_vm1 = vcmask 1045504   ;;  %s1747_s21 = smov 8   ;;  %vm1046_vm2 = vcmask 1043456   ;;  %vm834_vm3 = vcmask 64512  }
   0xe   : > { %s1748_s22 = smov 16   ;;  %s1749_s23 = smov 24   ;;  %vm851_vm4 = vcmask 130048   ;;  %vm868_vm5 = vcmask 195584   ;;  %vm885_vm6 = vcmask 261120   ;;  %vm902_vm7 = vcmask 326656  }
   0xf   : > { %s2659_s16 = smov (!%p194_p3, %s1319_s16), 1  ;;  %s1750_s24 = smov 32   ;;  %vm919_vm8 = vcmask 392192   ;;  %vm936_vm9 = vcmask 457728   ;;  %vm953_vm10 = vcmask 523264   ;;  %vm1021_vm11 = vcmask 588800  }
  0x10   : > { %s1395_s17 = smul.u32 160, %s2659_s16  ;;  %s1751_s25 = smov 40   ;;  %vm1222_vm12 = vcmask 125952   ;;  %vm1204_vm13 = vcmask 0  }
  0x11   : > { %s1752_s28 = smov 48   ;;  %s1753_s7 = smov 56  }
  0x12   : > { %s1794_s20 = scalar_lea.vmem %s2635_s0, %s1395_s17  ;;  %s1754_s12 = smov 64  }
  0x13   : > { %v212_v0 = vld [vmem:[%s1794_s20 + $0x10] ss:$8 sps:$4 sm:$0xff]   ;;  %v1798_v1 = vld [vmem:[%s1794_s20 + $0x14] sm:$0x1]  ;;  %v1801_v2 = vld [vmem:[%s1794_s20 + $0x1c] sm:$0x1] }
  0x14   : > { %v1803_v3 = vunpack.c.l.bf16 %v212_v0  ;;  %v253_v4 = vunpack.c.l.bf16 %v1798_v1  ;;  %v1806_v5 = vunpack.c.h.bf16 %v212_v0  ;;  %v255_v6 = vunpack.c.l.bf16 %v1801_v2  ;;  %v210_v7 = vld [vmem:[%s1794_s20] ss:$8 sps:$4 sm:$0xff]   ;;  %v1811_v8 = vld [vmem:[%s1794_s20 + $0xc] sm:$0x1]  ;;  %v209_v9 = vld [vmem:[%s1794_s20 + $0x4] sm:$0x1] }
  0x15   : > { %v1814_v10 = vunpack.c.h.bf16 %v210_v7  ;;  %v251_v11 = vunpack.c.l.bf16 %v1811_v8  ;;  %v1817_v12 = vunpack.c.l.bf16 %v210_v7  ;;  %v249_v13 = vunpack.c.l.bf16 %v209_v9  ;;  %v232_v14 = vld [vmem:[%s1794_s20 + $0x60] ss:$8 sps:$4 sm:$0xff]   ;;  %v233_v15 = vld [vmem:[%s1794_s20 + $0x64] sm:$0x1]  ;;  %v235_v24 = vld [vmem:[%s1794_s20 + $0x6c] sm:$0x1] }
  0x16   : > { %v327_v16 = vrot.slane %v1803_v3, 1  ;;  %v328_v17 = vrot.slane %v253_v4, 1  ;;  %v330_v18 = vrot.slane %v1806_v5, 1  ;;  %v331_v19 = vrot.slane %v255_v6, 1  ;;  %v228_v29 = vld [vmem:[%s1794_s20 + $0x50] ss:$8 sps:$4 sm:$0xff]  }
  0x17   : > { %v324_v20 = vrot.slane %v1814_v10, 1  ;;  %v325_v21 = vrot.slane %v251_v11, 1  ;;  %v321_v22 = vrot.slane %v1817_v12, 1  ;;  %v322_v23 = vrot.slane %v249_v13, 1  ;;  %v229_v30 = vld [vmem:[%s1794_s20 + $0x54] sm:$0x1] }
  0x18   : > { %v1831_v25 = vsel %vm320_vm0, %v327_v16, %v328_v17  ;;  %v1834_v26 = vsel %vm320_vm0, %v330_v18, %v331_v19  ;;  %v1836_v27 = vunpack.c.l.bf16 %v232_v14  ;;  %v273_v28 = vunpack.c.l.bf16 %v233_v15  ;;  %v231_v35 = vld [vmem:[%s1794_s20 + $0x5c] sm:$0x1]  ;;  %s1343_s17 = sshll.u32 %s2659_s16, 6 }
  0x19   : > { %v1842_v31 = vpack.i.bf16 %v1834_v26, %v1831_v25  ;;  %v1845_v32 = vsel %vm320_vm0, %v324_v20, %v325_v21  ;;  %v323_v33 = vsel %vm320_vm0, %v321_v22, %v322_v23  ;;  %v1848_v34 = vunpack.c.h.bf16 %v232_v14 }
  0x1a   : > { %2644 = vst [vmem:[#allocation2_spill] sm:$0xff] %v1836_v27  ;;  %v1414_v36 = vpack.i.bf16 %v1845_v32, %v323_v33  ;;  %v275_v37 = vunpack.c.l.bf16 %v235_v24  ;;  %v351_v38 = vrot.slane %v1836_v27, 1  ;;  %v352_v39 = vrot.slane %v273_v28, 1 }
  0x1b   : > { %1425 = vrot.lane.b32.xlu1 %v1842_v31, %s1747_s21  ;;  %v354_v40 = vrot.slane %v1848_v34, 1  ;;  %v1856_v41 = vunpack.c.l.bf16 %v228_v29  ;;  %v269_v42 = vunpack.c.l.bf16 %v229_v30  ;;  %v1859_v44 = vunpack.c.h.bf16 %v228_v29  ;;  %v237_v29 = vld [vmem:[%s1794_s20 + $0x74] sm:$0x1] }
  0x1c   : > { %1415 = vrot.lane.b32.xlu0 %v1414_v36, %s1747_s21  ;;  %v355_v43 = vrot.slane %v275_v37, 1  ;;  %v271_v45 = vunpack.c.l.bf16 %v231_v35  ;;  %v418_v46 = vrot.slane %v1817_v12, 2  ;;  %v1863_v47 = vsel %vm320_vm0, %v351_v38, %v352_v39 }
  0x1d   : > { %v345_v48 = vrot.slane %v1856_v41, 1  ;;  %v346_v49 = vrot.slane %v269_v42, 1  ;;  %v442_v50 = vrot.slane %v1856_v41, 2  ;;  %v348_v52 = vrot.slane %v1859_v44, 1 }
  0x1e   : > { %v1868_v51 = vsel %vm320_vm0, %v354_v40, %v355_v43  ;;  %v349_v53 = vrot.slane %v271_v45, 1  ;;  %v443_v54 = vrot.slane %v269_v42, 2  ;;  %v445_v57 = vrot.slane %v1859_v44, 2 }
  0x1f   : > { %v1873_v55 = vpack.i.bf16 %v1868_v51, %v1863_v47  ;;  %v347_v56 = vsel %vm320_vm0, %v345_v48, %v346_v49  ;;  %v446_v58 = vrot.slane %v271_v45, 2  ;;  %v419_v61 = vrot.slane %v249_v13, 2  ;;  %v240_v48 = vld [vmem:[%s1794_s20 + $0x80] ss:$8 sps:$4 sm:$0xff]   ;;  %v241_v49 = vld [vmem:[%s1794_s20 + $0x84] sm:$0x1] }
  0x20   : > { %v1878_v59 = vsel %vm320_vm0, %v348_v52, %v349_v53  ;;  %v444_v60 = vsel %vm417_vm1, %v442_v50, %v443_v54  ;;  %v421_v62 = vrot.slane %v1814_v10, 2  ;;  %v422_v7 = vrot.slane %v251_v11, 2 }
  0x21   : > { %1430 = vrot.lane.b32.xlu1 %v1873_v55, %s1747_s21  ;;  %v1419_v63 = vpack.i.bf16 %v1878_v59, %v347_v56  ;;  %v1886_v0 = vsel %vm417_vm1, %v445_v57, %v446_v58  ;;  %v448_v8 = vrot.slane %v1836_v27, 2  ;;  %v420_v14 = vsel %vm417_vm1, %v418_v46, %v419_v61  ;;  %v243_v57 = vld [vmem:[%s1794_s20 + $0x8c] sm:$0x1] }
  0x22   : > { %v1439_v9 = vpack.i.bf16 %v1886_v0, %v444_v60  ;;  %v449_v15 = vrot.slane %v273_v28, 2  ;;  %v451_v13 = vrot.slane %v1848_v34, 2  ;;  %v1894_v16 = vsel %vm417_vm1, %v421_v62, %v422_v7  ;;  %v236_v28 = vld [vmem:[%s1794_s20 + $0x20] ss:$80 sps:$4 sm:$0xff]   ;;  %v221_v7 = vld [vmem:[%s1794_s20 + $0x34] sm:$0x1] }
  0x23   : > { %1420 = vrot.lane.b32.xlu0 %v1419_v63, %s1747_s21  ;;  %v452_v17 = vrot.slane %v275_v37, 2  ;;  %v424_v18 = vrot.slane %v1803_v3, 2  ;;  %v425_v11 = vrot.slane %v253_v4, 2  ;;  %v1434_v19 = vpack.i.bf16 %v1894_v16, %v420_v14  ;;  %v220_v63 = vld [vmem:[%s1794_s20 + $0x30] ss:$8 sps:$4 sm:$0xff]  }
  0x24   : > { %v1901_v20 = vsel %vm417_vm1, %v448_v8, %v449_v15  ;;  %v427_v21 = vrot.slane %v1806_v5, 2  ;;  %v428_v22 = vrot.slane %v255_v6, 2  ;;  %v217_v6 = vld [vmem:[%s1794_s20 + $0x24] sm:$0x1]  ;;  %v1459_v30 = vpack.i.bf16 %v1836_v27, %v1859_v44  ;;  %v223_v15 = vld [vmem:[%s1794_s20 + $0x3c] sm:$0x1] }
  0x25   : > { %1440 = vrot.lane.b32.xlu1 %v1439_v9, %s1748_s22  ;;  %v1908_v23 = vsel %vm417_vm1, %v451_v13, %v452_v17  ;;  %v1911_v1 = vsel %vm417_vm1, %v424_v18, %v425_v11  ;;  %v1932_v33 = vunpack.c.h.bf16 %v236_v28  ;;  %v277_v35 = vunpack.c.l.bf16 %v237_v29 }
  0x26   : > { %v1915_v4 = vpack.i.bf16 %v1908_v23, %v1901_v20  ;;  %v1918_v24 = vsel %vm417_vm1, %v427_v21, %v428_v22  ;;  %v257_v36 = vunpack.c.l.bf16 %v217_v6  ;;  %v1449_v37 = vpack.i.bf16 %v1803_v3, %v1814_v10 }
  0x27   : > { %1435 = vrot.lane.b32.xlu0 %v1434_v19, %s1748_s22  ;;  %v1925_v2 = vpack.i.bf16 %v1918_v24, %v1911_v1  ;;  %2645 = vst [vmem:[#allocation3_spill] sm:$0xff] %v1932_v33  ;;  %v1938_v38 = vunpack.c.l.bf16 %v236_v28  ;;  %v1469_v39 = vpack.i.bf16 %v1932_v33, %v1848_v34  ;;  %v357_v40 = vrot.slane %v1932_v33, 1 }
  0x28   : > { %v358_v42 = vrot.slane %v277_v35, 1  ;;  %v334_v45 = vrot.slane %v257_v36, 1  ;;  %v1474_v50 = vpack.i.bf16 %v1831_v25, %v1845_v32  ;;  %v1479_v52 = vpack.i.bf16 %v1863_v47, %v1878_v59 }
  0x29   : > { %1455 = vrot.lane.b32.xlu1 %v1915_v4, %s1748_s22  ;;  %2646 = vst [vmem:[#allocation4_spill] sm:$0xff] %v1938_v38  ;;  %v333_v43 = vrot.slane %v1938_v38, 1  ;;  %v1464_v46 = vpack.i.bf16 %v1938_v38, %v1806_v5  ;;  %v454_v54 = vrot.slane %v1932_v33, 2  ;;  %v455_v56 = vrot.slane %v277_v35, 2 }
  0x2a   : > { %v1956_v53 = vsel %vm320_vm0, %v357_v40, %v358_v42  ;;  %v1499_v25 = vpack.i.bf16 %v1901_v20, %v1886_v0  ;;  %v1965_v32 = vunpack.c.l.bf16 %v240_v48  ;;  %v281_v60 = vunpack.c.l.bf16 %v241_v49 }
  0x2b   : > { %1445 = vrot.lane.b32.xlu0 %v1925_v2, %s1748_s22  ;;  %v1961_v58 = vsel %vm320_vm0, %v333_v43, %v334_v45  ;;  %v1494_v47 = vpack.i.bf16 %v1911_v1, %v1894_v16  ;;  %v430_v59 = vrot.slane %v1938_v38, 2  ;;  %v431_v61 = vrot.slane %v257_v36, 2 }
  0x2c   : > { %v1519_v62 = vpack.i.bf16 %v1848_v34, %v1836_v27  ;;  %v1489_v8 = vpack.i.bf16 %v1956_v53, %v1868_v51  ;;  %v1979_v9 = vunpack.c.h.bf16 %v240_v48  ;;  %v283_v14 = vunpack.c.l.bf16 %v243_v57  ;;  %v244_v57 = vld [vmem:[%s1794_s20 + $0x40] ss:$80 sps:$4 sm:$0xff]  }
  0x2d   : > { %1460 = vrot.lane.b32.xlu1 %v1459_v30, %s1749_s23  ;;  %v1484_v13 = vpack.i.bf16 %v1961_v58, %v1834_v26  ;;  %v1986_v17 = vsel %vm417_vm1, %v454_v54, %v455_v56  ;;  %v363_v18 = vrot.slane %v1965_v32, 1  ;;  %v364_v51 = vrot.slane %v281_v60, 1 }
  0x2e   : > { %v366_v11 = vrot.slane %v1979_v9, 1  ;;  %v367_v19 = vrot.slane %v283_v14, 1  ;;  %v1990_v20 = vunpack.c.l.bf16 %v220_v63  ;;  %v261_v21 = vunpack.c.l.bf16 %v221_v7  ;;  %v245_v7 = vld [vmem:[%s1794_s20 + $0x94] sm:$0x1] }
  0x2f   : > { %1450 = vrot.lane.b32.xlu0 %v1449_v37, %s1749_s23  ;;  %v1994_v22 = vsel %vm417_vm1, %v430_v59, %v431_v61  ;;  %v1997_v26 = vsel %vm320_vm0, %v363_v18, %v364_v51  ;;  %v1999_v28 = vunpack.c.h.bf16 %v220_v63  ;;  %v263_v29 = vunpack.c.l.bf16 %v223_v15  ;;  %v238_v37 = vld [vmem:[%s1794_s20 + $0x28] ss:$80 sps:$4 sm:$0xff]  }
  0x30   : > { %v1509_v6 = vpack.i.bf16 %v1986_v17, %v1908_v23  ;;  %v2004_v30 = vsel %vm320_vm0, %v366_v11, %v367_v19  ;;  %v339_v35 = vrot.slane %v1990_v20, 1  ;;  %v340_v36 = vrot.slane %v261_v21, 1  ;;  %v2016_v23 = vld [vmem:[%s1794_s20 + $0x7c] sm:$0x1] }
  0x31   : > { %1470 = vrot.lane.b32.xlu1 %v1469_v39, %s1749_s23  ;;  %v2011_v39 = vpack.i.bf16 %v2004_v30, %v1997_v26  ;;  %v342_v40 = vrot.slane %v1999_v28, 1  ;;  %v343_v42 = vrot.slane %v263_v29, 1  ;;  %v460_v43 = vrot.slane %v1965_v32, 2 }
  0x32   : > { %v2019_v45 = vsel %vm320_vm0, %v339_v35, %v340_v36  ;;  %v463_v48 = vrot.slane %v1979_v9, 2  ;;  %v464_v49 = vrot.slane %v283_v14, 2  ;;  %v437_v54 = vrot.slane %v261_v21, 2 }
  0x33   : > { %1465 = vrot.lane.b32.xlu0 %v1464_v46, %s1749_s23  ;;  %v461_v46 = vrot.slane %v281_v60, 2  ;;  %v439_v56 = vrot.slane %v1999_v28, 2  ;;  %v440_v63 = vrot.slane %v263_v29, 2  ;;  %v2042_v14 = vunpack.c.h.bf16 %v238_v37 }
  0x34   : > { %v2037_v61 = vsel %vm417_vm1, %v463_v48, %v464_v49  ;;  %v2044_v15 = vunpack.c.l.bf16 %v238_v37  ;;  %v1504_v11 = vpack.i.bf16 %v1994_v22, %v1918_v24  ;;  %v2063_v21 = vunpack.c.l.bf16 %v244_v57  ;;  %v227_v37 = vld [vmem:[%s1794_s20 + $0x4c] sm:$0x1] }
  0x35   : > { %1480 = vrot.lane.b32.xlu1 %v1479_v52, %s1750_s24  ;;  %v436_v52 = vrot.slane %v1990_v20, 2  ;;  %v2034_v60 = vsel %vm417_vm1, %v460_v43, %v461_v46  ;;  %v2059_v19 = vsel %vm417_vm1, %v439_v56, %v440_v63  ;;  %v2640_v29 = vunpack.c.l.bf16 %v2016_v23  ;;  %v1734_v46 = vld [vmem:[%s2636_s1] sm:$0xff]  }
  0x36   : > { %v2051_v18 = vpack.i.bf16 %v2037_v61, %v2034_v60  ;;  %v285_v24 = vunpack.c.l.bf16 %v245_v7  ;;  %v1529_v16 = vpack.i.bf16 %v2042_v14, %v1932_v33  ;;  %v1524_v1 = vpack.i.bf16 %v2044_v15, %v1938_v38  ;;  %1357 = vmatprep.subr.bf16.mxu0 %v1734_v46  ;;  %1383 = vmatprep.subr.bf16.mxu1 %v1734_v46 }
  0x37   : > { %1475 = vrot.lane.b32.xlu0 %v1474_v50, %s1750_s24  ;;  %v2024_v50 = vsel %vm320_vm0, %v342_v40, %v343_v42  ;;  %v2054_v51 = vsel %vm417_vm1, %v436_v52, %v437_v54  ;;  %v566_v42 = vrot.slane %v2063_v21, 1  ;;  %v620_v52 = vrot.slane %v2063_v21, 2  ;;  %v246_v54 = vld [vmem:[%s1794_s20 + $0x48] ss:$80 sps:$4 sm:$0xff]   ;;  %1358 = vmatpush3.bf16.msra.mxu0 %v1734_v46 }
  0x38   : > { %v2031_v59 = vpack.i.bf16 %v2024_v50, %v2019_v45  ;;  %v2072_v35 = vpack.i.bf16 %v2059_v19, %v2054_v51  ;;  %v624_v49 = vrot.slane %v285_v24, 2  ;;  %v360_v56 = vrot.slane %v2042_v14, 1  ;;  %1388 = vmatpush3.bf16.msra.mxu1 %v1734_v46 }
  0x39   : > { %1490 = vrot.lane.b32.xlu1 %v1489_v8, %s1750_s24  ;;  %v225_v8 = vld [vmem:[%s1794_s20 + $0x44] sm:$0x1] }
  0x3a   : > { %v265_v36 = vunpack.c.l.bf16 %v225_v8  ;;  %v247_v8 = vld [vmem:[%s1794_s20 + $0x9c] sm:$0x1] }
  0x3b   : > { %1485 = vrot.lane.b32.xlu0 %v1484_v13, %s1750_s24  ;;  %v2047_v13 = vld [vmem:[%s1794_s20 + $0x2c] sm:$0x1]  ;;  %s2574_s20 = scalar_lea.vmem %s2638_s3, %s1343_s17 }
  0x3c   : > { %v567_v43 = vrot.slane %v265_v36, 1 }
  0x3d   : > { %1500 = vrot.lane.b32.xlu1 %v1499_v25, %s1751_s25  ;;  %v2061_v25 = vunpack.c.h.bf16 %v244_v57  ;;  %v361_v57 = vrot.slane %v2640_v29, 1  ;;  %v1736_v29 = vld [vmem:[%s2636_s1 + $0x10] sm:$0xff]  }
  0x3e   : > { %v2096_v7 = vsel %vm320_vm0, %v566_v42, %v567_v43  ;;  %v2120_v43 = vunpack.c.l.bf16 %v246_v54  ;;  %v2648_v42 = vunpack.c.l.bf16 %v2047_v13 }
  0x3f   : > { %1495 = vrot.lane.b32.xlu0 %v1494_v47, %s1751_s25  ;;  %v569_v40 = vrot.slane %v2061_v25, 1  ;;  %v570_v47 = vrot.slane %v285_v24, 1  ;;  %v623_v48 = vrot.slane %v2061_v25, 2 }
  0x41   : > { %1510 = vrot.lane.b32.xlu1 %v1509_v6, %s1751_s25  ;;  %v621_v6 = vrot.slane %v265_v36, 2  ;;  %v2093_v63 = vsel %vm320_vm0, %v569_v40, %v570_v47  ;;  %v2118_v47 = vunpack.c.h.bf16 %v246_v54  ;;  %v337_v54 = vrot.slane %v2648_v42, 1 }
  0x42   : > { %v726_v36 = vrot.slane %v2120_v43, 1  ;;  %v2141_v42 = vsel %vm320_vm0, %v360_v56, %v361_v57 }
  0x43   : > { %1505 = vrot.lane.b32.xlu0 %v1504_v11, %s1751_s25  ;;  %v2105_v11 = vsel %vm417_vm1, %v623_v48, %v624_v49  ;;  %v2108_v0 = vsel %vm417_vm1, %v620_v52, %v621_v6  ;;  %v1735_v48 = vld [vmem:[%s2636_s1 + $0x8] sm:$0xff]   ;;  %v287_v49 = vunpack.c.l.bf16 %v247_v8  ;;  %v267_v52 = vunpack.c.l.bf16 %v227_v37 }
  0x44   : > { %v336_v6 = vrot.slane %v2044_v15, 1  ;;  %v729_v40 = vrot.slane %v2118_v47, 1  ;;  %1359 = vmatprep.subr.bf16.mxu0 %v1735_v48  ;;  %1384 = vmatprep.subr.bf16.mxu1 %v1735_v48  ;;  %v783_v37 = vrot.slane %v2118_v47, 2 }
  0x45   : > { %1520 = vrot.lane.b32.xlu1 %v1519_v62, %s1752_s28  ;;  %v2647_v62 = vpack.i.bf16 %v1806_v5, %v1803_v3  ;;  %v730_v24 = vrot.slane %v287_v49, 1  ;;  %v727_v8 = vrot.slane %v267_v52, 1  ;;  %v784_v46 = vrot.slane %v287_v49, 2  ;;  %1360 = vmatpush3.bf16.msra.mxu0 %v1735_v48 }
  0x46   : > { %v781_v27 = vrot.slane %v267_v52, 2  ;;  %1389 = vmatpush3.bf16.msra.mxu1 %v1735_v48  ;;  %1361 = vmatprep.subr.bf16.mxu0 %v1736_v29  ;;  %v338_v57 = vsel %vm320_vm0, %v336_v6, %v337_v54  ;;  %v1737_v48 = vld [vmem:[%s2636_s1 + $0x18] sm:$0xff]   ;;  %v2649_v52 = vunpack.c.l.bf16 %v2016_v23 }
  0x47   : > { %1515 = vrot.lane.b32.xlu0 %v2647_v62, %s1752_s28  ;;  %v780_v62 = vrot.slane %v2120_v43, 2  ;;  %v2144_v38 = vsel %vm320_vm0, %v729_v40, %v730_v24  ;;  %v2147_v33 = vsel %vm320_vm0, %v726_v36, %v727_v8  ;;  %v2155_v56 = vsel %vm417_vm1, %v783_v37, %v784_v46  ;;  %1385 = vmatprep.subr.bf16.mxu1 %v1736_v29 }
  0x48   : > { %v1704_v49 = vpack.i.bf16 %v2147_v33, %v2096_v7  ;;  %v1729_v24 = vpack.i.bf16 %v2155_v56, %v2105_v11  ;;  %v458_v6 = vrot.slane %v2649_v52, 2  ;;  %v1639_v46 = vpack.i.bf16 %v1997_v26, %v2141_v42 }
  0x49   : > { %1530 = vrot.lane.b32.xlu1 %v1529_v16, %s1752_s28  ;;  %v1709_v16 = vpack.i.bf16 %v2144_v38, %v2093_v63  ;;  %v2161_v36 = vsel %vm417_vm1, %v780_v62, %v781_v27  ;;  %1362 = vmatpush3.bf16.msra.mxu0 %v1736_v29  ;;  %v1544_v27 = vpack.i.bf16 %v338_v57, %v1961_v58  ;;  %v433_v58 = vrot.slane %v2044_v15, 2 }
  0x4a   : > { %v1724_v40 = vpack.i.bf16 %v2161_v36, %v2108_v0  ;;  %1390 = vmatpush3.bf16.msra.mxu1 %v1736_v29  ;;  %1363 = vmatprep.subr.bf16.mxu0 %v1737_v48  ;;  %v2650_v29 = vunpack.c.l.bf16 %v2047_v13  ;;  %v1634_v62 = vpack.i.bf16 %v2019_v45, %v338_v57  ;;  %v2653_v45 = vpack.i.bf16 %v2105_v11, %v2037_v61 }
  0x4b   : > { %1525 = vrot.lane.b32.xlu0 %v1524_v1, %s1752_s28  ;;  %v1549_v1 = vpack.i.bf16 %v2141_v42, %v1956_v53  ;;  %1386 = vmatprep.subr.bf16.mxu1 %v1737_v48  ;;  %v457_v53 = vrot.slane %v2042_v14, 2  ;;  %v1684_v61 = vpack.i.bf16 %v2120_v43, %v2063_v21 }
  0x4c   : > { %v434_v54 = vrot.slane %v2650_v29, 2 }
  0x4d   : > { %1540 = vrot.lane.b32.xlu1 %v1873_v55, %s1753_s7  ;;  %v1738_v55 = vld [vmem:[%s2636_s1 + $0x20] ss:$0 sps:$4 sm:$0xff]   ;;  %1364 = vmatpush3.bf16.msra.mxu0 %v1737_v48  ;;  %v459_v23 = vsel %vm417_vm1, %v457_v53, %v458_v6 }
  0x4e   : > { %1391 = vmatpush3.bf16.msra.mxu1 %v1737_v48  ;;  %1393 = vmatprep.subr.msk.bf16.mxu0 %vm1046_vm2, %v1738_v55  ;;  %v435_v8 = vsel %vm417_vm1, %v433_v58, %v434_v54  ;;  %v1579_v37 = vpack.i.bf16 %v459_v23, %v1986_v17  ;;  %v1629_v17 = vpack.i.bf16 %v2061_v25, %v1979_v9 }
  0x4f   : > { %1535 = vrot.lane.b32.xlu0 %v1842_v31, %s1753_s7  ;;  %v1048_v31 = vsel %vm1046_vm2, %v1738_v55, 0  ;;  %1394 = vmatprep.subr.msk.bf16.mxu1 %vm1046_vm2, %v1738_v55  ;;  %v1574_v13 = vpack.i.bf16 %v435_v8, %v1994_v22  ;;  %v1624_v22 = vpack.i.bf16 %v2063_v21, %v1999_v28  ;;  %v1659_v48 = vpack.i.bf16 %v2034_v60, %v459_v23 }
  0x50   : > { %v1654_v26 = vpack.i.bf16 %v2054_v51, %v435_v8  ;;  %v2654_v60 = vpack.i.bf16 %v2108_v0, %v2059_v19  ;;  %v1689_v51 = vpack.i.bf16 %v2118_v47, %v2061_v25 }
  0x51   : > { %1550 = vrot.lane.b32.xlu1 %v1549_v1, %s1753_s7  ;;  %1366 = vmatpush3.bf16.msra.mxu0 %v1048_v31 }
  0x52   : > { %1392 = vmatpush3.bf16.msra.mxu1 %v1048_v31 }
  0x53   : > { %1545 = vrot.lane.b32.xlu0 %v1544_v27, %s1753_s7 }
  0x55   : > { %1560 = vrot.lane.b32.xlu1 %v1915_v4, %s1754_s12  ;;  %v1619_v4 = vpack.i.bf16 %v1965_v32, %v2042_v14 }
  0x57   : > { %1555 = vrot.lane.b32.xlu0 %v1925_v2, %s1754_s12  ;;  %v1614_v2 = vpack.i.bf16 %v1990_v20, %v2044_v15 }
  0x59   : > { %1570 = vrot.lane.b32.xlu1 %v1549_v1, %s1747_s21  ;;  %v2651_v1 = vpack.i.bf16 %v2093_v63, %v2004_v30  ;;  %v1679_v30 = vpack.i.bf16 %v1979_v9, %v1965_v32 }
  0x5b   : > { %1565 = vrot.lane.b32.xlu0 %v1544_v27, %s1747_s21  ;;  %v2652_v27 = vpack.i.bf16 %v2096_v7, %v2024_v50  ;;  %v1674_v50 = vpack.i.bf16 %v1999_v28, %v1990_v20 }
  0x5d   : > { %1580 = vrot.lane.b32.xlu1 %v1579_v37, %s1754_s12 }
  0x5f   : > { %1575 = vrot.lane.b32.xlu0 %v1574_v13, %s1754_s12 }
  0x61   : > { %1590 = vrot.lane.b32.xlu1 %v2011_v39, %s1747_s21 }
  0x63   : > { %1585 = vrot.lane.b32.xlu0 %v2031_v59, %s1747_s21 }
  0x65   : > { %1600 = vrot.lane.b32.xlu1 %v1579_v37, %s1748_s22 }
  0x67   : > { %1595 = vrot.lane.b32.xlu0 %v1574_v13, %s1748_s22 }
  0x69   : > { %1610 = vrot.lane.b32.xlu1 %v2051_v18, %s1748_s22 }
  0x6b   : > { %1605 = vrot.lane.b32.xlu0 %v2072_v35, %s1748_s22 }
  0x6d   : > { %1620 = vrot.lane.b32.xlu1 %v1619_v4, %s1749_s23 }
  0x6f   : > { %1615 = vrot.lane.b32.xlu0 %v1614_v2, %s1749_s23 }
  0x71   : > { %1630 = vrot.lane.b32.xlu1 %v1629_v17, %s1749_s23 }
  0x73   : > { %1625 = vrot.lane.b32.xlu0 %v1624_v22, %s1749_s23  ;;  %s206_s23 = scalar_lea.vmem %s2639_s4, %s2659_s16 }
  0x75   : > { %1640 = vrot.lane.b32.xlu1 %v1639_v46, %s1750_s24 }
  0x77   : > { %1635 = vrot.lane.b32.xlu0 %v1634_v62, %s1750_s24 }
  0x79   : > { %1650 = vrot.lane.b32.xlu1 %v2651_v1, %s1750_s24 }
  0x7b   : > { %1645 = vrot.lane.b32.xlu0 %v2652_v27, %s1750_s24 }
  0x7d   : > { %1660 = vrot.lane.b32.xlu1 %v1659_v48, %s1751_s25  ;;  %v2655_v48 = vld [vmem:[#allocation2_spill] sm:$0xff] }
  0x7f   : > { %1655 = vrot.lane.b32.xlu0 %v1654_v26, %s1751_s25 }
  0x81   : > { %1670 = vrot.lane.b32.xlu1 %v2653_v45, %s1751_s25 }
  0x83   : > { %1665 = vrot.lane.b32.xlu0 %v2654_v60, %s1751_s25 }
  0x85   : > { %1680 = vrot.lane.b32.xlu1 %v1679_v30, %s1752_s28 }
  0x87   : > { %1675 = vrot.lane.b32.xlu0 %v1674_v50, %s1752_s28 }
  0x89   : > { %1690 = vrot.lane.b32.xlu1 %v1689_v51, %s1752_s28 }
  0x8b   : > { %1685 = vrot.lane.b32.xlu0 %v1684_v61, %s1752_s28 }
  0x8d   : > { %1700 = vrot.lane.b32.xlu1 %v2011_v39, %s1753_s7  ;;  %v1426_v19 = vpop.permute.xlu1 %1425 }
  0x8e   : > { %v1416_v42 = vpop.permute.xlu0 %1415  ;;  %v1428_v56 = vunpack.i.h.bf16 %v1426_v19  ;;  %v1427_v57 = vunpack.i.l.bf16 %v1426_v19 }
  0x8f   : > { %1695 = vrot.lane.b32.xlu0 %v2031_v59, %s1753_s7  ;;  %v1417_v36 = vunpack.i.l.bf16 %v1416_v42 }
  0x90   : > { %v838_v54 = vsel %vm834_vm3, %v1806_v5, %v1428_v56  ;;  %v837_v23 = vsel %vm834_vm3, %v1803_v3, %v1427_v57 }
  0x91   : > { %1710 = vrot.lane.b32.xlu1 %v1709_v16, %s1753_s7  ;;  %v835_v4 = vsel %vm834_vm3, %v1817_v12, %v1417_v36 }
  0x93   : > { %1705 = vrot.lane.b32.xlu0 %v1704_v49, %s1753_s7  ;;  %v1431_v25 = vpop.permute.xlu1 %1430 }
  0x94   : > { %v1433_v52 = vunpack.i.h.bf16 %v1431_v25  ;;  %v1432_v6 = vunpack.i.l.bf16 %v1431_v25 }
  0x95   : > { %v1421_v21 = vpop.permute.xlu0 %1420  ;;  %1720 = vrot.lane.b32.xlu1 %v2051_v18, %s1754_s12 }
  0x96   : > { %v1423_v55 = vunpack.i.h.bf16 %v1421_v21  ;;  %v1422_v53 = vunpack.i.l.bf16 %v1421_v21  ;;  %v846_v1 = vsel %vm834_vm3, %v1848_v34, %v1433_v52 }
  0x97   : > { %1715 = vrot.lane.b32.xlu0 %v2072_v35, %s1754_s12  ;;  %v1441_v39 = vpop.permute.xlu1 %1440 }
  0x98   : > { %v1443_v31 = vunpack.i.h.bf16 %v1441_v39  ;;  %v1442_v58 = vunpack.i.l.bf16 %v1441_v39  ;;  %v844_v46 = vsel %vm834_vm3, %v1859_v44, %v1423_v55  ;;  %v843_v5 = vsel %vm834_vm3, %v1856_v41, %v1422_v53 }
  0x99   : > { %v1436_v59 = vpop.permute.xlu0 %1435  ;;  %1730 = vrot.lane.b32.xlu1 %v1729_v24, %s1754_s12  ;;  %v1418_v24 = vunpack.i.h.bf16 %v1416_v42 }
  0x9a   : > { %v1438_v8 = vunpack.i.h.bf16 %v1436_v59  ;;  %v1437_v37 = vunpack.i.l.bf16 %v1436_v59  ;;  %v860_v12 = vsel %vm851_vm4, %v843_v5, %v1442_v58  ;;  %v861_v27 = vsel %vm851_vm4, %v844_v46, %v1443_v31 }
  0x9b   : > { %1725 = vrot.lane.b32.xlu0 %v1724_v40, %s1754_s12  ;;  %v1456_v33 = vpop.permute.xlu1 %1455  ;;  %v836_v13 = vsel %vm834_vm3, %v1814_v10, %v1418_v24  ;;  %v845_v10 = vsel %vm834_vm3, %v2655_v48, %v1432_v6 }
  0x9c   : > { %v1458_v2 = vunpack.i.h.bf16 %v1456_v33  ;;  %v1457_v17 = vunpack.i.l.bf16 %v1456_v33  ;;  %v852_v44 = vsel %vm851_vm4, %v835_v4, %v1437_v37  ;;  %v853_v45 = vsel %vm851_vm4, %v836_v13, %v1438_v8 }
  0x9d   : > { %v1446_v38 = vpop.permute.xlu0 %1445 }
  0x9e   : > { %v1448_v3 = vunpack.i.h.bf16 %v1446_v38  ;;  %v1447_v62 = vunpack.i.l.bf16 %v1446_v38  ;;  %v862_v34 = vsel %vm851_vm4, %v845_v10, %v1457_v17  ;;  %v863_v60 = vsel %vm851_vm4, %v846_v1, %v1458_v2 }
  0x9f   : > { %v2281_v63 = vpop.permute.xlu1 %1460 }
  0xa0   : > { %v1463_v41 = vunpack.i.h.bf16 %v2281_v63  ;;  %v1462_v30 = vunpack.i.l.bf16 %v2281_v63  ;;  %v855_v19 = vsel %vm851_vm4, %v838_v54, %v1448_v3  ;;  %v854_v42 = vsel %vm851_vm4, %v837_v23, %v1447_v62 }
  0xa1   : > { %v2283_v18 = vpop.permute.xlu0 %1450 }
  0xa2   : > { %v1453_v50 = vunpack.i.h.bf16 %v2283_v18  ;;  %v1452_v51 = vunpack.i.l.bf16 %v2283_v18  ;;  %v877_v18 = vsel %vm868_vm5, %v860_v12, %v1462_v30  ;;  %v878_v56 = vsel %vm868_vm5, %v861_v27, %v1463_v41 }
  0xa3   : > { %v2285_v7 = vpop.permute.xlu1 %1470 }
  0xa4   : > { %v1473_v25 = vunpack.i.h.bf16 %v2285_v7  ;;  %v1472_v21 = vunpack.i.l.bf16 %v2285_v7  ;;  %v869_v7 = vsel %vm868_vm5, %v852_v44, %v1452_v51 }
  0xa5   : > { %v2287_v35 = vpop.permute.xlu0 %1465 }
  0xa6   : > { %v1468_v39 = vunpack.i.h.bf16 %v2287_v35  ;;  %v1467_v59 = vunpack.i.l.bf16 %v2287_v35  ;;  %v870_v35 = vsel %vm868_vm5, %v853_v45, %v1453_v50  ;;  %v879_v53 = vsel %vm868_vm5, %v862_v34, %v1472_v21 }
  0xa7   : > { %v2289_v47 = vpop.permute.xlu1 %1480  ;;  %v880_v52 = vsel %vm868_vm5, %v863_v60, %v1473_v25 }
  0xa8   : > { %v1483_v33 = vunpack.i.h.bf16 %v2289_v47  ;;  %v1482_v38 = vunpack.i.l.bf16 %v2289_v47  ;;  %v872_v58 = vsel %vm868_vm5, %v855_v19, %v1468_v39 }
  0xa9   : > { %v2291_v43 = vpop.permute.xlu0 %1475 }
  0xaa   : > { %v1478_v57 = vunpack.i.h.bf16 %v2291_v43  ;;  %v1477_v24 = vunpack.i.l.bf16 %v2291_v43  ;;  %v871_v43 = vsel %vm868_vm5, %v854_v42, %v1467_v59  ;;  %v894_v54 = vsel %vm885_vm6, %v877_v18, %v1482_v38 }
  0xab   : > { %v2293_v11 = vpop.permute.xlu1 %1490  ;;  %v895_v23 = vsel %vm885_vm6, %v878_v56, %v1483_v33 }
  0xac   : > { %v1493_v36 = vunpack.i.h.bf16 %v2293_v11  ;;  %v1492_v47 = vunpack.i.l.bf16 %v2293_v11  ;;  %v886_v11 = vsel %vm885_vm6, %v869_v7, %v1477_v24  ;;  %v887_v37 = vsel %vm885_vm6, %v870_v35, %v1478_v57 }
  0xad   : > { %v2295_v16 = vpop.permute.xlu0 %1485 }
  0xae   : > { %v897_v2 = vsel %vm885_vm6, %v880_v52, %v1493_v36  ;;  %v1488_v17 = vunpack.i.h.bf16 %v2295_v16  ;;  %v1487_v46 = vunpack.i.l.bf16 %v2295_v16 }
  0xaf   : > { %v2297_v0 = vpop.permute.xlu1 %1500 }
  0xb0   : > { %v1503_v6 = vunpack.i.h.bf16 %v2297_v0  ;;  %v1502_v31 = vunpack.i.l.bf16 %v2297_v0  ;;  %v896_v0 = vsel %vm885_vm6, %v879_v53, %v1492_v47 }
  0xb1   : > { %v2299_v49 = vpop.permute.xlu0 %1495 }
  0xb2   : > { %v1498_v13 = vunpack.i.h.bf16 %v2299_v49  ;;  %v1497_v4 = vunpack.i.l.bf16 %v2299_v49  ;;  %v911_v3 = vsel %vm902_vm7, %v894_v54, %v1502_v31  ;;  %v912_v62 = vsel %vm902_vm7, %v895_v23, %v1503_v6 }
  0xb3   : > { %v2301_v40 = vpop.permute.xlu1 %1510 }
  0xb4   : > { %v903_v16 = vsel %vm902_vm7, %v886_v11, %v1497_v4  ;;  %v904_v45 = vsel %vm902_vm7, %v887_v37, %v1498_v13  ;;  %v1513_v41 = vunpack.i.h.bf16 %v2301_v40  ;;  %v1512_v30 = vunpack.i.l.bf16 %v2301_v40 }
  0xb5   : > { %v2303_v29 = vpop.permute.xlu0 %1505  ;;  %v888_v11 = vsel %vm885_vm6, %v871_v43, %v1487_v46 }
  0xb6   : > { %v1508_v34 = vunpack.i.h.bf16 %v2303_v29  ;;  %v913_v37 = vsel %vm902_vm7, %v896_v0, %v1512_v30  ;;  %v914_v13 = vsel %vm902_vm7, %v897_v2, %v1513_v41 }
  0xb7   : > { %v2313_v22 = vpop.permute.xlu1 %1520 }
  0xb8   : > { %v1523_v1 = vunpack.i.h.bf16 %v2313_v22  ;;  %v1522_v48 = vunpack.i.l.bf16 %v2313_v22  ;;  %v1507_v22 = vunpack.i.l.bf16 %v2303_v29 }
  0xb9   : > { %v2325_v26 = vpop.permute.xlu0 %1515 }
  0xba   : > { %v1518_v49 = vunpack.i.h.bf16 %v2325_v26  ;;  %v1517_v10 = vunpack.i.l.bf16 %v2325_v26  ;;  %v928_v26 = vsel %vm919_vm8, %v911_v3, %v1522_v48  ;;  %v929_v19 = vsel %vm919_vm8, %v912_v62, %v1523_v1 }
  0xbb   : > { %v2335_v61 = vpop.permute.xlu1 %1530  ;;  %v905_v4 = vsel %vm902_vm7, %v888_v11, %v1507_v22 }
  0xbc   : > { %v920_v21 = vsel %vm919_vm8, %v903_v16, %v1517_v10  ;;  %v921_v39 = vsel %vm919_vm8, %v904_v45, %v1518_v49  ;;  %v1533_v57 = vunpack.i.h.bf16 %v2335_v61  ;;  %v1532_v47 = vunpack.i.l.bf16 %v2335_v61 }
  0xbd   : > { %v2345_v63 = vpop.permute.xlu0 %1525  ;;  %v889_v61 = vsel %vm885_vm6, %v872_v58, %v1488_v17 }
  0xbe   : > { %v1527_v6 = vunpack.i.l.bf16 %v2345_v63  ;;  %v930_v1 = vsel %vm919_vm8, %v913_v37, %v1532_v47  ;;  %v931_v43 = vsel %vm919_vm8, %v914_v13, %v1533_v57  ;;  %v2657_v37 = vld [vmem:[#allocation4_spill] sm:$0xff] }
  0xbf   : > { %v1541_v55 = vpop.permute.xlu1 %1540 }
  0xc0   : > { %v1543_v12 = vunpack.i.h.bf16 %v1541_v55  ;;  %v1542_v27 = vunpack.i.l.bf16 %v1541_v55  ;;  %v1528_v55 = vunpack.i.h.bf16 %v2345_v63  ;;  %v906_v63 = vsel %vm902_vm7, %v889_v61, %v1508_v34 }
  0xc1   : > { %v1536_v8 = vpop.permute.xlu0 %1535  ;;  %v922_v0 = vsel %vm919_vm8, %v905_v4, %v1527_v6 }
  0xc2   : > { %v1538_v60 = vunpack.i.h.bf16 %v1536_v8  ;;  %v1537_v50 = vunpack.i.l.bf16 %v1536_v8  ;;  %v945_v40 = vsel %vm936_vm9, %v928_v26, %v1542_v27  ;;  %v946_v33 = vsel %vm936_vm9, %v929_v19, %v1543_v12 }
  0xc3   : > { %v2371_v5 = vpop.permute.xlu1 %1550  ;;  %v923_v2 = vsel %vm919_vm8, %v906_v63, %v1528_v55 }
  0xc4   : > { %v937_v7 = vsel %vm936_vm9, %v920_v21, %v1537_v50  ;;  %v938_v35 = vsel %vm936_vm9, %v921_v39, %v1538_v60  ;;  %v1553_v31 = vunpack.i.h.bf16 %v2371_v5  ;;  %v1552_v54 = vunpack.i.l.bf16 %v2371_v5 }
  0xc5   : > { %v2379_v44 = vpop.permute.xlu0 %1545 }
  0xc6   : > { %v1548_v3 = vunpack.i.h.bf16 %v2379_v44  ;;  %v1547_v5 = vunpack.i.l.bf16 %v2379_v44  ;;  %v947_v46 = vsel %vm936_vm9, %v930_v1, %v1552_v54  ;;  %v948_v48 = vsel %vm936_vm9, %v931_v43, %v1553_v31 }
  0xc7   : > { %v1561_v51 = vpop.permute.xlu1 %1560 }
  0xc8   : > { %v1563_v42 = vunpack.i.h.bf16 %v1561_v51  ;;  %v1562_v25 = vunpack.i.l.bf16 %v1561_v51  ;;  %v939_v16 = vsel %vm936_vm9, %v922_v0, %v1547_v5  ;;  %v940_v45 = vsel %vm936_vm9, %v923_v2, %v1548_v3 }
  0xc9   : > { %v1556_v59 = vpop.permute.xlu0 %1555 }
  0xca   : > { %v1558_v38 = vunpack.i.h.bf16 %v1556_v59  ;;  %v1557_v29 = vunpack.i.l.bf16 %v1556_v59  ;;  %v962_v18 = vsel %vm953_vm10, %v945_v40, %v1562_v25  ;;  %v963_v56 = vsel %vm953_vm10, %v946_v33, %v1563_v42 }
  0xcb   : > { %v2396_v24 = vpop.permute.xlu1 %1570  ;;  %v974_v36 = vpack.c.bf16 %v963_v56, %v962_v18 }
  0xcc   : > { %v954_v53 = vsel %vm953_vm10, %v937_v7, %v1557_v29  ;;  %v955_v52 = vsel %vm953_vm10, %v938_v35, %v1558_v38  ;;  %v1573_v29 = vunpack.i.h.bf16 %v2396_v24  ;;  %v1572_v18 = vunpack.i.l.bf16 %v2396_v24 }
  0xcd   : > { %v2407_v23 = vpop.permute.xlu0 %1565  ;;  %v970_v8 = vpack.c.bf16 %v955_v52, %v954_v53  ;;  %1375 = vmatprep.mubr.msk.bf16.mxu1 %vm1021_vm11, %v974_v36  ;;  %v2656_v53 = vld [vmem:[#allocation3_spill] sm:$0xff] }
  0xce   : > { %v1568_v57 = vunpack.i.h.bf16 %v2407_v23  ;;  %v1567_v7 = vunpack.i.l.bf16 %v2407_v23  ;;  %v848_v55 = vsel %vm834_vm3, %v2042_v14, %v1573_v29  ;;  %v847_v52 = vsel %vm834_vm3, %v2656_v53, %v1572_v18 }
  0xcf   : > { %1367 = vmatprep.mubr.msk.bf16.mxu0 %vm1021_vm11, %v970_v8  ;;  %v1581_v62 = vpop.permute.xlu1 %1580 }
  0xd0   : > { %v1583_v58 = vunpack.i.h.bf16 %v1581_v62  ;;  %v1582_v17 = vunpack.i.l.bf16 %v1581_v62  ;;  %v840_v23 = vsel %vm834_vm3, %v2044_v15, %v1568_v57  ;;  %v839_v13 = vsel %vm834_vm3, %v2657_v37, %v1567_v7 }
  0xd1   : > { %v1576_v49 = vpop.permute.xlu0 %1575 }
  0xd2   : > { %v964_v10 = vsel %vm953_vm10, %v947_v46, %v1582_v17  ;;  %v965_v12 = vsel %vm953_vm10, %v948_v48, %v1583_v58  ;;  %v1578_v27 = vunpack.i.h.bf16 %v1576_v49  ;;  %v1577_v44 = vunpack.i.l.bf16 %v1576_v49 }
  0xd3   : > { %v975_v41 = vpack.c.bf16 %v965_v12, %v964_v10  ;;  %v1591_v30 = vpop.permute.xlu1 %1590 }
  0xd4   : > { %v956_v34 = vsel %vm953_vm10, %v939_v16, %v1577_v44  ;;  %v957_v22 = vsel %vm953_vm10, %v940_v45, %v1578_v27  ;;  %v1593_v36 = vunpack.i.h.bf16 %v1591_v30  ;;  %v1592_v47 = vunpack.i.l.bf16 %v1591_v30 }
  0xd5   : > { %v971_v60 = vpack.c.bf16 %v957_v22, %v956_v34  ;;  %v1586_v50 = vpop.permute.xlu0 %1585  ;;  %1376 = vmatmul.mubr.msk.bf16.vlgmr.msra.gmra.mrb[0].mxu1 %vm1021_vm11, %v975_v41 }
  0xd6   : > { %v1588_v6 = vunpack.i.h.bf16 %v1586_v50  ;;  %v1587_v31 = vunpack.i.l.bf16 %v1586_v50  ;;  %v850_v3 = vsel %vm834_vm3, %v1979_v9, %v1593_v36  ;;  %v849_v5 = vsel %vm834_vm3, %v1965_v32, %v1592_v47 }
  0xd7   : > { %1368 = vmatmul.mubr.msk.bf16.vlgmr.msra.gmra.mrb[0].mxu0 %vm1021_vm11, %v971_v60  ;;  %v1601_v51 = vpop.permute.xlu1 %1600 }
  0xd8   : > { %v1603_v24 = vunpack.i.h.bf16 %v1601_v51  ;;  %v1602_v8 = vunpack.i.l.bf16 %v1601_v51  ;;  %v842_v43 = vsel %vm834_vm3, %v1999_v28, %v1588_v6  ;;  %v841_v15 = vsel %vm834_vm3, %v1990_v20, %v1587_v31 }
  0xd9   : > { %v1596_v26 = vpop.permute.xlu0 %1595 }
  0xda   : > { %v1598_v11 = vunpack.i.h.bf16 %v1596_v26  ;;  %v1597_v61 = vunpack.i.l.bf16 %v1596_v26  ;;  %v864_v2 = vsel %vm851_vm4, %v847_v52, %v1602_v8  ;;  %v865_v46 = vsel %vm851_vm4, %v848_v55, %v1603_v24 }
  0xdb   : > { %v1611_v19 = vpop.permute.xlu1 %1610 }
  0xdc   : > { %v1613_v4 = vunpack.i.h.bf16 %v1611_v19  ;;  %v1612_v63 = vunpack.i.l.bf16 %v1611_v19  ;;  %v856_v9 = vsel %vm851_vm4, %v839_v13, %v1597_v61  ;;  %v857_v32 = vsel %vm851_vm4, %v840_v23, %v1598_v11 }
  0xdd   : > { %v1606_v42 = vpop.permute.xlu0 %1605 }
  0xde   : > { %v1608_v62 = vunpack.i.h.bf16 %v1606_v42  ;;  %v1607_v1 = vunpack.i.l.bf16 %v1606_v42  ;;  %v866_v48 = vsel %vm851_vm4, %v849_v5, %v1612_v63  ;;  %v867_v49 = vsel %vm851_vm4, %v850_v3, %v1613_v4 }
  0xdf   : > { %v1621_v25 = vpop.permute.xlu1 %1620 }
  0xe0   : > { %v1623_v58 = vunpack.i.h.bf16 %v1621_v25  ;;  %v1622_v17 = vunpack.i.l.bf16 %v1621_v25  ;;  %v858_v20 = vsel %vm851_vm4, %v841_v15, %v1607_v1  ;;  %v859_v27 = vsel %vm851_vm4, %v842_v43, %v1608_v62 }
  0xe1   : > { %v1616_v21 = vpop.permute.xlu0 %1615 }
  0xe2   : > { %v1618_v28 = vunpack.i.h.bf16 %v1616_v21  ;;  %v1617_v10 = vunpack.i.l.bf16 %v1616_v21  ;;  %v881_v45 = vsel %vm868_vm5, %v864_v2, %v1622_v17  ;;  %v882_v41 = vsel %vm868_vm5, %v865_v46, %v1623_v58 }
  0xe3   : > { %v2433_v39 = vpop.permute.xlu1 %1630 }
  0xe4   : > { %v1633_v44 = vunpack.i.h.bf16 %v2433_v39  ;;  %v1632_v16 = vunpack.i.l.bf16 %v2433_v39  ;;  %v873_v19 = vsel %vm868_vm5, %v856_v9, %v1617_v10  ;;  %v874_v42 = vsel %vm868_vm5, %v857_v32, %v1618_v28 }
  0xe5   : > { %v2435_v59 = vpop.permute.xlu0 %1625 }
  0xe6   : > { %v1628_v30 = vunpack.i.h.bf16 %v2435_v59  ;;  %v1627_v34 = vunpack.i.l.bf16 %v2435_v59  ;;  %v883_v59 = vsel %vm868_vm5, %v866_v48, %v1632_v16  ;;  %v884_v29 = vsel %vm868_vm5, %v867_v49, %v1633_v44 }
  0xe7   : > { %v2437_v40 = vpop.permute.xlu1 %1640 }
  0xe8   : > { %v1643_v60 = vunpack.i.h.bf16 %v2437_v40  ;;  %v1642_v50 = vunpack.i.l.bf16 %v2437_v40  ;;  %v875_v57 = vsel %vm868_vm5, %v858_v20, %v1627_v34 }
  0xe9   : > { %v2439_v33 = vpop.permute.xlu0 %1635 }
  0xea   : > { %v1638_v51 = vunpack.i.h.bf16 %v2439_v33  ;;  %v1637_v26 = vunpack.i.l.bf16 %v2439_v33  ;;  %v876_v33 = vsel %vm868_vm5, %v859_v27, %v1628_v30  ;;  %v899_v55 = vsel %vm885_vm6, %v882_v41, %v1643_v60 }
  0xeb   : > { %v2441_v38 = vpop.permute.xlu1 %1650 }
  0xec   : > { %v1653_v25 = vunpack.i.h.bf16 %v2441_v38  ;;  %v1652_v21 = vunpack.i.l.bf16 %v2441_v38  ;;  %v898_v38 = vsel %vm885_vm6, %v881_v45, %v1642_v50  ;;  %v890_v53 = vsel %vm885_vm6, %v873_v19, %v1637_v26 }
  0xed   : > { %v2445_v56 = vpop.permute.xlu0 %1645  ;;  %v891_v52 = vsel %vm885_vm6, %v874_v42, %v1638_v51 }
  0xee   : > { %v1648_v18 = vunpack.i.h.bf16 %v2445_v56  ;;  %v1647_v40 = vunpack.i.l.bf16 %v2445_v56  ;;  %v900_v56 = vsel %vm885_vm6, %v883_v59, %v1652_v21  ;;  %v901_v6 = vsel %vm885_vm6, %v884_v29, %v1653_v25 }
  0xef   : > { %v2449_v35 = vpop.permute.xlu1 %1660 }
  0xf0   : > { %v1663_v7 = vunpack.i.h.bf16 %v2449_v35  ;;  %v1662_v36 = vunpack.i.l.bf16 %v2449_v35  ;;  %v892_v35 = vsel %vm885_vm6, %v875_v57, %v1647_v40  ;;  %v893_v11 = vsel %vm885_vm6, %v876_v33, %v1648_v18 }
  0xf1   : > { %v2455_v54 = vpop.permute.xlu0 %1655 }
  0xf2   : > { %v1658_v31 = vunpack.i.h.bf16 %v2455_v54  ;;  %v1657_v24 = vunpack.i.l.bf16 %v2455_v54  ;;  %v915_v37 = vsel %vm902_vm7, %v898_v38, %v1662_v36  ;;  %v916_v13 = vsel %vm902_vm7, %v899_v55, %v1663_v7 }
  0xf3   : > { %v2461_v14 = vpop.permute.xlu1 %1670 }
  0xf4   : > { %v1673_v61 = vunpack.i.h.bf16 %v2461_v14  ;;  %v1672_v23 = vunpack.i.l.bf16 %v2461_v14  ;;  %v907_v43 = vsel %vm902_vm7, %v890_v53, %v1657_v24  ;;  %v908_v15 = vsel %vm902_vm7, %v891_v52, %v1658_v31 }
  0xf5   : > { %v2471_v0 = vpop.permute.xlu0 %1665 }
  0xf6   : > { %v1668_v4 = vunpack.i.h.bf16 %v2471_v0  ;;  %v1667_v63 = vunpack.i.l.bf16 %v2471_v0  ;;  %v917_v2 = vsel %vm902_vm7, %v900_v56, %v1672_v23  ;;  %v918_v46 = vsel %vm902_vm7, %v901_v6, %v1673_v61 }
  0xf7   : > { %v2479_v12 = vpop.permute.xlu1 %1680 }
  0xf8   : > { %v1683_v54 = vunpack.i.h.bf16 %v2479_v12  ;;  %v1682_v5 = vunpack.i.l.bf16 %v2479_v12  ;;  %v909_v32 = vsel %vm902_vm7, %v892_v35, %v1667_v63  ;;  %v910_v48 = vsel %vm902_vm7, %v893_v11, %v1668_v4 }
  0xf9   : > { %v1676_v22 = vpop.permute.xlu0 %1675 }
  0xfa   : > { %v1678_v62 = vunpack.i.h.bf16 %v1676_v22  ;;  %v1677_v1 = vunpack.i.l.bf16 %v1676_v22  ;;  %v932_v12 = vsel %vm919_vm8, %v915_v37, %v1682_v5  ;;  %v933_v20 = vsel %vm919_vm8, %v916_v13, %v1683_v54  ;;  %v2564_v54 = vld [vmem:[%s2637_s2] ss:$0 sm:$0xff] }
  0xfb   : > { %v1691_v39 = vpop.permute.xlu1 %1690 }
  0xfc   : > { %v1693_v14 = vunpack.i.h.bf16 %v1691_v39  ;;  %v1692_v58 = vunpack.i.l.bf16 %v1691_v39  ;;  %v924_v27 = vsel %vm919_vm8, %v907_v43, %v1677_v1  ;;  %v925_v44 = vsel %vm919_vm8, %v908_v15, %v1678_v62 }
  0xfd   : > { %v2505_v47 = vpop.permute.xlu0 %1685 }
  0xfe   : > { %v1687_v0 = vunpack.i.l.bf16 %v2505_v47  ;;  %v934_v16 = vsel %vm919_vm8, %v917_v2, %v1692_v58  ;;  %v935_v45 = vsel %vm919_vm8, %v918_v46, %v1693_v14  ;;  %v1688_v41 = vunpack.i.h.bf16 %v2505_v47 }
  0xff   : > { %v1701_v8 = vpop.permute.xlu1 %1700 }
 0x100   : > { %v1702_v9 = vunpack.i.l.bf16 %v1701_v8  ;;  %v1703_v49 = vunpack.i.h.bf16 %v1701_v8  ;;  %v926_v22 = vsel %vm919_vm8, %v909_v32, %v1687_v0  ;;  %v927_v52 = vsel %vm919_vm8, %v910_v48, %v1688_v41 }
 0x101   : > { %v1696_v3 = vpop.permute.xlu0 %1695 }
 0x102   : > { %v1697_v28 = vunpack.i.l.bf16 %v1696_v3  ;;  %v1698_v30 = vunpack.i.h.bf16 %v1696_v3  ;;  %v949_v60 = vsel %vm936_vm9, %v932_v12, %v1702_v9  ;;  %v950_v26 = vsel %vm936_vm9, %v933_v20, %v1703_v49 }
 0x103   : > { %v1711_v17 = vpop.permute.xlu1 %1710 }
 0x104   : > { %v941_v19 = vsel %vm936_vm9, %v924_v27, %v1697_v28  ;;  %v1713_v42 = vunpack.i.h.bf16 %v1711_v17  ;;  %v1712_v25 = vunpack.i.l.bf16 %v1711_v17  ;;  %v942_v40 = vsel %vm936_vm9, %v925_v44, %v1698_v30 }
 0x105   : > { %v1706_v10 = vpop.permute.xlu0 %1705 }
 0x106   : > { %v1708_v57 = vunpack.i.h.bf16 %v1706_v10  ;;  %v1707_v33 = vunpack.i.l.bf16 %v1706_v10  ;;  %v951_v56 = vsel %vm936_vm9, %v934_v16, %v1712_v25  ;;  %v952_v6 = vsel %vm936_vm9, %v935_v45, %v1713_v42 }
 0x107   : > { %v1721_v34 = vpop.permute.xlu1 %1720 }
 0x108   : > { %v1723_v50 = vunpack.i.h.bf16 %v1721_v34  ;;  %v1722_v51 = vunpack.i.l.bf16 %v1721_v34  ;;  %v943_v23 = vsel %vm936_vm9, %v926_v22, %v1707_v33  ;;  %v944_v37 = vsel %vm936_vm9, %v927_v52, %v1708_v57 }
 0x109   : > { %v1716_v21 = vpop.permute.xlu0 %1715 }
 0x10a   : > { %v966_v39 = vsel %vm953_vm10, %v949_v60, %v1722_v51  ;;  %v967_v59 = vsel %vm953_vm10, %v950_v26, %v1723_v50  ;;  %v1718_v29 = vunpack.i.h.bf16 %v1716_v21  ;;  %v1717_v18 = vunpack.i.l.bf16 %v1716_v21 }
 0x10b   : > { %v976_v7 = vpack.c.bf16 %v967_v59, %v966_v39  ;;  %v1731_v36 = vpop.permute.xlu1 %1730 }
 0x10c   : > { %v958_v47 = vsel %vm953_vm10, %v941_v19, %v1717_v18  ;;  %v959_v38 = vsel %vm953_vm10, %v942_v40, %v1718_v29  ;;  %v1733_v55 = vunpack.i.h.bf16 %v1731_v36  ;;  %v1732_v53 = vunpack.i.l.bf16 %v1731_v36 }
 0x10d   : > { %v972_v31 = vpack.c.bf16 %v959_v38, %v958_v47  ;;  %v1726_v24 = vpop.permute.xlu0 %1725  ;;  %1379 = vmatprep.mubr.msk.bf16.mxu1 %vm1021_vm11, %v976_v7 }
 0x10e   : > { %v968_v8 = vsel %vm953_vm10, %v951_v56, %v1732_v53  ;;  %v969_v35 = vsel %vm953_vm10, %v952_v6, %v1733_v55  ;;  %v1728_v11 = vunpack.i.h.bf16 %v1726_v24  ;;  %v1727_v61 = vunpack.i.l.bf16 %v1726_v24 }
 0x10f   : > { %v977_v13 = vpack.c.bf16 %v969_v35, %v968_v8  ;;  %1371 = vmatprep.mubr.msk.bf16.mxu0 %vm1021_vm11, %v972_v31 }
 0x110   : > { %v960_v4 = vsel %vm953_vm10, %v943_v23, %v1727_v61  ;;  %v961_v63 = vsel %vm953_vm10, %v944_v37, %v1728_v11 }
 0x111   : > { %v973_v3 = vpack.c.bf16 %v961_v63, %v960_v4  ;;  %1380 = vmatmul.mubr.msk.bf16.gmra.mrb[4].mxu1 %vm1021_vm11, %v977_v13 }
 0x113   : > { %1372 = vmatmul.mubr.msk.bf16.gmra.mrb[4].mxu0 %vm1021_vm11, %v973_v3 }
 0x1a8   : > { %v1377_v5 = vpop.f32.mrb[0].mxu1 }
 0x1a9   : > { %v1125_v62 = vadd.f32 %v1377_v5, %v2564_v54  ;;  %v1116_v1 = vpop.f32.mrb[1].mxu1 }
 0x1aa   : > { %v1369_v43 = vpop.f32.mrb[0].mxu0  ;;  %v1117_v15 = vadd.f32 %v2564_v54, %v1116_v1  ;;  %v1378_v14 = vpop.f32.mrb[2].mxu1 }
 0x1ab   : > { %v1093_v58 = vadd.f32 %v1369_v43, %v2564_v54  ;;  %v1157_v17 = vmax.f32 %v1125_v62, 0.0  ;;  %v1084_v2 = vpop.f32.mrb[1].mxu0  ;;  %v1128_v46 = vadd.f32 %v1378_v14, %v2564_v54  ;;  %v1119_v0 = vpop.f32.mrb[3].mxu1 }
 0x1ac   : > { %v1085_v9 = vadd.f32 %v2564_v54, %v1084_v2  ;;  %v1155_v32 = vmax.f32 %v1117_v15, 0.0  ;;  %v1370_v48 = vpop.f32.mrb[2].mxu0  ;;  %v1120_v49 = vadd.f32 %v2564_v54, %v1119_v0 }
 0x1ad   : > { %v1149_v28 = vmax.f32 %v1093_v58, 0.0  ;;  %v1216_v10 = vpack.c.bf16 %v1157_v17, %v1157_v17  ;;  %v1096_v12 = vadd.f32 %v1370_v48, %v2564_v54  ;;  %v1158_v20 = vmax.f32 %v1128_v46, 0.0  ;;  %v1087_v27 = vpop.f32.mrb[3].mxu0 }
 0x1ae   : > { %v1147_v44 = vmax.f32 %v1085_v9, 0.0  ;;  %v1214_v16 = vpack.c.bf16 %v1155_v32, %v1155_v32  ;;  %v1088_v45 = vadd.f32 %v2564_v54, %v1087_v27  ;;  %v1156_v41 = vmax.f32 %v1120_v49, 0.0 }
 0x1af   : > { %v1208_v30 = vpack.c.bf16 %v1149_v28, %v1149_v28  ;;  %v1165_v34 = vsub.f32 %v1149_v28, %v1157_v17  ;;  %1233 = vst.msk [vmem:[%s2574_s20 + $0x28] sm:$0xf] %vm1222_vm12, %v1216_v10  ;;  %v1150_v22 = vmax.f32 %v1096_v12, 0.0  ;;  %v1217_v60 = vpack.c.bf16 %v1158_v20, %v1158_v20 }
 0x1b0   : > { %v1206_v50 = vpack.c.bf16 %v1147_v44, %v1147_v44  ;;  %v1163_v51 = vsub.f32 %v1147_v44, %v1155_v32  ;;  %1231 = vst.msk [vmem:[%s2574_s20 + $0x20] sm:$0xf] %vm1222_vm12, %v1214_v16  ;;  %v1148_v26 = vmax.f32 %v1088_v45, 0.0  ;;  %v1215_v19 = vpack.c.bf16 %v1156_v41, %v1156_v41 }
 0x1b1   : > { %1225 = vst.msk [vmem:[%s2574_s20 + $0x8] sm:$0xf] %vm1222_vm12, %v1208_v30  ;;  %v1209_v42 = vpack.c.bf16 %v1150_v22, %v1150_v22  ;;  %v1166_v25 = vsub.f32 %v1150_v22, %v1158_v20  ;;  %1234 = vst.msk [vmem:[%s2574_s20 + $0x2c] sm:$0xf] %vm1222_vm12, %v1217_v60  ;;  %v1173_v29 = vand.u32 2147483647, %v1165_v34 }
 0x1b2   : > { %1223 = vst.msk [vmem:[%s2574_s20] sm:$0xf] %vm1222_vm12, %v1206_v50  ;;  %v1171_v21 = vand.u32 2147483647, %v1163_v51  ;;  %v1207_v39 = vpack.c.bf16 %v1148_v26, %v1148_v26  ;;  %v1164_v59 = vsub.f32 %v1148_v26, %v1156_v41  ;;  %1232 = vst.msk [vmem:[%s2574_s20 + $0x24] sm:$0xf] %vm1222_vm12, %v1215_v19 }
 0x1b3   : > { %1226 = vst.msk [vmem:[%s2574_s20 + $0xc] sm:$0xf] %vm1222_vm12, %v1209_v42  ;;  %v1174_v57 = vand.u32 2147483647, %v1166_v25  ;;  %v1182_v36 = vsel %vm851_vm4, %v1173_v29, 0.0 }
 0x1b4   : > { %1224 = vst.msk [vmem:[%s2574_s20 + $0x4] sm:$0xf] %vm1222_vm12, %v1207_v39  ;;  %v1172_v18 = vand.u32 2147483647, %v1164_v59  ;;  %v1179_v40 = vsel %vm851_vm4, %v1171_v21, 0.0 }
 0x1b5   : > { %v1184_v38 = vsel %vm851_vm4, %v1174_v57, 0.0 }
 0x1b6   : > { %v1180_v33 = vsel %vm851_vm4, %v1172_v18, 0.0 }
 0x1b7   : > { %v1181_v7 = vadd.f32 %v1180_v33, %v1179_v40 }
 0x1b9   : > { %v1183_v47 = vadd.f32 %v1182_v36, %v1181_v7 }
 0x1bb   : > { %v1185_v55 = vadd.f32 %v1184_v38, %v1183_v47 }
 0x1e4   : > { %v1381_v53 = vpop.f32.mrb[4].mxu1 }
 0x1e5   : > { %v1141_v52 = vadd.f32 %v1381_v53, %v2564_v54  ;;  %v1132_v56 = vpop.f32.mrb[5].mxu1 }
 0x1e6   : > { %v1373_v6 = vpop.f32.mrb[4].mxu0  ;;  %v1133_v31 = vadd.f32 %v2564_v54, %v1132_v56  ;;  %v1382_v24 = vpop.f32.mrb[6].mxu1 }
 0x1e7   : > { %v1109_v8 = vadd.f32 %v1373_v6, %v2564_v54  ;;  %v1161_v35 = vmax.f32 %v1141_v52, 0.0  ;;  %v1100_v11 = vpop.f32.mrb[5].mxu0  ;;  %v1144_v61 = vadd.f32 %v1382_v24, %v2564_v54  ;;  %v1135_v23 = vpop.f32.mrb[7].mxu1 }
 0x1e8   : > { %v1101_v37 = vadd.f32 %v2564_v54, %v1100_v11  ;;  %v1159_v13 = vmax.f32 %v1133_v31, 0.0  ;;  %v1374_v4 = vpop.f32.mrb[6].mxu0  ;;  %v1136_v63 = vadd.f32 %v2564_v54, %v1135_v23 }
 0x1e9   : > { %v1153_v3 = vmax.f32 %v1109_v8, 0.0  ;;  %v1220_v5 = vpack.c.bf16 %v1161_v35, %v1161_v35  ;;  %v1112_v62 = vadd.f32 %v1374_v4, %v2564_v54  ;;  %v1162_v1 = vmax.f32 %v1144_v61, 0.0  ;;  %v1103_v43 = vpop.f32.mrb[7].mxu0 }
 0x1ea   : > { %v1151_v15 = vmax.f32 %v1101_v37, 0.0  ;;  %v1218_v14 = vpack.c.bf16 %v1159_v13, %v1159_v13  ;;  %v1104_v58 = vadd.f32 %v2564_v54, %v1103_v43  ;;  %v1160_v17 = vmax.f32 %v1136_v63, 0.0 }
 0x1eb   : > { %v1212_v2 = vpack.c.bf16 %v1153_v3, %v1153_v3  ;;  %v1169_v46 = vsub.f32 %v1153_v3, %v1161_v35  ;;  %1237 = vst.msk [vmem:[%s2574_s20 + $0x38] sm:$0xf] %vm1222_vm12, %v1220_v5  ;;  %v1154_v0 = vmax.f32 %v1112_v62, 0.0  ;;  %v1221_v9 = vpack.c.bf16 %v1162_v1, %v1162_v1 }
 0x1ec   : > { %v1210_v32 = vpack.c.bf16 %v1151_v15, %v1151_v15  ;;  %v1167_v48 = vsub.f32 %v1151_v15, %v1159_v13  ;;  %1235 = vst.msk [vmem:[%s2574_s20 + $0x30] sm:$0xf] %vm1222_vm12, %v1218_v14  ;;  %v1152_v49 = vmax.f32 %v1104_v58, 0.0  ;;  %v1219_v28 = vpack.c.bf16 %v1160_v17, %v1160_v17 }
 0x1ed   : > { %1229 = vst.msk [vmem:[%s2574_s20 + $0x18] sm:$0xf] %vm1222_vm12, %v1212_v2  ;;  %v1213_v54 = vpack.c.bf16 %v1154_v0, %v1154_v0  ;;  %v1170_v10 = vsub.f32 %v1154_v0, %v1162_v1  ;;  %1238 = vst.msk [vmem:[%s2574_s20 + $0x3c] sm:$0xf] %vm1222_vm12, %v1221_v9  ;;  %v1177_v44 = vand.u32 2147483647, %v1169_v46 }
 0x1ee   : > { %1227 = vst.msk [vmem:[%s2574_s20 + $0x10] sm:$0xf] %vm1222_vm12, %v1210_v32  ;;  %v1175_v12 = vand.u32 2147483647, %v1167_v48  ;;  %v1211_v20 = vpack.c.bf16 %v1152_v49, %v1152_v49  ;;  %v1168_v27 = vsub.f32 %v1152_v49, %v1160_v17  ;;  %1236 = vst.msk [vmem:[%s2574_s20 + $0x34] sm:$0xf] %vm1222_vm12, %v1219_v28 }
 0x1ef   : > { %1230 = vst.msk [vmem:[%s2574_s20 + $0x1c] sm:$0xf] %vm1222_vm12, %v1213_v54  ;;  %v1178_v30 = vand.u32 2147483647, %v1170_v10  ;;  %v1190_v60 = vsel %vm851_vm4, %v1177_v44, 0.0 }
 0x1f0   : > { %v1186_v16 = vsel %vm851_vm4, %v1175_v12, 0.0  ;;  %1228 = vst.msk [vmem:[%s2574_s20 + $0x14] sm:$0xf] %vm1222_vm12, %v1211_v20  ;;  %v1176_v45 = vand.u32 2147483647, %v1168_v27 }
 0x1f1   : > { %v1187_v41 = vadd.f32 %v1186_v16, %v1185_v55  ;;  %v1192_v51 = vsel %vm851_vm4, %v1178_v30, 0.0 }
 0x1f2   : > { %v1188_v34 = vsel %vm851_vm4, %v1176_v45, 0.0 }
 0x1f3   : > { %v1189_v22 = vadd.f32 %v1188_v34, %v1187_v41 }
 0x1f5   : > { %v1191_v50 = vadd.f32 %v1190_v60, %v1189_v22 }
 0x1f7   : > { %v1193_v26 = vadd.f32 %v1192_v51, %v1191_v50 }
 0x1f9   : > { %1194 = vadd.xlane.f32.xlu0 %v1193_v26 }
 0x286   : > { %v1195_v19 = vpop.xlane.xlu0 %1194 }
 0x287   : > { %v1196_v42 = vrot.slane %v1195_v19, 4 }
 0x289   : > { %v1197_v25 = vadd.f32 %v1196_v42, %v1195_v19 }
 0x28b   : > { %v1198_v21 = vrot.slane %v1197_v25, 2 }
 0x28d   : > { %v1199_v39 = vadd.f32 %v1198_v21, %v1197_v25 }
 0x28f   : > { %v1200_v59 = vrot.slane %v1199_v39, 1 }
 0x291   : > { %v1201_v29 = vadd.f32 %v1200_v59, %v1199_v39 }
 0x293   : > { %1396 = vpush %v1201_v29 }
 0x2c4   : > { %s1397_s24 = spop %1396 }
 0x2c5   : > { %v1203_v18 = vstv %s1397_s24 }
 0x2c6   : > { %1205 = vst.msk [vmem:[%s206_s23] sm:$0x1] %vm1204_vm13, %v1203_v18 }
 0x2c7 PF: > { %s15_s15 = sadd.s32 1, %s1745_s15  }
 0x2c8   : > { %p12_p4 = scmp.ge.s32.totalorder %s15_s15, 4  }
 0x2ca   :  { %14 = sbr.rel (!%p12_p4) target bundleno = 1 (0x1), region = 74 }

// kernel: squeeze.27
= control target key start
LH: loop header
LB: loop body
LE: loop exit
PB: predicated region body
PF: predicated region fallthrough
CT: control target
= control target key end

     0   :  { %vm259_vm0 = vcmask 130048   ;;  %s490_s0 = inlined_call_operand.vmem [shape: bf16[1,2,4,4,144], index: 0, kind: input, shape index: {}]   ;;  %s491_s1 = inlined_call_operand.vmem [shape: bf16[32,144], index: 1, kind: output, shape index: {}]  }
   0x1   :  { %v403_v0 = vld [vmem:[%s490_s0 + $0x18] sm:$0xff]   ;;  %v407_v1 = vld [vmem:[%s490_s0 + $0x10] sm:$0xff]   ;;  %v411_v2 = vld [vmem:[%s490_s0 + $0x8] sm:$0xff]  }
   0x2   :  { %v17_v3 = vunpack.c.h.bf16 %v403_v0  ;;  %v49_v4 = vunpack.c.l.bf16 %v403_v0  ;;  %v415_v5 = vld [vmem:[%s490_s0] sm:$0xff]   ;;  %v81_v6 = vunpack.c.h.bf16 %v407_v1  ;;  %v113_v7 = vunpack.c.l.bf16 %v407_v1 }
   0x3   :  { %v145_v8 = vunpack.c.h.bf16 %v411_v2  ;;  %v177_v9 = vunpack.c.l.bf16 %v411_v2  ;;  %v209_v10 = vunpack.c.h.bf16 %v415_v5  ;;  %v240_v11 = vunpack.c.l.bf16 %v415_v5 }
   0x4   :  { %20 = vst [vmem:[#allocation1 + $0x70] ss:$8 sps:$4 sm:$0xff] %v17_v3   ;;  %52 = vst [vmem:[#allocation1 + $0x60] ss:$8 sps:$4 sm:$0xff] %v49_v4  }
   0x5   :  { %84 = vst [vmem:[#allocation1 + $0x50] ss:$8 sps:$4 sm:$0xff] %v81_v6   ;;  %116 = vst [vmem:[#allocation1 + $0x40] ss:$8 sps:$4 sm:$0xff] %v113_v7  }
   0x6   :  { %148 = vst [vmem:[#allocation1 + $0x30] ss:$8 sps:$4 sm:$0xff] %v145_v8   ;;  %180 = vst [vmem:[#allocation1 + $0x20] ss:$8 sps:$4 sm:$0xff] %v177_v9  }
   0x7   :  { %212 = vst [vmem:[#allocation1 + $0x10] ss:$8 sps:$4 sm:$0xff] %v209_v10   ;;  %243 = vst [vmem:[#allocation1] ss:$8 sps:$4 sm:$0xff] %v240_v11  }
   0xb   :  { %v288_v12 = vld [vmem:[#allocation1 + $0x68] sm:$0xf]   ;;  %v293_v13 = vld [vmem:[#allocation1 + $0x78] sm:$0xf]   ;;  %v320_v14 = vld [vmem:[#allocation1 + $0x60] sm:$0xf]  }
   0xc   :  { %v278_v15 = vld [vmem:[#allocation1 + $0x48] sm:$0xf]   ;;  %v283_v16 = vld [vmem:[#allocation1 + $0x58] sm:$0xf]   ;;  %291 = vst.msk [vmem:[#allocation0 + $0x38] sm:$0xf] %vm259_vm0, %v288_v12  }
   0xd   :  { %296 = vst.msk [vmem:[#allocation0 + $0x3c] sm:$0xf] %vm259_vm0, %v293_v13   ;;  %v312_v17 = vld [vmem:[#allocation1 + $0x40] sm:$0xf]   ;;  %322 = vst [vmem:[#allocation0 + $0x30] sm:$0xf] %v320_v14  }
   0xe   :  { %v268_v18 = vld [vmem:[#allocation1 + $0x28] sm:$0xf]   ;;  %v273_v19 = vld [vmem:[#allocation1 + $0x38] sm:$0xf]   ;;  %281 = vst.msk [vmem:[#allocation0 + $0x28] sm:$0xf] %vm259_vm0, %v278_v15  }
   0xf   :  { %286 = vst.msk [vmem:[#allocation0 + $0x2c] sm:$0xf] %vm259_vm0, %v283_v16   ;;  %v304_v20 = vld [vmem:[#allocation1 + $0x20] sm:$0xf]   ;;  %314 = vst [vmem:[#allocation0 + $0x20] sm:$0xf] %v312_v17  }
  0x10   :  { %v258_v21 = vld [vmem:[#allocation1 + $0x8] sm:$0xf]   ;;  %v263_v22 = vld [vmem:[#allocation1 + $0x18] sm:$0xf]   ;;  %271 = vst.msk [vmem:[#allocation0 + $0x18] sm:$0xf] %vm259_vm0, %v268_v18  }
  0x11   :  { %276 = vst.msk [vmem:[#allocation0 + $0x1c] sm:$0xf] %vm259_vm0, %v273_v19   ;;  %v297_v23 = vld [vmem:[#allocation1] sm:$0xf]   ;;  %306 = vst [vmem:[#allocation0 + $0x10] sm:$0xf] %v304_v20  }
  0x12   :  { %261 = vst.msk [vmem:[#allocation0 + $0x8] sm:$0xf] %vm259_vm0, %v258_v21   ;;  %266 = vst.msk [vmem:[#allocation0 + $0xc] sm:$0xf] %vm259_vm0, %v263_v22   ;;  %v300_v24 = vld [vmem:[#allocation1 + $0x10] sm:$0xf]  }
  0x13   :  { %298 = vst [vmem:[#allocation0] sm:$0xf] %v297_v23   ;;  %v308_v25 = vld [vmem:[#allocation1 + $0x30] sm:$0xf]   ;;  %302 = vst [vmem:[#allocation0 + $0x4] sm:$0xf] %v300_v24  }
  0x14   :  { %v316_v26 = vld [vmem:[#allocation1 + $0x50] sm:$0xf]   ;;  %310 = vst [vmem:[#allocation0 + $0x14] sm:$0xf] %v308_v25   ;;  %v377_v31 = vld [vmem:[#allocation0 + $0x38] sm:$0xff] }
  0x15   :  { %318 = vst [vmem:[#allocation0 + $0x24] sm:$0xf] %v316_v26   ;;  %v324_v27 = vld [vmem:[#allocation1 + $0x70] sm:$0xf]  }
  0x16   :  { %326 = vst [vmem:[#allocation0 + $0x34] sm:$0xf] %v324_v27   ;;  %v363_v29 = vld [vmem:[#allocation0 + $0x28] sm:$0xff] }
  0x18   :  { %v349_v28 = vld [vmem:[#allocation0 + $0x18] sm:$0xff] }
  0x19   :  { %v336_v30 = vld [vmem:[#allocation0 + $0x8] sm:$0xff] }
  0x1a   :  { %v331_v32 = vld [vmem:[#allocation0] sm:$0xff] }
  0x1b   :  { %v342_v33 = vld [vmem:[#allocation0 + $0x10] sm:$0xff]  ;;  %v428_v35 = vpack.c.bf16 %v336_v30, %v331_v32 }
  0x1c   :  { %v356_v34 = vld [vmem:[#allocation0 + $0x20] sm:$0xff]  ;;  %v433_v36 = vpack.c.bf16 %v349_v28, %v342_v33 }
  0x1d   :  { %v438_v37 = vpack.c.bf16 %v363_v29, %v356_v34  ;;  %v370_v38 = vld [vmem:[#allocation0 + $0x30] sm:$0xff]  ;;  %429 = vst [vmem:[%s491_s1] sm:$0xff] %v428_v35  }
  0x1e   :  { %v443_v39 = vpack.c.bf16 %v377_v31, %v370_v38  ;;  %445 = vst [vmem:[%s491_s1 + $0x8] sm:$0xff] %v433_v36  }
  0x1f   :  { %446 = vst [vmem:[%s491_s1 + $0x10] sm:$0xff] %v438_v37  }
  0x20   :  { %447 = vst [vmem:[%s491_s1 + $0x18] sm:$0xff] %v443_v39  }

// kernel: a_call__.20
= control target key start
LH: loop header
LB: loop body
LE: loop exit
PB: predicated region body
PF: predicated region fallthrough
CT: control target
= control target key end

     0   :  { %s5714_s15 = smov 0   ;;  %s9210_s0 = inlined_call_operand.vmem [shape: bf16[2,2,18,18,3], index: 0, kind: input, shape index: {}]   ;;  %s9211_s1 = inlined_call_operand.vmem [shape: bf16[27,8], index: 1, kind: input, shape index: {}]   ;;  %s9212_s2 = inlined_call_operand.vmem [shape: f32[1,8], index: 2, kind: input, shape index: {}]   ;;  %s9213_s3 = inlined_call_operand.vmem [shape: bf16[2,2,16,16,8], index: 3, kind: output, shape index: {0}]   ;;  %s9214_s4 = inlined_call_operand.vmem [shape: f32[2,1,1], index: 4, kind: output, shape index: {1}]  }
   0x1 LB: > { %s4001_s16 = sadd.s32 4294967295, %s5678_s15   ;;  %p4005_p0 = scmp.ge.s32.totalorder %s5678_s15, 1  ;;  %s5678_s15 = sphi %s5714_s15, %s15_s15  }
   0x2   : > { %p165_p1 = scmp.lt.s32.totalorder %s5678_s15, 3 }
   0x4   : > { %p166_p2 = pnand %p4005_p0, %p165_p1 }
   0x6   : > { %169 = sbr.rel (%p166_p2) target bundleno = 1101 (0x44d), region = 32 }
   0xd   : > { %p194_p3 = scmp.lt.s32.totalorder %s4001_s16, 1  ;;  %vm520_vm0 = vcmask 1046528   ;;  %s5680_s21 = smov 3   ;;  %vm873_vm1 = vcmask 1045504   ;;  %vm2430_vm2 = vcmask 23552   ;;  %vm2495_vm3 = vcmask 48128  }
   0xe   : > { %s5681_s22 = smov 6   ;;  %s5682_s23 = smov 9   ;;  %vm2560_vm4 = vcmask 72704   ;;  %vm3101_vm5 = vcmask 1044480   ;;  %vm2625_vm6 = vcmask 97280   ;;  %vm2690_vm7 = vcmask 121856  }
   0xf   : > { %s10289_s16 = smov (!%p194_p3, %s4001_s16), 1  ;;  %s5683_s24 = smov 12   ;;  %vm2755_vm8 = vcmask 146432   ;;  %vm2820_vm9 = vcmask 171008   ;;  %vm2885_vm10 = vcmask 195584   ;;  %vm3004_vm11 = vcmask 220160  }
  0x10   : > { %s4370_s17 = smul.u32 432, %s10289_s16  ;;  %s5684_s25 = smov 15   ;;  %vm3856_vm12 = vcmask 60416   ;;  %vm3524_vm13 = vcmask 64512   ;;  %vm3598_vm14 = vcmask 0  }
  0x11   : > { %s5685_s26 = smov 18   ;;  %s5686_s29 = smov 21  }
  0x12   : > { %s5728_s20 = scalar_lea.vmem %s9210_s0, %s4370_s17  ;;  %s5688_s6 = smov 24  }
  0x13   : > { %v4247_v0 = vld [vmem:[%s5728_s20 + $0x18] sm:$0xff]   ;;  %v5732_v1 = vld [vmem:[%s5728_s20 + $0x20] sm:$0x1]  ;;  %v5743_v7 = vld [vmem:[%s5728_s20 + $0x8] sm:$0x1]  ;;  %s4110_s9 = sshll.u32 %s10289_s16, 8  ;;  %s206_s17 = scalar_lea.vmem %s9214_s4, %s10289_s16 }
  0x14   : > { %v4176_v2 = vld [vmem:[%s5728_s20] sm:$0xff]   ;;  %v5735_v3 = vunpack.c.l.bf16 %v4247_v0  ;;  %v5737_v4 = vunpack.c.h.bf16 %v4247_v0  ;;  %v9221_v5 = vunpack.c.l.bf16 %v5732_v1  ;;  %v5747_v9 = vld [vmem:[%s5728_s20 + $0x2c] sm:$0x1]  ;;  %v9224_v11 = vunpack.c.l.bf16 %v5743_v7  ;;  %v5771_v26 = vld [vmem:[%s5728_s20 + $0x14] sm:$0x1]  ;;  %s8980_s12 = scalar_lea.vmem %s9213_s3, %s4110_s9 }
  0x15   : > { %v5740_v6 = vunpack.c.l.bf16 %v4176_v2  ;;  %v217_v8 = vld [vmem:[%s5728_s20 + $0x24] sm:$0xff]   ;;  %v5749_v10 = vunpack.c.h.bf16 %v4176_v2  ;;  %v211_v14 = vld [vmem:[%s5728_s20 + $0xc] sm:$0xff]   ;;  %v9222_v21 = vunpack.c.l.bf16 %v5747_v9  ;;  %v223_v28 = vld [vmem:[%s5728_s20 + $0x3c] sm:$0xff]   ;;  %v9226_v38 = vunpack.c.l.bf16 %v5771_v26 }
  0x16   : > { %9589 = vst [vmem:[#allocation2_spill] sm:$0xff] %v5735_v3  ;;  %9590 = vst [vmem:[#allocation3_spill] sm:$0xff] %v5737_v4  ;;  %v5752_v12 = vunpack.c.l.bf16 %v217_v8  ;;  %v5754_v13 = vunpack.c.h.bf16 %v217_v8  ;;  %v531_v15 = vrot.slane %v5735_v3, 1  ;;  %v532_v16 = vrot.slane %v5737_v4, 1  ;;  %v5781_v32 = vld [vmem:[%s5728_s20 + $0x44] sm:$0x1] }
  0x17   : > { %9591 = vst [vmem:[#allocation4_spill] sm:$0xff] %v5740_v6  ;;  %9592 = vst [vmem:[#allocation5_spill] sm:$0xff] %v5749_v10  ;;  %v534_v17 = vrot.slane %v9221_v5, 1  ;;  %v521_v18 = vrot.slane %v5740_v6, 1  ;;  %v522_v19 = vrot.slane %v5749_v10, 1  ;;  %v524_v20 = vrot.slane %v9224_v11, 1 }
  0x18   : > { %9593 = vst [vmem:[#allocation6_spill] sm:$0xff] %v5752_v12  ;;  %9594 = vst [vmem:[#allocation7_spill] sm:$0xff] %v5754_v13  ;;  %v536_v22 = vrot.slane %v5752_v12, 1  ;;  %v533_v23 = vsel %vm520_vm0, %v531_v15, %v532_v16  ;;  %v537_v25 = vrot.slane %v5754_v13, 1  ;;  %v5773_v27 = vunpack.c.l.bf16 %v211_v14  ;;  %v4248_v33 = vld [vmem:[%s5728_s20 + $0x30] sm:$0xff]   ;;  %v4249_v61 = vld [vmem:[%s5728_s20 + $0x48] sm:$0xff]  }
  0x19   : > { %v535_v24 = vsel %vm520_vm0, %v532_v16, %v534_v17  ;;  %v523_v30 = vsel %vm520_vm0, %v521_v18, %v522_v19  ;;  %v525_v31 = vsel %vm520_vm0, %v522_v19, %v524_v20  ;;  %v539_v36 = vrot.slane %v9222_v21, 1  ;;  %v5798_v42 = vld [vmem:[%s5728_s20 + $0x38] sm:$0x1]  ;;  %v5820_v56 = vld [vmem:[%s5728_s20 + $0x5c] sm:$0x1]  ;;  %v235_v18 = vld [vmem:[%s5728_s20 + $0x6c] sm:$0xff]  }
  0x1a   : > { %9595 = vst [vmem:[#allocation8_spill] sm:$0xff] %v5773_v27  ;;  %v5776_v29 = vpack.i.bf16 %v535_v24, %v533_v23  ;;  %v4390_v34 = vpack.i.bf16 %v525_v31, %v523_v30  ;;  %v538_v35 = vsel %vm520_vm0, %v536_v22, %v537_v25  ;;  %v5787_v37 = vunpack.c.h.bf16 %v211_v14  ;;  %v229_v47 = vld [vmem:[%s5728_s20 + $0x54] sm:$0xff]   ;;  %v5837_v8 = vld [vmem:[%s5728_s20 + $0x50] sm:$0x1] }
  0x1b   : > { %v526_v39 = vrot.slane %v5773_v27, 1  ;;  %v5793_v40 = vunpack.c.l.bf16 %v223_v28  ;;  %v5795_v41 = vunpack.c.h.bf16 %v223_v28  ;;  %v540_v43 = vsel %vm520_vm0, %v537_v25, %v539_v36  ;;  %v5855_v24 = vld [vmem:[%s5728_s20 + $0x74] sm:$0x1]  ;;  %v5954_v11 = vld [vmem:[%s5728_s20 + $0x98] sm:$0x1] }
  0x1c   : > { %9596 = vst [vmem:[#allocation9_spill] sm:$0xff] %v5776_v29  ;;  %9597 = vst [vmem:[#allocation10_spill] sm:$0xff] %v5787_v37  ;;  %4401 = vrot.lane.b32.xlu1 %v5776_v29, %s5680_s21  ;;  %4391 = vrot.lane.b32.xlu0 %v4390_v34, %s5680_s21  ;;  %v527_v44 = vrot.slane %v5787_v37, 1  ;;  %v9220_v45 = vunpack.c.l.bf16 %v5781_v32  ;;  %v5804_v46 = vunpack.c.l.bf16 %v4248_v33  ;;  %v5807_v48 = vpack.i.bf16 %v540_v43, %v538_v35 }
  0x1d   : > { %9598 = vst [vmem:[#allocation11_spill] sm:$0xff] %v5793_v40  ;;  %9599 = vst [vmem:[#allocation12_spill] sm:$0xff] %v5795_v41  ;;  %v529_v49 = vrot.slane %v9226_v38, 1  ;;  %v546_v50 = vrot.slane %v5793_v40, 1  ;;  %v547_v51 = vrot.slane %v5795_v41, 1  ;;  %v5816_v54 = vunpack.c.h.bf16 %v4248_v33 }
  0x1e   : > { %9600 = vst [vmem:[#allocation13_spill] sm:$0xff] %v5804_v46  ;;  %9601 = vst [vmem:[#allocation14_spill] sm:$0xff] %v5807_v48  ;;  %v528_v52 = vsel %vm520_vm0, %v526_v39, %v527_v44  ;;  %v549_v53 = vrot.slane %v9220_v45, 1  ;;  %v9219_v55 = vunpack.c.l.bf16 %v5798_v42  ;;  %v541_v59 = vrot.slane %v5804_v46, 1  ;;  %v4250_v39 = vld [vmem:[%s5728_s20 + $0x60] sm:$0xff]  }
  0x1f   : > { %9602 = vst [vmem:[#allocation15_spill] sm:$0xff] %v5816_v54  ;;  %v530_v57 = vsel %vm520_vm0, %v527_v44, %v529_v49  ;;  %v548_v58 = vsel %vm520_vm0, %v546_v50, %v547_v51  ;;  %v5827_v60 = vunpack.c.l.bf16 %v229_v47  ;;  %v542_v0 = vrot.slane %v5816_v54, 1  ;;  %v5878_v50 = vld [vmem:[%s5728_s20 + $0x68] sm:$0x1] }
  0x20   : > { %4406 = vrot.lane.b32.xlu1 %v5807_v48, %s5680_s21  ;;  %v5830_v62 = vpack.i.bf16 %v530_v57, %v528_v52  ;;  %v550_v63 = vsel %vm520_vm0, %v547_v51, %v549_v53  ;;  %v544_v2 = vrot.slane %v9219_v55, 1  ;;  %v5841_v15 = vunpack.c.h.bf16 %v229_v47  ;;  %v241_v51 = vld [vmem:[%s5728_s20 + $0x84] sm:$0xff]  }
  0x21   : > { %v5839_v14 = vpack.i.bf16 %v550_v63, %v548_v58  ;;  %v9218_v16 = vunpack.c.l.bf16 %v5820_v56  ;;  %v556_v17 = vrot.slane %v5827_v60, 1  ;;  %v543_v19 = vsel %vm520_vm0, %v541_v59, %v542_v0 }
  0x22   : > { %9603 = vst [vmem:[#allocation16_spill] sm:$0xff] %v5830_v62  ;;  %4396 = vrot.lane.b32.xlu0 %v5830_v62, %s5680_s21  ;;  %v545_v20 = vsel %vm520_vm0, %v542_v0, %v544_v2  ;;  %v5850_v22 = vunpack.c.l.bf16 %v4249_v61  ;;  %v5852_v23 = vunpack.c.h.bf16 %v4249_v61  ;;  %v557_v28 = vrot.slane %v5841_v15, 1  ;;  %v5896_v2 = vld [vmem:[%s5728_s20 + $0x8c] sm:$0x1] }
  0x23   : > { %9604 = vst [vmem:[#allocation17_spill] sm:$0xff] %v5839_v14  ;;  %v5859_v25 = vpack.i.bf16 %v545_v20, %v543_v19  ;;  %v559_v30 = vrot.slane %v9218_v16, 1  ;;  %v9216_v31 = vunpack.c.l.bf16 %v5837_v8  ;;  %v5867_v35 = vunpack.c.l.bf16 %v235_v18  ;;  %v4252_v16 = vld [vmem:[%s5728_s20 + $0x90] sm:$0xff]   ;;  %v6007_v62 = vld [vmem:[%s5728_s20 + $0xec] sm:$0x1] }
  0x24   : > { %4416 = vrot.lane.b32.xlu1 %v5839_v14, %s5680_s21  ;;  %v551_v33 = vrot.slane %v5850_v22, 1  ;;  %v552_v34 = vrot.slane %v5852_v23, 1  ;;  %v5869_v36 = vunpack.c.h.bf16 %v235_v18  ;;  %v558_v43 = vsel %vm520_vm0, %v556_v17, %v557_v28  ;;  %9619 = vst [vmem:[#allocation32_spill] sm:$0xff] %v6007_v62 }
  0x25   : > { %9605 = vst [vmem:[#allocation18_spill] sm:$0xff] %v5859_v25  ;;  %v560_v44 = vsel %vm520_vm0, %v557_v28, %v559_v30  ;;  %v554_v47 = vrot.slane %v9216_v31, 1  ;;  %v9215_v49 = vunpack.c.l.bf16 %v5855_v24  ;;  %v566_v57 = vrot.slane %v5867_v35, 1  ;;  %v4251_v28 = vld [vmem:[%s5728_s20 + $0x78] sm:$0xff]   ;;  %v5931_v31 = vld [vmem:[%s5728_s20 + $0xa4] sm:$0x1] }
  0x26   : > { %4411 = vrot.lane.b32.xlu0 %v5859_v25, %s5680_s21  ;;  %v5883_v52 = vpack.i.bf16 %v560_v44, %v558_v43  ;;  %v553_v53 = vsel %vm520_vm0, %v551_v33, %v552_v34  ;;  %v567_v58 = vrot.slane %v5869_v36, 1  ;;  %v5891_v63 = vunpack.c.l.bf16 %v4250_v39  ;;  %v5913_v43 = vld [vmem:[%s5728_s20 + $0x80] sm:$0x1] }
  0x27   : > { %v555_v59 = vsel %vm520_vm0, %v552_v34, %v554_v47  ;;  %v569_v61 = vrot.slane %v9215_v49, 1  ;;  %v5893_v0 = vunpack.c.h.bf16 %v4250_v39  ;;  %v9217_v19 = vunpack.c.l.bf16 %v5878_v50  ;;  %v247_v44 = vld [vmem:[%s5728_s20 + $0x9c] sm:$0xff]  }
  0x28   : > { %9606 = vst [vmem:[#allocation19_spill] sm:$0xff] %v5883_v52  ;;  %4426 = vrot.lane.b32.xlu1 %v5883_v52, %s5680_s21  ;;  %v5900_v17 = vpack.i.bf16 %v555_v59, %v553_v53  ;;  %v568_v18 = vsel %vm520_vm0, %v566_v57, %v567_v58  ;;  %v5904_v20 = vunpack.c.l.bf16 %v241_v51  ;;  %v561_v33 = vrot.slane %v5891_v63, 1  ;;  %v5972_v52 = vld [vmem:[%s5728_s20 + $0xbc] sm:$0x1] }
  0x29   : > { %v570_v30 = vsel %vm520_vm0, %v567_v58, %v569_v61  ;;  %v562_v34 = vrot.slane %v5893_v0, 1  ;;  %v5910_v39 = vunpack.c.h.bf16 %v241_v51  ;;  %v564_v53 = vrot.slane %v9217_v19, 1  ;;  %9611 = vst [vmem:[#allocation24_spill] sm:$0xff] %v5972_v52 }
  0x2a   : > { %9607 = vst [vmem:[#allocation20_spill] sm:$0xff] %v5900_v17  ;;  %4421 = vrot.lane.b32.xlu0 %v5900_v17, %s5680_s21  ;;  %v5918_v47 = vpack.i.bf16 %v570_v30, %v568_v18  ;;  %v9223_v57 = vunpack.c.l.bf16 %v5896_v2  ;;  %v576_v58 = vrot.slane %v5904_v20, 1  ;;  %v5926_v61 = vunpack.c.l.bf16 %v4251_v28  ;;  %v5989_v17 = vld [vmem:[%s5728_s20 + $0xb0] sm:$0x1] }
  0x2b   : > { %v563_v59 = vsel %vm520_vm0, %v561_v33, %v562_v34  ;;  %v577_v51 = vrot.slane %v5910_v39, 1  ;;  %v5928_v49 = vunpack.c.h.bf16 %v4251_v28  ;;  %v565_v18 = vsel %vm520_vm0, %v562_v34, %v564_v53  ;;  %9615 = vst [vmem:[#allocation28_spill] sm:$0xff] %v5989_v17 }
  0x2c   : > { %9608 = vst [vmem:[#allocation21_spill] sm:$0xff] %v5918_v47  ;;  %4436 = vrot.lane.b32.xlu1 %v5918_v47, %s5680_s21  ;;  %v579_v30 = vrot.slane %v9223_v57, 1  ;;  %v9225_v33 = vunpack.c.l.bf16 %v5913_v43  ;;  %v5939_v19 = vunpack.c.l.bf16 %v247_v44  ;;  %v5942_v55 = vpack.i.bf16 %v565_v18, %v563_v59  ;;  %v253_v59 = vld [vmem:[%s5728_s20 + $0xb4] sm:$0xff]  }
  0x2d   : > { %v578_v28 = vsel %vm520_vm0, %v576_v58, %v577_v51  ;;  %v571_v45 = vrot.slane %v5926_v61, 1  ;;  %v572_v5 = vrot.slane %v5928_v49, 1  ;;  %v5950_v53 = vunpack.c.h.bf16 %v247_v44 }
  0x2e   : > { %9609 = vst [vmem:[#allocation22_spill] sm:$0xff] %v5942_v55  ;;  %v580_v21 = vsel %vm520_vm0, %v577_v51, %v579_v30  ;;  %v574_v34 = vrot.slane %v9225_v33, 1  ;;  %v9233_v57 = vunpack.c.l.bf16 %v5931_v31  ;;  %4431 = vrot.lane.b32.xlu0 %v5942_v55, %s5680_s21  ;;  %v586_v51 = vrot.slane %v5939_v19, 1 }
  0x2f   : > { %v5959_v58 = vpack.i.bf16 %v580_v21, %v578_v28  ;;  %v573_v18 = vsel %vm520_vm0, %v571_v45, %v572_v5  ;;  %v5963_v30 = vunpack.c.l.bf16 %v4252_v16  ;;  %v587_v33 = vrot.slane %v5950_v53, 1 }
  0x30   : > { %v575_v44 = vsel %vm520_vm0, %v572_v5, %v574_v34  ;;  %v589_v38 = vrot.slane %v9233_v57, 1  ;;  %v5969_v47 = vunpack.c.h.bf16 %v4252_v16  ;;  %v9245_v45 = vunpack.c.l.bf16 %v5954_v11  ;;  %v4253_v34 = vld [vmem:[%s5728_s20 + $0xa8] sm:$0xff]  }
  0x31   : > { %9610 = vst [vmem:[#allocation23_spill] sm:$0xff] %v5959_v58  ;;  %4446 = vrot.lane.b32.xlu1 %v5959_v58, %s5680_s21  ;;  %v5976_v21 = vpack.i.bf16 %v575_v44, %v573_v18  ;;  %v581_v28 = vrot.slane %v5963_v30, 1  ;;  %v5980_v5 = vunpack.c.l.bf16 %v253_v59  ;;  %v588_v55 = vsel %vm520_vm0, %v586_v51, %v587_v33  ;;  %v265_v18 = vld [vmem:[%s5728_s20 + $0xe4] sm:$0xff]  }
  0x32   : > { %v590_v16 = vsel %vm520_vm0, %v587_v33, %v589_v38  ;;  %v582_v57 = vrot.slane %v5969_v47, 1  ;;  %v5986_v14 = vunpack.c.h.bf16 %v253_v59  ;;  %v584_v58 = vrot.slane %v9245_v45, 1 }
  0x33   : > { %9612 = vst [vmem:[#allocation25_spill] sm:$0xff] %v5976_v21  ;;  %9613 = vst [vmem:[#allocation26_spill] sm:$0xff] %v5980_v5  ;;  %4441 = vrot.lane.b32.xlu0 %v5976_v21, %s5680_s21  ;;  %v5994_v44 = vpack.i.bf16 %v590_v16, %v588_v55  ;;  %v9256_v51 = vunpack.c.l.bf16 %v5972_v52  ;;  %v596_v38 = vrot.slane %v5980_v5, 1  ;;  %v6002_v48 = vunpack.c.l.bf16 %v4253_v34  ;;  %v4255_v21 = vld [vmem:[%s5728_s20 + $0xd8] sm:$0xff]   ;;  %v6030_v52 = vld [vmem:[%s5728_s20 + $0xe0] sm:$0x1] }
  0x34   : > { %9614 = vst [vmem:[#allocation27_spill] sm:$0xff] %v5986_v14  ;;  %v583_v33 = vsel %vm520_vm0, %v581_v28, %v582_v57  ;;  %v597_v59 = vrot.slane %v5986_v14, 1  ;;  %v6004_v25 = vunpack.c.h.bf16 %v4253_v34  ;;  %v585_v55 = vsel %vm520_vm0, %v582_v57, %v584_v58  ;;  %9623 = vst [vmem:[#allocation36_spill] sm:$0xff] %v6030_v52 }
  0x35   : > { %9616 = vst [vmem:[#allocation29_spill] sm:$0xff] %v5994_v44  ;;  %9617 = vst [vmem:[#allocation30_spill] sm:$0xff] %v6002_v48  ;;  %4456 = vrot.lane.b32.xlu1 %v5994_v44, %s5680_s21  ;;  %v599_v16 = vrot.slane %v9256_v51, 1  ;;  %v9258_v28 = vunpack.c.l.bf16 %v5989_v17  ;;  %v6015_v45 = vunpack.c.l.bf16 %v265_v18  ;;  %v6018_v29 = vpack.i.bf16 %v585_v55, %v583_v33  ;;  %v271_v33 = vld [vmem:[%s5728_s20 + $0xfc] sm:$0xff]  }
  0x36   : > { %9618 = vst [vmem:[#allocation31_spill] sm:$0xff] %v6004_v25  ;;  %v598_v34 = vsel %vm520_vm0, %v596_v38, %v597_v59  ;;  %v591_v14 = vrot.slane %v6002_v48, 1  ;;  %v592_v5 = vrot.slane %v6004_v25, 1  ;;  %v6026_v58 = vunpack.c.h.bf16 %v265_v18  ;;  %v6048_v48 = vld [vmem:[%s5728_s20 + $0x104] sm:$0x1] }
  0x37   : > { %9620 = vst [vmem:[#allocation33_spill] sm:$0xff] %v6015_v45  ;;  %9621 = vst [vmem:[#allocation34_spill] sm:$0xff] %v6018_v29  ;;  %v600_v44 = vsel %vm520_vm0, %v597_v59, %v599_v16  ;;  %v594_v57 = vrot.slane %v9258_v28, 1  ;;  %v9266_v51 = vunpack.c.l.bf16 %v6007_v62  ;;  %4451 = vrot.lane.b32.xlu0 %v6018_v29, %s5680_s21  ;;  %v606_v59 = vrot.slane %v6015_v45, 1  ;;  %v6065_v62 = vld [vmem:[%s5728_s20 + $0xf8] sm:$0x1] }
  0x38   : > { %9622 = vst [vmem:[#allocation35_spill] sm:$0xff] %v6026_v58  ;;  %v6035_v38 = vpack.i.bf16 %v600_v44, %v598_v34  ;;  %v593_v55 = vsel %vm520_vm0, %v591_v14, %v592_v5  ;;  %v6039_v16 = vunpack.c.l.bf16 %v4255_v21  ;;  %v607_v28 = vrot.slane %v6026_v58, 1  ;;  %9627 = vst [vmem:[#allocation40_spill] sm:$0xff] %v6048_v48 }
  0x39   : > { %v595_v18 = vsel %vm520_vm0, %v592_v5, %v594_v57  ;;  %v609_v17 = vrot.slane %v9266_v51, 1  ;;  %v6045_v25 = vunpack.c.h.bf16 %v4255_v21  ;;  %v9274_v44 = vunpack.c.l.bf16 %v6030_v52  ;;  %v4256_v57 = vld [vmem:[%s5728_s20 + $0xf0] sm:$0xff]   ;;  %9631 = vst [vmem:[#allocation44_spill] sm:$0xff] %v6065_v62 }
  0x3a   : > { %9624 = vst [vmem:[#allocation37_spill] sm:$0xff] %v6035_v38  ;;  %9625 = vst [vmem:[#allocation38_spill] sm:$0xff] %v6039_v16  ;;  %4466 = vrot.lane.b32.xlu1 %v6035_v38, %s5680_s21  ;;  %v6052_v14 = vpack.i.bf16 %v595_v18, %v593_v55  ;;  %v601_v34 = vrot.slane %v6039_v16, 1  ;;  %v6056_v5 = vunpack.c.l.bf16 %v271_v33  ;;  %v608_v29 = vsel %vm520_vm0, %v606_v59, %v607_v28  ;;  %v277_v38 = vld [vmem:[%s5728_s20 + $0x114] sm:$0xff]  }
  0x3b   : > { %9626 = vst [vmem:[#allocation39_spill] sm:$0xff] %v6045_v25  ;;  %v610_v21 = vsel %vm520_vm0, %v607_v28, %v609_v17  ;;  %v602_v51 = vrot.slane %v6045_v25, 1  ;;  %v6062_v45 = vunpack.c.h.bf16 %v271_v33  ;;  %v604_v18 = vrot.slane %v9274_v44, 1 }
  0x3c   : > { %9628 = vst [vmem:[#allocation41_spill] sm:$0xff] %v6052_v14  ;;  %9629 = vst [vmem:[#allocation42_spill] sm:$0xff] %v6056_v5  ;;  %4461 = vrot.lane.b32.xlu0 %v6052_v14, %s5680_s21  ;;  %v6069_v55 = vpack.i.bf16 %v610_v21, %v608_v29  ;;  %v9286_v59 = vunpack.c.l.bf16 %v6048_v48  ;;  %v616_v28 = vrot.slane %v6056_v5, 1  ;;  %v6078_v25 = vunpack.c.l.bf16 %v4256_v57  ;;  %v4257_v5 = vld [vmem:[%s5728_s20 + $0x108] sm:$0xff]  }
  0x3d   : > { %9630 = vst [vmem:[#allocation43_spill] sm:$0xff] %v6062_v45  ;;  %v603_v17 = vsel %vm520_vm0, %v601_v34, %v602_v51  ;;  %v617_v33 = vrot.slane %v6062_v45, 1  ;;  %v605_v29 = vsel %vm520_vm0, %v602_v51, %v604_v18  ;;  %v6085_v44 = vunpack.c.h.bf16 %v4256_v57  ;;  %v6089_v34 = vld [vmem:[%s5728_s20 + $0x11c] sm:$0x1]  ;;  %v6137_v48 = vld [vmem:[%s5728_s20 + $0x128] sm:$0x1] }
  0x3e   : > { %9632 = vst [vmem:[#allocation45_spill] sm:$0xff] %v6069_v55  ;;  %9633 = vst [vmem:[#allocation46_spill] sm:$0xff] %v6078_v25  ;;  %4476 = vrot.lane.b32.xlu1 %v6069_v55, %s5680_s21  ;;  %v619_v21 = vrot.slane %v9286_v59, 1  ;;  %v9290_v14 = vunpack.c.l.bf16 %v6065_v62  ;;  %v4470_v45 = vpack.i.bf16 %v605_v29, %v603_v17  ;;  %v611_v16 = vrot.slane %v6078_v25, 1  ;;  %v6103_v55 = vld [vmem:[%s5728_s20 + $0x110] sm:$0x1] }
  0x3f   : > { %9634 = vst [vmem:[#allocation47_spill] sm:$0xff] %v6085_v44  ;;  %9635 = vst [vmem:[#allocation48_spill] sm:$0xff] %v6089_v34  ;;  %v618_v52 = vsel %vm520_vm0, %v616_v28, %v617_v33  ;;  %v6094_v58 = vunpack.c.l.bf16 %v277_v38  ;;  %v612_v57 = vrot.slane %v6085_v44, 1  ;;  %v6100_v59 = vunpack.c.h.bf16 %v277_v38  ;;  %v6119_v44 = vld [vmem:[%s5728_s20 + $0x134] sm:$0x1] }
  0x40   : > { %v620_v51 = vsel %vm520_vm0, %v617_v33, %v619_v21  ;;  %v614_v18 = vrot.slane %v9290_v14, 1  ;;  %9638 = vst [vmem:[#allocation51_spill] sm:$0xff] %v6103_v55  ;;  %4471 = vrot.lane.b32.xlu0 %v4470_v45, %s5680_s21  ;;  %v9299_v28 = vunpack.c.l.bf16 %v6089_v34  ;;  %v6110_v25 = vunpack.c.l.bf16 %v4257_v5  ;;  %v283_v33 = vld [vmem:[%s5728_s20 + $0x12c] sm:$0xff]   ;;  %9642 = vst [vmem:[#allocation55_spill] sm:$0xff] %v6119_v44 }
  0x41   : > { %9636 = vst [vmem:[#allocation49_spill] sm:$0xff] %v6094_v58  ;;  %9637 = vst [vmem:[#allocation50_spill] sm:$0xff] %v6100_v59  ;;  %v6106_v17 = vpack.i.bf16 %v620_v51, %v618_v52  ;;  %v626_v29 = vrot.slane %v6094_v58, 1  ;;  %v613_v21 = vsel %vm520_vm0, %v611_v16, %v612_v57  ;;  %v627_v38 = vrot.slane %v6100_v59, 1  ;;  %v4258_v52 = vld [vmem:[%s5728_s20 + $0x120] sm:$0xff]  }
  0x42   : > { %9640 = vst [vmem:[#allocation53_spill] sm:$0xff] %v6110_v25  ;;  %v615_v14 = vsel %vm520_vm0, %v612_v57, %v614_v18  ;;  %v6116_v62 = vunpack.c.h.bf16 %v4257_v5  ;;  %v629_v51 = vrot.slane %v9299_v28, 1  ;;  %v9309_v16 = vunpack.c.l.bf16 %v6103_v55  ;;  %9646 = vst [vmem:[#allocation59_spill] sm:$0xff] %v6137_v48  ;;  %v6160_v55 = vld [vmem:[%s5728_s20 + $0x14c] sm:$0x1] }
  0x43   : > { %9639 = vst [vmem:[#allocation52_spill] sm:$0xff] %v6106_v17  ;;  %4486 = vrot.lane.b32.xlu1 %v6106_v17, %s5680_s21  ;;  %v6124_v45 = vpack.i.bf16 %v615_v14, %v613_v21  ;;  %v621_v57 = vrot.slane %v6110_v25, 1  ;;  %v628_v18 = vsel %vm520_vm0, %v626_v29, %v627_v38  ;;  %v6132_v59 = vunpack.c.l.bf16 %v283_v33  ;;  %v289_v17 = vld [vmem:[%s5728_s20 + $0x144] sm:$0xff]   ;;  %9650 = vst [vmem:[#allocation63_spill] sm:$0xff] %v6160_v55 }
  0x44   : > { %9641 = vst [vmem:[#allocation54_spill] sm:$0xff] %v6116_v62  ;;  %v622_v5 = vrot.slane %v6116_v62, 1  ;;  %v6134_v58 = vunpack.c.h.bf16 %v283_v33  ;;  %v630_v14 = vsel %vm520_vm0, %v627_v38, %v629_v51  ;;  %v624_v21 = vrot.slane %v9309_v16, 1 }
  0x45   : > { %9643 = vst [vmem:[#allocation56_spill] sm:$0xff] %v6124_v45  ;;  %9644 = vst [vmem:[#allocation57_spill] sm:$0xff] %v6132_v59  ;;  %4481 = vrot.lane.b32.xlu0 %v6124_v45, %s5680_s21  ;;  %v9311_v29 = vunpack.c.l.bf16 %v6119_v44  ;;  %v6145_v28 = vunpack.c.l.bf16 %v4258_v52  ;;  %v6148_v62 = vpack.i.bf16 %v630_v14, %v628_v18  ;;  %v636_v25 = vrot.slane %v6132_v59, 1  ;;  %v4259_v18 = vld [vmem:[%s5728_s20 + $0x138] sm:$0xff]  }
  0x46   : > { %9645 = vst [vmem:[#allocation58_spill] sm:$0xff] %v6134_v58  ;;  %v623_v33 = vsel %vm520_vm0, %v621_v57, %v622_v5  ;;  %v637_v34 = vrot.slane %v6134_v58, 1  ;;  %v625_v45 = vsel %vm520_vm0, %v622_v5, %v624_v21  ;;  %v6156_v51 = vunpack.c.h.bf16 %v4258_v52  ;;  %v6213_v59 = vld [vmem:[%s5728_s20 + $0x158] sm:$0x1] }
  0x47   : > { %9647 = vst [vmem:[#allocation60_spill] sm:$0xff] %v6145_v28  ;;  %9648 = vst [vmem:[#allocation61_spill] sm:$0xff] %v6148_v62  ;;  %v639_v38 = vrot.slane %v9311_v29, 1  ;;  %v9318_v16 = vunpack.c.l.bf16 %v6137_v48  ;;  %4496 = vrot.lane.b32.xlu1 %v6148_v62, %s5680_s21  ;;  %v6165_v57 = vpack.i.bf16 %v625_v45, %v623_v33  ;;  %v631_v5 = vrot.slane %v6145_v28, 1  ;;  %v6178_v62 = vld [vmem:[%s5728_s20 + $0x140] sm:$0x1] }
  0x48   : > { %9649 = vst [vmem:[#allocation62_spill] sm:$0xff] %v6156_v51  ;;  %v638_v14 = vsel %vm520_vm0, %v636_v25, %v637_v34  ;;  %v6169_v21 = vunpack.c.l.bf16 %v289_v17  ;;  %v632_v29 = vrot.slane %v6156_v51, 1  ;;  %v6175_v58 = vunpack.c.h.bf16 %v289_v17  ;;  %9654 = vst [vmem:[#allocation67_spill] sm:$0xff] %v6178_v62  ;;  %v6195_v28 = vld [vmem:[%s5728_s20 + $0x164] sm:$0x1] }
  0x49   : > { %9651 = vst [vmem:[#allocation64_spill] sm:$0xff] %v6165_v57  ;;  %v640_v52 = vsel %vm520_vm0, %v637_v34, %v639_v38  ;;  %v634_v44 = vrot.slane %v9318_v16, 1  ;;  %4491 = vrot.lane.b32.xlu0 %v6165_v57, %s5680_s21  ;;  %v9331_v45 = vunpack.c.l.bf16 %v6160_v55  ;;  %v6186_v34 = vunpack.c.l.bf16 %v4259_v18  ;;  %v295_v38 = vld [vmem:[%s5728_s20 + $0x15c] sm:$0xff]   ;;  %9658 = vst [vmem:[#allocation71_spill] sm:$0xff] %v6195_v28 }
  0x4a   : > { %9652 = vst [vmem:[#allocation65_spill] sm:$0xff] %v6169_v21  ;;  %9653 = vst [vmem:[#allocation66_spill] sm:$0xff] %v6175_v58  ;;  %v6182_v25 = vpack.i.bf16 %v640_v52, %v638_v14  ;;  %v646_v33 = vrot.slane %v6169_v21, 1  ;;  %v633_v48 = vsel %vm520_vm0, %v631_v5, %v632_v29  ;;  %v647_v16 = vrot.slane %v6175_v58, 1  ;;  %v4260_v14 = vld [vmem:[%s5728_s20 + $0x150] sm:$0xff]  }
  0x4b   : > { %9656 = vst [vmem:[#allocation69_spill] sm:$0xff] %v6186_v34  ;;  %v635_v17 = vsel %vm520_vm0, %v632_v29, %v634_v44  ;;  %v6192_v51 = vunpack.c.h.bf16 %v4259_v18  ;;  %v649_v57 = vrot.slane %v9331_v45, 1  ;;  %v9341_v5 = vunpack.c.l.bf16 %v6178_v62  ;;  %9662 = vst [vmem:[#allocation75_spill] sm:$0xff] %v6213_v59  ;;  %v6236_v62 = vld [vmem:[%s5728_s20 + $0x17c] sm:$0x1] }
  0x4c   : > { %9655 = vst [vmem:[#allocation68_spill] sm:$0xff] %v6182_v25  ;;  %4506 = vrot.lane.b32.xlu1 %v6182_v25, %s5680_s21  ;;  %v6200_v52 = vpack.i.bf16 %v635_v17, %v633_v48  ;;  %v641_v44 = vrot.slane %v6186_v34, 1  ;;  %v648_v29 = vsel %vm520_vm0, %v646_v33, %v647_v16  ;;  %v6208_v58 = vunpack.c.l.bf16 %v295_v38  ;;  %v301_v25 = vld [vmem:[%s5728_s20 + $0x174] sm:$0xff]   ;;  %9666 = vst [vmem:[#allocation79_spill] sm:$0xff] %v6236_v62 }
  0x4d   : > { %9657 = vst [vmem:[#allocation70_spill] sm:$0xff] %v6192_v51  ;;  %v642_v18 = vrot.slane %v6192_v51, 1  ;;  %v6210_v21 = vunpack.c.h.bf16 %v295_v38  ;;  %v650_v48 = vsel %vm520_vm0, %v647_v16, %v649_v57  ;;  %v644_v17 = vrot.slane %v9341_v5, 1 }
  0x4e   : > { %9659 = vst [vmem:[#allocation72_spill] sm:$0xff] %v6200_v52  ;;  %9660 = vst [vmem:[#allocation73_spill] sm:$0xff] %v6208_v58  ;;  %4501 = vrot.lane.b32.xlu0 %v6200_v52, %s5680_s21  ;;  %v9343_v33 = vunpack.c.l.bf16 %v6195_v28  ;;  %v6221_v45 = vunpack.c.l.bf16 %v4260_v14  ;;  %v6224_v51 = vpack.i.bf16 %v650_v48, %v648_v29  ;;  %v656_v34 = vrot.slane %v6208_v58, 1  ;;  %v4261_v29 = vld [vmem:[%s5728_s20 + $0x168] sm:$0xff]  }
  0x4f   : > { %9661 = vst [vmem:[#allocation74_spill] sm:$0xff] %v6210_v21  ;;  %v643_v38 = vsel %vm520_vm0, %v641_v44, %v642_v18  ;;  %v657_v55 = vrot.slane %v6210_v21, 1  ;;  %v645_v52 = vsel %vm520_vm0, %v642_v18, %v644_v17  ;;  %v6232_v57 = vunpack.c.h.bf16 %v4260_v14  ;;  %v6289_v58 = vld [vmem:[%s5728_s20 + $0x188] sm:$0x1] }
  0x50   : > { %9663 = vst [vmem:[#allocation76_spill] sm:$0xff] %v6221_v45  ;;  %9664 = vst [vmem:[#allocation77_spill] sm:$0xff] %v6224_v51  ;;  %v659_v16 = vrot.slane %v9343_v33, 1  ;;  %v9349_v5 = vunpack.c.l.bf16 %v6213_v59  ;;  %4516 = vrot.lane.b32.xlu1 %v6224_v51, %s5680_s21  ;;  %v6241_v44 = vpack.i.bf16 %v645_v52, %v643_v38  ;;  %v651_v18 = vrot.slane %v6221_v45, 1  ;;  %v6254_v51 = vld [vmem:[%s5728_s20 + $0x170] sm:$0x1] }
  0x51   : > { %9665 = vst [vmem:[#allocation78_spill] sm:$0xff] %v6232_v57  ;;  %v658_v48 = vsel %vm520_vm0, %v656_v34, %v657_v55  ;;  %v6245_v17 = vunpack.c.l.bf16 %v301_v25  ;;  %v652_v33 = vrot.slane %v6232_v57, 1  ;;  %v6251_v21 = vunpack.c.h.bf16 %v301_v25  ;;  %v6271_v45 = vld [vmem:[%s5728_s20 + $0x194] sm:$0x1]  ;;  %9676 = vst [vmem:[#allocation89_spill] sm:$0xff] %v6289_v58 }
  0x52   : > { %9667 = vst [vmem:[#allocation80_spill] sm:$0xff] %v6241_v44  ;;  %v660_v14 = vsel %vm520_vm0, %v657_v55, %v659_v16  ;;  %v654_v28 = vrot.slane %v9349_v5, 1  ;;  %4511 = vrot.lane.b32.xlu0 %v6241_v44, %s5680_s21  ;;  %v9363_v52 = vunpack.c.l.bf16 %v6236_v62  ;;  %v6262_v38 = vunpack.c.l.bf16 %v4261_v29  ;;  %v307_v16 = vld [vmem:[%s5728_s20 + $0x18c] sm:$0xff]  }
  0x53   : > { %9668 = vst [vmem:[#allocation81_spill] sm:$0xff] %v6245_v17  ;;  %9669 = vst [vmem:[#allocation82_spill] sm:$0xff] %v6251_v21  ;;  %v6258_v34 = vpack.i.bf16 %v660_v14, %v658_v48  ;;  %v666_v55 = vrot.slane %v6245_v17, 1  ;;  %v653_v5 = vsel %vm520_vm0, %v651_v18, %v652_v33  ;;  %v667_v59 = vrot.slane %v6251_v21, 1  ;;  %v4262_v48 = vld [vmem:[%s5728_s20 + $0x180] sm:$0xff]  }
  0x54   : > { %9671 = vst [vmem:[#allocation84_spill] sm:$0xff] %v6262_v38  ;;  %v655_v25 = vsel %vm520_vm0, %v652_v33, %v654_v28  ;;  %v6268_v57 = vunpack.c.h.bf16 %v4261_v29  ;;  %v669_v44 = vrot.slane %v9363_v52, 1  ;;  %v9371_v17 = vunpack.c.l.bf16 %v6254_v51 }
  0x55   : > { %9670 = vst [vmem:[#allocation83_spill] sm:$0xff] %v6258_v34  ;;  %4526 = vrot.lane.b32.xlu1 %v6258_v34, %s5680_s21  ;;  %v6276_v14 = vpack.i.bf16 %v655_v25, %v653_v5  ;;  %v661_v18 = vrot.slane %v6262_v38, 1  ;;  %v668_v28 = vsel %vm520_vm0, %v666_v55, %v667_v59  ;;  %v6284_v29 = vunpack.c.l.bf16 %v307_v16 }
  0x56   : > { %9672 = vst [vmem:[#allocation85_spill] sm:$0xff] %v6268_v57  ;;  %v662_v33 = vrot.slane %v6268_v57, 1  ;;  %v6286_v21 = vunpack.c.h.bf16 %v307_v16  ;;  %v670_v5 = vsel %vm520_vm0, %v667_v59, %v669_v44  ;;  %v664_v25 = vrot.slane %v9371_v17, 1 }
  0x57   : > { %9673 = vst [vmem:[#allocation86_spill] sm:$0xff] %v6276_v14  ;;  %9674 = vst [vmem:[#allocation87_spill] sm:$0xff] %v6284_v29  ;;  %4521 = vrot.lane.b32.xlu0 %v6276_v14, %s5680_s21  ;;  %v9374_v52 = vunpack.c.l.bf16 %v6271_v45  ;;  %v6297_v34 = vunpack.c.l.bf16 %v4262_v48  ;;  %v6299_v55 = vpack.i.bf16 %v670_v5, %v668_v28  ;;  %v676_v16 = vrot.slane %v6284_v29, 1 }
  0x58   : > { %9675 = vst [vmem:[#allocation88_spill] sm:$0xff] %v6286_v21  ;;  %v663_v57 = vsel %vm520_vm0, %v661_v18, %v662_v33  ;;  %v677_v38 = vrot.slane %v6286_v21, 1  ;;  %v665_v62 = vsel %vm520_vm0, %v662_v33, %v664_v25  ;;  %v6307_v44 = vunpack.c.h.bf16 %v4262_v48 }
  0x59   : > { %9677 = vst [vmem:[#allocation90_spill] sm:$0xff] %v6297_v34  ;;  %9678 = vst [vmem:[#allocation91_spill] sm:$0xff] %v6299_v55  ;;  %v679_v59 = vrot.slane %v9374_v52, 1  ;;  %v9379_v17 = vunpack.c.l.bf16 %v6289_v58  ;;  %4536 = vrot.lane.b32.xlu1 %v6299_v55, %s5680_s21  ;;  %v6312_v28 = vpack.i.bf16 %v665_v62, %v663_v57  ;;  %v671_v5 = vrot.slane %v6297_v34, 1 }
  0x5a   : > { %9679 = vst [vmem:[#allocation92_spill] sm:$0xff] %v6307_v44  ;;  %v678_v18 = vsel %vm520_vm0, %v676_v16, %v677_v38  ;;  %v879_v14 = vrot.slane %v5773_v27, 2  ;;  %v672_v25 = vrot.slane %v6307_v44, 1  ;;  %v880_v52 = vrot.slane %v5787_v37, 2 }
  0x5b   : > { %9680 = vst [vmem:[#allocation93_spill] sm:$0xff] %v6312_v28  ;;  %v680_v33 = vsel %vm520_vm0, %v677_v38, %v679_v59  ;;  %v674_v48 = vrot.slane %v9379_v17, 1  ;;  %4531 = vrot.lane.b32.xlu0 %v6312_v28, %s5680_s21  ;;  %v9682_v57 = vunpack.c.l.bf16 %v5771_v26  ;;  %v874_v55 = vrot.slane %v5740_v6, 2 }
  0x5c   : > { %v6324_v62 = vpack.i.bf16 %v680_v33, %v678_v18  ;;  %v875_v27 = vrot.slane %v5749_v10, 2  ;;  %v673_v38 = vsel %vm520_vm0, %v671_v5, %v672_v25  ;;  %v881_v17 = vsel %vm873_vm1, %v879_v14, %v880_v52 }
  0x5d   : > { %v882_v16 = vrot.slane %v9682_v57, 2  ;;  %v675_v59 = vsel %vm520_vm0, %v672_v25, %v674_v48  ;;  %v9683_v37 = vunpack.c.l.bf16 %v5743_v7  ;;  %v889_v57 = vrot.slane %v5752_v12, 2 }
  0x5e   : > { %9681 = vst [vmem:[#allocation94_spill] sm:$0xff] %v6324_v62  ;;  %4546 = vrot.lane.b32.xlu1 %v6324_v62, %s5680_s21  ;;  %v6337_v18 = vpack.i.bf16 %v675_v59, %v673_v38  ;;  %v876_v33 = vsel %vm873_vm1, %v874_v55, %v875_v27  ;;  %v890_v14 = vrot.slane %v5754_v13, 2  ;;  %v884_v48 = vrot.slane %v5735_v3, 2 }
  0x5f   : > { %v877_v58 = vrot.slane %v9683_v37, 2  ;;  %v883_v26 = vsel %vm873_vm1, %v880_v52, %v882_v16  ;;  %v9686_v37 = vunpack.c.l.bf16 %v5747_v9  ;;  %v885_v52 = vrot.slane %v5737_v4, 2 }
  0x60   : > { %9684 = vst [vmem:[#allocation95_spill] sm:$0xff] %v6337_v18  ;;  %v6342_v6 = vpack.i.bf16 %v883_v26, %v881_v17  ;;  %4541 = vrot.lane.b32.xlu0 %v6337_v18, %s5680_s21  ;;  %v891_v55 = vsel %vm873_vm1, %v889_v57, %v890_v14  ;;  %v9687_v17 = vunpack.c.l.bf16 %v5732_v1  ;;  %v9688_v59 = vunpack.c.l.bf16 %v5781_v32 }
  0x61   : > { %v878_v5 = vsel %vm873_vm1, %v875_v27, %v877_v58  ;;  %v892_v25 = vrot.slane %v9686_v37, 2  ;;  %v899_v27 = vrot.slane %v5793_v40, 2  ;;  %v900_v58 = vrot.slane %v5795_v41, 2 }
  0x62   : > { %9685 = vst [vmem:[#allocation96_spill] sm:$0xff] %v6342_v6  ;;  %v4550_v7 = vpack.i.bf16 %v878_v5, %v876_v33  ;;  %v887_v16 = vrot.slane %v9687_v17, 2  ;;  %4556 = vrot.lane.b32.xlu1 %v6342_v6, %s5681_s22  ;;  %v886_v38 = vsel %vm873_vm1, %v884_v48, %v885_v52  ;;  %v902_v26 = vrot.slane %v9688_v59, 2 }
  0x63   : > { %v893_v9 = vsel %vm873_vm1, %v890_v14, %v892_v25  ;;  %v894_v33 = vrot.slane %v5804_v46, 2  ;;  %v901_v5 = vsel %vm873_vm1, %v899_v27, %v900_v58  ;;  %v895_v37 = vrot.slane %v5816_v54, 2 }
  0x64   : > { %v6364_v57 = vpack.i.bf16 %v893_v9, %v891_v55  ;;  %v888_v1 = vsel %vm873_vm1, %v885_v52, %v887_v16  ;;  %4551 = vrot.lane.b32.xlu0 %v4550_v7, %s5681_s22  ;;  %v903_v14 = vsel %vm873_vm1, %v900_v58, %v902_v26  ;;  %v9691_v25 = vunpack.c.l.bf16 %v5798_v42 }
  0x65   : > { %v6370_v17 = vpack.i.bf16 %v888_v1, %v886_v38  ;;  %v909_v48 = vrot.slane %v5827_v60, 2  ;;  %v6376_v59 = vpack.i.bf16 %v903_v14, %v901_v5  ;;  %v896_v55 = vsel %vm873_vm1, %v894_v33, %v895_v37 }
  0x66   : > { %9689 = vst [vmem:[#allocation97_spill] sm:$0xff] %v6364_v57  ;;  %v897_v32 = vrot.slane %v9691_v25, 2  ;;  %v910_v52 = vrot.slane %v5841_v15, 2  ;;  %v9693_v16 = vunpack.c.l.bf16 %v5820_v56  ;;  %4566 = vrot.lane.b32.xlu1 %v6364_v57, %s5681_s22  ;;  %v904_v58 = vrot.slane %v5850_v22, 2 }
  0x67   : > { %9690 = vst [vmem:[#allocation98_spill] sm:$0xff] %v6370_v17  ;;  %9692 = vst [vmem:[#allocation99_spill] sm:$0xff] %v6376_v59  ;;  %v905_v42 = vrot.slane %v5852_v23, 2  ;;  %v9694_v9 = vunpack.c.l.bf16 %v5837_v8  ;;  %v919_v1 = vrot.slane %v5867_v35, 2  ;;  %v9696_v8 = vunpack.c.l.bf16 %v5855_v24 }
  0x68   : > { %v912_v27 = vrot.slane %v9693_v16, 2  ;;  %v898_v7 = vsel %vm873_vm1, %v895_v37, %v897_v32  ;;  %v911_v26 = vsel %vm873_vm1, %v909_v48, %v910_v52  ;;  %4561 = vrot.lane.b32.xlu0 %v6370_v17, %s5681_s22  ;;  %v920_v37 = vrot.slane %v5869_v36, 2 }
  0x69   : > { %v907_v38 = vrot.slane %v9694_v9, 2  ;;  %v6394_v56 = vpack.i.bf16 %v898_v7, %v896_v55  ;;  %v906_v5 = vsel %vm873_vm1, %v904_v58, %v905_v42  ;;  %v922_v25 = vrot.slane %v9696_v8, 2 }
  0x6a   : > { %v913_v33 = vsel %vm873_vm1, %v910_v52, %v912_v27  ;;  %v914_v32 = vrot.slane %v5891_v63, 2  ;;  %v915_v48 = vrot.slane %v5893_v0, 2  ;;  %4576 = vrot.lane.b32.xlu1 %v6376_v59, %s5681_s22  ;;  %v921_v55 = vsel %vm873_vm1, %v919_v1, %v920_v37 }
  0x6b   : > { %9695 = vst [vmem:[#allocation100_spill] sm:$0xff] %v6394_v56  ;;  %v908_v14 = vsel %vm873_vm1, %v905_v42, %v907_v38  ;;  %v6405_v52 = vpack.i.bf16 %v913_v33, %v911_v26  ;;  %v9698_v16 = vunpack.c.l.bf16 %v5878_v50  ;;  %v923_v7 = vsel %vm873_vm1, %v920_v37, %v922_v25 }
  0x6c   : > { %v929_v58 = vrot.slane %v5904_v20, 2  ;;  %v930_v24 = vrot.slane %v5910_v39, 2  ;;  %v9699_v42 = vunpack.c.l.bf16 %v5896_v2  ;;  %4571 = vrot.lane.b32.xlu0 %v6394_v56, %s5681_s22  ;;  %v6417_v38 = vpack.i.bf16 %v908_v14, %v906_v5 }
  0x6d   : > { %9697 = vst [vmem:[#allocation101_spill] sm:$0xff] %v6405_v52  ;;  %v917_v27 = vrot.slane %v9698_v16, 2  ;;  %v924_v26 = vrot.slane %v5926_v61, 2  ;;  %v925_v33 = vrot.slane %v5928_v49, 2  ;;  %v916_v50 = vsel %vm873_vm1, %v914_v32, %v915_v48 }
  0x6e   : > { %v932_v9 = vrot.slane %v9699_v42, 2  ;;  %9700 = vst [vmem:[#allocation102_spill] sm:$0xff] %v6417_v38  ;;  %v9701_v37 = vunpack.c.l.bf16 %v5913_v43  ;;  %4586 = vrot.lane.b32.xlu1 %v6405_v52, %s5681_s22  ;;  %v6427_v2 = vpack.i.bf16 %v923_v7, %v921_v55  ;;  %v939_v25 = vrot.slane %v5939_v19, 2 }
  0x6f   : > { %v918_v1 = vsel %vm873_vm1, %v915_v48, %v917_v27  ;;  %v940_v5 = vrot.slane %v5950_v53, 2  ;;  %v6432_v14 = vsel %vm873_vm1, %v929_v58, %v930_v24  ;;  %v9705_v32 = vunpack.c.l.bf16 %v5931_v31 }
  0x70   : > { %v927_v8 = vrot.slane %v9701_v37, 2  ;;  %9702 = vst [vmem:[#allocation103_spill] sm:$0xff] %v6427_v2  ;;  %9703 = vst [vmem:[#allocation104_spill] sm:$0xff] %v6432_v14  ;;  %v6435_v16 = vsel %vm873_vm1, %v930_v24, %v932_v9  ;;  %4581 = vrot.lane.b32.xlu0 %v6417_v38, %s5681_s22  ;;  %v6441_v43 = vpack.i.bf16 %v918_v1, %v916_v50  ;;  %v934_v7 = vrot.slane %v5963_v30, 2  ;;  %v9709_v50 = vld [vmem:[#allocation26_spill] sm:$0xff]  ;;  %v9710_v1 = vld [vmem:[#allocation27_spill] sm:$0xff] }
  0x71   : > { %9704 = vst [vmem:[#allocation105_spill] sm:$0xff] %v6435_v16  ;;  %v942_v48 = vrot.slane %v9705_v32, 2  ;;  %v926_v55 = vsel %vm873_vm1, %v924_v26, %v925_v33  ;;  %v935_v58 = vrot.slane %v5969_v47, 2  ;;  %v9707_v42 = vunpack.c.l.bf16 %v5954_v11 }
  0x72   : > { %9706 = vst [vmem:[#allocation106_spill] sm:$0xff] %v6441_v43  ;;  %v928_v27 = vsel %vm873_vm1, %v925_v33, %v927_v8  ;;  %4596 = vrot.lane.b32.xlu1 %v6427_v2, %s5681_s22  ;;  %v6453_v31 = vpack.i.bf16 %v6435_v16, %v6432_v14  ;;  %v941_v9 = vsel %vm873_vm1, %v939_v25, %v940_v5  ;;  %v949_v33 = vrot.slane %v9709_v50, 2  ;;  %v9711_v8 = vld [vmem:[#allocation24_spill] sm:$0xff]  ;;  %v9715_v16 = vld [vmem:[#allocation31_spill] sm:$0xff] }
  0x73   : > { %v937_v24 = vrot.slane %v9707_v42, 2  ;;  %v943_v26 = vsel %vm873_vm1, %v940_v5, %v942_v48  ;;  %v950_v37 = vrot.slane %v9710_v1, 2  ;;  %v9712_v32 = vunpack.c.l.bf16 %v9711_v8  ;;  %v9714_v42 = vld [vmem:[#allocation30_spill] sm:$0xff]  ;;  %v9716_v48 = vld [vmem:[#allocation28_spill] sm:$0xff] }
  0x74   : > { %9708 = vst [vmem:[#allocation107_spill] sm:$0xff] %v6453_v31  ;;  %4591 = vrot.lane.b32.xlu0 %v6441_v43, %s5681_s22  ;;  %v6463_v11 = vpack.i.bf16 %v928_v27, %v926_v55  ;;  %v944_v2 = vrot.slane %v9714_v42, 2  ;;  %v945_v52 = vrot.slane %v9715_v16, 2  ;;  %v936_v25 = vsel %vm873_vm1, %v934_v7, %v935_v58  ;;  %v9720_v55 = vld [vmem:[#allocation32_spill] sm:$0xff]  ;;  %v9722_v7 = vld [vmem:[#allocation33_spill] sm:$0xff] }
  0x75   : > { %v952_v10 = vrot.slane %v9712_v32, 2  ;;  %v938_v5 = vsel %vm873_vm1, %v935_v58, %v937_v24  ;;  %v9717_v59 = vunpack.c.l.bf16 %v9716_v48  ;;  %v6473_v8 = vpack.i.bf16 %v943_v26, %v941_v9  ;;  %v9719_v32 = vld [vmem:[#allocation35_spill] sm:$0xff]  ;;  %v9724_v9 = vld [vmem:[#allocation38_spill] sm:$0xff] }
  0x76   : > { %9713 = vst [vmem:[#allocation26_spill] sm:$0xff] %v6463_v11  ;;  %4606 = vrot.lane.b32.xlu1 %v6453_v31, %s5681_s22  ;;  %v960_v43 = vrot.slane %v9719_v32, 2  ;;  %v9721_v27 = vunpack.c.l.bf16 %v9720_v55  ;;  %v951_v56 = vsel %vm873_vm1, %v949_v33, %v950_v37  ;;  %v959_v17 = vrot.slane %v9722_v7, 2  ;;  %v9725_v48 = vld [vmem:[#allocation39_spill] sm:$0xff] }
  0x77   : > { %v947_v38 = vrot.slane %v9717_v59, 2  ;;  %9718 = vst [vmem:[#allocation27_spill] sm:$0xff] %v6473_v8  ;;  %v953_v6 = vsel %vm873_vm1, %v950_v37, %v952_v10  ;;  %v6483_v59 = vpack.i.bf16 %v938_v5, %v936_v25  ;;  %v946_v58 = vsel %vm873_vm1, %v944_v2, %v945_v52  ;;  %v9731_v2 = vld [vmem:[#allocation42_spill] sm:$0xff] }
  0x78   : > { %v962_v57 = vrot.slane %v9721_v27, 2  ;;  %4601 = vrot.lane.b32.xlu0 %v6463_v11, %s5681_s22  ;;  %v954_v26 = vrot.slane %v9724_v9, 2  ;;  %v955_v55 = vrot.slane %v9725_v48, 2  ;;  %v9726_v27 = vld [vmem:[#allocation36_spill] sm:$0xff]  ;;  %v6493_v10 = vpack.i.bf16 %v953_v6, %v951_v56  ;;  %v9736_v6 = vld [vmem:[#allocation46_spill] sm:$0xff] }
  0x79   : > { %9723 = vst [vmem:[#allocation24_spill] sm:$0xff] %v6483_v59  ;;  %v948_v24 = vsel %vm873_vm1, %v945_v52, %v947_v38  ;;  %v9727_v31 = vunpack.c.l.bf16 %v9726_v27  ;;  %v6499_v25 = vsel %vm873_vm1, %v959_v17, %v960_v43  ;;  %v969_v52 = vrot.slane %v9731_v2, 2  ;;  %v9732_v38 = vld [vmem:[#allocation43_spill] sm:$0xff]  ;;  %v9733_v9 = vld [vmem:[#allocation40_spill] sm:$0xff] }
  0x7a   : > { %4616 = vrot.lane.b32.xlu1 %v6473_v8, %s5681_s22  ;;  %9728 = vst [vmem:[#allocation30_spill] sm:$0xff] %v6493_v10  ;;  %v6496_v37 = vsel %vm873_vm1, %v960_v43, %v962_v57  ;;  %9730 = vst [vmem:[#allocation28_spill] sm:$0xff] %v6499_v25  ;;  %v970_v5 = vrot.slane %v9732_v38, 2  ;;  %v9734_v48 = vunpack.c.l.bf16 %v9733_v9  ;;  %v964_v56 = vrot.slane %v9736_v6, 2  ;;  %v9737_v27 = vld [vmem:[#allocation47_spill] sm:$0xff]  ;;  %v9738_v43 = vld [vmem:[#allocation44_spill] sm:$0xff] }
  0x7b   : > { %v957_v33 = vrot.slane %v9727_v31, 2  ;;  %9729 = vst [vmem:[#allocation31_spill] sm:$0xff] %v6496_v37  ;;  %v6507_v31 = vpack.i.bf16 %v948_v24, %v946_v58  ;;  %v965_v57 = vrot.slane %v9737_v27, 2  ;;  %v956_v8 = vsel %vm873_vm1, %v954_v26, %v955_v55  ;;  %v9741_v24 = vld [vmem:[#allocation50_spill] sm:$0xff] }
  0x7c   : > { %v972_v11 = vrot.slane %v9734_v48, 2  ;;  %4611 = vrot.lane.b32.xlu0 %v6483_v59, %s5681_s22  ;;  %v9739_v62 = vunpack.c.l.bf16 %v9738_v43  ;;  %v4635_v9 = vpack.i.bf16 %v6496_v37, %v6499_v25  ;;  %v9740_v48 = vld [vmem:[#allocation49_spill] sm:$0xff]  ;;  %v980_v59 = vrot.slane %v9741_v24, 2  ;;  %v9747_v25 = vld [vmem:[#allocation54_spill] sm:$0xff]  ;;  %v9750_v24 = vld [vmem:[#allocation51_spill] sm:$0xff] }
  0x7d   : > { %9735 = vst [vmem:[#allocation32_spill] sm:$0xff] %v6507_v31  ;;  %v958_v17 = vsel %vm873_vm1, %v955_v55, %v957_v33  ;;  %v979_v58 = vrot.slane %v9740_v48, 2  ;;  %v6522_v28 = vsel %vm873_vm1, %v969_v52, %v970_v5  ;;  %v9744_v55 = vld [vmem:[#allocation48_spill] sm:$0xff]  ;;  %v975_v37 = vrot.slane %v9747_v25, 2 }
  0x7e   : > { %v967_v18 = vrot.slane %v9739_v62, 2  ;;  %4626 = vrot.lane.b32.xlu1 %v6493_v10, %s5681_s22  ;;  %9742 = vst [vmem:[#allocation36_spill] sm:$0xff] %v6522_v28  ;;  %v6525_v26 = vsel %vm873_vm1, %v970_v5, %v972_v11  ;;  %v9745_v33 = vunpack.c.l.bf16 %v9744_v55  ;;  %v4630_v62 = vpack.i.bf16 %v958_v17, %v956_v8  ;;  %v9746_v10 = vld [vmem:[#allocation53_spill] sm:$0xff] }
  0x7f   : > { %9743 = vst [vmem:[#allocation40_spill] sm:$0xff] %v6525_v26  ;;  %v974_v14 = vrot.slane %v9746_v10, 2  ;;  %v6534_v48 = vsel %vm873_vm1, %v964_v56, %v965_v57  ;;  %v9751_v11 = vunpack.c.l.bf16 %v9750_v24  ;;  %v6544_v55 = vpack.i.bf16 %v6525_v26, %v6522_v28  ;;  %v9755_v56 = vld [vmem:[#allocation57_spill] sm:$0xff]  ;;  %v9763_v26 = vld [vmem:[#allocation62_spill] sm:$0xff] }
  0x80   : > { %v982_v43 = vrot.slane %v9745_v33, 2  ;;  %4621 = vrot.lane.b32.xlu0 %v6507_v31, %s5681_s22  ;;  %9748 = vst [vmem:[#allocation44_spill] sm:$0xff] %v6534_v48  ;;  %v6537_v52 = vsel %vm873_vm1, %v965_v57, %v967_v18  ;;  %v6547_v8 = vsel %vm873_vm1, %v979_v58, %v980_v59  ;;  %v989_v33 = vrot.slane %v9755_v56, 2  ;;  %v9756_v31 = vld [vmem:[#allocation58_spill] sm:$0xff]  ;;  %v9757_v57 = vld [vmem:[#allocation55_spill] sm:$0xff] }
  0x81   : > { %9749 = vst [vmem:[#allocation48_spill] sm:$0xff] %v6537_v52  ;;  %v977_v5 = vrot.slane %v9751_v11, 2  ;;  %9752 = vst [vmem:[#allocation51_spill] sm:$0xff] %v6544_v55  ;;  %v990_v18 = vrot.slane %v9756_v31, 2  ;;  %v9758_v38 = vunpack.c.l.bf16 %v9757_v57  ;;  %v6562_v11 = vsel %vm873_vm1, %v974_v14, %v975_v37  ;;  %v9764_v31 = vld [vmem:[#allocation59_spill] sm:$0xff] }
  0x82   : > { %4636 = vrot.lane.b32.xlu1 %v4635_v9, %s5681_s22  ;;  %9753 = vst [vmem:[#allocation108_spill] sm:$0xff] %v6547_v8  ;;  %v6550_v17 = vsel %vm873_vm1, %v980_v59, %v982_v43  ;;  %v6559_v9 = vpack.i.bf16 %v6537_v52, %v6534_v48  ;;  %9760 = vst [vmem:[#allocation110_spill] sm:$0xff] %v6562_v11  ;;  %v9762_v59 = vld [vmem:[#allocation60_spill] sm:$0xff]  ;;  %v985_v28 = vrot.slane %v9763_v26, 2  ;;  %v9765_v56 = vunpack.c.l.bf16 %v9764_v31  ;;  %v9768_v52 = vld [vmem:[#allocation66_spill] sm:$0xff] }
  0x83   : > { %9754 = vst [vmem:[#allocation109_spill] sm:$0xff] %v6550_v17  ;;  %v992_v24 = vrot.slane %v9758_v38, 2  ;;  %v6565_v58 = vsel %vm873_vm1, %v975_v37, %v977_v5  ;;  %v984_v43 = vrot.slane %v9762_v59, 2  ;;  %v6575_v38 = vpack.i.bf16 %v6550_v17, %v6547_v8  ;;  %v9771_v26 = vld [vmem:[#allocation63_spill] sm:$0xff]  ;;  %v9774_v8 = vld [vmem:[#allocation69_spill] sm:$0xff] }
  0x84   : > { %4631 = vrot.lane.b32.xlu0 %v4630_v62, %s5681_s22  ;;  %9759 = vst [vmem:[#allocation55_spill] sm:$0xff] %v6559_v9  ;;  %9761 = vst [vmem:[#allocation111_spill] sm:$0xff] %v6565_v58  ;;  %v987_v57 = vrot.slane %v9765_v56, 2  ;;  %v9767_v62 = vld [vmem:[#allocation65_spill] sm:$0xff]  ;;  %v1000_v48 = vrot.slane %v9768_v52, 2  ;;  %v6580_v37 = vsel %vm873_vm1, %v989_v33, %v990_v18  ;;  %v9772_v31 = vunpack.c.l.bf16 %v9771_v26 }
  0x85   : > { %9766 = vst [vmem:[#allocation59_spill] sm:$0xff] %v6575_v38  ;;  %v999_v14 = vrot.slane %v9767_v62, 2  ;;  %9769 = vst [vmem:[#allocation112_spill] sm:$0xff] %v6580_v37  ;;  %v6583_v5 = vsel %vm873_vm1, %v990_v18, %v992_v24  ;;  %v6591_v17 = vpack.i.bf16 %v6565_v58, %v6562_v11  ;;  %v9775_v62 = vld [vmem:[#allocation70_spill] sm:$0xff]  ;;  %v6596_v33 = vsel %vm873_vm1, %v984_v43, %v985_v28  ;;  %v9778_v24 = vld [vmem:[#allocation67_spill] sm:$0xff] }
  0x86   : > { %4646 = vrot.lane.b32.xlu1 %v6544_v55, %s5681_s22  ;;  %9770 = vst [vmem:[#allocation113_spill] sm:$0xff] %v6583_v5  ;;  %v1002_v56 = vrot.slane %v9772_v31, 2  ;;  %v994_v55 = vrot.slane %v9774_v8, 2  ;;  %v995_v52 = vrot.slane %v9775_v62, 2  ;;  %9776 = vst [vmem:[#allocation114_spill] sm:$0xff] %v6596_v33  ;;  %v6599_v18 = vsel %vm873_vm1, %v985_v28, %v987_v57  ;;  %v9783_v43 = vld [vmem:[#allocation73_spill] sm:$0xff] }
  0x87   : > { %9773 = vst [vmem:[#allocation63_spill] sm:$0xff] %v6591_v17  ;;  %9777 = vst [vmem:[#allocation115_spill] sm:$0xff] %v6599_v18  ;;  %v9779_v26 = vunpack.c.l.bf16 %v9778_v24  ;;  %v6607_v58 = vpack.i.bf16 %v6583_v5, %v6580_v37  ;;  %v1009_v62 = vrot.slane %v9783_v43, 2  ;;  %v9784_v28 = vld [vmem:[#allocation74_spill] sm:$0xff]  ;;  %v9785_v8 = vld [vmem:[#allocation71_spill] sm:$0xff]  ;;  %v6623_v5 = vpack.i.bf16 %v6599_v18, %v6596_v33 }
  0x88   : > { %4641 = vrot.lane.b32.xlu0 %v6559_v9, %s5681_s22  ;;  %v6610_v9 = vsel %vm873_vm1, %v999_v14, %v1000_v48  ;;  %v6613_v11 = vsel %vm873_vm1, %v1000_v48, %v1002_v56  ;;  %v1010_v57 = vrot.slane %v9784_v28, 2  ;;  %v9786_v24 = vunpack.c.l.bf16 %v9785_v8  ;;  %v9791_v37 = vld [vmem:[#allocation76_spill] sm:$0xff]  ;;  %v9792_v28 = vld [vmem:[#allocation78_spill] sm:$0xff] }
  0x89   : > { %v997_v31 = vrot.slane %v9779_v26, 2  ;;  %9780 = vst [vmem:[#allocation67_spill] sm:$0xff] %v6607_v58  ;;  %9781 = vst [vmem:[#allocation116_spill] sm:$0xff] %v6610_v9  ;;  %v6626_v14 = vsel %vm873_vm1, %v994_v55, %v995_v52  ;;  %v1005_v8 = vrot.slane %v9792_v28, 2  ;;  %v6641_v18 = vpack.i.bf16 %v6613_v11, %v6610_v9  ;;  %v9802_v9 = vld [vmem:[#allocation84_spill] sm:$0xff] }
  0x8a   : > { %4656 = vrot.lane.b32.xlu1 %v6575_v38, %s5681_s22  ;;  %9782 = vst [vmem:[#allocation117_spill] sm:$0xff] %v6613_v11  ;;  %v1012_v26 = vrot.slane %v9786_v24, 2  ;;  %9787 = vst [vmem:[#allocation71_spill] sm:$0xff] %v6623_v5  ;;  %v1004_v38 = vrot.slane %v9791_v37, 2  ;;  %v9793_v24 = vld [vmem:[#allocation75_spill] sm:$0xff]  ;;  %v1011_v33 = vsel %vm873_vm1, %v1009_v62, %v1010_v57 }
  0x8b   : > { %9788 = vst [vmem:[#allocation118_spill] sm:$0xff] %v6626_v14  ;;  %v6629_v48 = vsel %vm873_vm1, %v995_v52, %v997_v31  ;;  %v9794_v43 = vunpack.c.l.bf16 %v9793_v24  ;;  %9795 = vst [vmem:[#allocation75_spill] sm:$0xff] %v6641_v18  ;;  %v9797_v52 = vld [vmem:[#allocation81_spill] sm:$0xff]  ;;  %v9799_v37 = vld [vmem:[#allocation79_spill] sm:$0xff] }
  0x8c   : > { %4651 = vrot.lane.b32.xlu0 %v6591_v17, %s5681_s22  ;;  %9789 = vst [vmem:[#allocation119_spill] sm:$0xff] %v6629_v48  ;;  %v1019_v31 = vrot.slane %v9797_v52, 2  ;;  %v9798_v17 = vld [vmem:[#allocation82_spill] sm:$0xff]  ;;  %v1013_v28 = vsel %vm873_vm1, %v1010_v57, %v1012_v26  ;;  %v9800_v24 = vunpack.c.l.bf16 %v9799_v37  ;;  %v6655_v11 = vpack.i.bf16 %v6629_v48, %v6626_v14 }
  0x8d   : > { %v1007_v59 = vrot.slane %v9794_v43, 2  ;;  %v9807_v37 = vunpack.c.l.bf16 %v6254_v51  ;;  %v1030_v14 = vrot.slane %v6286_v21, 2 }
  0x8e   : > { %v6631_v56 = vpop.permute.xlu1 %4401  ;;  %4666 = vrot.lane.b32.xlu1 %v6607_v58, %s5681_s22  ;;  %v6643_v55 = vpop.permute.xlu0 %4391  ;;  %v1022_v43 = vrot.slane %v9800_v24, 2  ;;  %9801 = vst [vmem:[#allocation79_spill] sm:$0xff] %v6655_v11  ;;  %v1014_v58 = vrot.slane %v9802_v9, 2  ;;  %v6671_v24 = vpack.i.bf16 %v1013_v28, %v1011_v33 }
  0x8f   : > { %9790 = vst [vmem:[#allocation120_spill] sm:$0xff] %v6631_v56  ;;  %9796 = vst [vmem:[#allocation121_spill] sm:$0xff] %v6643_v55  ;;  %v1020_v56 = vrot.slane %v9798_v17, 2  ;;  %v9803_v55 = vld [vmem:[#allocation85_spill] sm:$0xff]  ;;  %v6660_v17 = vsel %vm873_vm1, %v1004_v38, %v1005_v8  ;;  %v6663_v62 = vsel %vm873_vm1, %v1005_v8, %v1007_v59  ;;  %v1017_v26 = vrot.slane %v9807_v37, 2 }
  0x90   : > { %4661 = vrot.lane.b32.xlu0 %v6623_v5, %s5681_s22  ;;  %v1015_v52 = vrot.slane %v9803_v55, 2  ;;  %9804 = vst [vmem:[#allocation122_spill] sm:$0xff] %v6660_v17  ;;  %9805 = vst [vmem:[#allocation123_spill] sm:$0xff] %v6663_v62  ;;  %v1029_v38 = vrot.slane %v6284_v29, 2  ;;  %v9809_v59 = vunpack.c.l.bf16 %v6271_v45  ;;  %v6683_v51 = vpack.i.bf16 %v6663_v62, %v6660_v17  ;;  %v9813_v37 = vld [vmem:[#allocation89_spill] sm:$0xff] }
  0x91   : > { %9808 = vst [vmem:[#allocation125_spill] sm:$0xff] %v6671_v24  ;;  %v1021_v48 = vsel %vm873_vm1, %v1019_v31, %v1020_v56  ;;  %v1023_v5 = vsel %vm873_vm1, %v1020_v56, %v1022_v43  ;;  %v1024_v43 = vrot.slane %v6297_v34, 2  ;;  %v1025_v45 = vrot.slane %v6307_v44, 2 }
  0x92   : > { %v6665_v57 = vpop.permute.xlu1 %4406  ;;  %4676 = vrot.lane.b32.xlu1 %v6641_v18, %s5681_s22  ;;  %v1032_v8 = vrot.slane %v9809_v59, 2  ;;  %9810 = vst [vmem:[#allocation126_spill] sm:$0xff] %v6683_v51  ;;  %v1016_v28 = vsel %vm873_vm1, %v1014_v58, %v1015_v52  ;;  %v1018_v56 = vsel %vm873_vm1, %v1015_v52, %v1017_v26  ;;  %v9814_v59 = vunpack.c.l.bf16 %v9813_v37 }
  0x93   : > { %9806 = vst [vmem:[#allocation124_spill] sm:$0xff] %v6665_v57  ;;  %v6697_v62 = vpack.i.bf16 %v1023_v5, %v1021_v48  ;;  %v6703_v52 = vpack.i.bf16 %v1018_v56, %v1016_v28  ;;  %v1026_v17 = vsel %vm873_vm1, %v1024_v43, %v1025_v45  ;;  %v9822_v28 = vld [vmem:[#allocation10_spill] sm:$0xff] }
  0x94   : > { %4671 = vrot.lane.b32.xlu0 %v6655_v11, %s5681_s22  ;;  %v6685_v33 = vpop.permute.xlu0 %4396  ;;  %v1027_v18 = vrot.slane %v9814_v59, 2  ;;  %v1031_v11 = vsel %vm873_vm1, %v1029_v38, %v1030_v14  ;;  %v1033_v58 = vsel %vm873_vm1, %v1030_v14, %v1032_v8  ;;  %v6746_v59 = vpack.i.bf16 %v5754_v13, %v5752_v12 }
  0x95   : > { %9811 = vst [vmem:[#allocation127_spill] sm:$0xff] %v6685_v33  ;;  %9815 = vst [vmem:[#allocation89_spill] sm:$0xff] %v6697_v62  ;;  %v6711_v5 = vpack.i.bf16 %v1033_v58, %v1031_v11  ;;  %v9821_v11 = vld [vmem:[#allocation8_spill] sm:$0xff] }
  0x96   : > { %v6689_v31 = vpop.permute.xlu1 %4416  ;;  %4686 = vrot.lane.b32.xlu1 %v6671_v24, %s5681_s22  ;;  %9816 = vst [vmem:[#allocation129_spill] sm:$0xff] %v6703_v52  ;;  %v1028_v37 = vsel %vm873_vm1, %v1025_v45, %v1027_v18  ;;  %v6725_v18 = vpack.i.bf16 %v5737_v4, %v5735_v3  ;;  %v4710_v56 = vpack.i.bf16 %v9822_v28, %v9821_v11  ;;  %9824 = vst [vmem:[#allocation135_spill] sm:$0xff] %v6746_v59  ;;  %v4254_v28 = vld [vmem:[%s5728_s20 + $0xc0] sm:$0xff]  }
  0x97   : > { %9812 = vst [vmem:[#allocation128_spill] sm:$0xff] %v6689_v31  ;;  %9818 = vst [vmem:[#allocation131_spill] sm:$0xff] %v6711_v5  ;;  %v6717_v14 = vpack.i.bf16 %v1028_v37, %v1026_v17  ;;  %v6739_v17 = vpack.i.bf16 %v5816_v54, %v5804_v46  ;;  %v6754_v37 = vpack.i.bf16 %v5852_v23, %v5850_v22  ;;  %v9858_v3 = vld [vmem:[#allocation70_spill] sm:$0xff] }
  0x98   : > { %4681 = vrot.lane.b32.xlu0 %v6683_v51, %s5681_s22  ;;  %v6705_v26 = vpop.permute.xlu0 %4411  ;;  %9820 = vst [vmem:[#allocation133_spill] sm:$0xff] %v6725_v18  ;;  %v6786_v46 = vpack.i.bf16 %v5928_v49, %v5926_v61  ;;  %v6792_v54 = vpack.i.bf16 %v5869_v36, %v5867_v35 }
  0x99   : > { %9817 = vst [vmem:[#allocation130_spill] sm:$0xff] %v6705_v26  ;;  %9819 = vst [vmem:[#allocation132_spill] sm:$0xff] %v6717_v14  ;;  %v6809_v26 = vpack.i.bf16 %v5910_v39, %v5904_v20 }
  0x9a   : > { %4696 = vrot.lane.b32.xlu1 %v6697_v62, %s5681_s22  ;;  %v6713_v48 = vpop.permute.xlu1 %4426  ;;  %9823 = vst [vmem:[#allocation134_spill] sm:$0xff] %v6739_v17  ;;  %9825 = vst [vmem:[#allocation136_spill] sm:$0xff] %v6754_v37  ;;  %v6770_v62 = vpack.i.bf16 %v5893_v0, %v5891_v63 }
  0x9b   : > { %9829 = vst [vmem:[#allocation140_spill] sm:$0xff] %v6786_v46  ;;  %9830 = vst [vmem:[#allocation141_spill] sm:$0xff] %v6792_v54 }
  0x9c   : > { %4691 = vrot.lane.b32.xlu0 %v6703_v52, %s5681_s22  ;;  %v6719_v38 = vpop.permute.xlu0 %4421  ;;  %9827 = vst [vmem:[#allocation138_spill] sm:$0xff] %v6770_v62  ;;  %v6776_v52 = vpack.i.bf16 %v5841_v15, %v5827_v60  ;;  %9834 = vst [vmem:[#allocation145_spill] sm:$0xff] %v6809_v26 }
  0x9e   : > { %4706 = vrot.lane.b32.xlu1 %v6711_v5, %s5681_s22  ;;  %v6727_v8 = vpop.permute.xlu1 %4436  ;;  %9828 = vst [vmem:[#allocation139_spill] sm:$0xff] %v6776_v52 }
  0xa0   : > { %4701 = vrot.lane.b32.xlu0 %v6717_v14, %s5681_s22  ;;  %v6733_v43 = vpop.permute.xlu0 %4431 }
  0xa2   : > { %4716 = vrot.lane.b32.xlu1 %v6725_v18, %s5682_s23 }
  0xa3   : > { %v6741_v45 = vpop.permute.xlu1 %4446 }
  0xa4   : > { %4711 = vrot.lane.b32.xlu0 %v4710_v56, %s5682_s23  ;;  %v6762_v56 = vpack.i.bf16 %v5795_v41, %v5793_v40  ;;  %v6800_v41 = vpack.i.bf16 %v5969_v47, %v5963_v30 }
  0xa5   : > { %v6748_v58 = vpop.permute.xlu0 %4441 }
  0xa6   : > { %4726 = vrot.lane.b32.xlu1 %v6739_v17, %s5682_s23  ;;  %9826 = vst [vmem:[#allocation137_spill] sm:$0xff] %v6762_v56  ;;  %9832 = vst [vmem:[#allocation143_spill] sm:$0xff] %v6800_v41  ;;  %v9865_v17 = vld [vmem:[#allocation76_spill] sm:$0xff] }
  0xa7   : > { %v6756_v5 = vpop.permute.xlu1 %4456 }
  0xa8   : > { %4721 = vrot.lane.b32.xlu0 %v6746_v59, %s5682_s23  ;;  %v9870_v59 = vld [vmem:[#allocation66_spill] sm:$0xff] }
  0xa9   : > { %v6766_v14 = vpop.permute.xlu0 %4451 }
  0xaa   : > { %4736 = vrot.lane.b32.xlu1 %v6754_v37, %s5682_s23  ;;  %v9862_v37 = vld [vmem:[#allocation58_spill] sm:$0xff] }
  0xac   : > { %4731 = vrot.lane.b32.xlu0 %v6762_v56, %s5682_s23  ;;  %v6778_v24 = vpop.permute.xlu1 %4466 }
  0xae   : > { %4746 = vrot.lane.b32.xlu1 %v6770_v62, %s5682_s23  ;;  %v6782_v51 = vpop.permute.xlu0 %4461 }
  0xb0   : > { %4741 = vrot.lane.b32.xlu0 %v6776_v52, %s5682_s23  ;;  %v6794_v40 = vpop.permute.xlu1 %4476  ;;  %v9861_v52 = vld [vmem:[#allocation57_spill] sm:$0xff] }
  0xb1   : > { %9831 = vst [vmem:[#allocation142_spill] sm:$0xff] %v6794_v40  ;;  %v6819_v40 = vunpack.c.l.bf16 %v4254_v28 }
  0xb2   : > { %4756 = vrot.lane.b32.xlu1 %v6786_v46, %s5682_s23  ;;  %v6802_v11 = vpop.permute.xlu0 %4471  ;;  %v6817_v46 = vpack.i.bf16 %v9715_v16, %v9714_v42 }
  0xb3   : > { %9833 = vst [vmem:[#allocation144_spill] sm:$0xff] %v6802_v11  ;;  %9837 = vst [vmem:[#allocation148_spill] sm:$0xff] %v6819_v40  ;;  %v6821_v11 = vunpack.c.h.bf16 %v4254_v28 }
  0xb4   : > { %4751 = vrot.lane.b32.xlu0 %v6792_v54, %s5682_s23  ;;  %9836 = vst [vmem:[#allocation147_spill] sm:$0xff] %v6817_v46  ;;  %v6829_v54 = vpack.i.bf16 %v5950_v53, %v5939_v19 }
  0xb5   : > { %v6811_v31 = vpop.permute.xlu1 %4486  ;;  %9838 = vst [vmem:[#allocation149_spill] sm:$0xff] %v6821_v11 }
  0xb6   : > { %9835 = vst [vmem:[#allocation146_spill] sm:$0xff] %v6811_v31  ;;  %4766 = vrot.lane.b32.xlu1 %v6800_v41, %s5682_s23  ;;  %9840 = vst [vmem:[#allocation151_spill] sm:$0xff] %v6829_v54  ;;  %v6837_v31 = vpack.i.bf16 %v6821_v11, %v6819_v40 }
  0xb7   : > { %v6823_v33 = vpop.permute.xlu0 %4481 }
  0xb8   : > { %9839 = vst [vmem:[#allocation150_spill] sm:$0xff] %v6823_v33  ;;  %4761 = vrot.lane.b32.xlu0 %v6809_v26, %s5682_s23  ;;  %9841 = vst [vmem:[#allocation152_spill] sm:$0xff] %v6837_v31  ;;  %v6845_v26 = vpack.i.bf16 %v9710_v1, %v9709_v50 }
  0xb9   : > { %v6833_v41 = vpop.permute.xlu1 %4496 }
  0xba   : > { %4776 = vrot.lane.b32.xlu1 %v6817_v46, %s5682_s23  ;;  %9843 = vst [vmem:[#allocation154_spill] sm:$0xff] %v6845_v26  ;;  %v6853_v46 = vpack.i.bf16 %v9737_v27, %v9736_v6  ;;  %v9846_v6 = vld [vmem:[#allocation43_spill] sm:$0xff] }
  0xbb   : > { %v6841_v28 = vpop.permute.xlu0 %4491  ;;  %v6872_v27 = vpack.i.bf16 %v9846_v6, %v9731_v2  ;;  %v9857_v6 = vld [vmem:[#allocation69_spill] sm:$0xff] }
  0xbc   : > { %4771 = vrot.lane.b32.xlu0 %v6829_v54, %s5682_s23  ;;  %9842 = vst [vmem:[#allocation153_spill] sm:$0xff] %v6841_v28  ;;  %9844 = vst [vmem:[#allocation155_spill] sm:$0xff] %v6853_v46  ;;  %v4790_v54 = vpack.i.bf16 %v9719_v32, %v9722_v7  ;;  %v9849_v7 = vld [vmem:[#allocation60_spill] sm:$0xff]  ;;  %v9850_v32 = vld [vmem:[#allocation62_spill] sm:$0xff]  ;;  %v6896_v4 = vpack.i.bf16 %v9858_v3, %v9857_v6 }
  0xbd   : > { %9847 = vst [vmem:[#allocation157_spill] sm:$0xff] %v6872_v27  ;;  %v6880_v62 = vpack.i.bf16 %v9850_v32, %v9849_v7 }
  0xbe   : > { %4786 = vrot.lane.b32.xlu1 %v6837_v31, %s5682_s23  ;;  %v6849_v33 = vpop.permute.xlu1 %4506  ;;  %v6865_v31 = vpack.i.bf16 %v9747_v25, %v9746_v10  ;;  %v9853_v10 = vld [vmem:[#allocation49_spill] sm:$0xff]  ;;  %9859 = vst [vmem:[#allocation159_spill] sm:$0xff] %v6896_v4 }
  0xbf   : > { %9851 = vst [vmem:[#allocation60_spill] sm:$0xff] %v6880_v62 }
  0xc0   : > { %4781 = vrot.lane.b32.xlu0 %v6845_v26, %s5682_s23  ;;  %v6857_v12 = vpop.permute.xlu0 %4501  ;;  %9845 = vst [vmem:[#allocation156_spill] sm:$0xff] %v6865_v31 }
  0xc2   : > { %4796 = vrot.lane.b32.xlu1 %v6853_v46, %s5682_s23  ;;  %v6867_v28 = vpop.permute.xlu1 %4516 }
  0xc4   : > { %4791 = vrot.lane.b32.xlu0 %v4790_v54, %s5682_s23  ;;  %v6874_v26 = vpop.permute.xlu0 %4511  ;;  %v9854_v54 = vld [vmem:[#allocation50_spill] sm:$0xff] }
  0xc5   : > { %9848 = vst [vmem:[#allocation158_spill] sm:$0xff] %v6874_v26  ;;  %v6888_v25 = vpack.i.bf16 %v9854_v54, %v9853_v10 }
  0xc6   : > { %4806 = vrot.lane.b32.xlu1 %v6865_v31, %s5682_s23  ;;  %v6904_v31 = vpack.i.bf16 %v9862_v37, %v9861_v52 }
  0xc7   : > { %v6882_v13 = vpop.permute.xlu1 %4526  ;;  %9855 = vst [vmem:[#allocation49_spill] sm:$0xff] %v6888_v25 }
  0xc8   : > { %9852 = vst [vmem:[#allocation62_spill] sm:$0xff] %v6882_v13  ;;  %4801 = vrot.lane.b32.xlu0 %v6872_v27, %s5682_s23  ;;  %9863 = vst [vmem:[#allocation57_spill] sm:$0xff] %v6904_v31  ;;  %v1425_v13 = vrot.slane %v6821_v11, 1 }
  0xc9   : > { %v6890_v2 = vpop.permute.xlu0 %4521 }
  0xca   : > { %9856 = vst [vmem:[#allocation50_spill] sm:$0xff] %v6890_v2  ;;  %4816 = vrot.lane.b32.xlu1 %v6880_v62, %s5682_s23  ;;  %v9866_v62 = vld [vmem:[#allocation78_spill] sm:$0xff]  ;;  %v1424_v2 = vrot.slane %v6819_v40, 1  ;;  %v9911_v40 = vld [vmem:[#allocation23_spill] sm:$0xff] }
  0xcb   : > { %v6900_v57 = vpop.permute.xlu1 %4536  ;;  %v6912_v27 = vpack.i.bf16 %v9866_v62, %v9865_v17  ;;  %v4263_v17 = vld [vmem:[%s5728_s20 + $0x198] sm:$0xff]  }
  0xcc   : > { %4811 = vrot.lane.b32.xlu0 %v6888_v25, %s5682_s23  ;;  %9860 = vst [vmem:[#allocation160_spill] sm:$0xff] %v6900_v57  ;;  %v9869_v25 = vld [vmem:[#allocation65_spill] sm:$0xff] }
  0xcd   : > { %v6906_v56 = vpop.permute.xlu0 %4531  ;;  %9867 = vst [vmem:[#allocation161_spill] sm:$0xff] %v6912_v27  ;;  %v6920_v18 = vpack.i.bf16 %v9870_v59, %v9869_v25  ;;  %v9875_v62 = vld [vmem:[#allocation73_spill] sm:$0xff] }
  0xce   : > { %9864 = vst [vmem:[#allocation58_spill] sm:$0xff] %v6906_v56  ;;  %4826 = vrot.lane.b32.xlu1 %v6896_v4, %s5682_s23  ;;  %v6928_v4 = vpack.i.bf16 %v9803_v55, %v9802_v9  ;;  %v6949_v9 = vunpack.c.h.bf16 %v4263_v17  ;;  %v9884_v55 = vld [vmem:[#allocation82_spill] sm:$0xff] }
  0xcf   : > { %9871 = vst [vmem:[#allocation65_spill] sm:$0xff] %v6920_v18 }
  0xd0   : > { %4821 = vrot.lane.b32.xlu0 %v6904_v31, %s5682_s23  ;;  %v6916_v46 = vpop.permute.xlu1 %4546  ;;  %9873 = vst [vmem:[#allocation163_spill] sm:$0xff] %v6928_v4  ;;  %9881 = vst [vmem:[#allocation169_spill] sm:$0xff] %v6949_v9 }
  0xd1   : > { %9868 = vst [vmem:[#allocation162_spill] sm:$0xff] %v6916_v46  ;;  %v9876_v46 = vld [vmem:[#allocation74_spill] sm:$0xff] }
  0xd2   : > { %v6922_v6 = vpop.permute.xlu0 %4541  ;;  %4836 = vrot.lane.b32.xlu1 %v6912_v27, %s5682_s23  ;;  %v6937_v56 = vpack.i.bf16 %v9876_v46, %v9875_v62  ;;  %v6945_v27 = vpack.i.bf16 %v6307_v44, %v6297_v34  ;;  %v9903_v46 = vld [vmem:[#allocation19_spill] sm:$0xff] }
  0xd3   : > { %9872 = vst [vmem:[#allocation66_spill] sm:$0xff] %v6922_v6  ;;  %v6947_v6 = vunpack.c.l.bf16 %v4263_v17 }
  0xd4   : > { %4831 = vrot.lane.b32.xlu0 %v6920_v18, %s5682_s23  ;;  %v6933_v31 = vpop.permute.xlu1 %4556  ;;  %9877 = vst [vmem:[#allocation165_spill] sm:$0xff] %v6937_v56  ;;  %9879 = vst [vmem:[#allocation167_spill] sm:$0xff] %v6945_v27  ;;  %v9883_v18 = vld [vmem:[#allocation81_spill] sm:$0xff] }
  0xd5   : > { %9874 = vst [vmem:[#allocation164_spill] sm:$0xff] %v6933_v31  ;;  %9880 = vst [vmem:[#allocation168_spill] sm:$0xff] %v6947_v6  ;;  %v6957_v62 = vpack.i.bf16 %v9884_v55, %v9883_v18  ;;  %v7008_v18 = vld [vmem:[%s5728_s20 + $0xc8] sm:$0x1] }
  0xd6   : > { %v6939_v57 = vpop.permute.xlu0 %4551  ;;  %4846 = vrot.lane.b32.xlu1 %v6928_v4, %s5682_s23  ;;  %v6965_v4 = vpack.i.bf16 %v6949_v9, %v6947_v6  ;;  %9900 = vst [vmem:[#allocation179_spill] sm:$0xff] %v7008_v18 }
  0xd7   : > { %9878 = vst [vmem:[#allocation166_spill] sm:$0xff] %v6939_v57  ;;  %9885 = vst [vmem:[#allocation171_spill] sm:$0xff] %v6957_v62 }
  0xd8   : > { %4841 = vrot.lane.b32.xlu0 %v6937_v56, %s5682_s23  ;;  %v6953_v31 = vpop.permute.xlu1 %4566  ;;  %9887 = vst [vmem:[#allocation173_spill] sm:$0xff] %v6965_v4  ;;  %v6973_v56 = vpack.i.bf16 %v6286_v21, %v6284_v29  ;;  %v9897_v21 = vld [vmem:[#allocation20_spill] sm:$0xff] }
  0xd9   : > { %9882 = vst [vmem:[#allocation170_spill] sm:$0xff] %v6953_v31 }
  0xda   : > { %v6959_v57 = vpop.permute.xlu0 %4561  ;;  %4856 = vrot.lane.b32.xlu1 %v6945_v27, %s5682_s23  ;;  %9889 = vst [vmem:[#allocation175_spill] sm:$0xff] %v6973_v56 }
  0xdb   : > { %9886 = vst [vmem:[#allocation172_spill] sm:$0xff] %v6959_v57 }
  0xdc   : > { %4851 = vrot.lane.b32.xlu0 %v6957_v62, %s5682_s23  ;;  %v6969_v17 = vpop.permute.xlu1 %4576  ;;  %v9891_v62 = vld [vmem:[#allocation9_spill] sm:$0xff] }
  0xdd   : > { %9888 = vst [vmem:[#allocation174_spill] sm:$0xff] %v6969_v17  ;;  %v9892_v17 = vld [vmem:[#allocation16_spill] sm:$0xff] }
  0xde   : > { %v6975_v31 = vpop.permute.xlu0 %4571  ;;  %4866 = vrot.lane.b32.xlu1 %v6965_v4, %s5682_s23  ;;  %v9893_v4 = vld [vmem:[#allocation18_spill] sm:$0xff] }
  0xdf   : > { %9890 = vst [vmem:[#allocation176_spill] sm:$0xff] %v6975_v31 }
  0xe0   : > { %4861 = vrot.lane.b32.xlu0 %v6973_v56, %s5682_s23  ;;  %v6981_v27 = vpop.permute.xlu1 %4586  ;;  %v9894_v56 = vld [vmem:[#allocation14_spill] sm:$0xff] }
  0xe2   : > { %v6983_v57 = vpop.permute.xlu0 %4581  ;;  %4876 = vrot.lane.b32.xlu1 %v9891_v62, %s5683_s24  ;;  %v9898_v62 = vld [vmem:[#allocation17_spill] sm:$0xff] }
  0xe4   : > { %4871 = vrot.lane.b32.xlu0 %v9892_v17, %s5683_s24  ;;  %v6989_v34 = vpop.permute.xlu1 %4596 }
  0xe6   : > { %v6991_v31 = vpop.permute.xlu0 %4591  ;;  %4886 = vrot.lane.b32.xlu1 %v9893_v4, %s5683_s24  ;;  %v9902_v4 = vld [vmem:[#allocation22_spill] sm:$0xff] }
  0xe8   : > { %4881 = vrot.lane.b32.xlu0 %v9894_v56, %s5683_s24  ;;  %v6997_v44 = vpop.permute.xlu1 %4606  ;;  %v9548_v56 = vunpack.c.l.bf16 %v7008_v18  ;;  %v9914_v18 = vld [vmem:[#allocation41_spill] sm:$0xff] }
  0xe9   : > { %9895 = vst [vmem:[#allocation16_spill] sm:$0xff] %v6997_v44 }
  0xea   : > { %v6999_v29 = vpop.permute.xlu0 %4601  ;;  %4896 = vrot.lane.b32.xlu1 %v9897_v21, %s5683_s24  ;;  %v1427_v26 = vrot.slane %v9548_v56, 1 }
  0xeb   : > { %9896 = vst [vmem:[#allocation177_spill] sm:$0xff] %v6999_v29  ;;  %v9937_v29 = vld [vmem:[#allocation28_spill] sm:$0xff] }
  0xec   : > { %4891 = vrot.lane.b32.xlu0 %v9898_v62, %s5683_s24  ;;  %v7005_v17 = vpop.permute.xlu1 %4616  ;;  %v9906_v62 = vld [vmem:[#allocation25_spill] sm:$0xff] }
  0xed   : > { %9899 = vst [vmem:[#allocation178_spill] sm:$0xff] %v7005_v17  ;;  %v9936_v17 = vld [vmem:[#allocation104_spill] sm:$0xff] }
  0xee   : > { %v7010_v55 = vpop.permute.xlu0 %4611  ;;  %4906 = vrot.lane.b32.xlu1 %v9902_v4, %s5683_s24  ;;  %v9907_v4 = vld [vmem:[#allocation21_spill] sm:$0xff] }
  0xef   : > { %9901 = vst [vmem:[#allocation180_spill] sm:$0xff] %v7010_v55 }
  0xf0   : > { %4901 = vrot.lane.b32.xlu0 %v9903_v46, %s5683_s24  ;;  %v7017_v3 = vpop.permute.xlu1 %4626 }
  0xf1   : > { %9904 = vst [vmem:[#allocation181_spill] sm:$0xff] %v7017_v3  ;;  %v9910_v3 = vld [vmem:[#allocation34_spill] sm:$0xff] }
  0xf2   : > { %v7019_v21 = vpop.permute.xlu0 %4621  ;;  %4916 = vrot.lane.b32.xlu1 %v9906_v62, %s5683_s24  ;;  %v1428_v62 = vsel %vm520_vm0, %v1425_v13, %v1427_v26 }
  0xf3   : > { %9905 = vst [vmem:[#allocation182_spill] sm:$0xff] %v7019_v21  ;;  %v1426_v21 = vsel %vm520_vm0, %v1424_v2, %v1425_v13  ;;  %v9919_v13 = vld [vmem:[#allocation37_spill] sm:$0xff] }
  0xf4   : > { %4911 = vrot.lane.b32.xlu0 %v9907_v4, %s5683_s24  ;;  %v7029_v55 = vpop.permute.xlu1 %4636  ;;  %v4424_v4 = vunpack.i.h.bf16 %v6719_v38 }
  0xf5   : > { %9908 = vst [vmem:[#allocation183_spill] sm:$0xff] %v7029_v55  ;;  %v7045_v55 = vpack.i.bf16 %v1428_v62, %v1426_v21  ;;  %v9922_v21 = vld [vmem:[#allocation56_spill] sm:$0xff]  ;;  %v9923_v62 = vld [vmem:[#allocation45_spill] sm:$0xff] }
  0xf6   : > { %v7031_v46 = vpop.permute.xlu0 %4631  ;;  %4926 = vrot.lane.b32.xlu1 %v9910_v3, %s5683_s24 }
  0xf7   : > { %9909 = vst [vmem:[#allocation184_spill] sm:$0xff] %v7031_v46  ;;  %9915 = vst [vmem:[#allocation187_spill] sm:$0xff] %v7045_v55  ;;  %v9916_v46 = vld [vmem:[#allocation29_spill] sm:$0xff] }
  0xf8   : > { %4921 = vrot.lane.b32.xlu0 %v9911_v40, %s5683_s24  ;;  %v7039_v11 = vpop.permute.xlu1 %4646 }
  0xf9   : > { %9912 = vst [vmem:[#allocation185_spill] sm:$0xff] %v7039_v11  ;;  %v4428_v11 = vunpack.i.l.bf16 %v6713_v48 }
  0xfa   : > { %v7041_v56 = vpop.permute.xlu0 %4641  ;;  %4936 = vrot.lane.b32.xlu1 %v9914_v18, %s5683_s24 }
  0xfb   : > { %9913 = vst [vmem:[#allocation186_spill] sm:$0xff] %v7041_v56  ;;  %v4429_v56 = vunpack.i.h.bf16 %v6713_v48  ;;  %v4449_v48 = vunpack.i.h.bf16 %v6741_v45 }
  0xfc   : > { %4931 = vrot.lane.b32.xlu0 %v9916_v46, %s5683_s24  ;;  %v7049_v3 = vpop.permute.xlu1 %4656 }
  0xfd   : > { %9917 = vst [vmem:[#allocation188_spill] sm:$0xff] %v7049_v3  ;;  %v7101_v44 = vsel %vm2430_vm2, %v5841_v15, %v4429_v56  ;;  %v9939_v56 = vld [vmem:[#allocation68_spill] sm:$0xff] }
  0xfe   : > { %v7051_v2 = vpop.permute.xlu0 %4651  ;;  %4946 = vrot.lane.b32.xlu1 %v7045_v55, %s5683_s24  ;;  %v9927_v55 = vld [vmem:[#allocation52_spill] sm:$0xff] }
  0xff   : > { %9918 = vst [vmem:[#allocation189_spill] sm:$0xff] %v7051_v2  ;;  %v9926_v2 = vld [vmem:[#allocation64_spill] sm:$0xff] }
 0x100   : > { %4941 = vrot.lane.b32.xlu0 %v9919_v13, %s5683_s24  ;;  %v7057_v26 = vpop.permute.xlu1 %4666 }
 0x101   : > { %9920 = vst [vmem:[#allocation190_spill] sm:$0xff] %v7057_v26  ;;  %v9934_v26 = vld [vmem:[#allocation31_spill] sm:$0xff] }
 0x102   : > { %v7059_v40 = vpop.permute.xlu0 %4661  ;;  %4956 = vrot.lane.b32.xlu1 %v9922_v21, %s5683_s24 }
 0x103   : > { %9921 = vst [vmem:[#allocation191_spill] sm:$0xff] %v7059_v40  ;;  %v9931_v40 = vld [vmem:[#allocation61_spill] sm:$0xff] }
 0x104   : > { %4951 = vrot.lane.b32.xlu0 %v9923_v62, %s5683_s24  ;;  %v7065_v18 = vpop.permute.xlu1 %4676  ;;  %v4423_v62 = vunpack.i.l.bf16 %v6719_v38 }
 0x105   : > { %9924 = vst [vmem:[#allocation45_spill] sm:$0xff] %v7065_v18  ;;  %v4434_v18 = vunpack.i.h.bf16 %v6733_v43 }
 0x106   : > { %v7067_v46 = vpop.permute.xlu0 %4671  ;;  %4966 = vrot.lane.b32.xlu1 %v9926_v2, %s5683_s24  ;;  %v4439_v2 = vunpack.i.h.bf16 %v6727_v8 }
 0x107   : > { %9925 = vst [vmem:[#allocation192_spill] sm:$0xff] %v7067_v46  ;;  %v9930_v46 = vld [vmem:[#allocation72_spill] sm:$0xff] }
 0x108   : > { %4961 = vrot.lane.b32.xlu0 %v9927_v55, %s5683_s24  ;;  %v7073_v13 = vpop.permute.xlu1 %4686  ;;  %v4438_v55 = vunpack.i.l.bf16 %v6727_v8  ;;  %v9938_v8 = vld [vmem:[#allocation80_spill] sm:$0xff]  ;;  %v7121_v15 = vsel %vm2430_vm2, %v5869_v36, %v4439_v2  ;;  %v4448_v36 = vunpack.i.l.bf16 %v6741_v45  ;;  %v4454_v2 = vunpack.i.h.bf16 %v6766_v14 }
 0x109   : > { %9928 = vst [vmem:[#allocation193_spill] sm:$0xff] %v7073_v13  ;;  %v4433_v13 = vunpack.i.l.bf16 %v6733_v43  ;;  %v7105_v43 = vsel %vm2430_vm2, %v5827_v60, %v4428_v11  ;;  %v7138_v11 = vsel %vm2430_vm2, %v5910_v39, %v4449_v48  ;;  %v4453_v39 = vunpack.i.l.bf16 %v6766_v14 }
 0x10a   : > { %v7079_v21 = vpop.permute.xlu0 %4681  ;;  %4976 = vrot.lane.b32.xlu1 %v9930_v46, %s5683_s24  ;;  %v9935_v46 = vld [vmem:[#allocation44_spill] sm:$0xff]  ;;  %v7125_v60 = vsel %vm2430_vm2, %v5867_v35, %v4438_v55  ;;  %v4443_v55 = vunpack.i.l.bf16 %v6748_v58  ;;  %v4468_v48 = vunpack.i.l.bf16 %v6778_v24  ;;  %v4464_v14 = vunpack.i.h.bf16 %v6782_v51 }
 0x10b   : > { %9929 = vst [vmem:[#allocation194_spill] sm:$0xff] %v7079_v21  ;;  %v7093_v21 = vld [vmem:[%s5728_s20 + $0x1a0] sm:$0x1] }
 0x10c   : > { %4971 = vrot.lane.b32.xlu0 %v9931_v40, %s5683_s24  ;;  %v7090_v38 = vpop.permute.xlu1 %4696  ;;  %9933 = vst [vmem:[#allocation196_spill] sm:$0xff] %v7093_v21  ;;  %v7109_v40 = vsel %vm2430_vm2, %v5852_v23, %v4424_v4  ;;  %v7129_v4 = vsel %vm2430_vm2, %v5893_v0, %v4434_v18  ;;  %v7134_v23 = vsel %vm2430_vm2, %v5891_v63, %v4433_v13  ;;  %v4444_v0 = vunpack.i.h.bf16 %v6748_v58 }
 0x10d   : > { %9932 = vst [vmem:[#allocation195_spill] sm:$0xff] %v7090_v38  ;;  %v7113_v38 = vsel %vm2430_vm2, %v5850_v22, %v4423_v62  ;;  %v4459_v18 = vunpack.i.h.bf16 %v6756_v5  ;;  %v4458_v63 = vunpack.i.l.bf16 %v6756_v5  ;;  %v4469_v13 = vunpack.i.h.bf16 %v6778_v24  ;;  %v9942_v62 = vld [vmem:[#allocation86_spill] sm:$0xff] }
 0x10e   : > { %v7115_v3 = vpop.permute.xlu0 %4691  ;;  %4986 = vrot.lane.b32.xlu1 %v9938_v8, %s5683_s24  ;;  %v1429_v22 = vrot.slane %v6947_v6, 1  ;;  %v1430_v58 = vrot.slane %v6949_v9, 1  ;;  %v9943_v8 = vunpack.c.l.bf16 %v7093_v21  ;;  %v7173_v24 = vsel %vm2430_vm2, %v5928_v49, %v4444_v0 }
 0x10f   : > { %v7193_v49 = vsel %vm2430_vm2, %v5963_v30, %v4453_v39  ;;  %v7211_v30 = vsel %vm2430_vm2, %v9715_v16, %v4464_v14  ;;  %v9951_v16 = vld [vmem:[#allocation95_spill] sm:$0xff]  ;;  %v4519_v14 = vunpack.i.h.bf16 %v6867_v28  ;;  %v4588_v9 = vunpack.i.l.bf16 %v6981_v27 }
 0x110   : > { %4981 = vrot.lane.b32.xlu0 %v9939_v56, %s5683_s24  ;;  %v7143_v35 = vpop.permute.xlu1 %4706  ;;  %v1432_v5 = vrot.slane %v9943_v8, 1  ;;  %v7163_v56 = vsel %vm2430_vm2, %v5904_v20, %v4448_v36  ;;  %v7177_v8 = vsel %vm2430_vm2, %v5926_v61, %v4443_v55  ;;  %v7181_v20 = vsel %vm2430_vm2, %v5950_v53, %v4459_v18  ;;  %v9947_v61 = vld [vmem:[#allocation93_spill] sm:$0xff] }
 0x111   : > { %9940 = vst [vmem:[#allocation31_spill] sm:$0xff] %v7143_v35  ;;  %v9944_v35 = vld [vmem:[#allocation77_spill] sm:$0xff]  ;;  %v7189_v36 = vsel %vm2430_vm2, %v5969_v47, %v4454_v2  ;;  %v7201_v53 = vsel %vm2430_vm2, %v9710_v1, %v4469_v13  ;;  %v1431_v47 = vsel %vm520_vm0, %v1429_v22, %v1430_v58  ;;  %v4498_v22 = vunpack.i.l.bf16 %v6833_v41 }
 0x112   : > { %v7152_v45 = vpop.permute.xlu0 %4701  ;;  %4996 = vrot.lane.b32.xlu1 %v9942_v62, %s5683_s24  ;;  %v1433_v55 = vsel %vm520_vm0, %v1430_v58, %v1432_v5  ;;  %v4508_v13 = vunpack.i.l.bf16 %v6849_v33  ;;  %v9953_v58 = vld [vmem:[#allocation91_spill] sm:$0xff] }
 0x113   : > { %9941 = vst [vmem:[#allocation44_spill] sm:$0xff] %v7152_v45  ;;  %v4463_v45 = vunpack.i.l.bf16 %v6782_v51  ;;  %v7185_v51 = vsel %vm2430_vm2, %v5939_v19, %v4458_v63  ;;  %v7205_v19 = vsel %vm2430_vm2, %v9709_v50, %v4468_v48  ;;  %v9948_v63 = vld [vmem:[#allocation83_spill] sm:$0xff]  ;;  %v4499_v50 = vunpack.i.h.bf16 %v6833_v41 }
 0x114   : > { %4991 = vrot.lane.b32.xlu0 %v9944_v35, %s5683_s24  ;;  %v7169_v62 = vpop.permute.xlu1 %4716  ;;  %v7227_v39 = vpack.i.bf16 %v1433_v55, %v1431_v47  ;;  %v4503_v48 = vunpack.i.l.bf16 %v6857_v12  ;;  %v4518_v47 = vunpack.i.l.bf16 %v6867_v28  ;;  %v9955_v55 = vld [vmem:[#allocation48_spill] sm:$0xff]  ;;  %v7247_v21 = vsel %vm2430_vm2, %v9853_v10, %v4498_v22 }
 0x115   : > { %9945 = vst [vmem:[#allocation104_spill] sm:$0xff] %v7169_v62  ;;  %v7215_v18 = vsel %vm2430_vm2, %v9714_v42, %v4463_v45  ;;  %v4509_v42 = vunpack.i.h.bf16 %v6849_v33  ;;  %v4504_v45 = vunpack.i.h.bf16 %v6857_v12  ;;  %v7239_v5 = vsel %vm2430_vm2, %v9854_v54, %v4499_v50  ;;  %v9958_v33 = vld [vmem:[#allocation94_spill] sm:$0xff] }
 0x116   : > { %v7195_v0 = vpop.permute.xlu0 %4711  ;;  %5006 = vrot.lane.b32.xlu1 %v9947_v61, %s5683_s24  ;;  %9952 = vst [vmem:[#allocation199_spill] sm:$0xff] %v7227_v39  ;;  %v4589_v12 = vunpack.i.h.bf16 %v6981_v27  ;;  %v7261_v28 = vsel %vm2430_vm2, %v9861_v52, %v4508_v13  ;;  %v7269_v27 = vsel %vm2430_vm2, %v9849_v7, %v4503_v48  ;;  %v4584_v50 = vunpack.i.h.bf16 %v6983_v57  ;;  %v9966_v61 = vld [vmem:[#allocation102_spill] sm:$0xff] }
 0x117   : > { %9946 = vst [vmem:[#allocation28_spill] sm:$0xff] %v7195_v0  ;;  %v7257_v54 = vsel %vm2430_vm2, %v9862_v37, %v4509_v42  ;;  %v7265_v10 = vsel %vm2430_vm2, %v9850_v32, %v4504_v45  ;;  %v4583_v22 = vunpack.i.l.bf16 %v6983_v57  ;;  %v7277_v52 = vsel %vm2430_vm2, %v9870_v59, %v4519_v14  ;;  %v9959_v59 = vld [vmem:[#allocation98_spill] sm:$0xff] }
 0x118   : > { %5001 = vrot.lane.b32.xlu0 %v9948_v63, %s5683_s24  ;;  %v7219_v1 = vpop.permute.xlu1 %4726  ;;  %v7281_v32 = vsel %vm2430_vm2, %v9869_v25, %v4518_v47  ;;  %v2511_v7 = vsel %vm2495_vm3, %v7101_v44, %v4589_v12  ;;  %v2510_v57 = vsel %vm2495_vm3, %v7105_v43, %v4588_v9  ;;  %v4599_v45 = vunpack.i.h.bf16 %v6989_v34  ;;  %v9970_v63 = vld [vmem:[#allocation106_spill] sm:$0xff] }
 0x119   : > { %9949 = vst [vmem:[#allocation197_spill] sm:$0xff] %v7219_v1  ;;  %v4598_v48 = vunpack.i.l.bf16 %v6989_v34  ;;  %v2508_v9 = vsel %vm2495_vm3, %v7113_v38, %v4583_v22  ;;  %v2509_v43 = vsel %vm2495_vm3, %v7109_v40, %v4584_v50  ;;  %v4594_v34 = vunpack.i.h.bf16 %v6991_v31  ;;  %v9961_v50 = vld [vmem:[#allocation16_spill] sm:$0xff] }
 0x11a   : > { %v7223_v2 = vpop.permute.xlu0 %4721  ;;  %5016 = vrot.lane.b32.xlu1 %v9951_v16, %s5683_s24  ;;  %v9956_v16 = vld [vmem:[#allocation36_spill] sm:$0xff]  ;;  %v4593_v12 = vunpack.i.l.bf16 %v6991_v31  ;;  %v2515_v38 = vsel %vm2495_vm3, %v7121_v15, %v4599_v45  ;;  %v4609_v31 = vunpack.i.h.bf16 %v9961_v50  ;;  %v4608_v22 = vunpack.i.l.bf16 %v9961_v50  ;;  %v9963_v45 = vld [vmem:[#allocation177_spill] sm:$0xff] }
 0x11b   : > { %9950 = vst [vmem:[#allocation198_spill] sm:$0xff] %v7223_v2  ;;  %v2514_v40 = vsel %vm2495_vm3, %v7125_v60, %v4598_v48  ;;  %v2513_v60 = vsel %vm2495_vm3, %v7129_v4, %v4594_v34  ;;  %v4604_v48 = vunpack.i.h.bf16 %v9963_v45  ;;  %v9964_v50 = vld [vmem:[#allocation97_spill] sm:$0xff]  ;;  %v9965_v34 = vld [vmem:[#allocation178_spill] sm:$0xff] }
 0x11c   : > { %5011 = vrot.lane.b32.xlu0 %v9953_v58, %s5683_s24  ;;  %v7235_v41 = vpop.permute.xlu1 %4736  ;;  %v2512_v15 = vsel %vm2495_vm3, %v7134_v23, %v4593_v12  ;;  %v2519_v23 = vsel %vm2495_vm3, %v7138_v11, %v4609_v31  ;;  %v2518_v4 = vsel %vm2495_vm3, %v7163_v56, %v4608_v22  ;;  %v4619_v12 = vunpack.i.h.bf16 %v9965_v34  ;;  %v9967_v31 = vld [vmem:[#allocation180_spill] sm:$0xff]  ;;  %v9974_v2 = vld [vmem:[#allocation26_spill] sm:$0xff] }
 0x11d   : > { %9954 = vst [vmem:[#allocation200_spill] sm:$0xff] %v7235_v41  ;;  %v2517_v56 = vsel %vm2495_vm3, %v7173_v24, %v4604_v48  ;;  %v4614_v22 = vunpack.i.h.bf16 %v9967_v31  ;;  %v9969_v48 = vld [vmem:[#allocation181_spill] sm:$0xff] }
 0x11e   : > { %v7251_v6 = vpop.permute.xlu0 %4731  ;;  %5026 = vrot.lane.b32.xlu1 %v7227_v39, %s5683_s24 }
 0x11f   : > { %9957 = vst [vmem:[#allocation48_spill] sm:$0xff] %v7251_v6 }
 0x120   : > { %5021 = vrot.lane.b32.xlu0 %v9958_v33, %s5683_s24  ;;  %v4747_v37 = vpop.permute.xlu1 %4746  ;;  %v9962_v33 = vld [vmem:[#allocation100_spill] sm:$0xff] }
 0x121   : > { %v4749_v42 = vunpack.i.h.bf16 %v4747_v37  ;;  %v4748_v13 = vunpack.i.l.bf16 %v4747_v37  ;;  %v9960_v37 = vld [vmem:[#allocation96_spill] sm:$0xff] }
 0x122   : > { %v4742_v39 = vpop.permute.xlu0 %4741  ;;  %5036 = vrot.lane.b32.xlu1 %v9959_v59, %s5684_s25 }
 0x123   : > { %v7292_v25 = vsel %vm2560_vm4, %v2510_v57, %v4748_v13  ;;  %v7295_v14 = vsel %vm2560_vm4, %v2511_v7, %v4749_v42  ;;  %v4744_v47 = vunpack.i.h.bf16 %v4742_v39  ;;  %v4743_v44 = vunpack.i.l.bf16 %v4742_v39 }
 0x124   : > { %5031 = vrot.lane.b32.xlu0 %v9960_v37, %s5684_s25  ;;  %v4757_v13 = vpop.permute.xlu1 %4756 }
 0x125   : > { %v7306_v57 = vsel %vm2560_vm4, %v2508_v9, %v4743_v44  ;;  %v7309_v42 = vsel %vm2560_vm4, %v2509_v43, %v4744_v47  ;;  %v4759_v39 = vunpack.i.h.bf16 %v4757_v13  ;;  %v4758_v7 = vunpack.i.l.bf16 %v4757_v13 }
 0x126   : > { %v4752_v37 = vpop.permute.xlu0 %4751  ;;  %5046 = vrot.lane.b32.xlu1 %v9962_v33, %s5684_s25  ;;  %v4603_v13 = vunpack.i.l.bf16 %v9963_v45  ;;  %v4618_v45 = vunpack.i.l.bf16 %v9965_v34  ;;  %v9968_v34 = vld [vmem:[#allocation99_spill] sm:$0xff] }
 0x127   : > { %v7320_v44 = vsel %vm2560_vm4, %v2514_v40, %v4758_v7  ;;  %v7323_v47 = vsel %vm2560_vm4, %v2515_v38, %v4759_v39  ;;  %v4754_v9 = vunpack.i.h.bf16 %v4752_v37  ;;  %v4753_v43 = vunpack.i.l.bf16 %v4752_v37 }
 0x128   : > { %5041 = vrot.lane.b32.xlu0 %v9964_v50, %s5684_s25  ;;  %v4767_v7 = vpop.permute.xlu1 %4766  ;;  %v2516_v11 = vsel %vm2495_vm3, %v7177_v8, %v4603_v13  ;;  %v2523_v8 = vsel %vm2495_vm3, %v7181_v20, %v4619_v12  ;;  %v2522_v24 = vsel %vm2495_vm3, %v7185_v51, %v4618_v45  ;;  %v4629_v13 = vunpack.i.h.bf16 %v9969_v48  ;;  %v9971_v12 = vld [vmem:[#allocation182_spill] sm:$0xff] }
 0x129   : > { %v7334_v40 = vsel %vm2560_vm4, %v2512_v15, %v4753_v43  ;;  %v7337_v39 = vsel %vm2560_vm4, %v2513_v60, %v4754_v9  ;;  %v4769_v38 = vunpack.i.h.bf16 %v4767_v7  ;;  %v4768_v37 = vunpack.i.l.bf16 %v4767_v7 }
 0x12a   : > { %v4762_v58 = vpop.permute.xlu0 %4761  ;;  %5056 = vrot.lane.b32.xlu1 %v9966_v61, %s5684_s25  ;;  %v4613_v7 = vunpack.i.l.bf16 %v9967_v31  ;;  %v4628_v31 = vunpack.i.l.bf16 %v9969_v48  ;;  %v2521_v51 = vsel %vm2495_vm3, %v7189_v36, %v4614_v22  ;;  %v4624_v45 = vunpack.i.h.bf16 %v9971_v12  ;;  %v9972_v48 = vld [vmem:[#allocation101_spill] sm:$0xff]  ;;  %v10008_v61 = vld [vmem:[#allocation191_spill] sm:$0xff] }
 0x12b   : > { %v7348_v43 = vsel %vm2560_vm4, %v2518_v4, %v4768_v37  ;;  %v7351_v9 = vsel %vm2560_vm4, %v2519_v23, %v4769_v38  ;;  %v4764_v15 = vunpack.i.h.bf16 %v4762_v58  ;;  %v4763_v60 = vunpack.i.l.bf16 %v4762_v58 }
 0x12c   : > { %5051 = vrot.lane.b32.xlu0 %v9968_v34, %s5684_s25  ;;  %v4777_v37 = vpop.permute.xlu1 %4776  ;;  %v2520_v20 = vsel %vm2495_vm3, %v7193_v49, %v4613_v7  ;;  %v9973_v49 = vld [vmem:[#allocation158_spill] sm:$0xff]  ;;  %v2527_v22 = vsel %vm2495_vm3, %v7201_v53, %v4629_v13  ;;  %v9977_v13 = vld [vmem:[#allocation103_spill] sm:$0xff] }
 0x12d   : > { %v7362_v4 = vsel %vm2560_vm4, %v2516_v11, %v4763_v60  ;;  %v7365_v38 = vsel %vm2560_vm4, %v2517_v56, %v4764_v15  ;;  %v4779_v58 = vunpack.i.h.bf16 %v4777_v37  ;;  %v4778_v23 = vunpack.i.l.bf16 %v4777_v37 }
 0x12e   : > { %v4772_v6 = vpop.permute.xlu0 %4771  ;;  %5066 = vrot.lane.b32.xlu1 %v9970_v63, %s5684_s25  ;;  %v4623_v37 = vunpack.i.l.bf16 %v9971_v12  ;;  %v4514_v7 = vunpack.i.h.bf16 %v9973_v49  ;;  %v4513_v36 = vunpack.i.l.bf16 %v9973_v49  ;;  %v2526_v12 = vsel %vm2495_vm3, %v7205_v19, %v4628_v31  ;;  %v10007_v63 = vld [vmem:[#allocation190_spill] sm:$0xff] }
 0x12f   : > { %v7376_v60 = vsel %vm2560_vm4, %v2522_v24, %v4778_v23  ;;  %v7379_v15 = vsel %vm2560_vm4, %v2523_v8, %v4779_v58  ;;  %v4774_v11 = vunpack.i.h.bf16 %v4772_v6  ;;  %v4773_v56 = vunpack.i.l.bf16 %v4772_v6 }
 0x130   : > { %5061 = vrot.lane.b32.xlu0 %v9972_v48, %s5684_s25  ;;  %v4787_v23 = vpop.permute.xlu1 %4786  ;;  %v2524_v53 = vsel %vm2495_vm3, %v7215_v18, %v4623_v37  ;;  %v2525_v19 = vsel %vm2495_vm3, %v7211_v30, %v4624_v45  ;;  %v9983_v30 = vld [vmem:[#allocation160_spill] sm:$0xff] }
 0x131   : > { %v7390_v24 = vsel %vm2560_vm4, %v2520_v20, %v4773_v56  ;;  %v7393_v58 = vsel %vm2560_vm4, %v2521_v51, %v4774_v11  ;;  %v4789_v6 = vunpack.i.h.bf16 %v4787_v23  ;;  %v4788_v8 = vunpack.i.l.bf16 %v4787_v23  ;;  %v9976_v23 = vld [vmem:[#allocation62_spill] sm:$0xff] }
 0x132   : > { %v4782_v41 = vpop.permute.xlu0 %4781  ;;  %5076 = vrot.lane.b32.xlu1 %v9974_v2, %s5684_s25  ;;  %v4529_v49 = vunpack.i.h.bf16 %v9976_v23  ;;  %v4528_v1 = vunpack.i.l.bf16 %v9976_v23  ;;  %v9982_v23 = vld [vmem:[#allocation70_spill] sm:$0xff]  ;;  %v4539_v45 = vunpack.i.h.bf16 %v9983_v30  ;;  %v9985_v2 = vpack.i.bf16 %v9935_v46, %v9934_v26 }
 0x133   : > { %v7404_v56 = vsel %vm2560_vm4, %v2526_v12, %v4788_v8  ;;  %v7407_v11 = vsel %vm2560_vm4, %v2527_v22, %v4789_v6  ;;  %v4784_v20 = vunpack.i.h.bf16 %v4782_v41  ;;  %v4783_v51 = vunpack.i.l.bf16 %v4782_v41  ;;  %v9979_v8 = vld [vmem:[#allocation50_spill] sm:$0xff] }
 0x134   : > { %9975 = vst [vmem:[#allocation36_spill] sm:$0xff] %v7407_v11  ;;  %5071 = vrot.lane.b32.xlu0 %v9977_v13, %s5684_s25  ;;  %v7417_v31 = vpop.permute.xlu1 %4796  ;;  %v4524_v6 = vunpack.i.h.bf16 %v9979_v8  ;;  %v4523_v22 = vunpack.i.l.bf16 %v9979_v8  ;;  %v7429_v18 = vsel %vm2430_vm2, %v9982_v23, %v4514_v7  ;;  %v9986_v8 = vld [vmem:[#allocation69_spill] sm:$0xff]  ;;  %v9988_v23 = vld [vmem:[#allocation74_spill] sm:$0xff] }
 0x135   : > { %9978 = vst [vmem:[#allocation98_spill] sm:$0xff] %v7417_v31  ;;  %v7422_v41 = vsel %vm2560_vm4, %v2524_v53, %v4783_v51  ;;  %v7425_v12 = vsel %vm2560_vm4, %v2525_v19, %v4784_v20  ;;  %v7440_v51 = vsel %vm2430_vm2, %v9986_v8, %v4513_v36  ;;  %v4538_v20 = vunpack.i.l.bf16 %v9983_v30  ;;  %v9987_v53 = vld [vmem:[#allocation58_spill] sm:$0xff] }
 0x136   : > { %9980 = vst [vmem:[#allocation96_spill] sm:$0xff] %v7422_v41  ;;  %9981 = vst [vmem:[#allocation16_spill] sm:$0xff] %v7425_v12  ;;  %v7432_v37 = vpop.permute.xlu0 %4791  ;;  %5086 = vrot.lane.b32.xlu1 %v9985_v2, %s5684_s25  ;;  %v4534_v19 = vunpack.i.h.bf16 %v9987_v53  ;;  %v4533_v7 = vunpack.i.l.bf16 %v9987_v53  ;;  %v7447_v31 = vsel %vm2430_vm2, %v9988_v23, %v4529_v49  ;;  %v9990_v46 = vld [vmem:[#allocation162_spill] sm:$0xff]  ;;  %v9991_v2 = vpack.i.bf16 %v9937_v29, %v9936_v17  ;;  %v9994_v53 = vld [vmem:[#allocation76_spill] sm:$0xff] }
 0x137   : > { %9984 = vst [vmem:[#allocation100_spill] sm:$0xff] %v7432_v37  ;;  %v9989_v37 = vld [vmem:[#allocation73_spill] sm:$0xff]  ;;  %v4549_v26 = vunpack.i.h.bf16 %v9990_v46  ;;  %v9993_v30 = vld [vmem:[#allocation78_spill] sm:$0xff]  ;;  %v7466_v49 = vsel %vm2430_vm2, %v9994_v53, %v4523_v22  ;;  %v4664_v12 = vunpack.i.h.bf16 %v10008_v61  ;;  %v10014_v41 = vld [vmem:[#allocation155_spill] sm:$0xff] }
 0x138   : > { %v7451_v0 = vsel %vm2430_vm2, %v9989_v37, %v4528_v1  ;;  %5081 = vrot.lane.b32.xlu0 %v9991_v2, %s5684_s25  ;;  %v7458_v36 = vpop.permute.xlu1 %4806  ;;  %v7462_v8 = vsel %vm2430_vm2, %v9993_v30, %v4524_v6  ;;  %v9995_v23 = vld [vmem:[#allocation82_spill] sm:$0xff]  ;;  %v9996_v37 = vld [vmem:[#allocation188_spill] sm:$0xff]  ;;  %v9998_v17 = vld [vmem:[#allocation133_spill] sm:$0xff] }
 0x139   : > { %9992 = vst [vmem:[#allocation177_spill] sm:$0xff] %v7458_v36  ;;  %v7470_v1 = vsel %vm2430_vm2, %v9995_v23, %v4539_v45  ;;  %v4659_v62 = vunpack.i.h.bf16 %v9996_v37  ;;  %v4658_v13 = vunpack.i.l.bf16 %v9996_v37  ;;  %v9999_v6 = vld [vmem:[#allocation81_spill] sm:$0xff]  ;;  %v10001_v45 = vld [vmem:[#allocation84_spill] sm:$0xff]  ;;  %v4548_v23 = vunpack.i.l.bf16 %v9990_v46  ;;  %v10003_v36 = vld [vmem:[#allocation66_spill] sm:$0xff] }
 0x13a   : > { %v7474_v29 = vpop.permute.xlu0 %4801  ;;  %5096 = vrot.lane.b32.xlu1 %v9998_v17, %s5685_s26  ;;  %v7480_v2 = vsel %vm2430_vm2, %v9999_v6, %v4538_v20  ;;  %v10000_v22 = vld [vmem:[#allocation85_spill] sm:$0xff]  ;;  %v7488_v53 = vsel %vm2430_vm2, %v10001_v45, %v4533_v7  ;;  %v10002_v37 = vld [vmem:[#allocation88_spill] sm:$0xff]  ;;  %v4544_v17 = vunpack.i.h.bf16 %v10003_v36  ;;  %v10004_v20 = vpack.i.bf16 %v9956_v16, %v9955_v55 }
 0x13b   : > { %9997 = vst [vmem:[#allocation97_spill] sm:$0xff] %v7474_v29  ;;  %v7484_v30 = vsel %vm2430_vm2, %v10000_v22, %v4534_v19  ;;  %v7493_v29 = vsel %vm2430_vm2, %v10002_v37, %v4549_v26  ;;  %v10005_v19 = vld [vmem:[#allocation40_spill] sm:$0xff]  ;;  %v10006_v22 = vld [vmem:[#allocation110_spill] sm:$0xff]  ;;  %v4669_v7 = vunpack.i.h.bf16 %v10007_v63  ;;  %v4668_v45 = vunpack.i.l.bf16 %v10007_v63 }
 0x13c   : > { %5091 = vrot.lane.b32.xlu0 %v10004_v20, %s5684_s25  ;;  %v4817_v6 = vpop.permute.xlu1 %4816  ;;  %v2539_v26 = vsel %vm2495_vm3, %v7239_v5, %v4659_v62  ;;  %v2538_v37 = vsel %vm2495_vm3, %v7247_v21, %v4658_v13  ;;  %v4663_v16 = vunpack.i.l.bf16 %v10008_v61  ;;  %v10010_v20 = vld [vmem:[#allocation135_spill] sm:$0xff]  ;;  %v5670_v63 = vld [vmem:[%s9211_s1] sm:$0xff]   ;;  %v10012_v5 = vld [vmem:[#allocation92_spill] sm:$0xff] }
 0x13d   : > { %v4819_v46 = vunpack.i.h.bf16 %v4817_v6  ;;  %v4818_v48 = vunpack.i.l.bf16 %v4817_v6  ;;  %v10011_v6 = vld [vmem:[#allocation87_spill] sm:$0xff]  ;;  %v7530_v13 = vsel %vm2430_vm2, %v10012_v5, %v4544_v17  ;;  %4298 = vmatprep.subr.bf16.mxu0 %v5670_v63  ;;  %4366 = vmatprep.subr.bf16.mxu1 %v5670_v63  ;;  %v10015_v5 = vld [vmem:[#allocation9_spill] sm:$0xff] }
 0x13e   : > { %v7510_v55 = vpop.permute.xlu0 %4811  ;;  %5106 = vrot.lane.b32.xlu1 %v10010_v20, %s5685_s26  ;;  %v7519_v35 = vsel %vm2430_vm2, %v10011_v6, %v4548_v23  ;;  %v10013_v20 = vld [vmem:[#allocation45_spill] sm:$0xff]  ;;  %v2543_v23 = vsel %vm2495_vm3, %v7257_v54, %v4669_v7  ;;  %4299 = vmatpush3.bf16.msra.mxu0 %v5670_v63  ;;  %v2540_v17 = vsel %vm2495_vm3, %v7269_v27, %v4663_v16  ;;  %v5671_v54 = vld [vmem:[%s9211_s1 + $0x8] sm:$0x3f]   ;;  %v10017_v16 = vld [vmem:[#allocation192_spill] sm:$0xff] }
 0x13f   : > { %10009 = vst [vmem:[#allocation178_spill] sm:$0xff] %v7510_v55  ;;  %v7523_v21 = vsel %vm2560_vm4, %v2538_v37, %v4818_v48  ;;  %v7526_v61 = vsel %vm2560_vm4, %v2539_v26, %v4819_v46  ;;  %v4679_v55 = vunpack.i.h.bf16 %v10013_v20  ;;  %v2542_v48 = vsel %vm2495_vm3, %v7261_v28, %v4668_v45  ;;  %4368 = vmatpush3.bf16.msra.mxu1 %v5670_v63  ;;  %v10018_v62 = vld [vmem:[#allocation157_spill] sm:$0xff] }
 0x140   : > { %5101 = vrot.lane.b32.xlu0 %v10014_v41, %s5685_s26  ;;  %v4827_v11 = vpop.permute.xlu1 %4826  ;;  %v2541_v37 = vsel %vm2495_vm3, %v7265_v10, %v4664_v12  ;;  %v4678_v41 = vunpack.i.l.bf16 %v10013_v20  ;;  %v5687_v28 = vmov 65535   ;;  %v4674_v20 = vunpack.i.h.bf16 %v10017_v16 }
 0x141   : > { %v4829_v46 = vunpack.i.h.bf16 %v4827_v11  ;;  %v4828_v26 = vunpack.i.l.bf16 %v4827_v11  ;;  %v3102_v11 = vsel %vm3101_vm5, 4294967295, %v5687_v28  ;;  %v2547_v45 = vsel %vm2495_vm3, %v7277_v52, %v4679_v55  ;;  %v10020_v55 = vld [vmem:[#allocation193_spill] sm:$0xff] }
 0x142   : > { %v4822_v6 = vpop.permute.xlu0 %4821  ;;  %5116 = vrot.lane.b32.xlu1 %v10015_v5, %s5686_s29  ;;  %v4673_v5 = vunpack.i.l.bf16 %v10017_v16  ;;  %v3103_v63 = vsel %vm873_vm1, %v3102_v11, 0  ;;  %v2546_v52 = vsel %vm2495_vm3, %v7281_v32, %v4678_v41  ;;  %v4688_v16 = vunpack.i.l.bf16 %v10020_v55 }
 0x143   : > { %v7550_v7 = vsel %vm2560_vm4, %v2542_v48, %v4828_v26  ;;  %v7553_v27 = vsel %vm2560_vm4, %v2543_v23, %v4829_v46  ;;  %v4824_v10 = vunpack.i.h.bf16 %v4822_v6  ;;  %v4823_v12 = vunpack.i.l.bf16 %v4822_v6 }
 0x144   : > { %10016 = vst [vmem:[#allocation180_spill] sm:$0xff] %v7553_v27  ;;  %5111 = vrot.lane.b32.xlu0 %v10018_v62, %s5685_s26  ;;  %v4837_v28 = vpop.permute.xlu1 %4836  ;;  %v4689_v6 = vunpack.i.h.bf16 %v10020_v55  ;;  %v10021_v62 = vld [vmem:[#allocation14_spill] sm:$0xff]  ;;  %v3105_v11 = vand.u32 %v5671_v54, %v3103_v63  ;;  %v2544_v32 = vsel %vm2495_vm3, %v7440_v51, %v4673_v5  ;;  %v2545_v41 = vsel %vm2495_vm3, %v7429_v18, %v4674_v20  ;;  %v10023_v54 = vld [vmem:[#allocation56_spill] sm:$0xff]  ;;  %v10024_v5 = vld [vmem:[#allocation195_spill] sm:$0xff] }
 0x145   : > { %v7563_v48 = vsel %vm2560_vm4, %v2540_v17, %v4823_v12  ;;  %v7566_v23 = vsel %vm2560_vm4, %v2541_v37, %v4824_v10  ;;  %v4839_v46 = vunpack.i.h.bf16 %v4837_v28  ;;  %v4838_v26 = vunpack.i.l.bf16 %v4837_v28  ;;  %v10022_v28 = vld [vmem:[#allocation194_spill] sm:$0xff] }
 0x146   : > { %10019 = vst [vmem:[#allocation99_spill] sm:$0xff] %v7566_v23  ;;  %v4832_v27 = vpop.permute.xlu0 %4831  ;;  %5126 = vrot.lane.b32.xlu1 %v10021_v62, %s5686_s29  ;;  %v4684_v55 = vunpack.i.h.bf16 %v10022_v28  ;;  %v4683_v23 = vunpack.i.l.bf16 %v10022_v28  ;;  %4300 = vmatprep.subr.bf16.mxu0 %v3105_v11  ;;  %v2551_v18 = vsel %vm2495_vm3, %v7447_v31, %v4689_v6  ;;  %v2550_v20 = vsel %vm2495_vm3, %v7451_v0, %v4688_v16 }
 0x147   : > { %v7575_v17 = vsel %vm2560_vm4, %v2546_v52, %v4838_v26  ;;  %v7578_v37 = vsel %vm2560_vm4, %v2547_v45, %v4839_v46  ;;  %v4834_v10 = vunpack.i.h.bf16 %v4832_v27  ;;  %v4833_v12 = vunpack.i.l.bf16 %v4832_v27  ;;  %4301 = vmatpush3.bf16.msra.mxu0 %v3105_v11  ;;  %4367 = vmatprep.subr.bf16.mxu1 %v3105_v11 }
 0x148   : > { %5121 = vrot.lane.b32.xlu0 %v10023_v54, %s5686_s29  ;;  %v4847_v63 = vpop.permute.xlu1 %4846  ;;  %v4699_v26 = vunpack.i.h.bf16 %v10024_v5  ;;  %v4698_v52 = vunpack.i.l.bf16 %v10024_v5  ;;  %4369 = vmatpush3.bf16.msra.mxu1 %v3105_v11  ;;  %v2548_v0 = vsel %vm2495_vm3, %v7466_v49, %v4683_v23  ;;  %v2549_v16 = vsel %vm2495_vm3, %v7462_v8, %v4684_v55  ;;  %v10026_v23 = vld [vmem:[#allocation31_spill] sm:$0xff] }
 0x149   : > { %v7589_v45 = vsel %vm2560_vm4, %v2544_v32, %v4833_v12  ;;  %v7592_v27 = vsel %vm2560_vm4, %v2545_v41, %v4834_v10  ;;  %v4849_v46 = vunpack.i.h.bf16 %v4847_v63  ;;  %v4848_v51 = vunpack.i.l.bf16 %v4847_v63 }
 0x14a   : > { %v4842_v62 = vpop.permute.xlu0 %4841  ;;  %5136 = vrot.lane.b32.xlu1 %v9959_v59, %s5688_s6  ;;  %v4694_v32 = vunpack.i.h.bf16 %v7115_v3  ;;  %v4693_v41 = vunpack.i.l.bf16 %v7115_v3  ;;  %v10025_v59 = vld [vmem:[#allocation52_spill] sm:$0xff]  ;;  %v2555_v49 = vsel %vm2495_vm3, %v7470_v1, %v4699_v26  ;;  %v2554_v8 = vsel %vm2495_vm3, %v7480_v2, %v4698_v52 }
 0x14b   : > { %v7603_v10 = vsel %vm2560_vm4, %v2550_v20, %v4848_v51  ;;  %v7606_v12 = vsel %vm2560_vm4, %v2551_v18, %v4849_v46  ;;  %v4844_v31 = vunpack.i.h.bf16 %v4842_v62  ;;  %v4843_v6 = vunpack.i.l.bf16 %v4842_v62  ;;  %v10027_v26 = vld [vmem:[#allocation44_spill] sm:$0xff] }
 0x14c   : > { %5131 = vrot.lane.b32.xlu0 %v10025_v59, %s5686_s29  ;;  %v4857_v11 = vpop.permute.xlu1 %4856  ;;  %v4709_v3 = vunpack.i.h.bf16 %v10026_v23  ;;  %v4708_v55 = vunpack.i.l.bf16 %v10026_v23  ;;  %v2552_v1 = vsel %vm2495_vm3, %v7488_v53, %v4693_v41  ;;  %v2553_v2 = vsel %vm2495_vm3, %v7484_v30, %v4694_v32  ;;  %v10030_v41 = vld [vmem:[#allocation90_spill] sm:$0xff] }
 0x14d   : > { %v7617_v28 = vsel %vm2560_vm4, %v2548_v0, %v4843_v6  ;;  %v7620_v54 = vsel %vm2560_vm4, %v2549_v16, %v4844_v31  ;;  %v4859_v63 = vunpack.i.h.bf16 %v4857_v11  ;;  %v4858_v46 = vunpack.i.l.bf16 %v4857_v11 }
 0x14e   : > { %v4852_v51 = vpop.permute.xlu0 %4851  ;;  %5146 = vrot.lane.b32.xlu1 %v9964_v50, %s5688_s6  ;;  %v4704_v52 = vunpack.i.h.bf16 %v10027_v26  ;;  %v4703_v31 = vunpack.i.l.bf16 %v10027_v26  ;;  %v10028_v50 = vld [vmem:[#allocation55_spill] sm:$0xff]  ;;  %v10029_v53 = vunpack.i.l.bf16 %v10003_v36  ;;  %v2559_v32 = vsel %vm2495_vm3, %v7493_v29, %v4709_v3  ;;  %v10035_v26 = vld [vmem:[#allocation134_spill] sm:$0xff] }
 0x14f   : > { %v7631_v18 = vsel %vm2560_vm4, %v2554_v8, %v4858_v46  ;;  %v7634_v20 = vsel %vm2560_vm4, %v2555_v49, %v4859_v63  ;;  %v4854_v5 = vunpack.i.h.bf16 %v4852_v51  ;;  %v4853_v62 = vunpack.i.l.bf16 %v4852_v51 }
 0x150   : > { %5141 = vrot.lane.b32.xlu0 %v10028_v50, %s5688_s6  ;;  %v4867_v6 = vpop.permute.xlu1 %4866  ;;  %v2491_v30 = vsel %vm2430_vm2, %v10030_v41, %v10029_v53  ;;  %v2558_v63 = vsel %vm2495_vm3, %v7519_v35, %v4708_v55  ;;  %v10031_v49 = vpack.i.bf16 %v10006_v22, %v10005_v19  ;;  %v2557_v29 = vsel %vm2495_vm3, %v7530_v13, %v4704_v52  ;;  %v10032_v35 = vld [vmem:[#allocation51_spill] sm:$0xff]  ;;  %v10034_v22 = vld [vmem:[#allocation108_spill] sm:$0xff]  ;;  %v10039_v53 = vld [vmem:[#allocation49_spill] sm:$0xff] }
 0x151   : > { %v7645_v0 = vsel %vm2560_vm4, %v2552_v1, %v4853_v62  ;;  %v7648_v16 = vsel %vm2560_vm4, %v2553_v2, %v4854_v5  ;;  %v4869_v59 = vunpack.i.h.bf16 %v4867_v6  ;;  %v4868_v11 = vunpack.i.l.bf16 %v4867_v6  ;;  %v10033_v19 = vld [vmem:[#allocation111_spill] sm:$0xff]  ;;  %v10037_v50 = vld [vmem:[#allocation156_spill] sm:$0xff] }
 0x152   : > { %v4862_v46 = vpop.permute.xlu0 %4861  ;;  %5156 = vrot.lane.b32.xlu1 %v10031_v49, %s5684_s25  ;;  %v2556_v5 = vsel %vm2495_vm3, %v2491_v30, %v4703_v31  ;;  %v5160_v55 = vpack.i.bf16 %v10034_v22, %v10033_v19  ;;  %v10036_v31 = vld [vmem:[#allocation137_spill] sm:$0xff] }
 0x153   : > { %v7663_v8 = vsel %vm2560_vm4, %v2558_v63, %v4868_v11  ;;  %v7666_v36 = vsel %vm2560_vm4, %v2559_v32, %v4869_v59  ;;  %v4864_v23 = vunpack.i.h.bf16 %v4862_v46  ;;  %v4863_v51 = vunpack.i.l.bf16 %v4862_v46  ;;  %v10038_v11 = vld [vmem:[#allocation18_spill] sm:$0xff]  ;;  %v10040_v46 = vld [vmem:[#allocation17_spill] sm:$0xff] }
 0x154   : > { %5151 = vrot.lane.b32.xlu0 %v10032_v35, %s5688_s6  ;;  %v7673_v3 = vpop.permute.xlu1 %4876 }
 0x155   : > { %v7678_v62 = vsel %vm2560_vm4, %v2556_v5, %v4863_v51  ;;  %v7681_v1 = vsel %vm2560_vm4, %v2557_v29, %v4864_v23  ;;  %v10043_v29 = vld [vmem:[#allocation64_spill] sm:$0xff] }
 0x156   : > { %v7683_v2 = vpop.permute.xlu0 %4871  ;;  %5166 = vrot.lane.b32.xlu1 %v10035_v26, %s5685_s26 }
 0x158   : > { %5161 = vrot.lane.b32.xlu0 %v5160_v55, %s5684_s25  ;;  %v7688_v13 = vpop.permute.xlu1 %4886 }
 0x15a   : > { %v7690_v52 = vpop.permute.xlu0 %4881  ;;  %5176 = vrot.lane.b32.xlu1 %v10036_v31, %s5685_s26 }
 0x15c   : > { %5171 = vrot.lane.b32.xlu0 %v10037_v50, %s5685_s26  ;;  %v7696_v6 = vpop.permute.xlu1 %4896 }
 0x15e   : > { %v7698_v59 = vpop.permute.xlu0 %4891  ;;  %5186 = vrot.lane.b32.xlu1 %v10038_v11, %s5686_s29  ;;  %v10048_v11 = vld [vmem:[#allocation61_spill] sm:$0xff] }
 0x160   : > { %5181 = vrot.lane.b32.xlu0 %v10039_v53, %s5685_s26  ;;  %v4907_v41 = vpop.permute.xlu1 %4906 }
 0x161   : > { %v4909_v30 = vunpack.i.h.bf16 %v4907_v41  ;;  %v4908_v32 = vunpack.i.l.bf16 %v4907_v41 }
 0x162   : > { %v4902_v63 = vpop.permute.xlu0 %4901  ;;  %5196 = vrot.lane.b32.xlu1 %v10040_v46, %s5686_s29 }
 0x163   : > { %v7708_v49 = vsel %vm2625_vm6, %v7292_v25, %v4908_v32  ;;  %v7712_v23 = vsel %vm2625_vm6, %v7295_v14, %v4909_v30  ;;  %v4904_v51 = vunpack.i.h.bf16 %v4902_v63  ;;  %v4903_v5 = vunpack.i.l.bf16 %v4902_v63  ;;  %v10052_v32 = vld [vmem:[#allocation114_spill] sm:$0xff] }
 0x164   : > { %10041 = vst [vmem:[#allocation181_spill] sm:$0xff] %v7708_v49  ;;  %10042 = vst [vmem:[#allocation182_spill] sm:$0xff] %v7712_v23  ;;  %5191 = vrot.lane.b32.xlu0 %v10043_v29, %s5686_s29  ;;  %v4917_v35 = vpop.permute.xlu1 %4916  ;;  %v10168_v23 = vld [vmem:[#allocation186_spill] sm:$0xff] }
 0x165   : > { %v7718_v19 = vsel %vm2625_vm6, %v7306_v57, %v4903_v5  ;;  %v7722_v22 = vsel %vm2625_vm6, %v7309_v42, %v4904_v51  ;;  %v4919_v25 = vunpack.i.h.bf16 %v4917_v35  ;;  %v4918_v55 = vunpack.i.l.bf16 %v4917_v35  ;;  %v10055_v5 = vld [vmem:[#allocation63_spill] sm:$0xff] }
 0x166   : > { %10044 = vst [vmem:[#allocation158_spill] sm:$0xff] %v7718_v19  ;;  %10045 = vst [vmem:[#allocation62_spill] sm:$0xff] %v7722_v22  ;;  %v4912_v26 = vpop.permute.xlu0 %4911  ;;  %5206 = vrot.lane.b32.xlu1 %v9962_v33, %s5688_s6  ;;  %v10167_v22 = vld [vmem:[#allocation185_spill] sm:$0xff]  ;;  %v4644_v49 = vunpack.i.h.bf16 %v10168_v23 }
 0x167   : > { %v7728_v14 = vsel %vm2625_vm6, %v7320_v44, %v4918_v55  ;;  %v7732_v31 = vsel %vm2625_vm6, %v7323_v47, %v4919_v25  ;;  %v4914_v57 = vunpack.i.h.bf16 %v4912_v26  ;;  %v4913_v50 = vunpack.i.l.bf16 %v4912_v26  ;;  %v10051_v47 = vld [vmem:[#allocation109_spill] sm:$0xff] }
 0x168   : > { %10046 = vst [vmem:[#allocation50_spill] sm:$0xff] %v7728_v14  ;;  %10047 = vst [vmem:[#allocation70_spill] sm:$0xff] %v7732_v31  ;;  %5201 = vrot.lane.b32.xlu0 %v10048_v11, %s5686_s29  ;;  %v4927_v42 = vpop.permute.xlu1 %4926  ;;  %v5225_v63 = vpack.i.bf16 %v10052_v32, %v10051_v47  ;;  %v10061_v11 = vld [vmem:[#allocation115_spill] sm:$0xff]  ;;  %v10065_v32 = vld [vmem:[#allocation136_spill] sm:$0xff]  ;;  %v4649_v19 = vunpack.i.h.bf16 %v10167_v22 }
 0x169   : > { %v7738_v53 = vsel %vm2625_vm6, %v7334_v40, %v4913_v50  ;;  %v7742_v33 = vsel %vm2625_vm6, %v7337_v39, %v4914_v57  ;;  %v4929_v44 = vunpack.i.h.bf16 %v4927_v42  ;;  %v4928_v41 = vunpack.i.l.bf16 %v4927_v42  ;;  %v10060_v50 = vld [vmem:[#allocation59_spill] sm:$0xff]  ;;  %v10062_v42 = vld [vmem:[#allocation112_spill] sm:$0xff] }
 0x16a   : > { %10049 = vst [vmem:[#allocation160_spill] sm:$0xff] %v7738_v53  ;;  %10050 = vst [vmem:[#allocation69_spill] sm:$0xff] %v7742_v33  ;;  %v4922_v30 = vpop.permute.xlu0 %4921  ;;  %5216 = vrot.lane.b32.xlu1 %v9968_v34, %s5688_s6  ;;  %v10149_v33 = vld [vmem:[#allocation170_spill] sm:$0xff]  ;;  %v10150_v31 = vld [vmem:[#allocation80_spill] sm:$0xff] }
 0x16b   : > { %v7750_v46 = vsel %vm2625_vm6, %v7348_v43, %v4928_v41  ;;  %v7754_v40 = vsel %vm2625_vm6, %v7351_v9, %v4929_v44  ;;  %v4924_v51 = vunpack.i.h.bf16 %v4922_v30  ;;  %v4923_v39 = vunpack.i.l.bf16 %v4922_v30 }
 0x16c   : > { %10053 = vst [vmem:[#allocation58_spill] sm:$0xff] %v7750_v46  ;;  %10054 = vst [vmem:[#allocation74_spill] sm:$0xff] %v7754_v40  ;;  %5211 = vrot.lane.b32.xlu0 %v10055_v5, %s5688_s6  ;;  %v4937_v29 = vpop.permute.xlu1 %4936  ;;  %v5230_v44 = vpack.i.bf16 %v10062_v42, %v10061_v11  ;;  %v10075_v11 = vld [vmem:[#allocation20_spill] sm:$0xff]  ;;  %v10076_v42 = vld [vmem:[#allocation57_spill] sm:$0xff]  ;;  %v4568_v53 = vunpack.i.l.bf16 %v10149_v33 }
 0x16d   : > { %v7760_v34 = vsel %vm2625_vm6, %v7362_v4, %v4923_v39  ;;  %v7764_v35 = vsel %vm2625_vm6, %v7365_v38, %v4924_v51  ;;  %v4939_v43 = vunpack.i.h.bf16 %v4937_v29  ;;  %v4938_v25 = vunpack.i.l.bf16 %v4937_v29  ;;  %v10067_v51 = vld [vmem:[#allocation36_spill] sm:$0xff]  ;;  %v10111_v40 = vld [vmem:[#allocation7_spill] sm:$0xff] }
 0x16e   : > { %10056 = vst [vmem:[#allocation73_spill] sm:$0xff] %v7760_v34  ;;  %10057 = vst [vmem:[#allocation162_spill] sm:$0xff] %v7764_v35  ;;  %v4932_v55 = vpop.permute.xlu0 %4931  ;;  %5226 = vrot.lane.b32.xlu1 %v5225_v63, %s5684_s25  ;;  %v10069_v29 = vld [vmem:[#allocation96_spill] sm:$0xff]  ;;  %v10145_v34 = vld [vmem:[#allocation38_spill] sm:$0xff] }
 0x16f   : > { %v7769_v9 = vsel %vm2625_vm6, %v7376_v60, %v4938_v25  ;;  %v7773_v26 = vsel %vm2625_vm6, %v7379_v15, %v4939_v43  ;;  %v4934_v57 = vunpack.i.h.bf16 %v4932_v55  ;;  %v4933_v4 = vunpack.i.l.bf16 %v4932_v55  ;;  %v10071_v25 = vld [vmem:[#allocation16_spill] sm:$0xff] }
 0x170   : > { %10058 = vst [vmem:[#allocation78_spill] sm:$0xff] %v7769_v9  ;;  %10059 = vst [vmem:[#allocation76_spill] sm:$0xff] %v7773_v26  ;;  %5221 = vrot.lane.b32.xlu0 %v10060_v50, %s5688_s6  ;;  %v4947_v38 = vpop.permute.xlu1 %4946  ;;  %v10099_v9 = vld [vmem:[#allocation124_spill] sm:$0xff] }
 0x171   : > { %v7781_v41 = vsel %vm2625_vm6, %v7390_v24, %v4933_v4  ;;  %v7785_v60 = vsel %vm2625_vm6, %v7393_v58, %v4934_v57  ;;  %v4949_v30 = vunpack.i.h.bf16 %v4947_v38  ;;  %v4948_v15 = vunpack.i.l.bf16 %v4947_v38  ;;  %v10073_v57 = vld [vmem:[#allocation139_spill] sm:$0xff]  ;;  %v10074_v4 = vld [vmem:[#allocation60_spill] sm:$0xff] }
 0x172   : > { %10063 = vst [vmem:[#allocation82_spill] sm:$0xff] %v7781_v41  ;;  %10064 = vst [vmem:[#allocation188_spill] sm:$0xff] %v7785_v60  ;;  %v4942_v47 = vpop.permute.xlu0 %4941  ;;  %5236 = vrot.lane.b32.xlu1 %v10065_v32, %s5685_s26  ;;  %v10077_v32 = vld [vmem:[#allocation19_spill] sm:$0xff]  ;;  %v10106_v46 = vld [vmem:[#allocation116_spill] sm:$0xff] }
 0x173   : > { %v7791_v63 = vsel %vm2625_vm6, %v7404_v56, %v4948_v15  ;;  %v7795_v39 = vsel %vm2625_vm6, %v10067_v51, %v4949_v30  ;;  %v4944_v24 = vunpack.i.h.bf16 %v4942_v47  ;;  %v4943_v5 = vunpack.i.l.bf16 %v4942_v47  ;;  %v10104_v41 = vld [vmem:[#allocation67_spill] sm:$0xff] }
 0x174   : > { %10066 = vst [vmem:[#allocation133_spill] sm:$0xff] %v7791_v63  ;;  %10068 = vst [vmem:[#allocation81_spill] sm:$0xff] %v7795_v39  ;;  %5231 = vrot.lane.b32.xlu0 %v5230_v44, %s5684_s25  ;;  %v7798_v58 = vpop.permute.xlu1 %4956 }
 0x175   : > { %v7802_v43 = vsel %vm2625_vm6, %v10069_v29, %v4943_v5  ;;  %v7806_v55 = vsel %vm2625_vm6, %v10071_v25, %v4944_v24  ;;  %v10080_v5 = vld [vmem:[#allocation72_spill] sm:$0xff] }
 0x176   : > { %10070 = vst [vmem:[#allocation85_spill] sm:$0xff] %v7802_v43  ;;  %10072 = vst [vmem:[#allocation84_spill] sm:$0xff] %v7806_v55  ;;  %v7808_v56 = vpop.permute.xlu0 %4951  ;;  %5246 = vrot.lane.b32.xlu1 %v10073_v57, %s5685_s26  ;;  %v10095_v43 = vld [vmem:[#allocation71_spill] sm:$0xff] }
 0x178   : > { %5241 = vrot.lane.b32.xlu0 %v10074_v4, %s5685_s26  ;;  %v7814_v50 = vpop.permute.xlu1 %4966 }
 0x17a   : > { %v7816_v38 = vpop.permute.xlu0 %4961  ;;  %5256 = vrot.lane.b32.xlu1 %v10075_v11, %s5686_s29  ;;  %v10081_v11 = vld [vmem:[#allocation102_spill] sm:$0xff] }
 0x17c   : > { %5251 = vrot.lane.b32.xlu0 %v10076_v42, %s5685_s26  ;;  %v4977_v44 = vpop.permute.xlu1 %4976 }
 0x17d   : > { %v4979_v30 = vunpack.i.h.bf16 %v4977_v44  ;;  %v4978_v15 = vunpack.i.l.bf16 %v4977_v44 }
 0x17e   : > { %v7822_v47 = vpop.permute.xlu0 %4971  ;;  %5266 = vrot.lane.b32.xlu1 %v10077_v32, %s5686_s29 }
 0x17f   : > { %v7828_v51 = vsel %vm2625_vm6, %v7523_v21, %v4978_v15  ;;  %v7832_v24 = vsel %vm2625_vm6, %v7526_v61, %v4979_v30  ;;  %v10083_v21 = vld [vmem:[#allocation180_spill] sm:$0xff] }
 0x180   : > { %10078 = vst [vmem:[#allocation88_spill] sm:$0xff] %v7828_v51  ;;  %10079 = vst [vmem:[#allocation66_spill] sm:$0xff] %v7832_v24  ;;  %5261 = vrot.lane.b32.xlu0 %v10080_v5, %s5686_s29  ;;  %v4987_v29 = vpop.permute.xlu1 %4986  ;;  %v10085_v15 = vld [vmem:[#allocation68_spill] sm:$0xff] }
 0x181   : > { %v4989_v25 = vunpack.i.h.bf16 %v4987_v29  ;;  %v4988_v57 = vunpack.i.l.bf16 %v4987_v29  ;;  %v10087_v29 = vld [vmem:[#allocation99_spill] sm:$0xff] }
 0x182   : > { %v4982_v4 = vpop.permute.xlu0 %4981  ;;  %5276 = vrot.lane.b32.xlu1 %v10081_v11, %s5688_s6 }
 0x183   : > { %v7840_v42 = vsel %vm2625_vm6, %v7550_v7, %v4988_v57  ;;  %v7844_v44 = vsel %vm2625_vm6, %v10083_v21, %v4989_v25  ;;  %v4984_v61 = vunpack.i.h.bf16 %v4982_v4  ;;  %v4983_v30 = vunpack.i.l.bf16 %v4982_v4  ;;  %v10089_v25 = vld [vmem:[#allocation101_spill] sm:$0xff]  ;;  %v10091_v4 = vld [vmem:[#allocation118_spill] sm:$0xff] }
 0x184   : > { %10082 = vst [vmem:[#allocation40_spill] sm:$0xff] %v7840_v42  ;;  %10084 = vst [vmem:[#allocation110_spill] sm:$0xff] %v7844_v44  ;;  %5271 = vrot.lane.b32.xlu0 %v10085_v15, %s5686_s29  ;;  %v4997_v32 = vpop.permute.xlu1 %4996  ;;  %v10090_v21 = vld [vmem:[#allocation113_spill] sm:$0xff] }
 0x185   : > { %v7850_v5 = vsel %vm2625_vm6, %v7563_v48, %v4983_v30  ;;  %v7854_v11 = vsel %vm2625_vm6, %v10087_v29, %v4984_v61  ;;  %v4999_v7 = vunpack.i.h.bf16 %v4997_v32  ;;  %v4998_v57 = vunpack.i.l.bf16 %v4997_v32  ;;  %v10094_v29 = vld [vmem:[#allocation120_spill] sm:$0xff]  ;;  %v10155_v44 = vld [vmem:[#allocation53_spill] sm:$0xff] }
 0x186   : > { %10086 = vst [vmem:[#allocation190_spill] sm:$0xff] %v7850_v5  ;;  %10088 = vst [vmem:[#allocation191_spill] sm:$0xff] %v7854_v11  ;;  %v4992_v63 = vpop.permute.xlu0 %4991  ;;  %5286 = vrot.lane.b32.xlu1 %v10089_v25, %s5688_s6  ;;  %v5295_v39 = vpack.i.bf16 %v10091_v4, %v10090_v21  ;;  %v4404_v55 = vunpack.i.h.bf16 %v10094_v29  ;;  %v4403_v32 = vunpack.i.l.bf16 %v10094_v29  ;;  %v4409_v29 = vunpack.i.h.bf16 %v10099_v9 }
 0x187   : > { %v7862_v15 = vsel %vm2625_vm6, %v7575_v17, %v4998_v57  ;;  %v7866_v48 = vsel %vm2625_vm6, %v7578_v37, %v4999_v7  ;;  %v4994_v30 = vunpack.i.h.bf16 %v4992_v63  ;;  %v4993_v61 = vunpack.i.l.bf16 %v4992_v63  ;;  %v10098_v57 = vld [vmem:[#allocation121_spill] sm:$0xff] }
 0x188   : > { %10092 = vst [vmem:[#allocation135_spill] sm:$0xff] %v7862_v15  ;;  %10093 = vst [vmem:[#allocation87_spill] sm:$0xff] %v7866_v48  ;;  %5281 = vrot.lane.b32.xlu0 %v10095_v43, %s5688_s6  ;;  %v5007_v25 = vpop.permute.xlu1 %5006  ;;  %v4394_v63 = vunpack.i.h.bf16 %v10098_v57  ;;  %v4393_v4 = vunpack.i.l.bf16 %v10098_v57  ;;  %v10103_v57 = vld [vmem:[#allocation2_spill] sm:$0xff] }
 0x189   : > { %v7874_v21 = vsel %vm2625_vm6, %v7589_v45, %v4993_v61  ;;  %v7878_v17 = vsel %vm2625_vm6, %v7592_v27, %v4994_v30  ;;  %v5009_v37 = vunpack.i.h.bf16 %v5007_v25  ;;  %v5008_v7 = vunpack.i.l.bf16 %v5007_v25  ;;  %v10102_v61 = vld [vmem:[#allocation3_spill] sm:$0xff] }
 0x18a   : > { %10096 = vst [vmem:[#allocation92_spill] sm:$0xff] %v7874_v21  ;;  %10097 = vst [vmem:[#allocation45_spill] sm:$0xff] %v7878_v17  ;;  %v5002_v26 = vpop.permute.xlu0 %5001  ;;  %5296 = vrot.lane.b32.xlu1 %v5295_v39, %s5684_s25  ;;  %v7894_v25 = vsel %vm2430_vm2, %v10102_v61, %v4404_v55  ;;  %v7898_v60 = vsel %vm2430_vm2, %v10103_v57, %v4403_v32  ;;  %v4408_v39 = vunpack.i.l.bf16 %v10099_v9  ;;  %v10109_v61 = vld [vmem:[#allocation5_spill] sm:$0xff]  ;;  %v10110_v57 = vld [vmem:[#allocation4_spill] sm:$0xff] }
 0x18b   : > { %v7886_v43 = vsel %vm2625_vm6, %v7603_v10, %v5008_v7  ;;  %v7890_v45 = vsel %vm2625_vm6, %v7606_v12, %v5009_v37  ;;  %v5004_v27 = vunpack.i.h.bf16 %v5002_v26  ;;  %v5003_v30 = vunpack.i.l.bf16 %v5002_v26  ;;  %v10105_v7 = vld [vmem:[#allocation119_spill] sm:$0xff]  ;;  %v10148_v17 = vld [vmem:[#allocation166_spill] sm:$0xff] }
 0x18c   : > { %10100 = vst [vmem:[#allocation155_spill] sm:$0xff] %v7886_v43  ;;  %10101 = vst [vmem:[#allocation9_spill] sm:$0xff] %v7890_v45  ;;  %5291 = vrot.lane.b32.xlu0 %v10104_v41, %s5688_s6  ;;  %v5017_v10 = vpop.permute.xlu1 %5016  ;;  %v5300_v12 = vpack.i.bf16 %v10106_v46, %v10105_v7  ;;  %v7915_v9 = vsel %vm2430_vm2, %v10109_v61, %v4394_v63  ;;  %v7919_v41 = vsel %vm2430_vm2, %v10110_v57, %v4393_v4  ;;  %v10115_v4 = vld [vmem:[#allocation6_spill] sm:$0xff] }
 0x18d   : > { %v7907_v26 = vsel %vm2625_vm6, %v7617_v28, %v5003_v30  ;;  %v7911_v55 = vsel %vm2625_vm6, %v7620_v54, %v5004_v27  ;;  %v5019_v37 = vunpack.i.h.bf16 %v5017_v10  ;;  %v5018_v32 = vunpack.i.l.bf16 %v5017_v10  ;;  %v10112_v30 = vld [vmem:[#allocation138_spill] sm:$0xff] }
 0x18e   : > { %10107 = vst [vmem:[#allocation192_spill] sm:$0xff] %v7907_v26  ;;  %10108 = vst [vmem:[#allocation157_spill] sm:$0xff] %v7911_v55  ;;  %v7923_v46 = vsel %vm2430_vm2, %v10111_v40, %v4409_v29  ;;  %v5012_v28 = vpop.permute.xlu0 %5011  ;;  %5306 = vrot.lane.b32.xlu1 %v10112_v30, %s5685_s26  ;;  %v7937_v7 = vsel %vm2430_vm2, %v10115_v4, %v4408_v39  ;;  %v10116_v40 = vld [vmem:[#allocation127_spill] sm:$0xff]  ;;  %v10120_v4 = vld [vmem:[#allocation130_spill] sm:$0xff]  ;;  %v4554_v21 = vunpack.i.h.bf16 %v10148_v17 }
 0x18f   : > { %v7929_v54 = vsel %vm2625_vm6, %v7631_v18, %v5018_v32  ;;  %v7933_v63 = vsel %vm2625_vm6, %v7634_v20, %v5019_v37  ;;  %v5014_v27 = vunpack.i.h.bf16 %v5012_v28  ;;  %v5013_v10 = vunpack.i.l.bf16 %v5012_v28  ;;  %v10119_v28 = vld [vmem:[#allocation128_spill] sm:$0xff]  ;;  %v10126_v45 = vld [vmem:[#allocation10_spill] sm:$0xff] }
 0x190   : > { %10113 = vst [vmem:[#allocation193_spill] sm:$0xff] %v7929_v54  ;;  %10114 = vst [vmem:[#allocation14_spill] sm:$0xff] %v7933_v63  ;;  %v4399_v29 = vunpack.i.h.bf16 %v10116_v40  ;;  %v4398_v61 = vunpack.i.l.bf16 %v10116_v40  ;;  %5301 = vrot.lane.b32.xlu0 %v5300_v12, %s5684_s25  ;;  %v5027_v57 = vpop.permute.xlu1 %5026  ;;  %v4419_v39 = vunpack.i.h.bf16 %v10119_v28  ;;  %v4418_v30 = vunpack.i.l.bf16 %v10119_v28  ;;  %v10121_v12 = vld [vmem:[#allocation141_spill] sm:$0xff]  ;;  %v10124_v54 = vld [vmem:[#allocation142_spill] sm:$0xff] }
 0x191   : > { %v7944_v18 = vsel %vm2625_vm6, %v7645_v0, %v5013_v10  ;;  %v7948_v20 = vsel %vm2625_vm6, %v7648_v16, %v5014_v27  ;;  %v5029_v37 = vunpack.i.h.bf16 %v5027_v57  ;;  %v5028_v32 = vunpack.i.l.bf16 %v5027_v57  ;;  %v10141_v55 = vld [vmem:[#allocation150_spill] sm:$0xff] }
 0x192   : > { %10117 = vst [vmem:[#allocation194_spill] sm:$0xff] %v7944_v18  ;;  %10118 = vst [vmem:[#allocation56_spill] sm:$0xff] %v7948_v20  ;;  %v4414_v63 = vunpack.i.h.bf16 %v10120_v4  ;;  %v5022_v40 = vpop.permute.xlu0 %5021  ;;  %5316 = vrot.lane.b32.xlu1 %v10121_v12, %s5685_s26  ;;  %v4413_v57 = vunpack.i.l.bf16 %v10120_v4  ;;  %v4479_v28 = vunpack.i.h.bf16 %v10124_v54  ;;  %v4478_v20 = vunpack.i.l.bf16 %v10124_v54  ;;  %v10125_v18 = vld [vmem:[#allocation159_spill] sm:$0xff]  ;;  %v10130_v4 = vld [vmem:[#allocation8_spill] sm:$0xff] }
 0x193   : > { %v7957_v0 = vsel %vm2625_vm6, %v7663_v8, %v5028_v32  ;;  %v7961_v16 = vsel %vm2625_vm6, %v7666_v36, %v5029_v37  ;;  %v5024_v27 = vunpack.i.h.bf16 %v5022_v40  ;;  %v5023_v10 = vunpack.i.l.bf16 %v5022_v40  ;;  %v10127_v32 = vld [vmem:[#allocation144_spill] sm:$0xff] }
 0x194   : > { %10122 = vst [vmem:[#allocation195_spill] sm:$0xff] %v7957_v0  ;;  %10123 = vst [vmem:[#allocation52_spill] sm:$0xff] %v7961_v16  ;;  %5311 = vrot.lane.b32.xlu0 %v10125_v18, %s5685_s26  ;;  %v7968_v12 = vpop.permute.xlu1 %5036  ;;  %v2434_v8 = vsel %vm2430_vm2, %v10126_v45, %v4399_v29  ;;  %v4474_v0 = vunpack.i.h.bf16 %v10127_v32  ;;  %v2433_v54 = vsel %vm2430_vm2, %v10130_v4, %v4398_v61  ;;  %v10131_v40 = vld [vmem:[#allocation12_spill] sm:$0xff]  ;;  %v10132_v16 = vld [vmem:[#allocation11_spill] sm:$0xff]  ;;  %v4483_v26 = vunpack.i.l.bf16 %v10141_v55 }
 0x195   : > { %v7975_v36 = vsel %vm2625_vm6, %v7678_v62, %v5023_v10  ;;  %v7979_v37 = vsel %vm2625_vm6, %v7681_v1, %v5024_v27  ;;  %v2442_v18 = vsel %vm2430_vm2, %v10131_v40, %v4419_v39  ;;  %v2441_v43 = vsel %vm2430_vm2, %v10132_v16, %v4418_v30  ;;  %v10133_v29 = vld [vmem:[#allocation22_spill] sm:$0xff]  ;;  %v10134_v62 = vld [vmem:[#allocation15_spill] sm:$0xff]  ;;  %v10136_v4 = vld [vmem:[#allocation13_spill] sm:$0xff] }
 0x196   : > { %10128 = vst [vmem:[#allocation31_spill] sm:$0xff] %v7975_v36  ;;  %10129 = vst [vmem:[#allocation44_spill] sm:$0xff] %v7979_v37  ;;  %v7987_v45 = vpop.permute.xlu0 %5031  ;;  %5326 = vrot.lane.b32.xlu1 %v10133_v29, %s5686_s29  ;;  %v7993_v10 = vsel %vm2430_vm2, %v10134_v62, %v4414_v63  ;;  %v4473_v1 = vunpack.i.l.bf16 %v10127_v32  ;;  %v10135_v27 = vld [vmem:[#allocation146_spill] sm:$0xff]  ;;  %v2439_v39 = vsel %vm2430_vm2, %v10136_v4, %v4413_v57  ;;  %v10137_v40 = vld [vmem:[#allocation35_spill] sm:$0xff] }
 0x197   : > { %v4489_v37 = vunpack.i.h.bf16 %v10135_v27  ;;  %v4488_v61 = vunpack.i.l.bf16 %v10135_v27  ;;  %v2466_v30 = vsel %vm2430_vm2, %v10137_v40, %v4479_v28  ;;  %v10138_v16 = vld [vmem:[#allocation33_spill] sm:$0xff]  ;;  %v10140_v32 = vld [vmem:[#allocation39_spill] sm:$0xff]  ;;  %v4484_v27 = vunpack.i.h.bf16 %v10141_v55  ;;  %v10143_v40 = vld [vmem:[#allocation164_spill] sm:$0xff] }
 0x198   : > { %v8004_v36 = vsel %vm2430_vm2, %v10138_v16, %v4478_v20  ;;  %v10139_v29 = vld [vmem:[#allocation65_spill] sm:$0xff]  ;;  %v8008_v63 = vpop.permute.xlu1 %5046  ;;  %v2464_v62 = vsel %vm2430_vm2, %v10140_v32, %v4474_v0  ;;  %v4559_v35 = vunpack.i.h.bf16 %v10143_v40  ;;  %v4558_v20 = vunpack.i.l.bf16 %v10143_v40  ;;  %v10146_v32 = vld [vmem:[#allocation43_spill] sm:$0xff]  ;;  %v10147_v55 = vld [vmem:[#allocation42_spill] sm:$0xff] }
 0x199   : > { %5321 = vrot.lane.b32.xlu0 %v10139_v29, %s5685_s26  ;;  %v10142_v57 = vld [vmem:[#allocation153_spill] sm:$0xff]  ;;  %v2463_v0 = vsel %vm2430_vm2, %v10145_v34, %v4473_v1  ;;  %v2470_v48 = vsel %vm2430_vm2, %v10146_v32, %v4489_v37  ;;  %v2469_v15 = vsel %vm2430_vm2, %v10147_v55, %v4488_v61  ;;  %v4569_v40 = vunpack.i.h.bf16 %v10149_v33  ;;  %v10151_v34 = vld [vmem:[#allocation47_spill] sm:$0xff]  ;;  %v10152_v37 = vld [vmem:[#allocation46_spill] sm:$0xff] }
 0x19a   : > { %v4494_v4 = vunpack.i.h.bf16 %v10142_v57  ;;  %v4493_v28 = vunpack.i.l.bf16 %v10142_v57  ;;  %v8018_v16 = vpop.permute.xlu0 %5041  ;;  %v10144_v29 = vld [vmem:[#allocation21_spill] sm:$0xff]  ;;  %v4553_v57 = vunpack.i.l.bf16 %v10148_v17  ;;  %v2468_v1 = vsel %vm2430_vm2, %v10151_v34, %v4484_v27  ;;  %v10153_v61 = vld [vmem:[#allocation54_spill] sm:$0xff]  ;;  %v10154_v17 = vld [vmem:[#allocation172_spill] sm:$0xff] }
 0x19b   : > { %5336 = vrot.lane.b32.xlu1 %v10144_v29, %s5686_s29  ;;  %v2467_v32 = vsel %vm2430_vm2, %v10152_v37, %v4483_v26  ;;  %v4564_v14 = vunpack.i.h.bf16 %v10154_v17  ;;  %v2498_v42 = vsel %vm2495_vm3, %v2433_v54, %v4558_v20  ;;  %v10156_v27 = vld [vmem:[#allocation106_spill] sm:$0xff]  ;;  %v10160_v20 = vld [vmem:[#allocation176_spill] sm:$0xff] }
 0x19c   : > { %v8034_v29 = vpop.permute.xlu1 %5056  ;;  %v8042_v55 = vsel %vm2430_vm2, %v10153_v61, %v4494_v4  ;;  %v2471_v33 = vsel %vm2430_vm2, %v10155_v44, %v4493_v28  ;;  %v8055_v26 = vsel %vm2495_vm3, %v7919_v41, %v4553_v57  ;;  %v4563_v4 = vunpack.i.l.bf16 %v10154_v17  ;;  %v10157_v34 = vld [vmem:[#allocation174_spill] sm:$0xff]  ;;  %v10158_v41 = vld [vmem:[#allocation77_spill] sm:$0xff] }
 0x19d   : > { %5331 = vrot.lane.b32.xlu0 %v10150_v31, %s5686_s29  ;;  %v2499_v31 = vsel %vm2495_vm3, %v2434_v8, %v4559_v35  ;;  %v4579_v37 = vunpack.i.h.bf16 %v10157_v34  ;;  %v4578_v61 = vunpack.i.l.bf16 %v10157_v34  ;;  %v8062_v44 = vsel %vm2495_vm3, %v7915_v9, %v4554_v21  ;;  %v10161_v9 = vld [vmem:[#allocation183_spill] sm:$0xff] }
 0x19e   : > { %v8049_v11 = vpop.permute.xlu0 %5051  ;;  %v8066_v35 = vsel %vm2495_vm3, %v7923_v46, %v4569_v40  ;;  %v2502_v8 = vsel %vm2495_vm3, %v7937_v7, %v4568_v53  ;;  %v8076_v28 = vsel %vm2495_vm3, %v7894_v25, %v4564_v14  ;;  %v4574_v57 = vunpack.i.h.bf16 %v10160_v20  ;;  %v10162_v40 = vld [vmem:[#allocation184_spill] sm:$0xff]  ;;  %v10164_v34 = vld [vmem:[#allocation103_spill] sm:$0xff]  ;;  %v10166_v14 = vld [vmem:[#allocation122_spill] sm:$0xff] }
 0x19f   : > { %5346 = vrot.lane.b32.xlu1 %v10156_v27, %s5688_s6  ;;  %v4573_v21 = vunpack.i.l.bf16 %v10160_v20  ;;  %v4639_v17 = vunpack.i.h.bf16 %v10161_v9  ;;  %v4638_v46 = vunpack.i.l.bf16 %v10161_v9  ;;  %v4634_v27 = vunpack.i.h.bf16 %v10162_v40 }
 0x1a0   : > { %v8072_v54 = vpop.permute.xlu1 %5066  ;;  %v4633_v53 = vunpack.i.l.bf16 %v10162_v40  ;;  %v2500_v5 = vsel %vm2495_vm3, %v7898_v60, %v4563_v4  ;;  %v8093_v20 = vsel %vm2495_vm3, %v2442_v18, %v4579_v37  ;;  %v2506_v9 = vsel %vm2495_vm3, %v2441_v43, %v4578_v61  ;;  %v10171_v4 = vld [vmem:[#allocation189_spill] sm:$0xff] }
 0x1a1   : > { %5341 = vrot.lane.b32.xlu0 %v10158_v41, %s5686_s29  ;;  %10159 = vst [vmem:[#allocation55_spill] sm:$0xff] %v8072_v54  ;;  %v10165_v41 = vld [vmem:[#allocation117_spill] sm:$0xff]  ;;  %v4648_v40 = vunpack.i.l.bf16 %v10167_v22  ;;  %v8105_v60 = vsel %vm2495_vm3, %v2439_v39, %v4573_v21  ;;  %v8109_v18 = vsel %vm2495_vm3, %v7993_v10, %v4574_v57  ;;  %v2531_v43 = vsel %vm2495_vm3, %v2466_v30, %v4639_v17  ;;  %v10173_v57 = vld [vmem:[#allocation104_spill] sm:$0xff] }
 0x1a2   : > { %v8084_v7 = vpop.permute.xlu0 %5061  ;;  %v5365_v25 = vpack.i.bf16 %v10166_v14, %v10165_v41  ;;  %v4653_v22 = vunpack.i.l.bf16 %v10171_v4  ;;  %v2530_v37 = vsel %vm2495_vm3, %v8004_v36, %v4638_v46  ;;  %v2529_v61 = vsel %vm2495_vm3, %v2464_v62, %v4634_v27  ;;  %v10176_v46 = vld [vmem:[#allocation105_spill] sm:$0xff] }
 0x1a3   : > { %10163 = vst [vmem:[#allocation90_spill] sm:$0xff] %v8084_v7  ;;  %5356 = vrot.lane.b32.xlu1 %v10164_v34, %s5688_s6  ;;  %v4643_v7 = vunpack.i.l.bf16 %v10168_v23  ;;  %v10169_v34 = vld [vmem:[#allocation79_spill] sm:$0xff]  ;;  %v2528_v23 = vsel %vm2495_vm3, %v2463_v0, %v4633_v53  ;;  %v8121_v39 = vsel %vm2495_vm3, %v2470_v48, %v4649_v19  ;;  %v4654_v10 = vunpack.i.h.bf16 %v10171_v4 }
 0x1a4   : > { %v8102_v41 = vpop.permute.xlu1 %5076  ;;  %v4719_v30 = vunpack.i.h.bf16 %v10173_v57  ;;  %v4718_v21 = vunpack.i.l.bf16 %v10173_v57  ;;  %v8127_v17 = vsel %vm2495_vm3, %v2469_v15, %v4648_v40  ;;  %v8133_v62 = vsel %vm2495_vm3, %v2468_v1, %v4644_v49  ;;  %v10174_v0 = vld [vmem:[#allocation75_spill] sm:$0xff]  ;;  %v10179_v1 = vld [vmem:[#allocation198_spill] sm:$0xff] }
 0x1a5   : > { %5351 = vrot.lane.b32.xlu0 %v10169_v34, %s5688_s6  ;;  %10170 = vst [vmem:[#allocation51_spill] sm:$0xff] %v8102_v41  ;;  %v8130_v36 = vsel %vm2495_vm3, %v2467_v32, %v4643_v7  ;;  %v10175_v48 = vld [vmem:[#allocation123_spill] sm:$0xff]  ;;  %v8142_v53 = vsel %vm2495_vm3, %v2471_v33, %v4653_v22  ;;  %v10178_v32 = vld [vmem:[#allocation197_spill] sm:$0xff]  ;;  %v4724_v34 = vunpack.i.h.bf16 %v10179_v1  ;;  %v4723_v4 = vunpack.i.l.bf16 %v10179_v1  ;;  %v10184_v1 = vld [vmem:[#allocation100_spill] sm:$0xff] }
 0x1a6   : > { %v8117_v14 = vpop.permute.xlu0 %5071  ;;  %v5370_v27 = vpack.i.bf16 %v10176_v46, %v10175_v48  ;;  %v4728_v7 = vunpack.i.l.bf16 %v10178_v32  ;;  %v4729_v49 = vunpack.i.h.bf16 %v10178_v32  ;;  %v8156_v33 = vsel %vm2495_vm3, %v8042_v55, %v4654_v10  ;;  %v10182_v46 = vld [vmem:[#allocation200_spill] sm:$0xff]  ;;  %v10183_v32 = vld [vmem:[#allocation98_spill] sm:$0xff] }
 0x1a7   : > { %10172 = vst [vmem:[#allocation111_spill] sm:$0xff] %v8117_v14  ;;  %5366 = vrot.lane.b32.xlu1 %v5365_v25, %s5684_s25  ;;  %v10177_v25 = vld [vmem:[#allocation28_spill] sm:$0xff]  ;;  %v2563_v22 = vsel %vm2560_vm4, %v2498_v42, %v4718_v21  ;;  %v2564_v48 = vsel %vm2560_vm4, %v2499_v31, %v4719_v30  ;;  %v4799_v14 = vunpack.i.h.bf16 %v10183_v32  ;;  %v4798_v41 = vunpack.i.l.bf16 %v10183_v32 }
 0x1a8   : > { %v8137_v19 = vpop.permute.xlu1 %5086  ;;  %v4714_v15 = vunpack.i.h.bf16 %v10177_v25  ;;  %v4713_v40 = vunpack.i.l.bf16 %v10177_v25  ;;  %v4738_v25 = vunpack.i.l.bf16 %v10182_v46  ;;  %v4793_v54 = vunpack.i.l.bf16 %v10184_v1 }
 0x1a9   : > { %5361 = vrot.lane.b32.xlu0 %v10174_v0, %s5688_s6  ;;  %v10181_v0 = vld [vmem:[#allocation140_spill] sm:$0xff]  ;;  %v8172_v31 = vsel %vm2560_vm4, %v2502_v8, %v4728_v7  ;;  %v4794_v10 = vunpack.i.h.bf16 %v10184_v1  ;;  %v8177_v30 = vsel %vm2560_vm4, %v8066_v35, %v4729_v49  ;;  %v8180_v21 = vsel %vm2560_vm4, %v2500_v5, %v4723_v4 }
 0x1aa   : > { %v8150_v57 = vpop.permute.xlu0 %5081  ;;  %v2561_v55 = vsel %vm2560_vm4, %v8055_v26, %v4713_v40  ;;  %v2562_v42 = vsel %vm2560_vm4, %v8062_v44, %v4714_v15  ;;  %v10185_v44 = vld [vmem:[#allocation145_spill] sm:$0xff]  ;;  %v8192_v15 = vsel %vm2560_vm4, %v2506_v9, %v4738_v25  ;;  %v8195_v35 = vsel %vm2560_vm4, %v2530_v37, %v4798_v41  ;;  %v10191_v9 = vld [vmem:[#allocation86_spill] sm:$0xff] }
 0x1ab   : > { %10180 = vst [vmem:[#allocation108_spill] sm:$0xff] %v8150_v57  ;;  %5376 = vrot.lane.b32.xlu1 %v10181_v0, %s5685_s26  ;;  %v8198_v5 = vsel %vm2560_vm4, %v2531_v43, %v4799_v14  ;;  %v10186_v40 = vld [vmem:[#allocation161_spill] sm:$0xff]  ;;  %v2594_v49 = vsel %vm2560_vm4, %v2529_v61, %v4794_v10  ;;  %v4878_v0 = vunpack.i.l.bf16 %v7673_v3  ;;  %v4879_v41 = vunpack.i.h.bf16 %v7673_v3 }
 0x1ac   : > { %v8165_v24 = vpop.permute.xlu1 %5096  ;;  %v4874_v37 = vunpack.i.h.bf16 %v7683_v2  ;;  %v10189_v61 = vld [vmem:[#allocation165_spill] sm:$0xff]  ;;  %v4954_v32 = vunpack.i.h.bf16 %v7808_v56  ;;  %v4953_v3 = vunpack.i.l.bf16 %v7808_v56  ;;  %v5038_v1 = vunpack.i.l.bf16 %v7968_v12 }
 0x1ad   : > { %5371 = vrot.lane.b32.xlu0 %v5370_v27, %s5684_s25  ;;  %v8184_v27 = vsel %vm2560_vm4, %v8076_v28, %v4724_v34  ;;  %v2593_v28 = vsel %vm2560_vm4, %v2528_v23, %v4793_v54  ;;  %v10187_v34 = vld [vmem:[#allocation177_spill] sm:$0xff]  ;;  %v4873_v23 = vunpack.i.l.bf16 %v7683_v2  ;;  %v2628_v25 = vsel %vm2625_vm6, %v2563_v22, %v4878_v0 }
 0x1ae   : > { %v8186_v26 = vpop.permute.xlu0 %5091  ;;  %v10188_v54 = vld [vmem:[#allocation25_spill] sm:$0xff]  ;;  %v2629_v10 = vsel %vm2625_vm6, %v2564_v48, %v4879_v41  ;;  %v5033_v2 = vunpack.i.l.bf16 %v7987_v45  ;;  %v2627_v0 = vsel %vm2625_vm6, %v2562_v42, %v4874_v37  ;;  %v5088_v56 = vunpack.i.l.bf16 %v8137_v19 }
 0x1af   : > { %5386 = vrot.lane.b32.xlu1 %v10185_v44, %s5685_s26  ;;  %v5039_v44 = vunpack.i.h.bf16 %v7968_v12  ;;  %v2626_v22 = vsel %vm2625_vm6, %v2561_v55, %v4873_v23  ;;  %v5084_v4 = vunpack.i.h.bf16 %v8150_v57  ;;  %v5098_v41 = vunpack.i.l.bf16 %v8165_v24 }
 0x1b0   : > { %v8203_v7 = vpop.permute.xlu1 %5106  ;;  %v2658_v55 = vsel %vm2625_vm6, %v2593_v28, %v4953_v3  ;;  %v2659_v42 = vsel %vm2625_vm6, %v2594_v49, %v4954_v32  ;;  %v2693_v37 = vsel %vm2690_vm7, %v2628_v25, %v5038_v1  ;;  %v2691_v12 = vsel %vm2690_vm7, %v2626_v22, %v5033_v2  ;;  %v10193_v1 = vld [vmem:[#allocation83_spill] sm:$0xff] }
 0x1b1   : > { %5381 = vrot.lane.b32.xlu0 %v10186_v40, %s5685_s26  ;;  %v5034_v40 = vunpack.i.h.bf16 %v7987_v45  ;;  %v5099_v45 = vunpack.i.h.bf16 %v8165_v24  ;;  %v2694_v8 = vsel %vm2690_vm7, %v2629_v10, %v5039_v44  ;;  %v10192_v24 = vld [vmem:[#allocation26_spill] sm:$0xff]  ;;  %v2724_v28 = vsel %vm2690_vm7, %v2659_v42, %v5088_v56 }
 0x1b2   : > { %v8210_v43 = vpop.permute.xlu0 %5101  ;;  %v2723_v49 = vsel %vm2690_vm7, %v2658_v55, %v5084_v4  ;;  %v5108_v25 = vunpack.i.l.bf16 %v8203_v7  ;;  %v5109_v32 = vunpack.i.h.bf16 %v8203_v7  ;;  %v2756_v10 = vsel %vm2755_vm8, %v2691_v12, %v5098_v41  ;;  %v10194_v55 = vld [vmem:[#allocation107_spill] sm:$0xff] }
 0x1b3   : > { %5396 = vrot.lane.b32.xlu1 %v10188_v54, %s5686_s29  ;;  %v2692_v48 = vsel %vm2690_vm7, %v2627_v0, %v5034_v40  ;;  %v5103_v3 = vunpack.i.l.bf16 %v8210_v43 }
 0x1b4   : > { %v5117_v14 = vpop.permute.xlu1 %5116  ;;  %v2757_v44 = vsel %vm2755_vm8, %v2692_v48, %v5099_v45  ;;  %v2758_v12 = vsel %vm2755_vm8, %v2693_v37, %v5108_v25  ;;  %v2759_v45 = vsel %vm2755_vm8, %v2694_v8, %v5109_v32  ;;  %v10196_v32 = vld [vmem:[#allocation125_spill] sm:$0xff] }
 0x1b5   : > { %5391 = vrot.lane.b32.xlu0 %v10189_v61, %s5685_s26  ;;  %v10190_v61 = vld [vmem:[#allocation23_spill] sm:$0xff]  ;;  %v5118_v23 = vunpack.i.l.bf16 %v5117_v14  ;;  %v5119_v57 = vunpack.i.h.bf16 %v5117_v14 }
 0x1b6   : > { %v8226_v54 = vpop.permute.xlu0 %5111 }
 0x1b7   : > { %5406 = vrot.lane.b32.xlu1 %v10190_v61, %s5686_s29  ;;  %v2821_v4 = vsel %vm2820_vm9, %v2756_v10, %v5118_v23  ;;  %v2822_v42 = vsel %vm2820_vm9, %v2757_v44, %v5119_v57  ;;  %v5114_v57 = vunpack.i.h.bf16 %v8226_v54  ;;  %v5113_v25 = vunpack.i.l.bf16 %v8226_v54 }
 0x1b8   : > { %v5127_v61 = vpop.permute.xlu1 %5126 }
 0x1b9   : > { %5401 = vrot.lane.b32.xlu0 %v10191_v9, %s5686_s29  ;;  %v5089_v9 = vunpack.i.h.bf16 %v8137_v19  ;;  %v5104_v19 = vunpack.i.h.bf16 %v8210_v43  ;;  %v5129_v22 = vunpack.i.h.bf16 %v5127_v61  ;;  %v5128_v0 = vunpack.i.l.bf16 %v5127_v61  ;;  %v10195_v61 = vld [vmem:[#allocation126_spill] sm:$0xff] }
 0x1ba   : > { %v5122_v51 = vpop.permute.xlu0 %5121 }
 0x1bb   : > { %5416 = vrot.lane.b32.xlu1 %v10192_v24, %s5688_s6  ;;  %v5123_v56 = vunpack.i.l.bf16 %v5122_v51  ;;  %v5093_v24 = vunpack.i.l.bf16 %v8186_v26  ;;  %v5124_v41 = vunpack.i.h.bf16 %v5122_v51  ;;  %v2789_v37 = vsel %vm2755_vm8, %v2724_v28, %v5104_v19 }
 0x1bc   : > { %v5137_v14 = vpop.permute.xlu1 %5136  ;;  %v2824_v8 = vsel %vm2820_vm9, %v2759_v45, %v5129_v22  ;;  %v10199_v45 = vld [vmem:[#allocation97_spill] sm:$0xff] }
 0x1bd   : > { %5411 = vrot.lane.b32.xlu0 %v10193_v1, %s5686_s29  ;;  %v5139_v40 = vunpack.i.h.bf16 %v5137_v14  ;;  %v5138_v2 = vunpack.i.l.bf16 %v5137_v14  ;;  %v2788_v14 = vsel %vm2755_vm8, %v2723_v49, %v5103_v3 }
 0x1be   : > { %v5132_v7 = vpop.permute.xlu0 %5131  ;;  %v2853_v49 = vsel %vm2820_vm9, %v2788_v14, %v5123_v56  ;;  %v10200_v14 = vld [vmem:[#allocation129_spill] sm:$0xff] }
 0x1bf   : > { %5426 = vrot.lane.b32.xlu1 %v10194_v55, %s5688_s6  ;;  %v2886_v48 = vsel %vm2885_vm10, %v2821_v4, %v5138_v2  ;;  %v2887_v43 = vsel %vm2885_vm10, %v2822_v42, %v5139_v40  ;;  %v2823_v40 = vsel %vm2820_vm9, %v2758_v12, %v5128_v0  ;;  %v5134_v19 = vunpack.i.h.bf16 %v5132_v7 }
 0x1c0   : > { %v5147_v23 = vpop.permute.xlu1 %5146  ;;  %v2950_v1 = vpack.c.bf16 %v2887_v43, %v2886_v48  ;;  %v5133_v54 = vunpack.i.l.bf16 %v5132_v7  ;;  %v2854_v55 = vsel %vm2820_vm9, %v2789_v37, %v5124_v41  ;;  %v10197_v42 = vunpack.i.l.bf16 %v7798_v58 }
 0x1c1   : > { %5421 = vrot.lane.b32.xlu0 %v10195_v61, %s5688_s6  ;;  %v5149_v10 = vunpack.i.h.bf16 %v5147_v23  ;;  %v5148_v44 = vunpack.i.l.bf16 %v5147_v23  ;;  %v10198_v12 = vunpack.i.h.bf16 %v7798_v58  ;;  %v4804_v61 = vunpack.i.h.bf16 %v10199_v45 }
 0x1c2   : > { %v5142_v51 = vpop.permute.xlu0 %5141  ;;  %4302 = vmatprep.mubr.msk.bf16.mxu0 %vm3004_vm11, %v2950_v1  ;;  %v2660_v56 = vsel %vm2625_vm6, %v8195_v35, %v10197_v42  ;;  %v4803_v37 = vunpack.i.l.bf16 %v10199_v45  ;;  %v4884_v42 = vunpack.i.h.bf16 %v7690_v52  ;;  %v10209_v45 = vld [vmem:[#allocation171_spill] sm:$0xff] }
 0x1c3   : > { %5436 = vrot.lane.b32.xlu1 %v10196_v32, %s5684_s25  ;;  %v2888_v3 = vsel %vm2885_vm10, %v2823_v40, %v5148_v44  ;;  %v2889_v2 = vsel %vm2885_vm10, %v2824_v8, %v5149_v10  ;;  %v5144_v4 = vunpack.i.h.bf16 %v5142_v51  ;;  %v5143_v28 = vunpack.i.l.bf16 %v5142_v51 }
 0x1c4   : > { %v8284_v22 = vpop.permute.xlu1 %5156  ;;  %v2951_v0 = vpack.c.bf16 %v2889_v2, %v2888_v3  ;;  %v2661_v48 = vsel %vm2625_vm6, %v8198_v5, %v10198_v12  ;;  %v2725_v23 = vsel %vm2690_vm7, %v2660_v56, %v5089_v9  ;;  %v10202_v51 = vunpack.i.h.bf16 %v10182_v46  ;;  %v10207_v12 = vld [vmem:[#allocation143_spill] sm:$0xff] }
 0x1c5   : > { %5431 = vrot.lane.b32.xlu0 %v10196_v32, %s5688_s6  ;;  %v2918_v7 = vsel %vm2885_vm10, %v2853_v49, %v5143_v28  ;;  %v2919_v43 = vsel %vm2885_vm10, %v2854_v55, %v5144_v4  ;;  %v2726_v41 = vsel %vm2690_vm7, %v2661_v48, %v5093_v24  ;;  %v2790_v35 = vsel %vm2755_vm8, %v2725_v23, %v5113_v25  ;;  %v10201_v24 = vld [vmem:[#allocation24_spill] sm:$0xff] }
 0x1c6   : > { %v5152_v1 = vpop.permute.xlu0 %5151  ;;  %4303 = vmatmul.mubr.msk.bf16.vlgmr.msra.gmra.mrb[0].mxu0 %vm3004_vm11, %v2951_v0  ;;  %v2966_v58 = vpack.c.bf16 %v2919_v43, %v2918_v7  ;;  %v2791_v5 = vsel %vm2755_vm8, %v2726_v41, %v5114_v57  ;;  %v2855_v40 = vsel %vm2820_vm9, %v2790_v35, %v5133_v54  ;;  %v8317_v57 = vsel %vm2560_vm4, %v8093_v20, %v10202_v51  ;;  %v10203_v25 = vld [vmem:[#allocation48_spill] sm:$0xff] }
 0x1c7   : > { %5446 = vrot.lane.b32.xlu1 %v10200_v14, %s5684_s25  ;;  %v5154_v10 = vunpack.i.h.bf16 %v5152_v1  ;;  %v5153_v44 = vunpack.i.l.bf16 %v5152_v1  ;;  %v2856_v9 = vsel %vm2820_vm9, %v2791_v5, %v5134_v19  ;;  %v4734_v32 = vunpack.i.h.bf16 %v10203_v25  ;;  %v10206_v19 = vld [vmem:[#allocation163_spill] sm:$0xff] }
 0x1c8   : > { %4334 = vmatprep.mubr.msk.bf16.mxu1 %vm3004_vm11, %v2966_v58  ;;  %v8311_v8 = vpop.permute.xlu1 %5166  ;;  %v10204_v2 = vunpack.i.l.bf16 %v10187_v34  ;;  %v10205_v28 = vunpack.i.h.bf16 %v10187_v34  ;;  %v4889_v0 = vunpack.i.h.bf16 %v7688_v13  ;;  %v4888_v55 = vunpack.i.l.bf16 %v7688_v13  ;;  %v10208_v13 = vld [vmem:[#allocation178_spill] sm:$0xff]  ;;  %v10210_v58 = vld [vmem:[#allocation151_spill] sm:$0xff] }
 0x1c9   : > { %5441 = vrot.lane.b32.xlu0 %v10201_v24, %s5684_s25  ;;  %v2920_v49 = vsel %vm2885_vm10, %v2855_v40, %v5153_v44  ;;  %v2921_v3 = vsel %vm2885_vm10, %v2856_v9, %v5154_v10  ;;  %v4733_v34 = vunpack.i.l.bf16 %v10203_v25  ;;  %v2598_v56 = vsel %vm2560_vm4, %v8133_v62, %v4804_v61  ;;  %v10211_v40 = vld [vmem:[#allocation93_spill] sm:$0xff]  ;;  %v10217_v25 = vld [vmem:[#allocation132_spill] sm:$0xff] }
 0x1ca   : > { %v8326_v4 = vsel %vm2560_vm4, %v8127_v17, %v10204_v2  ;;  %v8332_v46 = vsel %vm2560_vm4, %v8121_v39, %v10205_v28  ;;  %v8334_v20 = vpop.permute.xlu0 %5161  ;;  %v2967_v54 = vpack.c.bf16 %v2921_v3, %v2920_v49  ;;  %v4883_v17 = vunpack.i.l.bf16 %v7690_v52  ;;  %v10212_v2 = vld [vmem:[#allocation34_spill] sm:$0xff] }
 0x1cb   : > { %5456 = vrot.lane.b32.xlu1 %v10206_v19, %s5685_s26  ;;  %v2597_v39 = vsel %vm2560_vm4, %v8130_v36, %v4803_v37  ;;  %v4814_v7 = vunpack.i.h.bf16 %v10208_v13  ;;  %v4813_v43 = vunpack.i.l.bf16 %v10208_v13  ;;  %v2632_v36 = vsel %vm2625_vm6, %v8172_v31, %v4888_v55  ;;  %v10218_v13 = vld [vmem:[#allocation32_spill] sm:$0xff] }
 0x1cc   : > { %4335 = vmatmul.mubr.msk.bf16.vlgmr.msra.gmra.mrb[0].mxu1 %vm3004_vm11, %v2967_v54  ;;  %v8350_v48 = vpop.permute.xlu1 %5176  ;;  %v2633_v62 = vsel %vm2625_vm6, %v8177_v30, %v4889_v0  ;;  %v2630_v61 = vsel %vm2625_vm6, %v8180_v21, %v4883_v17  ;;  %v2631_v23 = vsel %vm2625_vm6, %v8184_v27, %v4884_v42  ;;  %v4899_v41 = vunpack.i.h.bf16 %v7696_v6 }
 0x1cd   : > { %5451 = vrot.lane.b32.xlu0 %v10207_v12, %s5685_s26  ;;  %v4898_v1 = vunpack.i.l.bf16 %v7696_v6  ;;  %v4894_v5 = vunpack.i.h.bf16 %v7698_v59  ;;  %v4964_v31 = vunpack.i.h.bf16 %v7816_v38  ;;  %v4963_v30 = vunpack.i.l.bf16 %v7816_v38 }
 0x1ce   : > { %v8354_v52 = vpop.permute.xlu0 %5171  ;;  %v5048_v10 = vunpack.i.l.bf16 %v8008_v63  ;;  %v5049_v21 = vunpack.i.h.bf16 %v8008_v63  ;;  %v5044_v27 = vunpack.i.h.bf16 %v8018_v16  ;;  %v5043_v44 = vunpack.i.l.bf16 %v8018_v16 }
 0x1cf   : > { %5466 = vrot.lane.b32.xlu1 %v10209_v45, %s5685_s26  ;;  %v5094_v9 = vunpack.i.h.bf16 %v8186_v26  ;;  %v5158_v51 = vunpack.i.l.bf16 %v8284_v22  ;;  %v4969_v49 = vunpack.i.h.bf16 %v7814_v50  ;;  %v4968_v38 = vunpack.i.l.bf16 %v7814_v50 }
 0x1d0   : > { %v5187_v35 = vpop.permute.xlu1 %5186  ;;  %v5169_v3 = vunpack.i.h.bf16 %v8311_v8  ;;  %v5168_v63 = vunpack.i.l.bf16 %v8311_v8  ;;  %v2662_v28 = vsel %vm2625_vm6, %v2597_v39, %v4963_v30  ;;  %v2663_v19 = vsel %vm2625_vm6, %v2598_v56, %v4964_v31  ;;  %v10213_v8 = vld [vmem:[#allocation91_spill] sm:$0xff] }
 0x1d1   : > { %5461 = vrot.lane.b32.xlu0 %v10210_v58, %s5685_s26  ;;  %v2697_v26 = vsel %vm2690_vm7, %v2632_v36, %v5048_v10  ;;  %v5188_v54 = vunpack.i.l.bf16 %v5187_v35  ;;  %v2698_v0 = vsel %vm2690_vm7, %v2633_v62, %v5049_v21  ;;  %v2695_v55 = vsel %vm2690_vm7, %v2630_v61, %v5043_v44 }
 0x1d2   : > { %v8377_v37 = vpop.permute.xlu0 %5181  ;;  %v2696_v42 = vsel %vm2690_vm7, %v2631_v23, %v5044_v27  ;;  %v5189_v17 = vunpack.i.h.bf16 %v5187_v35  ;;  %v2727_v45 = vsel %vm2690_vm7, %v2662_v28, %v5094_v9  ;;  %v5159_v39 = vunpack.i.h.bf16 %v8284_v22  ;;  %v10214_v35 = vld [vmem:[#allocation29_spill] sm:$0xff] }
 0x1d3   : > { %5476 = vrot.lane.b32.xlu1 %v10211_v40, %s5686_s29  ;;  %v2728_v56 = vsel %vm2690_vm7, %v2663_v19, %v5158_v51  ;;  %v5178_v36 = vunpack.i.l.bf16 %v8350_v48  ;;  %v2760_v58 = vsel %vm2755_vm8, %v2695_v55, %v5168_v63  ;;  %v2761_v62 = vsel %vm2755_vm8, %v2696_v42, %v5169_v3 }
 0x1d4   : > { %v5197_v16 = vpop.permute.xlu1 %5196  ;;  %v5179_v61 = vunpack.i.h.bf16 %v8350_v48  ;;  %v5173_v23 = vunpack.i.l.bf16 %v8354_v52  ;;  %v5174_v30 = vunpack.i.h.bf16 %v8354_v52  ;;  %v2825_v22 = vsel %vm2820_vm9, %v2760_v58, %v5188_v54 }
 0x1d5   : > { %5471 = vrot.lane.b32.xlu0 %v10212_v2, %s5686_s29  ;;  %v2826_v27 = vsel %vm2820_vm9, %v2761_v62, %v5189_v17  ;;  %v5199_v44 = vunpack.i.h.bf16 %v5197_v16  ;;  %v5198_v40 = vunpack.i.l.bf16 %v5197_v16  ;;  %v5163_v48 = vunpack.i.l.bf16 %v8334_v20 }
 0x1d6   : > { %v5192_v12 = vpop.permute.xlu0 %5191  ;;  %v2762_v3 = vsel %vm2755_vm8, %v2697_v26, %v5178_v36  ;;  %v2763_v2 = vsel %vm2755_vm8, %v2698_v0, %v5179_v61  ;;  %v2792_v28 = vsel %vm2755_vm8, %v2727_v45, %v5173_v23  ;;  %v5184_v55 = vunpack.i.h.bf16 %v8377_v37  ;;  %v10215_v36 = vld [vmem:[#allocation89_spill] sm:$0xff] }
 0x1d7   : > { %5486 = vrot.lane.b32.xlu1 %v10213_v8, %s5686_s29  ;;  %v5193_v9 = vunpack.i.l.bf16 %v5192_v12  ;;  %v5194_v19 = vunpack.i.h.bf16 %v5192_v12  ;;  %v5183_v17 = vunpack.i.l.bf16 %v8377_v37  ;;  %v2827_v8 = vsel %vm2820_vm9, %v2762_v3, %v5198_v40 }
 0x1d8   : > { %v5207_v31 = vpop.permute.xlu1 %5206  ;;  %v2828_v0 = vsel %vm2820_vm9, %v2763_v2, %v5199_v44  ;;  %v4893_v44 = vunpack.i.l.bf16 %v7698_v59  ;;  %v4973_v59 = vunpack.i.l.bf16 %v7822_v47 }
 0x1d9   : > { %5481 = vrot.lane.b32.xlu0 %v10214_v35, %s5686_s29  ;;  %v5209_v10 = vunpack.i.h.bf16 %v5207_v31  ;;  %v5208_v21 = vunpack.i.l.bf16 %v5207_v31  ;;  %v2857_v45 = vsel %vm2820_vm9, %v2792_v28, %v5193_v9  ;;  %v10216_v31 = vld [vmem:[#allocation27_spill] sm:$0xff] }
 0x1da   : > { %v5202_v51 = vpop.permute.xlu0 %5201 }
 0x1db   : > { %5496 = vrot.lane.b32.xlu1 %v10200_v14, %s5688_s6  ;;  %v2890_v63 = vsel %vm2885_vm10, %v2825_v22, %v5208_v21  ;;  %v2891_v52 = vsel %vm2885_vm10, %v2826_v27, %v5209_v10  ;;  %v2793_v14 = vsel %vm2755_vm8, %v2728_v56, %v5174_v30  ;;  %v5204_v61 = vunpack.i.h.bf16 %v5202_v51 }
 0x1dc   : > { %v2952_v54 = vpack.c.bf16 %v2891_v52, %v2890_v63  ;;  %v5217_v16 = vpop.permute.xlu1 %5216  ;;  %v2858_v37 = vsel %vm2820_vm9, %v2793_v14, %v5194_v19  ;;  %v5203_v23 = vunpack.i.l.bf16 %v5202_v51  ;;  %v2664_v22 = vsel %vm2625_vm6, %v8326_v4, %v4968_v38 }
 0x1dd   : > { %5491 = vrot.lane.b32.xlu0 %v10201_v24, %s5688_s6  ;;  %v5219_v42 = vunpack.i.h.bf16 %v5217_v16  ;;  %v5218_v26 = vunpack.i.l.bf16 %v5217_v16  ;;  %v2665_v10 = vsel %vm2625_vm6, %v8332_v46, %v4969_v49  ;;  %v2729_v40 = vsel %vm2690_vm7, %v2664_v22, %v5159_v39  ;;  %v10221_v16 = vld [vmem:[#allocation196_spill] sm:$0xff]  ;;  %v10229_v22 = vld [vmem:[#allocation175_spill] sm:$0xff] }
 0x1de   : > { %v5212_v12 = vpop.permute.xlu0 %5211  ;;  %4306 = vmatprep.mubr.msk.bf16.mxu0 %vm3004_vm11, %v2952_v54  ;;  %v2730_v9 = vsel %vm2690_vm7, %v2665_v10, %v5163_v48  ;;  %v2794_v50 = vsel %vm2755_vm8, %v2729_v40, %v5183_v17  ;;  %v2569_v48 = vsel %vm2560_vm4, %v8105_v60, %v4733_v34  ;;  %v2570_v52 = vsel %vm2560_vm4, %v8109_v18, %v4734_v32  ;;  %v10225_v17 = vld [vmem:[#allocation147_spill] sm:$0xff] }
 0x1df   : > { %5506 = vrot.lane.b32.xlu1 %v10215_v36, %s5688_s6  ;;  %v2892_v24 = vsel %vm2885_vm10, %v2827_v8, %v5218_v26  ;;  %v2893_v56 = vsel %vm2885_vm10, %v2828_v0, %v5219_v42  ;;  %v5214_v58 = vunpack.i.h.bf16 %v5212_v12  ;;  %v5213_v62 = vunpack.i.l.bf16 %v5212_v12  ;;  %v10224_v42 = vld [vmem:[#allocation148_spill] sm:$0xff]  ;;  %v10226_v12 = vld [vmem:[#allocation149_spill] sm:$0xff]  ;;  %v313_v10 = vld [vmem:[%s5728_s20 + $0x1a4] sm:$0xff]  }
 0x1e0   : > { %v2953_v35 = vpack.c.bf16 %v2893_v56, %v2892_v24  ;;  %v8434_v30 = vpop.permute.xlu1 %5226  ;;  %v2795_v4 = vsel %vm2755_vm8, %v2730_v9, %v5184_v55  ;;  %v2859_v38 = vsel %vm2820_vm9, %v2794_v50, %v5203_v23  ;;  %v2601_v19 = vsel %vm2560_vm4, %v8142_v53, %v4813_v43  ;;  %v10219_v43 = vld [vmem:[#allocation168_spill] sm:$0xff]  ;;  %v10227_v24 = vld [vmem:[#allocation179_spill] sm:$0xff]  ;;  %v10230_v9 = vld [vmem:[#allocation154_spill] sm:$0xff] }
 0x1e1   : > { %5501 = vrot.lane.b32.xlu0 %v10216_v31, %s5688_s6  ;;  %v2922_v21 = vsel %vm2885_vm10, %v2857_v45, %v5213_v62  ;;  %v2923_v27 = vsel %vm2885_vm10, %v2858_v37, %v5214_v58  ;;  %v2860_v63 = vsel %vm2820_vm9, %v2795_v4, %v5204_v61  ;;  %v2602_v54 = vsel %vm2560_vm4, %v8156_v33, %v4814_v7 }
 0x1e2   : > { %v2968_v51 = vpack.c.bf16 %v2923_v27, %v2922_v21  ;;  %v5222_v3 = vpop.permute.xlu0 %5221  ;;  %4307 = vmatmul.mubr.msk.bf16.gmra.mrb[4].mxu0 %vm3004_vm11, %v2953_v35  ;;  %v2636_v18 = vsel %vm2625_vm6, %v8192_v15, %v4898_v1  ;;  %v2637_v53 = vsel %vm2625_vm6, %v8317_v57, %v4899_v41  ;;  %v2634_v32 = vsel %vm2625_vm6, %v2569_v48, %v4893_v44  ;;  %v10220_v1 = vld [vmem:[#allocation169_spill] sm:$0xff] }
 0x1e3   : > { %5516 = vrot.lane.b32.xlu1 %v10215_v36, %s5684_s25  ;;  %v5224_v46 = vunpack.i.h.bf16 %v5222_v3  ;;  %v5223_v49 = vunpack.i.l.bf16 %v5222_v3  ;;  %v2635_v33 = vsel %vm2625_vm6, %v2570_v52, %v4894_v5  ;;  %v1631_v15 = vrot.slane %v10219_v43, 2  ;;  %v10223_v5 = vld [vmem:[#allocation167_spill] sm:$0xff] }
 0x1e4   : > { %4338 = vmatprep.mubr.msk.bf16.mxu1 %vm3004_vm11, %v2968_v51  ;;  %v8459_v39 = vpop.permute.xlu1 %5236  ;;  %v1632_v6 = vrot.slane %v10220_v1, 2  ;;  %v10222_v14 = vunpack.c.l.bf16 %v10221_v16  ;;  %v4974_v41 = vunpack.i.h.bf16 %v7822_v47  ;;  %v1626_v26 = vrot.slane %v10224_v42, 2  ;;  %v10231_v52 = vld [vmem:[#allocation95_spill] sm:$0xff] }
 0x1e5   : > { %5511 = vrot.lane.b32.xlu0 %v10216_v31, %s5684_s25  ;;  %v2924_v2 = vsel %vm2885_vm10, %v2859_v38, %v5223_v49  ;;  %v2925_v28 = vsel %vm2885_vm10, %v2860_v63, %v5224_v46  ;;  %v1627_v36 = vrot.slane %v10226_v12, 2  ;;  %v10228_v47 = vunpack.c.l.bf16 %v10227_v24  ;;  %v10234_v12 = vld [vmem:[#allocation37_spill] sm:$0xff] }
 0x1e6   : > { %v2969_v60 = vpack.c.bf16 %v2925_v28, %v2924_v2  ;;  %v8479_v34 = vpop.permute.xlu0 %5231  ;;  %v1634_v57 = vrot.slane %v10222_v14, 2  ;;  %v1633_v0 = vsel %vm873_vm1, %v1631_v15, %v1632_v6  ;;  %v2666_v58 = vsel %vm2625_vm6, %v2601_v19, %v4973_v59 }
 0x1e7   : > { %5526 = vrot.lane.b32.xlu1 %v10217_v25, %s5684_s25  ;;  %v1629_v56 = vrot.slane %v10228_v47, 2  ;;  %v2667_v62 = vsel %vm2625_vm6, %v2602_v54, %v4974_v41  ;;  %v5058_v37 = vunpack.i.l.bf16 %v8034_v29  ;;  %v5059_v61 = vunpack.i.h.bf16 %v8034_v29 }
 0x1e8   : > { %4339 = vmatmul.mubr.msk.bf16.gmra.mrb[4].mxu1 %vm3004_vm11, %v2969_v60  ;;  %v8498_v7 = vpop.permute.xlu1 %5246  ;;  %v1635_v45 = vsel %vm873_vm1, %v1632_v6, %v1634_v57  ;;  %v5054_v23 = vunpack.i.h.bf16 %v8049_v11  ;;  %v5053_v35 = vunpack.i.l.bf16 %v8049_v11  ;;  %v5164_v21 = vunpack.i.h.bf16 %v8334_v20 }
 0x1e9   : > { %5521 = vrot.lane.b32.xlu0 %v10218_v13, %s5684_s25  ;;  %v5228_v27 = vunpack.i.l.bf16 %v8434_v30  ;;  %v8531_v44 = vpack.i.bf16 %v1635_v45, %v1633_v0  ;;  %v5239_v40 = vunpack.i.h.bf16 %v8459_v39  ;;  %v5238_v29 = vunpack.i.l.bf16 %v8459_v39 }
 0x1ea   : > { %v8506_v55 = vpop.permute.xlu0 %5241  ;;  %v8538_v51 = vsel %vm873_vm1, %v1626_v26, %v1627_v36  ;;  %v8541_v3 = vsel %vm873_vm1, %v1627_v36, %v1629_v56  ;;  %v2701_v20 = vsel %vm2690_vm7, %v2636_v18, %v5058_v37  ;;  %v8544_v4 = vunpack.c.l.bf16 %v313_v10 }
 0x1eb   : > { %5536 = vrot.lane.b32.xlu1 %v10223_v5, %s5685_s26  ;;  %v8546_v46 = vunpack.c.h.bf16 %v313_v10  ;;  %v2702_v49 = vsel %vm2690_vm7, %v2637_v53, %v5059_v61  ;;  %v2699_v38 = vsel %vm2690_vm7, %v2634_v32, %v5053_v35  ;;  %v2700_v63 = vsel %vm2690_vm7, %v2635_v33, %v5054_v23  ;;  %v10232_v33 = vld [vmem:[#allocation41_spill] sm:$0xff]  ;;  %v315_v10 = vld [vmem:[%s5728_s20 + $0x1ac] sm:$0x1] }
 0x1ec   : > { %v5257_v8 = vpop.permute.xlu1 %5256  ;;  %v2731_v2 = vsel %vm2690_vm7, %v2666_v58, %v5164_v21  ;;  %v5229_v28 = vunpack.i.h.bf16 %v8434_v30  ;;  %v2732_v19 = vsel %vm2690_vm7, %v2667_v62, %v5228_v27  ;;  %v5248_v54 = vunpack.i.l.bf16 %v8498_v7 }
 0x1ed   : > { %5531 = vrot.lane.b32.xlu0 %v10225_v17, %s5685_s26  ;;  %v5258_v50 = vunpack.i.l.bf16 %v5257_v8  ;;  %v5259_v39 = vunpack.i.h.bf16 %v5257_v8  ;;  %v2764_v60 = vsel %vm2755_vm8, %v2699_v38, %v5238_v29  ;;  %v2765_v18 = vsel %vm2755_vm8, %v2700_v63, %v5239_v40  ;;  %v8590_v29 = vld [vmem:[%s5728_s20 + $0xd4] sm:$0x1] }
 0x1ee   : > { %v8524_v31 = vpop.permute.xlu0 %5251  ;;  %v5249_v53 = vunpack.i.h.bf16 %v8498_v7  ;;  %v5243_v32 = vunpack.i.l.bf16 %v8506_v55  ;;  %v5244_v15 = vunpack.i.h.bf16 %v8506_v55  ;;  %v10233_v7 = vld [vmem:[#allocation94_spill] sm:$0xff]  ;;  %v5233_v5 = vunpack.i.l.bf16 %v8479_v34 }
 0x1ef   : > { %5546 = vrot.lane.b32.xlu1 %v10229_v22, %s5685_s26  ;;  %v2829_v30 = vsel %vm2820_vm9, %v2764_v60, %v5258_v50  ;;  %v2830_v16 = vsel %vm2820_vm9, %v2765_v18, %v5259_v39  ;;  %v2766_v42 = vsel %vm2755_vm8, %v2701_v20, %v5248_v54  ;;  %v5254_v47 = vunpack.i.h.bf16 %v8524_v31  ;;  %v259_v22 = vld [vmem:[%s5728_s20 + $0xcc] sm:$0xff]  }
 0x1f0   : > { %v5267_v11 = vpop.permute.xlu1 %5266  ;;  %v2767_v17 = vsel %vm2755_vm8, %v2702_v49, %v5249_v53  ;;  %v2796_v8 = vsel %vm2755_vm8, %v2731_v2, %v5243_v32  ;;  %v2797_v24 = vsel %vm2755_vm8, %v2732_v19, %v5244_v15  ;;  %v5253_v62 = vunpack.i.l.bf16 %v8524_v31  ;;  %v10236_v2 = vld [vmem:[#allocation66_spill] sm:$0xff]  ;;  %v10237_v18 = vld [vmem:[#allocation131_spill] sm:$0xff] }
 0x1f1   : > { %5541 = vrot.lane.b32.xlu0 %v10230_v9, %s5685_s26  ;;  %v5269_v14 = vunpack.i.h.bf16 %v5267_v11  ;;  %v5268_v57 = vunpack.i.l.bf16 %v5267_v11  ;;  %v8599_v63 = vunpack.c.l.bf16 %v259_v22  ;;  %v423_v39 = vunpack.c.l.bf16 %v315_v10 }
 0x1f2   : > { %v5262_v48 = vpop.permute.xlu0 %5261  ;;  %v2734_v19 = vsel %vm2690_vm7, %v10236_v2, %v5233_v5 }
 0x1f3   : > { %5556 = vrot.lane.b32.xlu1 %v10231_v52, %s5686_s29  ;;  %v5263_v41 = vunpack.i.l.bf16 %v5262_v48  ;;  %v5264_v0 = vunpack.i.h.bf16 %v5262_v48  ;;  %v2831_v37 = vsel %vm2820_vm9, %v2766_v42, %v5268_v57  ;;  %v2832_v61 = vsel %vm2820_vm9, %v2767_v17, %v5269_v14  ;;  %v10235_v48 = vld [vmem:[#allocation88_spill] sm:$0xff] }
 0x1f4   : > { %v5277_v43 = vpop.permute.xlu1 %5276  ;;  %v2733_v52 = vsel %vm2690_vm7, %v10235_v48, %v5229_v28  ;;  %v2799_v32 = vsel %vm2755_vm8, %v2734_v19, %v5254_v47  ;;  %v2026_v42 = vrot.slane %v8599_v63, 1  ;;  %v10243_v48 = vld [vmem:[#allocation181_spill] sm:$0xff] }
 0x1f5   : > { %5551 = vrot.lane.b32.xlu0 %v10232_v33, %s5686_s29  ;;  %v5279_v1 = vunpack.i.h.bf16 %v5277_v43  ;;  %v5278_v6 = vunpack.i.l.bf16 %v5277_v43  ;;  %v2861_v23 = vsel %vm2820_vm9, %v2796_v8, %v5263_v41  ;;  %v2862_v9 = vsel %vm2820_vm9, %v2797_v24, %v5264_v0 }
 0x1f6   : > { %v5272_v59 = vpop.permute.xlu0 %5271  ;;  %v2798_v53 = vsel %vm2755_vm8, %v2733_v52, %v5253_v62  ;;  %v2032_v41 = vrot.slane %v8546_v46, 1  ;;  %v8637_v8 = vpack.i.bf16 %v8541_v3, %v8538_v51  ;;  %v2236_v3 = vrot.slane %v423_v39, 2 }
 0x1f7   : > { %5566 = vrot.lane.b32.xlu1 %v10233_v7, %s5686_s29  ;;  %v2894_v26 = vsel %vm2885_vm10, %v2829_v30, %v5278_v6  ;;  %v2895_v55 = vsel %vm2885_vm10, %v2830_v16, %v5279_v1  ;;  %v5274_v11 = vunpack.i.h.bf16 %v5272_v59  ;;  %v5273_v20 = vunpack.i.l.bf16 %v5272_v59  ;;  %v10238_v30 = vld [vmem:[#allocation30_spill] sm:$0xff] }
 0x1f8   : > { %v2954_v45 = vpack.c.bf16 %v2895_v55, %v2894_v26  ;;  %v5287_v36 = vpop.permute.xlu1 %5286  ;;  %v8618_v6 = vunpack.c.h.bf16 %v259_v22  ;;  %v2031_v16 = vrot.slane %v8544_v4, 1  ;;  %v2034_v59 = vrot.slane %v423_v39, 1 }
 0x1f9   : > { %5561 = vrot.lane.b32.xlu0 %v10234_v12, %s5686_s29  ;;  %v5289_v56 = vunpack.i.h.bf16 %v5287_v36  ;;  %v5288_v58 = vunpack.i.l.bf16 %v5287_v36  ;;  %v2863_v28 = vsel %vm2820_vm9, %v2798_v53, %v5273_v20  ;;  %v2864_v15 = vsel %vm2820_vm9, %v2799_v32, %v5274_v11  ;;  %v10246_v32 = vld [vmem:[#allocation62_spill] sm:$0xff] }
 0x1fa   : > { %v5282_v35 = vpop.permute.xlu0 %5281  ;;  %4310 = vmatprep.mubr.msk.bf16.mxu0 %vm3004_vm11, %v2954_v45  ;;  %v2027_v26 = vrot.slane %v8618_v6, 1  ;;  %v8640_v0 = vsel %vm520_vm0, %v2031_v16, %v2032_v41  ;;  %v2233_v45 = vrot.slane %v8544_v4, 2  ;;  %v2234_v12 = vrot.slane %v8546_v46, 2  ;;  %v10248_v16 = vld [vmem:[#allocation191_spill] sm:$0xff] }
 0x1fb   : > { %5576 = vrot.lane.b32.xlu1 %v10217_v25, %s5688_s6  ;;  %v2896_v21 = vsel %vm2885_vm10, %v2831_v37, %v5288_v58  ;;  %v2897_v27 = vsel %vm2885_vm10, %v2832_v61, %v5289_v56  ;;  %v5284_v40 = vunpack.i.h.bf16 %v5282_v35  ;;  %v5283_v31 = vunpack.i.l.bf16 %v5282_v35  ;;  %v10239_v37 = vld [vmem:[#allocation55_spill] sm:$0xff] }
 0x1fc   : > { %v2955_v50 = vpack.c.bf16 %v2897_v27, %v2896_v21  ;;  %v8595_v25 = vpop.permute.xlu1 %5296  ;;  %v8649_v24 = vsel %vm520_vm0, %v2032_v41, %v2034_v59  ;;  %v8652_v47 = vsel %vm520_vm0, %v2026_v42, %v2027_v26  ;;  %v5625_v58 = vpack.i.bf16 %v8546_v46, %v8544_v4  ;;  %v10240_v21 = vld [vmem:[#allocation90_spill] sm:$0xff] }
 0x1fd   : > { %5571 = vrot.lane.b32.xlu0 %v10218_v13, %s5688_s6  ;;  %v2926_v49 = vsel %vm2885_vm10, %v2861_v23, %v5283_v31  ;;  %v2927_v38 = vsel %vm2885_vm10, %v2862_v9, %v5284_v40  ;;  %v369_v13 = vunpack.c.l.bf16 %v8590_v29  ;;  %v5620_v62 = vpack.i.bf16 %v8618_v6, %v8599_v63  ;;  %v10241_v40 = vld [vmem:[#allocation173_spill] sm:$0xff] }
 0x1fe   : > { %v2970_v54 = vpack.c.bf16 %v2927_v38, %v2926_v49  ;;  %v5292_v60 = vpop.permute.xlu0 %5291  ;;  %4311 = vmatmul.mubr.msk.bf16.gmra.mrb[8].mxu0 %vm3004_vm11, %v2955_v50  ;;  %v5068_v61 = vunpack.i.l.bf16 %v10239_v37  ;;  %v5645_v23 = vpack.i.bf16 %v8649_v24, %v8640_v0  ;;  %v8669_v22 = vsel %vm873_vm1, %v2233_v45, %v2234_v12  ;;  %v10242_v50 = vld [vmem:[#allocation152_spill] sm:$0xff] }
 0x1ff   : > { %5586 = vrot.lane.b32.xlu1 %v10237_v18, %s5688_s6  ;;  %v5294_v33 = vunpack.i.h.bf16 %v5292_v60  ;;  %v5293_v43 = vunpack.i.l.bf16 %v5292_v60  ;;  %v2029_v55 = vrot.slane %v369_v13, 1  ;;  %v5069_v10 = vunpack.i.h.bf16 %v10239_v37 }
 0x200   : > { %4342 = vmatprep.mubr.msk.bf16.mxu1 %vm3004_vm11, %v2970_v54  ;;  %v8616_v1 = vpop.permute.xlu1 %5306  ;;  %v5064_v27 = vunpack.i.h.bf16 %v10240_v21  ;;  %v5063_v4 = vunpack.i.l.bf16 %v10240_v21  ;;  %v8679_v31 = vsel %vm873_vm1, %v2234_v12, %v2236_v3  ;;  %v5234_v29 = vunpack.i.h.bf16 %v8479_v34  ;;  %v10244_v54 = vld [vmem:[#allocation182_spill] sm:$0xff] }
 0x201   : > { %5581 = vrot.lane.b32.xlu0 %v10238_v30, %s5688_s6  ;;  %v2928_v14 = vsel %vm2885_vm10, %v2863_v28, %v5293_v43  ;;  %v2929_v57 = vsel %vm2885_vm10, %v2864_v15, %v5294_v33  ;;  %v8655_v51 = vsel %vm520_vm0, %v2027_v26, %v2029_v55  ;;  %v5298_v9 = vunpack.i.l.bf16 %v8595_v25  ;;  %v10247_v15 = vld [vmem:[#allocation190_spill] sm:$0xff] }
 0x202   : > { %v2971_v7 = vpack.c.bf16 %v2929_v57, %v2928_v14  ;;  %v8624_v5 = vpop.permute.xlu0 %5301  ;;  %v5640_v35 = vpack.i.bf16 %v8655_v51, %v8652_v47  ;;  %v5309_v11 = vunpack.i.h.bf16 %v8616_v1  ;;  %v5308_v20 = vunpack.i.l.bf16 %v8616_v1  ;;  %v10252_v51 = vld [vmem:[#allocation110_spill] sm:$0xff] }
 0x203   : > { %5596 = vrot.lane.b32.xlu1 %v10237_v18, %s5684_s25  ;;  %v2228_v38 = vrot.slane %v8599_v63, 2  ;;  %v2229_v39 = vrot.slane %v8618_v6, 2  ;;  %v2705_v52 = vsel %vm2690_vm7, %v10243_v48, %v5068_v61  ;;  %v5665_v34 = vpack.i.bf16 %v8679_v31, %v8669_v22  ;;  %v10245_v18 = vld [vmem:[#allocation158_spill] sm:$0xff]  ;;  %v10249_v61 = vld [vmem:[#allocation199_spill] sm:$0xff] }
 0x204   : > { %4343 = vmatmul.mubr.msk.bf16.gmra.mrb[8].mxu1 %vm3004_vm11, %v2971_v7  ;;  %v8633_v17 = vpop.permute.xlu1 %5316  ;;  %v2231_v19 = vrot.slane %v369_v13, 2  ;;  %v2706_v60 = vsel %vm2690_vm7, %v10244_v54, %v5069_v10  ;;  %v2703_v53 = vsel %vm2690_vm7, %v10245_v18, %v5063_v4  ;;  %v2704_v33 = vsel %vm2690_vm7, %v10246_v32, %v5064_v27 }
 0x205   : > { %5591 = vrot.lane.b32.xlu0 %v10238_v30, %s5684_s25  ;;  %v2735_v30 = vsel %vm2690_vm7, %v10247_v15, %v5234_v29  ;;  %v5299_v1 = vunpack.i.h.bf16 %v8595_v25  ;;  %v2736_v13 = vsel %vm2690_vm7, %v10248_v16, %v5298_v9  ;;  %v5318_v14 = vunpack.i.l.bf16 %v8633_v17  ;;  %v10250_v29 = vld [vmem:[#allocation187_spill] sm:$0xff] }
 0x206   : > { %v8644_v36 = vpop.permute.xlu0 %5311  ;;  %v2768_v57 = vsel %vm2755_vm8, %v2703_v53, %v5308_v20  ;;  %v2769_v41 = vsel %vm2755_vm8, %v2704_v33, %v5309_v11  ;;  %v5319_v59 = vunpack.i.h.bf16 %v8633_v17  ;;  %v5303_v17 = vunpack.i.l.bf16 %v8624_v5 }
 0x207   : > { %5606 = vrot.lane.b32.xlu1 %v8531_v44, %s5684_s25  ;;  %v5313_v7 = vunpack.i.l.bf16 %v8644_v36  ;;  %v5314_v26 = vunpack.i.h.bf16 %v8644_v36  ;;  %v2232_v16 = vsel %vm873_vm1, %v2229_v39, %v2231_v19  ;;  %v5304_v22 = vunpack.i.h.bf16 %v8624_v5 }
 0x208   : > { %v5327_v56 = vpop.permute.xlu1 %5326  ;;  %v2771_v21 = vsel %vm2755_vm8, %v2706_v60, %v5319_v59 }
 0x209   : > { %5601 = vrot.lane.b32.xlu0 %v8637_v8, %s5684_s25  ;;  %v5328_v2 = vunpack.i.l.bf16 %v5327_v56  ;;  %v5329_v43 = vunpack.i.h.bf16 %v5327_v56  ;;  %v2800_v27 = vsel %vm2755_vm8, %v2735_v30, %v5313_v7  ;;  %v2801_v11 = vsel %vm2755_vm8, %v2736_v13, %v5314_v26  ;;  %v10251_v13 = vld [vmem:[#allocation40_spill] sm:$0xff] }
 0x20a   : > { %v2230_v30 = vsel %vm873_vm1, %v2228_v38, %v2229_v39  ;;  %v2737_v47 = vsel %vm2690_vm7, %v10251_v13, %v5299_v1 }
 0x20b   : > { %v8674_v46 = vpop.permute.xlu0 %5321  ;;  %5616 = vrot.lane.b32.xlu1 %v10241_v40, %s5685_s26  ;;  %v2833_v25 = vsel %vm2820_vm9, %v2768_v57, %v5328_v2  ;;  %v2834_v12 = vsel %vm2820_vm9, %v2769_v41, %v5329_v43  ;;  %v5660_v59 = vpack.i.bf16 %v2232_v16, %v2230_v30 }
 0x20c   : > { %v5324_v20 = vunpack.i.h.bf16 %v8674_v46  ;;  %v5323_v48 = vunpack.i.l.bf16 %v8674_v46 }
 0x20d   : > { %5611 = vrot.lane.b32.xlu0 %v10242_v50, %s5685_s26  ;;  %v5337_v49 = vpop.permute.xlu1 %5336 }
 0x20e   : > { %v5339_v3 = vunpack.i.h.bf16 %v5337_v49  ;;  %v5338_v56 = vunpack.i.l.bf16 %v5337_v49  ;;  %v2802_v63 = vsel %vm2755_vm8, %v2737_v47, %v5323_v48 }
 0x20f   : > { %v5332_v28 = vpop.permute.xlu0 %5331  ;;  %5626 = vrot.lane.b32.xlu1 %v5625_v58, %s5685_s26 }
 0x210   : > { %v5333_v58 = vunpack.i.l.bf16 %v5332_v28  ;;  %v5334_v4 = vunpack.i.h.bf16 %v5332_v28  ;;  %v2836_v2 = vsel %vm2820_vm9, %v2771_v21, %v5339_v3 }
 0x211   : > { %5621 = vrot.lane.b32.xlu0 %v5620_v62, %s5685_s26  ;;  %v5347_v42 = vpop.permute.xlu1 %5346  ;;  %v2770_v62 = vsel %vm2755_vm8, %v2705_v52, %v5318_v14 }
 0x212   : > { %v5349_v55 = vunpack.i.h.bf16 %v5347_v42  ;;  %v5348_v45 = vunpack.i.l.bf16 %v5347_v42  ;;  %v2835_v52 = vsel %vm2820_vm9, %v2770_v62, %v5338_v56  ;;  %v2865_v54 = vsel %vm2820_vm9, %v2800_v27, %v5333_v58  ;;  %v10254_v56 = vld [vmem:[#allocation111_spill] sm:$0xff]  ;;  %v10256_v27 = vld [vmem:[#allocation70_spill] sm:$0xff] }
 0x213   : > { %v5342_v37 = vpop.permute.xlu0 %5341  ;;  %5636 = vrot.lane.b32.xlu1 %v10249_v61, %s5686_s29  ;;  %v2866_v33 = vsel %vm2820_vm9, %v2801_v11, %v5334_v4  ;;  %v5074_v58 = vunpack.i.h.bf16 %v10254_v56 }
 0x214   : > { %v2898_v10 = vsel %vm2885_vm10, %v2833_v25, %v5348_v45  ;;  %v2899_v36 = vsel %vm2885_vm10, %v2834_v12, %v5349_v55  ;;  %v5344_v43 = vunpack.i.h.bf16 %v5342_v37  ;;  %v5343_v28 = vunpack.i.l.bf16 %v5342_v37  ;;  %v10253_v45 = vld [vmem:[#allocation51_spill] sm:$0xff] }
 0x215   : > { %v2956_v40 = vpack.c.bf16 %v2899_v36, %v2898_v10  ;;  %5631 = vrot.lane.b32.xlu0 %v10250_v29, %s5686_s29  ;;  %v5357_v9 = vpop.permute.xlu1 %5356  ;;  %v5078_v12 = vunpack.i.l.bf16 %v10253_v45  ;;  %v5079_v3 = vunpack.i.h.bf16 %v10253_v45  ;;  %v5073_v37 = vunpack.i.l.bf16 %v10254_v56  ;;  %v10255_v10 = vld [vmem:[#allocation50_spill] sm:$0xff] }
 0x216   : > { %v5359_v50 = vunpack.i.h.bf16 %v5357_v9  ;;  %v5358_v49 = vunpack.i.l.bf16 %v5357_v9  ;;  %v2867_v39 = vsel %vm2820_vm9, %v2802_v63, %v5343_v28  ;;  %v10258_v9 = vld [vmem:[#allocation69_spill] sm:$0xff] }
 0x217   : > { %v5352_v60 = vpop.permute.xlu0 %5351  ;;  %5646 = vrot.lane.b32.xlu1 %v5645_v23, %s5686_s29  ;;  %4314 = vmatprep.mubr.msk.bf16.mxu0 %vm3004_vm11, %v2956_v40  ;;  %v2709_v36 = vsel %vm2690_vm7, %v10255_v10, %v5078_v12  ;;  %v2710_v4 = vsel %vm2690_vm7, %v10256_v27, %v5079_v3  ;;  %v10257_v40 = vld [vmem:[#allocation160_spill] sm:$0xff]  ;;  %v2708_v11 = vsel %vm2690_vm7, %v10258_v9, %v5074_v58 }
 0x218   : > { %v2900_v18 = vsel %vm2885_vm10, %v2835_v52, %v5358_v49  ;;  %v2901_v53 = vsel %vm2885_vm10, %v2836_v2, %v5359_v50  ;;  %v5354_v32 = vunpack.i.h.bf16 %v5352_v60  ;;  %v5353_v46 = vunpack.i.l.bf16 %v5352_v60  ;;  %v10259_v50 = vld [vmem:[#allocation92_spill] sm:$0xff]  ;;  %v10260_v52 = vld [vmem:[#allocation45_spill] sm:$0xff] }
 0x219   : > { %v2957_v15 = vpack.c.bf16 %v2901_v53, %v2900_v18  ;;  %5641 = vrot.lane.b32.xlu0 %v5640_v35, %s5686_s29  ;;  %v8742_v0 = vpop.permute.xlu1 %5366  ;;  %v2738_v35 = vsel %vm2690_vm7, %v10252_v51, %v5303_v17  ;;  %v2707_v29 = vsel %vm2690_vm7, %v10257_v40, %v5073_v37  ;;  %v2739_v49 = vsel %vm2690_vm7, %v10259_v50, %v5304_v22 }
 0x21a   : > { %v2930_v24 = vsel %vm2885_vm10, %v2865_v54, %v5353_v46  ;;  %v2931_v23 = vsel %vm2885_vm10, %v2866_v33, %v5354_v32  ;;  %v2803_v38 = vsel %vm2755_vm8, %v2738_v35, %v5324_v20  ;;  %v5368_v31 = vunpack.i.l.bf16 %v8742_v0 }
 0x21b   : > { %v2972_v14 = vpack.c.bf16 %v2931_v23, %v2930_v24  ;;  %v5362_v57 = vpop.permute.xlu0 %5361  ;;  %5656 = vrot.lane.b32.xlu1 %v8531_v44, %s5688_s6  ;;  %4315 = vmatmul.mubr.msk.bf16.gmra.mrb[12].mxu0 %vm3004_vm11, %v2957_v15  ;;  %v2868_v19 = vsel %vm2820_vm9, %v2803_v38, %v5344_v43  ;;  %v5369_v48 = vunpack.i.h.bf16 %v8742_v0 }
 0x21c   : > { %v5364_v6 = vunpack.i.h.bf16 %v5362_v57  ;;  %v5363_v41 = vunpack.i.l.bf16 %v5362_v57  ;;  %v2740_v2 = vsel %vm2690_vm7, %v10260_v52, %v5368_v31 }
 0x21d   : > { %5651 = vrot.lane.b32.xlu0 %v8637_v8, %s5688_s6  ;;  %4346 = vmatprep.mubr.msk.bf16.mxu1 %vm3004_vm11, %v2972_v14  ;;  %v5377_v1 = vpop.permute.xlu1 %5376 }
 0x21e   : > { %v2932_v44 = vsel %vm2885_vm10, %v2867_v39, %v5363_v41  ;;  %v2933_v7 = vsel %vm2885_vm10, %v2868_v19, %v5364_v6  ;;  %v5378_v17 = vunpack.i.l.bf16 %v5377_v1 }
 0x21f   : > { %v2973_v42 = vpack.c.bf16 %v2933_v7, %v2932_v44  ;;  %v8770_v26 = vpop.permute.xlu0 %5371  ;;  %5666 = vrot.lane.b32.xlu1 %v5665_v34, %s5688_s6  ;;  %v5379_v34 = vunpack.i.h.bf16 %v5377_v1 }
 0x220   : > { %v2772_v60 = vsel %vm2755_vm8, %v2707_v29, %v5378_v17  ;;  %v5373_v13 = vunpack.i.l.bf16 %v8770_v26 }
 0x221   : > { %5661 = vrot.lane.b32.xlu0 %v5660_v59, %s5688_s6  ;;  %4347 = vmatmul.mubr.msk.bf16.gmra.mrb[12].mxu1 %vm3004_vm11, %v2973_v42  ;;  %v5387_v8 = vpop.permute.xlu1 %5386  ;;  %v2773_v18 = vsel %vm2755_vm8, %v2708_v11, %v5379_v34  ;;  %v10261_v34 = vld [vmem:[#allocation135_spill] sm:$0xff] }
 0x222   : > { %v5388_v54 = vunpack.i.l.bf16 %v5387_v8  ;;  %v5389_v53 = vunpack.i.h.bf16 %v5387_v8  ;;  %v2741_v17 = vsel %vm2690_vm7, %v10261_v34, %v5369_v48 }
 0x223   : > { %v5382_v25 = vpop.permute.xlu0 %5381 }
 0x224   : > { %v5383_v32 = vunpack.i.l.bf16 %v5382_v25  ;;  %v5384_v33 = vunpack.i.h.bf16 %v5382_v25  ;;  %v2774_v47 = vsel %vm2755_vm8, %v2709_v36, %v5388_v54  ;;  %v2775_v14 = vsel %vm2755_vm8, %v2710_v4, %v5389_v53 }
 0x225   : > { %v5397_v55 = vpop.permute.xlu1 %5396  ;;  %v5374_v53 = vunpack.i.h.bf16 %v8770_v26  ;;  %v10266_v26 = vld [vmem:[#allocation192_spill] sm:$0xff] }
 0x226   : > { %v5398_v21 = vunpack.i.l.bf16 %v5397_v55  ;;  %v5399_v20 = vunpack.i.h.bf16 %v5397_v55  ;;  %v2804_v57 = vsel %vm2755_vm8, %v2739_v49, %v5383_v32  ;;  %v2805_v41 = vsel %vm2755_vm8, %v2740_v2, %v5384_v33 }
 0x227   : > { %v8782_v61 = vpop.permute.xlu0 %5391 }
 0x228   : > { %v2837_v43 = vsel %vm2820_vm9, %v2772_v60, %v5398_v21  ;;  %v2838_v24 = vsel %vm2820_vm9, %v2773_v18, %v5399_v20  ;;  %v5394_v39 = vunpack.i.h.bf16 %v8782_v61  ;;  %v5393_v59 = vunpack.i.l.bf16 %v8782_v61  ;;  %v10263_v60 = vld [vmem:[#allocation108_spill] sm:$0xff] }
 0x229   : > { %v5407_v62 = vpop.permute.xlu1 %5406  ;;  %v5083_v18 = vunpack.i.l.bf16 %v10263_v60 }
 0x22a   : > { %v5409_v23 = vunpack.i.h.bf16 %v5407_v62  ;;  %v5408_v0 = vunpack.i.l.bf16 %v5407_v62  ;;  %v10262_v62 = vld [vmem:[#allocation87_spill] sm:$0xff]  ;;  %v2806_v27 = vsel %vm2755_vm8, %v2741_v17, %v5393_v59 }
 0x22b   : > { %v5402_v5 = vpop.permute.xlu0 %5401  ;;  %v2742_v10 = vsel %vm2690_vm7, %v10262_v62, %v5373_v13 }
 0x22c   : > { %v5403_v30 = vunpack.i.l.bf16 %v5402_v5  ;;  %v5404_v63 = vunpack.i.h.bf16 %v5402_v5  ;;  %v2839_v44 = vsel %vm2820_vm9, %v2774_v47, %v5408_v0  ;;  %v2840_v7 = vsel %vm2820_vm9, %v2775_v14, %v5409_v23  ;;  %v10265_v0 = vld [vmem:[#allocation162_spill] sm:$0xff] }
 0x22d   : > { %v5417_v46 = vpop.permute.xlu1 %5416  ;;  %v2807_v4 = vsel %vm2755_vm8, %v2742_v10, %v5394_v39 }
 0x22e   : > { %v5419_v28 = vunpack.i.h.bf16 %v5417_v46  ;;  %v5418_v15 = vunpack.i.l.bf16 %v5417_v46  ;;  %v2869_v42 = vsel %vm2820_vm9, %v2804_v57, %v5403_v30  ;;  %v2870_v3 = vsel %vm2820_vm9, %v2805_v41, %v5404_v63 }
 0x22f   : > { %v5412_v16 = vpop.permute.xlu0 %5411  ;;  %v2712_v30 = vsel %vm2690_vm7, %v10265_v0, %v5374_v53 }
 0x230   : > { %v2902_v51 = vsel %vm2885_vm10, %v2837_v43, %v5418_v15  ;;  %v2903_v35 = vsel %vm2885_vm10, %v2838_v24, %v5419_v28  ;;  %v5414_v56 = vunpack.i.h.bf16 %v5412_v16  ;;  %v5413_v58 = vunpack.i.l.bf16 %v5412_v16  ;;  %v10264_v24 = vld [vmem:[#allocation73_spill] sm:$0xff] }
 0x231   : > { %v2958_v38 = vpack.c.bf16 %v2903_v35, %v2902_v51  ;;  %v5427_v6 = vpop.permute.xlu1 %5426  ;;  %v2711_v23 = vsel %vm2690_vm7, %v10264_v24, %v5083_v18 }
 0x232   : > { %v5429_v19 = vunpack.i.h.bf16 %v5427_v6  ;;  %v5428_v1 = vunpack.i.l.bf16 %v5427_v6  ;;  %v2871_v9 = vsel %vm2820_vm9, %v2806_v27, %v5413_v58  ;;  %v2872_v11 = vsel %vm2820_vm9, %v2807_v4, %v5414_v56 }
 0x233   : > { %v5422_v8 = vpop.permute.xlu0 %5421  ;;  %4318 = vmatprep.mubr.msk.bf16.mxu0 %vm3004_vm11, %v2958_v38  ;;  %v10267_v38 = vld [vmem:[#allocation157_spill] sm:$0xff] }
 0x234   : > { %v2904_v25 = vsel %vm2885_vm10, %v2839_v44, %v5428_v1  ;;  %v2905_v55 = vsel %vm2885_vm10, %v2840_v7, %v5429_v19  ;;  %v5424_v45 = vunpack.i.h.bf16 %v5422_v8  ;;  %v5423_v12 = vunpack.i.l.bf16 %v5422_v8  ;;  %v10268_v1 = vld [vmem:[#allocation155_spill] sm:$0xff]  ;;  %v10269_v44 = vld [vmem:[#allocation9_spill] sm:$0xff] }
 0x235   : > { %v2959_v37 = vpack.c.bf16 %v2905_v55, %v2904_v25  ;;  %v5437_v61 = vpop.permute.xlu1 %5436  ;;  %v10270_v25 = vld [vmem:[#allocation74_spill] sm:$0xff] }
 0x236   : > { %v2934_v22 = vsel %vm2885_vm10, %v2869_v42, %v5423_v12  ;;  %v2935_v31 = vsel %vm2885_vm10, %v2870_v3, %v5424_v45  ;;  %v5439_v46 = vunpack.i.h.bf16 %v5437_v61  ;;  %v5438_v33 = vunpack.i.l.bf16 %v5437_v61  ;;  %v10271_v45 = vld [vmem:[#allocation58_spill] sm:$0xff] }
 0x237   : > { %v2974_v36 = vpack.c.bf16 %v2935_v31, %v2934_v22  ;;  %v5432_v21 = vpop.permute.xlu0 %5431  ;;  %4319 = vmatmul.mubr.msk.bf16.gmra.mrb[16].mxu0 %vm3004_vm11, %v2959_v37 }
 0x238   : > { %v5434_v40 = vunpack.i.h.bf16 %v5432_v21  ;;  %v5433_v29 = vunpack.i.l.bf16 %v5432_v21  ;;  %v2743_v63 = vsel %vm2690_vm7, %v10266_v26, %v5438_v33  ;;  %v2744_v6 = vsel %vm2690_vm7, %v10267_v38, %v5439_v46 }
 0x239   : > { %4350 = vmatprep.mubr.msk.bf16.mxu1 %vm3004_vm11, %v2974_v36  ;;  %v5447_v20 = vpop.permute.xlu1 %5446 }
 0x23a   : > { %v2936_v5 = vsel %vm2885_vm10, %v2871_v9, %v5433_v29  ;;  %v2937_v50 = vsel %vm2885_vm10, %v2872_v11, %v5434_v40  ;;  %v5449_v28 = vunpack.i.h.bf16 %v5447_v20  ;;  %v5448_v15 = vunpack.i.l.bf16 %v5447_v20 }
 0x23b   : > { %v2975_v49 = vpack.c.bf16 %v2937_v50, %v2936_v5  ;;  %v5442_v48 = vpop.permute.xlu0 %5441 }
 0x23c   : > { %v5444_v16 = vunpack.i.h.bf16 %v5442_v48  ;;  %v5443_v13 = vunpack.i.l.bf16 %v5442_v48  ;;  %v2745_v59 = vsel %vm2690_vm7, %v10268_v1, %v5448_v15  ;;  %v2746_v7 = vsel %vm2690_vm7, %v10269_v44, %v5449_v28 }
 0x23d   : > { %4351 = vmatmul.mubr.msk.bf16.gmra.mrb[16].mxu1 %vm3004_vm11, %v2975_v49  ;;  %v5457_v52 = vpop.permute.xlu1 %5456 }
 0x23e   : > { %v5459_v51 = vunpack.i.h.bf16 %v5457_v52  ;;  %v5458_v35 = vunpack.i.l.bf16 %v5457_v52  ;;  %v2714_v55 = vsel %vm2690_vm7, %v10270_v25, %v5444_v16  ;;  %v2713_v12 = vsel %vm2690_vm7, %v10271_v45, %v5443_v13 }
 0x23f   : > { %v5452_v2 = vpop.permute.xlu0 %5451 }
 0x240   : > { %v5454_v14 = vunpack.i.h.bf16 %v5452_v2  ;;  %v5453_v57 = vunpack.i.l.bf16 %v5452_v2  ;;  %v2808_v37 = vsel %vm2755_vm8, %v2743_v63, %v5458_v35  ;;  %v2809_v61 = vsel %vm2755_vm8, %v2744_v6, %v5459_v51 }
 0x241   : > { %v5467_v54 = vpop.permute.xlu1 %5466 }
 0x242   : > { %v5469_v41 = vunpack.i.h.bf16 %v5467_v54  ;;  %v5468_v39 = vunpack.i.l.bf16 %v5467_v54  ;;  %v2776_v22 = vsel %vm2755_vm8, %v2711_v23, %v5453_v57  ;;  %v2777_v31 = vsel %vm2755_vm8, %v2712_v30, %v5454_v14 }
 0x243   : > { %v5462_v32 = vpop.permute.xlu0 %5461 }
 0x244   : > { %v5463_v42 = vunpack.i.l.bf16 %v5462_v32  ;;  %v2810_v34 = vsel %vm2755_vm8, %v2745_v59, %v5468_v39  ;;  %v2811_v17 = vsel %vm2755_vm8, %v2746_v7, %v5469_v41  ;;  %v5464_v62 = vunpack.i.h.bf16 %v5462_v32 }
 0x245   : > { %v5477_v43 = vpop.permute.xlu1 %5476 }
 0x246   : > { %v5478_v8 = vunpack.i.l.bf16 %v5477_v43  ;;  %v5479_v3 = vunpack.i.h.bf16 %v5477_v43  ;;  %v2778_v21 = vsel %vm2755_vm8, %v2713_v12, %v5463_v42  ;;  %v2779_v28 = vsel %vm2755_vm8, %v2714_v55, %v5464_v62 }
 0x247   : > { %v5472_v47 = vpop.permute.xlu0 %5471 }
 0x248   : > { %v5473_v56 = vunpack.i.l.bf16 %v5472_v47  ;;  %v5474_v10 = vunpack.i.h.bf16 %v5472_v47  ;;  %v2873_v27 = vsel %vm2820_vm9, %v2808_v37, %v5478_v8  ;;  %v2874_v29 = vsel %vm2820_vm9, %v2809_v61, %v5479_v3  ;;  %v10272_v3 = vld [vmem:[#allocation194_spill] sm:$0xff] }
 0x249   : > { %v5487_v19 = vpop.permute.xlu1 %5486 }
 0x24a   : > { %v2841_v9 = vsel %vm2820_vm9, %v2776_v22, %v5473_v56  ;;  %v5489_v11 = vunpack.i.h.bf16 %v5487_v19  ;;  %v5488_v20 = vunpack.i.l.bf16 %v5487_v19  ;;  %v2842_v2 = vsel %vm2820_vm9, %v2777_v31, %v5474_v10 }
 0x24b   : > { %v5482_v58 = vpop.permute.xlu0 %5481 }
 0x24c   : > { %v5484_v54 = vunpack.i.h.bf16 %v5482_v58  ;;  %v5483_v60 = vunpack.i.l.bf16 %v5482_v58  ;;  %v2875_v15 = vsel %vm2820_vm9, %v2810_v34, %v5488_v20  ;;  %v2876_v24 = vsel %vm2820_vm9, %v2811_v17, %v5489_v11  ;;  %v10273_v58 = vld [vmem:[#allocation56_spill] sm:$0xff]  ;;  %v10276_v11 = vld [vmem:[#allocation193_spill] sm:$0xff] }
 0x24d   : > { %v5497_v36 = vpop.permute.xlu1 %5496 }
 0x24e   : > { %v5499_v4 = vunpack.i.h.bf16 %v5497_v36  ;;  %v5498_v40 = vunpack.i.l.bf16 %v5497_v36  ;;  %v2843_v51 = vsel %vm2820_vm9, %v2778_v21, %v5483_v60  ;;  %v2844_v35 = vsel %vm2820_vm9, %v2779_v28, %v5484_v54  ;;  %v10274_v36 = vld [vmem:[#allocation82_spill] sm:$0xff] }
 0x24f   : > { %v5492_v5 = vpop.permute.xlu0 %5491  ;;  %v10279_v54 = vld [vmem:[#allocation78_spill] sm:$0xff] }
 0x250   : > { %v2938_v50 = vsel %vm2885_vm10, %v2873_v27, %v5498_v40  ;;  %v2939_v49 = vsel %vm2885_vm10, %v2874_v29, %v5499_v4  ;;  %v5494_v48 = vunpack.i.h.bf16 %v5492_v5  ;;  %v5493_v52 = vunpack.i.l.bf16 %v5492_v5  ;;  %v10275_v27 = vld [vmem:[#allocation188_spill] sm:$0xff]  ;;  %v10277_v5 = vld [vmem:[#allocation14_spill] sm:$0xff] }
 0x251   : > { %v2976_v18 = vpack.c.bf16 %v2939_v49, %v2938_v50  ;;  %v5507_v53 = vpop.permute.xlu1 %5506 }
 0x252   : > { %v2906_v32 = vsel %vm2885_vm10, %v2841_v9, %v5493_v52  ;;  %v2907_v46 = vsel %vm2885_vm10, %v2842_v2, %v5494_v48  ;;  %v5509_v33 = vunpack.i.h.bf16 %v5507_v53  ;;  %v5508_v43 = vunpack.i.l.bf16 %v5507_v53  ;;  %v10278_v52 = vld [vmem:[#allocation76_spill] sm:$0xff] }
 0x253   : > { %v2960_v23 = vpack.c.bf16 %v2907_v46, %v2906_v32  ;;  %v5502_v0 = vpop.permute.xlu0 %5501  ;;  %4354 = vmatprep.mubr.msk.bf16.mxu1 %vm3004_vm11, %v2976_v18 }
 0x254   : > { %v2940_v30 = vsel %vm2885_vm10, %v2875_v15, %v5508_v43  ;;  %v2941_v16 = vsel %vm2885_vm10, %v2876_v24, %v5509_v33  ;;  %v5504_v13 = vunpack.i.h.bf16 %v5502_v0  ;;  %v5503_v47 = vunpack.i.l.bf16 %v5502_v0 }
 0x255   : > { %v2977_v14 = vpack.c.bf16 %v2941_v16, %v2940_v30  ;;  %4322 = vmatprep.mubr.msk.bf16.mxu0 %vm3004_vm11, %v2960_v23  ;;  %v5517_v57 = vpop.permute.xlu1 %5516 }
 0x256   : > { %v2908_v26 = vsel %vm2885_vm10, %v2843_v51, %v5503_v47  ;;  %v2909_v63 = vsel %vm2885_vm10, %v2844_v35, %v5504_v13  ;;  %v5519_v44 = vunpack.i.h.bf16 %v5517_v57  ;;  %v5518_v7 = vunpack.i.l.bf16 %v5517_v57 }
 0x257   : > { %v2961_v38 = vpack.c.bf16 %v2909_v63, %v2908_v26  ;;  %v5512_v6 = vpop.permute.xlu0 %5511  ;;  %4355 = vmatmul.mubr.msk.bf16.gmra.mrb[20].mxu1 %vm3004_vm11, %v2977_v14 }
 0x258   : > { %v5514_v8 = vunpack.i.h.bf16 %v5512_v6  ;;  %v5513_v25 = vunpack.i.l.bf16 %v5512_v6  ;;  %v2747_v56 = vsel %vm2690_vm7, %v10272_v3, %v5518_v7  ;;  %v2748_v37 = vsel %vm2690_vm7, %v10273_v58, %v5519_v44 }
 0x259   : > { %4323 = vmatmul.mubr.msk.bf16.gmra.mrb[20].mxu0 %vm3004_vm11, %v2961_v38  ;;  %v5527_v41 = vpop.permute.xlu1 %5526 }
 0x25a   : > { %v5529_v45 = vunpack.i.h.bf16 %v5527_v41  ;;  %v5528_v12 = vunpack.i.l.bf16 %v5527_v41  ;;  %v2715_v21 = vsel %vm2690_vm7, %v10274_v36, %v5513_v25  ;;  %v2716_v4 = vsel %vm2690_vm7, %v10275_v27, %v5514_v8 }
 0x25b   : > { %v5522_v39 = vpop.permute.xlu0 %5521 }
 0x25c   : > { %v5524_v61 = vunpack.i.h.bf16 %v5522_v39  ;;  %v5523_v22 = vunpack.i.l.bf16 %v5522_v39  ;;  %v2749_v20 = vsel %vm2690_vm7, %v10276_v11, %v5528_v12  ;;  %v2750_v50 = vsel %vm2690_vm7, %v10277_v5, %v5529_v45 }
 0x25d   : > { %v5537_v19 = vpop.permute.xlu1 %5536 }
 0x25e   : > { %v5539_v34 = vunpack.i.h.bf16 %v5537_v19  ;;  %v5538_v17 = vunpack.i.l.bf16 %v5537_v19  ;;  %v2718_v2 = vsel %vm2690_vm7, %v10278_v52, %v5524_v61  ;;  %v2717_v60 = vsel %vm2690_vm7, %v10279_v54, %v5523_v22 }
 0x25f   : > { %v5532_v1 = vpop.permute.xlu0 %5531 }
 0x260   : > { %v5534_v62 = vunpack.i.h.bf16 %v5532_v1  ;;  %v5533_v10 = vunpack.i.l.bf16 %v5532_v1  ;;  %v2812_v46 = vsel %vm2755_vm8, %v2747_v56, %v5538_v17  ;;  %v2813_v33 = vsel %vm2755_vm8, %v2748_v37, %v5539_v34 }
 0x261   : > { %v5547_v59 = vpop.permute.xlu1 %5546 }
 0x262   : > { %v5549_v40 = vunpack.i.h.bf16 %v5547_v59  ;;  %v5548_v29 = vunpack.i.l.bf16 %v5547_v59  ;;  %v2780_v43 = vsel %vm2755_vm8, %v2715_v21, %v5533_v10  ;;  %v2781_v28 = vsel %vm2755_vm8, %v2716_v4, %v5534_v62 }
 0x263   : > { %v5542_v42 = vpop.permute.xlu0 %5541 }
 0x264   : > { %v5543_v49 = vunpack.i.l.bf16 %v5542_v42  ;;  %v2814_v15 = vsel %vm2755_vm8, %v2749_v20, %v5548_v29  ;;  %v2815_v24 = vsel %vm2755_vm8, %v2750_v50, %v5549_v40  ;;  %v5544_v23 = vunpack.i.h.bf16 %v5542_v42 }
 0x265   : > { %v5557_v55 = vpop.permute.xlu1 %5556 }
 0x266   : > { %v5558_v48 = vunpack.i.l.bf16 %v5557_v55  ;;  %v5559_v18 = vunpack.i.h.bf16 %v5557_v55  ;;  %v2782_v16 = vsel %vm2755_vm8, %v2717_v60, %v5543_v49  ;;  %v2783_v45 = vsel %vm2755_vm8, %v2718_v2, %v5544_v23 }
 0x267   : > { %v5552_v31 = vpop.permute.xlu0 %5551 }
 0x268   : > { %v5553_v53 = vunpack.i.l.bf16 %v5552_v31  ;;  %v5554_v0 = vunpack.i.h.bf16 %v5552_v31  ;;  %v2877_v13 = vsel %vm2820_vm9, %v2812_v46, %v5558_v48  ;;  %v2878_v35 = vsel %vm2820_vm9, %v2813_v33, %v5559_v18  ;;  %v10280_v18 = vld [vmem:[#allocation31_spill] sm:$0xff] }
 0x269   : > { %v5567_v9 = vpop.permute.xlu1 %5566 }
 0x26a   : > { %v2845_v14 = vsel %vm2820_vm9, %v2780_v43, %v5553_v53  ;;  %v5569_v57 = vunpack.i.h.bf16 %v5567_v9  ;;  %v5568_v26 = vunpack.i.l.bf16 %v5567_v9  ;;  %v2846_v19 = vsel %vm2820_vm9, %v2781_v28, %v5554_v0 }
 0x26b   : > { %v5562_v32 = vpop.permute.xlu0 %5561 }
 0x26c   : > { %v5564_v1 = vunpack.i.h.bf16 %v5562_v32  ;;  %v5563_v59 = vunpack.i.l.bf16 %v5562_v32  ;;  %v2879_v12 = vsel %vm2820_vm9, %v2814_v15, %v5568_v26  ;;  %v2880_v3 = vsel %vm2820_vm9, %v2815_v24, %v5569_v57  ;;  %v10281_v32 = vld [vmem:[#allocation44_spill] sm:$0xff]  ;;  %v10284_v57 = vld [vmem:[#allocation195_spill] sm:$0xff] }
 0x26d   : > { %v5577_v30 = vpop.permute.xlu1 %5576 }
 0x26e   : > { %v5579_v47 = vunpack.i.h.bf16 %v5577_v30  ;;  %v5578_v51 = vunpack.i.l.bf16 %v5577_v30  ;;  %v2847_v34 = vsel %vm2820_vm9, %v2782_v16, %v5563_v59  ;;  %v2848_v17 = vsel %vm2820_vm9, %v2783_v45, %v5564_v1  ;;  %v10282_v30 = vld [vmem:[#allocation85_spill] sm:$0xff] }
 0x26f   : > { %v5572_v63 = vpop.permute.xlu0 %5571  ;;  %v10287_v1 = vld [vmem:[#allocation133_spill] sm:$0xff] }
 0x270   : > { %v2942_v38 = vsel %vm2885_vm10, %v2877_v13, %v5578_v51  ;;  %v2943_v6 = vsel %vm2885_vm10, %v2878_v35, %v5579_v47  ;;  %v5574_v41 = vunpack.i.h.bf16 %v5572_v63  ;;  %v5573_v39 = vunpack.i.l.bf16 %v5572_v63  ;;  %v10283_v13 = vld [vmem:[#allocation84_spill] sm:$0xff] }
 0x271   : > { %v2978_v44 = vpack.c.bf16 %v2943_v6, %v2942_v38  ;;  %v5587_v7 = vpop.permute.xlu1 %5586  ;;  %v10285_v63 = vld [vmem:[#allocation52_spill] sm:$0xff] }
 0x272   : > { %v2910_v42 = vsel %vm2885_vm10, %v2845_v14, %v5573_v39  ;;  %v2911_v8 = vsel %vm2885_vm10, %v2846_v19, %v5574_v41  ;;  %v5589_v25 = vunpack.i.h.bf16 %v5587_v7  ;;  %v5588_v55 = vunpack.i.l.bf16 %v5587_v7  ;;  %v10286_v39 = vld [vmem:[#allocation81_spill] sm:$0xff] }
 0x273   : > { %v2962_v56 = vpack.c.bf16 %v2911_v8, %v2910_v42  ;;  %v5582_v58 = vpop.permute.xlu0 %5581  ;;  %4358 = vmatprep.mubr.msk.bf16.mxu1 %vm3004_vm11, %v2978_v44 }
 0x274   : > { %v2944_v37 = vsel %vm2885_vm10, %v2879_v12, %v5588_v55  ;;  %v2945_v61 = vsel %vm2885_vm10, %v2880_v3, %v5589_v25  ;;  %v5584_v22 = vunpack.i.h.bf16 %v5582_v58  ;;  %v5583_v31 = vunpack.i.l.bf16 %v5582_v58 }
 0x275   : > { %v2979_v62 = vpack.c.bf16 %v2945_v61, %v2944_v37  ;;  %4326 = vmatprep.mubr.msk.bf16.mxu0 %vm3004_vm11, %v2962_v56  ;;  %v5597_v10 = vpop.permute.xlu1 %5596 }
 0x276   : > { %v2912_v36 = vsel %vm2885_vm10, %v2847_v34, %v5583_v31  ;;  %v2913_v21 = vsel %vm2885_vm10, %v2848_v17, %v5584_v22  ;;  %v5599_v5 = vunpack.i.h.bf16 %v5597_v10  ;;  %v5598_v50 = vunpack.i.l.bf16 %v5597_v10 }
 0x277   : > { %v2963_v27 = vpack.c.bf16 %v2913_v21, %v2912_v36  ;;  %v5592_v4 = vpop.permute.xlu0 %5591  ;;  %4359 = vmatmul.mubr.msk.bf16.gmra.mrb[24].mxu1 %vm3004_vm11, %v2979_v62 }
 0x278   : > { %v5594_v48 = vunpack.i.h.bf16 %v5592_v4  ;;  %v5593_v52 = vunpack.i.l.bf16 %v5592_v4  ;;  %v2751_v53 = vsel %vm2690_vm7, %v10280_v18, %v5598_v50  ;;  %v2752_v46 = vsel %vm2690_vm7, %v10281_v32, %v5599_v5 }
 0x279   : > { %4327 = vmatmul.mubr.msk.bf16.gmra.mrb[24].mxu0 %vm3004_vm11, %v2963_v27  ;;  %v5607_v40 = vpop.permute.xlu1 %5606 }
 0x27a   : > { %v5609_v54 = vunpack.i.h.bf16 %v5607_v40  ;;  %v5608_v60 = vunpack.i.l.bf16 %v5607_v40  ;;  %v2719_v16 = vsel %vm2690_vm7, %v10282_v30, %v5593_v52  ;;  %v2720_v47 = vsel %vm2690_vm7, %v10283_v13, %v5594_v48  ;;  %v8970_v13 = vld [vmem:[%s9212_s2] ss:$0 sm:$0xff] }
 0x27b   : > { %v5602_v29 = vpop.permute.xlu0 %5601 }
 0x27c   : > { %v5604_v33 = vunpack.i.h.bf16 %v5602_v29  ;;  %v5603_v43 = vunpack.i.l.bf16 %v5602_v29  ;;  %v2753_v26 = vsel %vm2690_vm7, %v10284_v57, %v5608_v60  ;;  %v2754_v38 = vsel %vm2690_vm7, %v10285_v63, %v5609_v54 }
 0x27d   : > { %v5617_v9 = vpop.permute.xlu1 %5616 }
 0x27e   : > { %v5619_v15 = vunpack.i.h.bf16 %v5617_v9  ;;  %v5618_v24 = vunpack.i.l.bf16 %v5617_v9  ;;  %v2722_v19 = vsel %vm2690_vm7, %v10286_v39, %v5604_v33  ;;  %v2721_v59 = vsel %vm2690_vm7, %v10287_v1, %v5603_v43 }
 0x27f   : > { %v5612_v11 = vpop.permute.xlu0 %5611 }
 0x280   : > { %v5614_v23 = vunpack.i.h.bf16 %v5612_v11  ;;  %v5613_v0 = vunpack.i.l.bf16 %v5612_v11  ;;  %v2816_v8 = vsel %vm2755_vm8, %v2751_v53, %v5618_v24  ;;  %v2817_v25 = vsel %vm2755_vm8, %v2752_v46, %v5619_v15 }
 0x281   : > { %v5627_v20 = vpop.permute.xlu1 %5626 }
 0x282   : > { %v5629_v51 = vunpack.i.h.bf16 %v5627_v20  ;;  %v5628_v35 = vunpack.i.l.bf16 %v5627_v20  ;;  %v2784_v55 = vsel %vm2755_vm8, %v2719_v16, %v5613_v0  ;;  %v2785_v45 = vsel %vm2755_vm8, %v2720_v47, %v5614_v23 }
 0x283   : > { %v5622_v49 = vpop.permute.xlu0 %5621 }
 0x284   : > { %v5623_v6 = vunpack.i.l.bf16 %v5622_v49  ;;  %v2818_v12 = vsel %vm2755_vm8, %v2753_v26, %v5628_v35  ;;  %v2819_v3 = vsel %vm2755_vm8, %v2754_v38, %v5629_v51  ;;  %v5624_v56 = vunpack.i.h.bf16 %v5622_v49 }
 0x285   : > { %v5637_v2 = vpop.permute.xlu1 %5636 }
 0x286   : > { %v5638_v41 = vunpack.i.l.bf16 %v5637_v2  ;;  %v5639_v44 = vunpack.i.h.bf16 %v5637_v2  ;;  %v2786_v61 = vsel %vm2755_vm8, %v2721_v59, %v5623_v6  ;;  %v2787_v54 = vsel %vm2755_vm8, %v2722_v19, %v5624_v56 }
 0x287   : > { %v5632_v28 = vpop.permute.xlu0 %5631 }
 0x288   : > { %v5633_v7 = vunpack.i.l.bf16 %v5632_v28  ;;  %v5634_v58 = vunpack.i.h.bf16 %v5632_v28  ;;  %v2881_v22 = vsel %vm2820_vm9, %v2816_v8, %v5638_v41  ;;  %v2882_v17 = vsel %vm2820_vm9, %v2817_v25, %v5639_v44 }
 0x289   : > { %v5647_v14 = vpop.permute.xlu1 %5646 }
 0x28a   : > { %v2849_v62 = vsel %vm2820_vm9, %v2784_v55, %v5633_v7  ;;  %v5649_v10 = vunpack.i.h.bf16 %v5647_v14  ;;  %v5648_v36 = vunpack.i.l.bf16 %v5647_v14  ;;  %v2850_v9 = vsel %vm2820_vm9, %v2785_v45, %v5634_v58 }
 0x28b   : > { %v5642_v42 = vpop.permute.xlu0 %5641 }
 0x28c   : > { %v5644_v11 = vunpack.i.h.bf16 %v5642_v42  ;;  %v5643_v20 = vunpack.i.l.bf16 %v5642_v42  ;;  %v2883_v60 = vsel %vm2820_vm9, %v2818_v12, %v5648_v36  ;;  %v2884_v18 = vsel %vm2820_vm9, %v2819_v3, %v5649_v10 }
 0x28d   : > { %v5657_v37 = vpop.permute.xlu1 %5656 }
 0x28e   : > { %v5659_v31 = vunpack.i.h.bf16 %v5657_v37  ;;  %v5658_v34 = vunpack.i.l.bf16 %v5657_v37  ;;  %v2851_v15 = vsel %vm2820_vm9, %v2786_v61, %v5643_v20  ;;  %v2852_v24 = vsel %vm2820_vm9, %v2787_v54, %v5644_v11 }
 0x28f   : > { %v5652_v21 = vpop.permute.xlu0 %5651 }
 0x290   : > { %v2946_v27 = vsel %vm2885_vm10, %v2881_v22, %v5658_v34  ;;  %v2947_v4 = vsel %vm2885_vm10, %v2882_v17, %v5659_v31  ;;  %v5654_v40 = vunpack.i.h.bf16 %v5652_v21  ;;  %v5653_v29 = vunpack.i.l.bf16 %v5652_v21 }
 0x291   : > { %v2980_v5 = vpack.c.bf16 %v2947_v4, %v2946_v27  ;;  %v5667_v50 = vpop.permute.xlu1 %5666 }
 0x292   : > { %v2914_v49 = vsel %vm2885_vm10, %v2849_v62, %v5653_v29  ;;  %v2915_v48 = vsel %vm2885_vm10, %v2850_v9, %v5654_v40  ;;  %v5669_v52 = vunpack.i.h.bf16 %v5667_v50  ;;  %v5668_v2 = vunpack.i.l.bf16 %v5667_v50 }
 0x293   : > { %v2964_v53 = vpack.c.bf16 %v2915_v48, %v2914_v49  ;;  %v5662_v32 = vpop.permute.xlu0 %5661  ;;  %4362 = vmatprep.mubr.msk.bf16.mxu1 %vm3004_vm11, %v2980_v5 }
 0x294   : > { %v2948_v46 = vsel %vm2885_vm10, %v2883_v60, %v5668_v2  ;;  %v2949_v33 = vsel %vm2885_vm10, %v2884_v18, %v5669_v52  ;;  %v5664_v43 = vunpack.i.h.bf16 %v5662_v32  ;;  %v5663_v28 = vunpack.i.l.bf16 %v5662_v32 }
 0x295   : > { %v2981_v23 = vpack.c.bf16 %v2949_v33, %v2948_v46  ;;  %4330 = vmatprep.mubr.msk.bf16.mxu0 %vm3004_vm11, %v2964_v53 }
 0x296   : > { %v2916_v0 = vsel %vm2885_vm10, %v2851_v15, %v5663_v28  ;;  %v2917_v30 = vsel %vm2885_vm10, %v2852_v24, %v5664_v43 }
 0x297   : > { %v2965_v16 = vpack.c.bf16 %v2917_v30, %v2916_v0  ;;  %4363 = vmatmul.mubr.msk.bf16.gmra.mrb[28].mxu1 %vm3004_vm11, %v2981_v23 }
 0x299   : > { %4331 = vmatmul.mubr.msk.bf16.gmra.mrb[28].mxu0 %vm3004_vm11, %v2965_v16  ;;  %v4304_v47 = vpop.f32.mrb[0].mxu0 }
 0x29a   : > { %v3150_v51 = vadd.f32 %v4304_v47, %v8970_v13  ;;  %v3141_v35 = vpop.f32.mrb[1].mxu0 }
 0x29b   : > { %v3142_v14 = vadd.f32 %v8970_v13, %v3141_v35  ;;  %v4305_v57 = vpop.f32.mrb[2].mxu0 }
 0x29c   : > { %v3398_v26 = vmax.f32 %v3150_v51, 0.0  ;;  %v3153_v63 = vadd.f32 %v4305_v57, %v8970_v13  ;;  %v3144_v38 = vpop.f32.mrb[3].mxu0 }
 0x29d   : > { %v3396_v6 = vmax.f32 %v3142_v14, 0.0  ;;  %v3145_v41 = vadd.f32 %v8970_v13, %v3144_v38 }
 0x29e   : > { %v4113_v39 = vpack.c.bf16 %v3398_v26, %v3398_v26  ;;  %v3399_v19 = vmax.f32 %v3153_v63, 0.0 }
 0x29f   : > { %v4111_v1 = vpack.c.bf16 %v3396_v6, %v3396_v6  ;;  %v3397_v59 = vmax.f32 %v3145_v41, 0.0  ;;  %v4336_v44 = vpop.f32.mrb[0].mxu1 }
 0x2a0   : > { %3859 = vst.msk [vmem:[%s8980_s12 + $0x8] sm:$0xf] %vm3856_vm12, %v4113_v39  ;;  %v4114_v7 = vpack.c.bf16 %v3399_v19, %v3399_v19  ;;  %v3278_v42 = vadd.f32 %v4336_v44, %v8970_v13  ;;  %v3269_v8 = vpop.f32.mrb[1].mxu1 }
 0x2a1   : > { %3857 = vst.msk [vmem:[%s8980_s12] sm:$0xf] %vm3856_vm12, %v4111_v1  ;;  %v4112_v25 = vpack.c.bf16 %v3397_v59, %v3397_v59  ;;  %v3270_v55 = vadd.f32 %v8970_v13, %v3269_v8  ;;  %v4337_v45 = vpop.f32.mrb[2].mxu1 }
 0x2a2   : > { %3860 = vst.msk [vmem:[%s8980_s12 + $0xc] sm:$0xf] %vm3856_vm12, %v4114_v7  ;;  %v3430_v12 = vmax.f32 %v3278_v42, 0.0  ;;  %v3281_v3 = vadd.f32 %v4337_v45, %v8970_v13  ;;  %v3272_v56 = vpop.f32.mrb[3].mxu1 }
 0x2a3   : > { %3858 = vst.msk [vmem:[%s8980_s12 + $0x4] sm:$0xf] %vm3856_vm12, %v4112_v25  ;;  %v3428_v58 = vmax.f32 %v3270_v55, 0.0  ;;  %v3273_v37 = vadd.f32 %v8970_v13, %v3272_v56 }
 0x2a4   : > { %v3462_v61 = vsub.f32 %v3398_v26, %v3430_v12  ;;  %v4145_v22 = vpack.c.bf16 %v3430_v12, %v3430_v12  ;;  %v3431_v31 = vmax.f32 %v3281_v3, 0.0 }
 0x2a5   : > { %v3460_v34 = vsub.f32 %v3396_v6, %v3428_v58  ;;  %v4143_v17 = vpack.c.bf16 %v3428_v58, %v3428_v58  ;;  %v3429_v62 = vmax.f32 %v3273_v37, 0.0 }
 0x2a6   : > { %3891 = vst.msk [vmem:[%s8980_s12 + $0x88] sm:$0xf] %vm3856_vm12, %v4145_v22  ;;  %v3463_v10 = vsub.f32 %v3399_v19, %v3431_v31  ;;  %v4146_v36 = vpack.c.bf16 %v3431_v31, %v3431_v31  ;;  %v3494_v40 = vand.u32 2147483647, %v3462_v61 }
 0x2a7   : > { %v3492_v21 = vand.u32 2147483647, %v3460_v34  ;;  %3889 = vst.msk [vmem:[%s8980_s12 + $0x80] sm:$0xf] %vm3856_vm12, %v4143_v17  ;;  %v3461_v27 = vsub.f32 %v3397_v59, %v3429_v62  ;;  %v4144_v4 = vpack.c.bf16 %v3429_v62, %v3429_v62 }
 0x2a8   : > { %3892 = vst.msk [vmem:[%s8980_s12 + $0x8c] sm:$0xf] %vm3856_vm12, %v4146_v36  ;;  %v3495_v11 = vand.u32 2147483647, %v3463_v10  ;;  %v3528_v50 = vsel %vm3524_vm13, %v3494_v40, 0.0 }
 0x2a9   : > { %v3493_v29 = vand.u32 2147483647, %v3461_v27  ;;  %3890 = vst.msk [vmem:[%s8980_s12 + $0x84] sm:$0xf] %vm3856_vm12, %v4144_v4  ;;  %v3525_v9 = vsel %vm3524_vm13, %v3492_v21, 0.0 }
 0x2aa   : > { %v3530_v48 = vsel %vm3524_vm13, %v3495_v11, 0.0 }
 0x2ab   : > { %v3526_v20 = vsel %vm3524_vm13, %v3493_v29, 0.0 }
 0x2ac   : > { %v3527_v5 = vadd.f32 %v3526_v20, %v3525_v9 }
 0x2ae   : > { %v3529_v49 = vadd.f32 %v3528_v50, %v3527_v5 }
 0x2b0   : > { %v3531_v52 = vadd.f32 %v3530_v48, %v3529_v49 }
 0x2b5   : > { %v4308_v2 = vpop.f32.mrb[4].mxu0 }
 0x2b6   : > { %v3166_v54 = vadd.f32 %v4308_v2, %v8970_v13  ;;  %v3157_v60 = vpop.f32.mrb[5].mxu0 }
 0x2b7   : > { %v3158_v18 = vadd.f32 %v8970_v13, %v3157_v60  ;;  %v4309_v53 = vpop.f32.mrb[6].mxu0 }
 0x2b8   : > { %v3402_v32 = vmax.f32 %v3166_v54, 0.0  ;;  %v3169_v46 = vadd.f32 %v4309_v53, %v8970_v13  ;;  %v3160_v33 = vpop.f32.mrb[7].mxu0 }
 0x2b9   : > { %v3400_v43 = vmax.f32 %v3158_v18, 0.0  ;;  %v3161_v28 = vadd.f32 %v8970_v13, %v3160_v33 }
 0x2ba   : > { %v4117_v15 = vpack.c.bf16 %v3402_v32, %v3402_v32  ;;  %v3403_v24 = vmax.f32 %v3169_v46, 0.0 }
 0x2bb   : > { %v4115_v23 = vpack.c.bf16 %v3400_v43, %v3400_v43  ;;  %v3401_v0 = vmax.f32 %v3161_v28, 0.0  ;;  %v4340_v30 = vpop.f32.mrb[4].mxu1 }
 0x2bc   : > { %3863 = vst.msk [vmem:[%s8980_s12 + $0x18] sm:$0xf] %vm3856_vm12, %v4117_v15  ;;  %v4118_v16 = vpack.c.bf16 %v3403_v24, %v3403_v24  ;;  %v3294_v47 = vadd.f32 %v4340_v30, %v8970_v13  ;;  %v3285_v51 = vpop.f32.mrb[5].mxu1 }
 0x2bd   : > { %3861 = vst.msk [vmem:[%s8980_s12 + $0x10] sm:$0xf] %vm3856_vm12, %v4115_v23  ;;  %v4116_v35 = vpack.c.bf16 %v3401_v0, %v3401_v0  ;;  %v3286_v14 = vadd.f32 %v8970_v13, %v3285_v51  ;;  %v4341_v57 = vpop.f32.mrb[6].mxu1 }
 0x2be   : > { %3864 = vst.msk [vmem:[%s8980_s12 + $0x1c] sm:$0xf] %vm3856_vm12, %v4118_v16  ;;  %v3434_v26 = vmax.f32 %v3294_v47, 0.0  ;;  %v3297_v63 = vadd.f32 %v4341_v57, %v8970_v13  ;;  %v3288_v38 = vpop.f32.mrb[7].mxu1 }
 0x2bf   : > { %3862 = vst.msk [vmem:[%s8980_s12 + $0x14] sm:$0xf] %vm3856_vm12, %v4116_v35  ;;  %v3432_v6 = vmax.f32 %v3286_v14, 0.0  ;;  %v3289_v41 = vadd.f32 %v8970_v13, %v3288_v38 }
 0x2c0   : > { %v3466_v39 = vsub.f32 %v3402_v32, %v3434_v26  ;;  %v4149_v19 = vpack.c.bf16 %v3434_v26, %v3434_v26  ;;  %v3435_v1 = vmax.f32 %v3297_v63, 0.0 }
 0x2c1   : > { %v3464_v59 = vsub.f32 %v3400_v43, %v3432_v6  ;;  %v4147_v44 = vpack.c.bf16 %v3432_v6, %v3432_v6  ;;  %v3433_v7 = vmax.f32 %v3289_v41, 0.0 }
 0x2c2   : > { %3895 = vst.msk [vmem:[%s8980_s12 + $0x98] sm:$0xf] %vm3856_vm12, %v4149_v19  ;;  %v3467_v42 = vsub.f32 %v3403_v24, %v3435_v1  ;;  %v4150_v8 = vpack.c.bf16 %v3435_v1, %v3435_v1  ;;  %v3498_v12 = vand.u32 2147483647, %v3466_v39 }
 0x2c3   : > { %v3496_v25 = vand.u32 2147483647, %v3464_v59  ;;  %3893 = vst.msk [vmem:[%s8980_s12 + $0x90] sm:$0xf] %vm3856_vm12, %v4147_v44  ;;  %v3465_v55 = vsub.f32 %v3401_v0, %v3433_v7  ;;  %v4148_v45 = vpack.c.bf16 %v3433_v7, %v3433_v7 }
 0x2c4   : > { %3896 = vst.msk [vmem:[%s8980_s12 + $0x9c] sm:$0xf] %vm3856_vm12, %v4150_v8  ;;  %v3499_v37 = vand.u32 2147483647, %v3467_v42  ;;  %v3536_v31 = vsel %vm3524_vm13, %v3498_v12, 0.0 }
 0x2c5   : > { %v3532_v3 = vsel %vm3524_vm13, %v3496_v25, 0.0  ;;  %v3497_v56 = vand.u32 2147483647, %v3465_v55  ;;  %3894 = vst.msk [vmem:[%s8980_s12 + $0x94] sm:$0xf] %vm3856_vm12, %v4148_v45 }
 0x2c6   : > { %v3533_v58 = vadd.f32 %v3532_v3, %v3531_v52  ;;  %v3538_v17 = vsel %vm3524_vm13, %v3499_v37, 0.0 }
 0x2c7   : > { %v3534_v61 = vsel %vm3524_vm13, %v3497_v56, 0.0 }
 0x2c8   : > { %v3535_v22 = vadd.f32 %v3534_v61, %v3533_v58 }
 0x2ca   : > { %v3537_v34 = vadd.f32 %v3536_v31, %v3535_v22 }
 0x2cc   : > { %v3539_v62 = vadd.f32 %v3538_v17, %v3537_v34 }
 0x2d1   : > { %v4312_v10 = vpop.f32.mrb[8].mxu0 }
 0x2d2   : > { %v3182_v36 = vadd.f32 %v4312_v10, %v8970_v13  ;;  %v3173_v21 = vpop.f32.mrb[9].mxu0 }
 0x2d3   : > { %v3174_v27 = vadd.f32 %v8970_v13, %v3173_v21  ;;  %v4313_v4 = vpop.f32.mrb[10].mxu0 }
 0x2d4   : > { %v3406_v40 = vmax.f32 %v3182_v36, 0.0  ;;  %v3185_v29 = vadd.f32 %v4313_v4, %v8970_v13  ;;  %v3176_v9 = vpop.f32.mrb[11].mxu0 }
 0x2d5   : > { %v3404_v11 = vmax.f32 %v3174_v27, 0.0  ;;  %v3177_v20 = vadd.f32 %v8970_v13, %v3176_v9 }
 0x2d6   : > { %v4121_v5 = vpack.c.bf16 %v3406_v40, %v3406_v40  ;;  %v3407_v50 = vmax.f32 %v3185_v29, 0.0 }
 0x2d7   : > { %v4119_v49 = vpack.c.bf16 %v3404_v11, %v3404_v11  ;;  %v3405_v48 = vmax.f32 %v3177_v20, 0.0  ;;  %v4344_v52 = vpop.f32.mrb[8].mxu1 }
 0x2d8   : > { %3867 = vst.msk [vmem:[%s8980_s12 + $0x28] sm:$0xf] %vm3856_vm12, %v4121_v5  ;;  %v4122_v2 = vpack.c.bf16 %v3407_v50, %v3407_v50  ;;  %v3310_v54 = vadd.f32 %v4344_v52, %v8970_v13  ;;  %v3301_v60 = vpop.f32.mrb[9].mxu1 }
 0x2d9   : > { %3865 = vst.msk [vmem:[%s8980_s12 + $0x20] sm:$0xf] %vm3856_vm12, %v4119_v49  ;;  %v4120_v18 = vpack.c.bf16 %v3405_v48, %v3405_v48  ;;  %v3302_v53 = vadd.f32 %v8970_v13, %v3301_v60  ;;  %v4345_v32 = vpop.f32.mrb[10].mxu1 }
 0x2da   : > { %3868 = vst.msk [vmem:[%s8980_s12 + $0x2c] sm:$0xf] %vm3856_vm12, %v4122_v2  ;;  %v3438_v46 = vmax.f32 %v3310_v54, 0.0  ;;  %v3313_v33 = vadd.f32 %v4345_v32, %v8970_v13  ;;  %v3304_v43 = vpop.f32.mrb[11].mxu1 }
 0x2db   : > { %3866 = vst.msk [vmem:[%s8980_s12 + $0x24] sm:$0xf] %vm3856_vm12, %v4120_v18  ;;  %v3436_v28 = vmax.f32 %v3302_v53, 0.0  ;;  %v3305_v15 = vadd.f32 %v8970_v13, %v3304_v43 }
 0x2dc   : > { %v3470_v24 = vsub.f32 %v3406_v40, %v3438_v46  ;;  %v4153_v23 = vpack.c.bf16 %v3438_v46, %v3438_v46  ;;  %v3439_v0 = vmax.f32 %v3313_v33, 0.0 }
 0x2dd   : > { %v3468_v30 = vsub.f32 %v3404_v11, %v3436_v28  ;;  %v4151_v16 = vpack.c.bf16 %v3436_v28, %v3436_v28  ;;  %v3437_v47 = vmax.f32 %v3305_v15, 0.0 }
 0x2de   : > { %3899 = vst.msk [vmem:[%s8980_s12 + $0xa8] sm:$0xf] %vm3856_vm12, %v4153_v23  ;;  %v3471_v51 = vsub.f32 %v3407_v50, %v3439_v0  ;;  %v4154_v35 = vpack.c.bf16 %v3439_v0, %v3439_v0  ;;  %v3502_v63 = vand.u32 2147483647, %v3470_v24 }
 0x2df   : > { %v3500_v14 = vand.u32 2147483647, %v3468_v30  ;;  %3897 = vst.msk [vmem:[%s8980_s12 + $0xa0] sm:$0xf] %vm3856_vm12, %v4151_v16  ;;  %v3469_v57 = vsub.f32 %v3405_v48, %v3437_v47  ;;  %v4152_v26 = vpack.c.bf16 %v3437_v47, %v3437_v47 }
 0x2e0   : > { %3900 = vst.msk [vmem:[%s8980_s12 + $0xac] sm:$0xf] %vm3856_vm12, %v4154_v35  ;;  %v3503_v39 = vand.u32 2147483647, %v3471_v51  ;;  %v3544_v59 = vsel %vm3524_vm13, %v3502_v63, 0.0 }
 0x2e1   : > { %v3540_v38 = vsel %vm3524_vm13, %v3500_v14, 0.0  ;;  %v3501_v6 = vand.u32 2147483647, %v3469_v57  ;;  %3898 = vst.msk [vmem:[%s8980_s12 + $0xa4] sm:$0xf] %vm3856_vm12, %v4152_v26 }
 0x2e2   : > { %v3541_v41 = vadd.f32 %v3540_v38, %v3539_v62  ;;  %v3546_v7 = vsel %vm3524_vm13, %v3503_v39, 0.0 }
 0x2e3   : > { %v3542_v19 = vsel %vm3524_vm13, %v3501_v6, 0.0 }
 0x2e4   : > { %v3543_v1 = vadd.f32 %v3542_v19, %v3541_v41 }
 0x2e6   : > { %v3545_v44 = vadd.f32 %v3544_v59, %v3543_v1 }
 0x2e8   : > { %v3547_v42 = vadd.f32 %v3546_v7, %v3545_v44 }
 0x2ee   : > { %v4316_v8 = vpop.f32.mrb[12].mxu0 }
 0x2ef   : > { %v3198_v25 = vadd.f32 %v4316_v8, %v8970_v13  ;;  %v3189_v55 = vpop.f32.mrb[13].mxu0 }
 0x2f0   : > { %v3190_v45 = vadd.f32 %v8970_v13, %v3189_v55  ;;  %v4317_v12 = vpop.f32.mrb[14].mxu0 }
 0x2f1   : > { %v3410_v3 = vmax.f32 %v3198_v25, 0.0  ;;  %v3201_v56 = vadd.f32 %v4317_v12, %v8970_v13  ;;  %v3192_v58 = vpop.f32.mrb[15].mxu0 }
 0x2f2   : > { %v3408_v37 = vmax.f32 %v3190_v45, 0.0  ;;  %v3193_v61 = vadd.f32 %v8970_v13, %v3192_v58 }
 0x2f3   : > { %v4125_v22 = vpack.c.bf16 %v3410_v3, %v3410_v3  ;;  %v3411_v31 = vmax.f32 %v3201_v56, 0.0 }
 0x2f4   : > { %v4123_v34 = vpack.c.bf16 %v3408_v37, %v3408_v37  ;;  %v3409_v17 = vmax.f32 %v3193_v61, 0.0  ;;  %v4348_v62 = vpop.f32.mrb[12].mxu1 }
 0x2f5   : > { %3871 = vst.msk [vmem:[%s8980_s12 + $0x38] sm:$0xf] %vm3856_vm12, %v4125_v22  ;;  %v4126_v10 = vpack.c.bf16 %v3411_v31, %v3411_v31  ;;  %v3326_v36 = vadd.f32 %v4348_v62, %v8970_v13  ;;  %v3317_v21 = vpop.f32.mrb[13].mxu1 }
 0x2f6   : > { %3869 = vst.msk [vmem:[%s8980_s12 + $0x30] sm:$0xf] %vm3856_vm12, %v4123_v34  ;;  %v4124_v27 = vpack.c.bf16 %v3409_v17, %v3409_v17  ;;  %v3318_v4 = vadd.f32 %v8970_v13, %v3317_v21  ;;  %v4349_v40 = vpop.f32.mrb[14].mxu1 }
 0x2f7   : > { %3872 = vst.msk [vmem:[%s8980_s12 + $0x3c] sm:$0xf] %vm3856_vm12, %v4126_v10  ;;  %v3442_v29 = vmax.f32 %v3326_v36, 0.0  ;;  %v3329_v9 = vadd.f32 %v4349_v40, %v8970_v13  ;;  %v3320_v11 = vpop.f32.mrb[15].mxu1 }
 0x2f8   : > { %3870 = vst.msk [vmem:[%s8980_s12 + $0x34] sm:$0xf] %vm3856_vm12, %v4124_v27  ;;  %v3440_v20 = vmax.f32 %v3318_v4, 0.0  ;;  %v3321_v5 = vadd.f32 %v8970_v13, %v3320_v11 }
 0x2f9   : > { %v3474_v50 = vsub.f32 %v3410_v3, %v3442_v29  ;;  %v4157_v49 = vpack.c.bf16 %v3442_v29, %v3442_v29  ;;  %v3443_v48 = vmax.f32 %v3329_v9, 0.0 }
 0x2fa   : > { %v3472_v52 = vsub.f32 %v3408_v37, %v3440_v20  ;;  %v4155_v2 = vpack.c.bf16 %v3440_v20, %v3440_v20  ;;  %v3441_v54 = vmax.f32 %v3321_v5, 0.0 }
 0x2fb   : > { %3903 = vst.msk [vmem:[%s8980_s12 + $0xb8] sm:$0xf] %vm3856_vm12, %v4157_v49  ;;  %v3475_v60 = vsub.f32 %v3411_v31, %v3443_v48  ;;  %v4158_v18 = vpack.c.bf16 %v3443_v48, %v3443_v48  ;;  %v3506_v33 = vand.u32 2147483647, %v3474_v50 }
 0x2fc   : > { %v3504_v53 = vand.u32 2147483647, %v3472_v52  ;;  %3901 = vst.msk [vmem:[%s8980_s12 + $0xb0] sm:$0xf] %vm3856_vm12, %v4155_v2  ;;  %v3473_v32 = vsub.f32 %v3409_v17, %v3441_v54  ;;  %v4156_v46 = vpack.c.bf16 %v3441_v54, %v3441_v54 }
 0x2fd   : > { %3904 = vst.msk [vmem:[%s8980_s12 + $0xbc] sm:$0xf] %vm3856_vm12, %v4158_v18  ;;  %v3507_v24 = vand.u32 2147483647, %v3475_v60  ;;  %v3552_v30 = vsel %vm3524_vm13, %v3506_v33, 0.0 }
 0x2fe   : > { %v3548_v43 = vsel %vm3524_vm13, %v3504_v53, 0.0  ;;  %v3505_v28 = vand.u32 2147483647, %v3473_v32  ;;  %3902 = vst.msk [vmem:[%s8980_s12 + $0xb4] sm:$0xf] %vm3856_vm12, %v4156_v46 }
 0x2ff   : > { %v3549_v15 = vadd.f32 %v3548_v43, %v3547_v42  ;;  %v3554_v47 = vsel %vm3524_vm13, %v3507_v24, 0.0 }
 0x300   : > { %v3550_v23 = vsel %vm3524_vm13, %v3505_v28, 0.0 }
 0x301   : > { %v3551_v0 = vadd.f32 %v3550_v23, %v3549_v15 }
 0x303   : > { %v3553_v16 = vadd.f32 %v3552_v30, %v3551_v0 }
 0x305   : > { %v3555_v51 = vadd.f32 %v3554_v47, %v3553_v16 }
 0x30a   : > { %v4320_v35 = vpop.f32.mrb[16].mxu0 }
 0x30b   : > { %v3214_v14 = vadd.f32 %v4320_v35, %v8970_v13  ;;  %v3205_v57 = vpop.f32.mrb[17].mxu0 }
 0x30c   : > { %v3206_v26 = vadd.f32 %v8970_v13, %v3205_v57  ;;  %v4321_v63 = vpop.f32.mrb[18].mxu0 }
 0x30d   : > { %v3414_v38 = vmax.f32 %v3214_v14, 0.0  ;;  %v3217_v6 = vadd.f32 %v4321_v63, %v8970_v13  ;;  %v3208_v41 = vpop.f32.mrb[19].mxu0 }
 0x30e   : > { %v3412_v39 = vmax.f32 %v3206_v26, 0.0  ;;  %v3209_v19 = vadd.f32 %v8970_v13, %v3208_v41 }
 0x30f   : > { %v4129_v1 = vpack.c.bf16 %v3414_v38, %v3414_v38  ;;  %v3415_v59 = vmax.f32 %v3217_v6, 0.0 }
 0x310   : > { %v4127_v44 = vpack.c.bf16 %v3412_v39, %v3412_v39  ;;  %v3413_v7 = vmax.f32 %v3209_v19, 0.0  ;;  %v4352_v42 = vpop.f32.mrb[16].mxu1 }
 0x311   : > { %3875 = vst.msk [vmem:[%s8980_s12 + $0x48] sm:$0xf] %vm3856_vm12, %v4129_v1  ;;  %v4130_v8 = vpack.c.bf16 %v3415_v59, %v3415_v59  ;;  %v3342_v25 = vadd.f32 %v4352_v42, %v8970_v13  ;;  %v3333_v55 = vpop.f32.mrb[17].mxu1 }
 0x312   : > { %3873 = vst.msk [vmem:[%s8980_s12 + $0x40] sm:$0xf] %vm3856_vm12, %v4127_v44  ;;  %v4128_v45 = vpack.c.bf16 %v3413_v7, %v3413_v7  ;;  %v3334_v12 = vadd.f32 %v8970_v13, %v3333_v55  ;;  %v4353_v3 = vpop.f32.mrb[18].mxu1 }
 0x313   : > { %3876 = vst.msk [vmem:[%s8980_s12 + $0x4c] sm:$0xf] %vm3856_vm12, %v4130_v8  ;;  %v3446_v56 = vmax.f32 %v3342_v25, 0.0  ;;  %v3345_v58 = vadd.f32 %v4353_v3, %v8970_v13  ;;  %v3336_v37 = vpop.f32.mrb[19].mxu1 }
 0x314   : > { %3874 = vst.msk [vmem:[%s8980_s12 + $0x44] sm:$0xf] %vm3856_vm12, %v4128_v45  ;;  %v3444_v61 = vmax.f32 %v3334_v12, 0.0  ;;  %v3337_v22 = vadd.f32 %v8970_v13, %v3336_v37 }
 0x315   : > { %v3478_v31 = vsub.f32 %v3414_v38, %v3446_v56  ;;  %v4161_v34 = vpack.c.bf16 %v3446_v56, %v3446_v56  ;;  %v3447_v17 = vmax.f32 %v3345_v58, 0.0 }
 0x316   : > { %v3476_v62 = vsub.f32 %v3412_v39, %v3444_v61  ;;  %v4159_v10 = vpack.c.bf16 %v3444_v61, %v3444_v61  ;;  %v3445_v36 = vmax.f32 %v3337_v22, 0.0 }
 0x317   : > { %3907 = vst.msk [vmem:[%s8980_s12 + $0xc8] sm:$0xf] %vm3856_vm12, %v4161_v34  ;;  %v3479_v21 = vsub.f32 %v3415_v59, %v3447_v17  ;;  %v4162_v27 = vpack.c.bf16 %v3447_v17, %v3447_v17  ;;  %v3510_v9 = vand.u32 2147483647, %v3478_v31 }
 0x318   : > { %v3508_v4 = vand.u32 2147483647, %v3476_v62  ;;  %3905 = vst.msk [vmem:[%s8980_s12 + $0xc0] sm:$0xf] %vm3856_vm12, %v4159_v10  ;;  %v3477_v40 = vsub.f32 %v3413_v7, %v3445_v36  ;;  %v4160_v29 = vpack.c.bf16 %v3445_v36, %v3445_v36 }
 0x319   : > { %3908 = vst.msk [vmem:[%s8980_s12 + $0xcc] sm:$0xf] %vm3856_vm12, %v4162_v27  ;;  %v3511_v50 = vand.u32 2147483647, %v3479_v21  ;;  %v3560_v52 = vsel %vm3524_vm13, %v3510_v9, 0.0 }
 0x31a   : > { %v3556_v11 = vsel %vm3524_vm13, %v3508_v4, 0.0  ;;  %v3509_v20 = vand.u32 2147483647, %v3477_v40  ;;  %3906 = vst.msk [vmem:[%s8980_s12 + $0xc4] sm:$0xf] %vm3856_vm12, %v4160_v29 }
 0x31b   : > { %v3557_v5 = vadd.f32 %v3556_v11, %v3555_v51  ;;  %v3562_v54 = vsel %vm3524_vm13, %v3511_v50, 0.0 }
 0x31c   : > { %v3558_v49 = vsel %vm3524_vm13, %v3509_v20, 0.0 }
 0x31d   : > { %v3559_v48 = vadd.f32 %v3558_v49, %v3557_v5 }
 0x31f   : > { %v3561_v2 = vadd.f32 %v3560_v52, %v3559_v48 }
 0x321   : > { %v3563_v60 = vadd.f32 %v3562_v54, %v3561_v2 }
 0x32a   : > { %v4356_v18 = vpop.f32.mrb[20].mxu1 }
 0x32b   : > { %v3358_v53 = vadd.f32 %v4356_v18, %v8970_v13  ;;  %v3349_v32 = vpop.f32.mrb[21].mxu1 }
 0x32c   : > { %v4324_v46 = vpop.f32.mrb[20].mxu0  ;;  %v3350_v33 = vadd.f32 %v8970_v13, %v3349_v32  ;;  %v4357_v43 = vpop.f32.mrb[22].mxu1 }
 0x32d   : > { %v3230_v28 = vadd.f32 %v4324_v46, %v8970_v13  ;;  %v3450_v15 = vmax.f32 %v3358_v53, 0.0  ;;  %v3221_v24 = vpop.f32.mrb[21].mxu0  ;;  %v3361_v23 = vadd.f32 %v4357_v43, %v8970_v13  ;;  %v3352_v0 = vpop.f32.mrb[23].mxu1 }
 0x32e   : > { %v3222_v30 = vadd.f32 %v8970_v13, %v3221_v24  ;;  %v3448_v16 = vmax.f32 %v3350_v33, 0.0  ;;  %v4325_v47 = vpop.f32.mrb[22].mxu0  ;;  %v3353_v51 = vadd.f32 %v8970_v13, %v3352_v0 }
 0x32f   : > { %v3418_v35 = vmax.f32 %v3230_v28, 0.0  ;;  %v4165_v14 = vpack.c.bf16 %v3450_v15, %v3450_v15  ;;  %v3233_v57 = vadd.f32 %v4325_v47, %v8970_v13  ;;  %v3451_v26 = vmax.f32 %v3361_v23, 0.0  ;;  %v3224_v63 = vpop.f32.mrb[23].mxu0 }
 0x330   : > { %v3416_v38 = vmax.f32 %v3222_v30, 0.0  ;;  %v4163_v6 = vpack.c.bf16 %v3448_v16, %v3448_v16  ;;  %v3225_v41 = vadd.f32 %v8970_v13, %v3224_v63  ;;  %v3449_v39 = vmax.f32 %v3353_v51, 0.0 }
 0x331   : > { %v4133_v19 = vpack.c.bf16 %v3418_v35, %v3418_v35  ;;  %v3482_v1 = vsub.f32 %v3418_v35, %v3450_v15  ;;  %3911 = vst.msk [vmem:[%s8980_s12 + $0xd8] sm:$0xf] %vm3856_vm12, %v4165_v14  ;;  %v3419_v59 = vmax.f32 %v3233_v57, 0.0  ;;  %v4166_v44 = vpack.c.bf16 %v3451_v26, %v3451_v26 }
 0x332   : > { %v4131_v7 = vpack.c.bf16 %v3416_v38, %v3416_v38  ;;  %v3480_v42 = vsub.f32 %v3416_v38, %v3448_v16  ;;  %3909 = vst.msk [vmem:[%s8980_s12 + $0xd0] sm:$0xf] %vm3856_vm12, %v4163_v6  ;;  %v3417_v8 = vmax.f32 %v3225_v41, 0.0  ;;  %v4164_v25 = vpack.c.bf16 %v3449_v39, %v3449_v39 }
 0x333   : > { %3879 = vst.msk [vmem:[%s8980_s12 + $0x58] sm:$0xf] %vm3856_vm12, %v4133_v19  ;;  %v4134_v55 = vpack.c.bf16 %v3419_v59, %v3419_v59  ;;  %v3483_v45 = vsub.f32 %v3419_v59, %v3451_v26  ;;  %3912 = vst.msk [vmem:[%s8980_s12 + $0xdc] sm:$0xf] %vm3856_vm12, %v4166_v44  ;;  %v3514_v58 = vand.u32 2147483647, %v3482_v1 }
 0x334   : > { %3877 = vst.msk [vmem:[%s8980_s12 + $0x50] sm:$0xf] %vm3856_vm12, %v4131_v7  ;;  %v3512_v12 = vand.u32 2147483647, %v3480_v42  ;;  %v4132_v3 = vpack.c.bf16 %v3417_v8, %v3417_v8  ;;  %v3481_v56 = vsub.f32 %v3417_v8, %v3449_v39  ;;  %3910 = vst.msk [vmem:[%s8980_s12 + $0xd4] sm:$0xf] %vm3856_vm12, %v4164_v25 }
 0x335   : > { %3880 = vst.msk [vmem:[%s8980_s12 + $0x5c] sm:$0xf] %vm3856_vm12, %v4134_v55  ;;  %v3515_v31 = vand.u32 2147483647, %v3483_v45  ;;  %v3568_v62 = vsel %vm3524_vm13, %v3514_v58, 0.0 }
 0x336   : > { %v3564_v37 = vsel %vm3524_vm13, %v3512_v12, 0.0  ;;  %3878 = vst.msk [vmem:[%s8980_s12 + $0x54] sm:$0xf] %vm3856_vm12, %v4132_v3  ;;  %v3513_v61 = vand.u32 2147483647, %v3481_v56 }
 0x337   : > { %v3565_v22 = vadd.f32 %v3564_v37, %v3563_v60  ;;  %v3570_v36 = vsel %vm3524_vm13, %v3515_v31, 0.0 }
 0x338   : > { %v3566_v34 = vsel %vm3524_vm13, %v3513_v61, 0.0 }
 0x339   : > { %v3567_v17 = vadd.f32 %v3566_v34, %v3565_v22 }
 0x33b   : > { %v3569_v10 = vadd.f32 %v3568_v62, %v3567_v17 }
 0x33d   : > { %v3571_v21 = vadd.f32 %v3570_v36, %v3569_v10 }
 0x34a   : > { %v4360_v27 = vpop.f32.mrb[24].mxu1 }
 0x34b   : > { %v3374_v4 = vadd.f32 %v4360_v27, %v8970_v13  ;;  %v3365_v40 = vpop.f32.mrb[25].mxu1 }
 0x34c   : > { %v4328_v29 = vpop.f32.mrb[24].mxu0  ;;  %v3366_v9 = vadd.f32 %v8970_v13, %v3365_v40  ;;  %v4361_v11 = vpop.f32.mrb[26].mxu1 }
 0x34d   : > { %v3246_v20 = vadd.f32 %v4328_v29, %v8970_v13  ;;  %v3454_v5 = vmax.f32 %v3374_v4, 0.0  ;;  %v3237_v50 = vpop.f32.mrb[25].mxu0  ;;  %v3377_v49 = vadd.f32 %v4361_v11, %v8970_v13  ;;  %v3368_v48 = vpop.f32.mrb[27].mxu1 }
 0x34e   : > { %v3238_v52 = vadd.f32 %v8970_v13, %v3237_v50  ;;  %v3452_v2 = vmax.f32 %v3366_v9, 0.0  ;;  %v4329_v54 = vpop.f32.mrb[26].mxu0  ;;  %v3369_v60 = vadd.f32 %v8970_v13, %v3368_v48 }
 0x34f   : > { %v3422_v18 = vmax.f32 %v3246_v20, 0.0  ;;  %v4169_v53 = vpack.c.bf16 %v3454_v5, %v3454_v5  ;;  %v3249_v32 = vadd.f32 %v4329_v54, %v8970_v13  ;;  %v3455_v46 = vmax.f32 %v3377_v49, 0.0  ;;  %v3240_v33 = vpop.f32.mrb[27].mxu0 }
 0x350   : > { %v3420_v43 = vmax.f32 %v3238_v52, 0.0  ;;  %v4167_v28 = vpack.c.bf16 %v3452_v2, %v3452_v2  ;;  %v3241_v15 = vadd.f32 %v8970_v13, %v3240_v33  ;;  %v3453_v24 = vmax.f32 %v3369_v60, 0.0 }
 0x351   : > { %v4137_v23 = vpack.c.bf16 %v3422_v18, %v3422_v18  ;;  %v3486_v0 = vsub.f32 %v3422_v18, %v3454_v5  ;;  %3915 = vst.msk [vmem:[%s8980_s12 + $0xe8] sm:$0xf] %vm3856_vm12, %v4169_v53  ;;  %v3423_v30 = vmax.f32 %v3249_v32, 0.0  ;;  %v4170_v16 = vpack.c.bf16 %v3455_v46, %v3455_v46 }
 0x352   : > { %v4135_v47 = vpack.c.bf16 %v3420_v43, %v3420_v43  ;;  %v3484_v51 = vsub.f32 %v3420_v43, %v3452_v2  ;;  %3913 = vst.msk [vmem:[%s8980_s12 + $0xe0] sm:$0xf] %vm3856_vm12, %v4167_v28  ;;  %v3421_v35 = vmax.f32 %v3241_v15, 0.0  ;;  %v4168_v14 = vpack.c.bf16 %v3453_v24, %v3453_v24 }
 0x353   : > { %3883 = vst.msk [vmem:[%s8980_s12 + $0x68] sm:$0xf] %vm3856_vm12, %v4137_v23  ;;  %v4138_v57 = vpack.c.bf16 %v3423_v30, %v3423_v30  ;;  %v3487_v26 = vsub.f32 %v3423_v30, %v3455_v46  ;;  %3916 = vst.msk [vmem:[%s8980_s12 + $0xec] sm:$0xf] %vm3856_vm12, %v4170_v16  ;;  %v3518_v41 = vand.u32 2147483647, %v3486_v0 }
 0x354   : > { %3881 = vst.msk [vmem:[%s8980_s12 + $0x60] sm:$0xf] %vm3856_vm12, %v4135_v47  ;;  %v3516_v63 = vand.u32 2147483647, %v3484_v51  ;;  %v4136_v38 = vpack.c.bf16 %v3421_v35, %v3421_v35  ;;  %v3485_v6 = vsub.f32 %v3421_v35, %v3453_v24  ;;  %3914 = vst.msk [vmem:[%s8980_s12 + $0xe4] sm:$0xf] %vm3856_vm12, %v4168_v14 }
 0x355   : > { %3884 = vst.msk [vmem:[%s8980_s12 + $0x6c] sm:$0xf] %vm3856_vm12, %v4138_v57  ;;  %v3519_v59 = vand.u32 2147483647, %v3487_v26  ;;  %v3576_v42 = vsel %vm3524_vm13, %v3518_v41, 0.0 }
 0x356   : > { %v3572_v39 = vsel %vm3524_vm13, %v3516_v63, 0.0  ;;  %3882 = vst.msk [vmem:[%s8980_s12 + $0x64] sm:$0xf] %vm3856_vm12, %v4136_v38  ;;  %v3517_v19 = vand.u32 2147483647, %v3485_v6 }
 0x357   : > { %v3573_v1 = vadd.f32 %v3572_v39, %v3571_v21  ;;  %v3578_v25 = vsel %vm3524_vm13, %v3519_v59, 0.0 }
 0x358   : > { %v3574_v44 = vsel %vm3524_vm13, %v3517_v19, 0.0 }
 0x359   : > { %v3575_v7 = vadd.f32 %v3574_v44, %v3573_v1 }
 0x35b   : > { %v3577_v8 = vadd.f32 %v3576_v42, %v3575_v7 }
 0x35d   : > { %v3579_v55 = vadd.f32 %v3578_v25, %v3577_v8 }
 0x36a   : > { %v4364_v45 = vpop.f32.mrb[28].mxu1 }
 0x36b   : > { %v3390_v12 = vadd.f32 %v4364_v45, %v8970_v13  ;;  %v3381_v3 = vpop.f32.mrb[29].mxu1 }
 0x36c   : > { %v4332_v56 = vpop.f32.mrb[28].mxu0  ;;  %v3382_v58 = vadd.f32 %v8970_v13, %v3381_v3  ;;  %v4365_v37 = vpop.f32.mrb[30].mxu1 }
 0x36d   : > { %v3262_v61 = vadd.f32 %v4332_v56, %v8970_v13  ;;  %v3458_v22 = vmax.f32 %v3390_v12, 0.0  ;;  %v3253_v31 = vpop.f32.mrb[29].mxu0  ;;  %v3393_v34 = vadd.f32 %v4365_v37, %v8970_v13  ;;  %v3384_v17 = vpop.f32.mrb[31].mxu1 }
 0x36e   : > { %v3254_v62 = vadd.f32 %v8970_v13, %v3253_v31  ;;  %v3456_v10 = vmax.f32 %v3382_v58, 0.0  ;;  %v4333_v36 = vpop.f32.mrb[30].mxu0  ;;  %v3385_v21 = vadd.f32 %v8970_v13, %v3384_v17 }
 0x36f   : > { %v3426_v27 = vmax.f32 %v3262_v61, 0.0  ;;  %v4173_v4 = vpack.c.bf16 %v3458_v22, %v3458_v22  ;;  %v3265_v40 = vadd.f32 %v4333_v36, %v8970_v13  ;;  %v3459_v29 = vmax.f32 %v3393_v34, 0.0  ;;  %v3256_v9 = vpop.f32.mrb[31].mxu0 }
 0x370   : > { %v3424_v11 = vmax.f32 %v3254_v62, 0.0  ;;  %v4171_v20 = vpack.c.bf16 %v3456_v10, %v3456_v10  ;;  %v3257_v5 = vadd.f32 %v8970_v13, %v3256_v9  ;;  %v3457_v50 = vmax.f32 %v3385_v21, 0.0 }
 0x371   : > { %v4141_v49 = vpack.c.bf16 %v3426_v27, %v3426_v27  ;;  %v3490_v48 = vsub.f32 %v3426_v27, %v3458_v22  ;;  %3919 = vst.msk [vmem:[%s8980_s12 + $0xf8] sm:$0xf] %vm3856_vm12, %v4173_v4  ;;  %v3427_v52 = vmax.f32 %v3265_v40, 0.0  ;;  %v4174_v2 = vpack.c.bf16 %v3459_v29, %v3459_v29 }
 0x372   : > { %v4139_v54 = vpack.c.bf16 %v3424_v11, %v3424_v11  ;;  %v3488_v60 = vsub.f32 %v3424_v11, %v3456_v10  ;;  %3917 = vst.msk [vmem:[%s8980_s12 + $0xf0] sm:$0xf] %vm3856_vm12, %v4171_v20  ;;  %v3425_v18 = vmax.f32 %v3257_v5, 0.0  ;;  %v4172_v53 = vpack.c.bf16 %v3457_v50, %v3457_v50 }
 0x373   : > { %3887 = vst.msk [vmem:[%s8980_s12 + $0x78] sm:$0xf] %vm3856_vm12, %v4141_v49  ;;  %v4142_v13 = vpack.c.bf16 %v3427_v52, %v3427_v52  ;;  %v3491_v32 = vsub.f32 %v3427_v52, %v3459_v29  ;;  %3920 = vst.msk [vmem:[%s8980_s12 + $0xfc] sm:$0xf] %vm3856_vm12, %v4174_v2  ;;  %v3522_v28 = vand.u32 2147483647, %v3490_v48 }
 0x374   : > { %3885 = vst.msk [vmem:[%s8980_s12 + $0x70] sm:$0xf] %vm3856_vm12, %v4139_v54  ;;  %v3520_v46 = vand.u32 2147483647, %v3488_v60  ;;  %v4140_v33 = vpack.c.bf16 %v3425_v18, %v3425_v18  ;;  %v3489_v43 = vsub.f32 %v3425_v18, %v3457_v50  ;;  %3918 = vst.msk [vmem:[%s8980_s12 + $0xf4] sm:$0xf] %vm3856_vm12, %v4172_v53 }
 0x375   : > { %3888 = vst.msk [vmem:[%s8980_s12 + $0x7c] sm:$0xf] %vm3856_vm12, %v4142_v13  ;;  %v3523_v0 = vand.u32 2147483647, %v3491_v32  ;;  %v3584_v47 = vsel %vm3524_vm13, %v3522_v28, 0.0 }
 0x376   : > { %v3580_v15 = vsel %vm3524_vm13, %v3520_v46, 0.0  ;;  %3886 = vst.msk [vmem:[%s8980_s12 + $0x74] sm:$0xf] %vm3856_vm12, %v4140_v33  ;;  %v3521_v24 = vand.u32 2147483647, %v3489_v43 }
 0x377   : > { %v3581_v23 = vadd.f32 %v3580_v15, %v3579_v55  ;;  %v3586_v35 = vsel %vm3524_vm13, %v3523_v0, 0.0 }
 0x378   : > { %v3582_v30 = vsel %vm3524_vm13, %v3521_v24, 0.0 }
 0x379   : > { %v3583_v16 = vadd.f32 %v3582_v30, %v3581_v23 }
 0x37b   : > { %v3585_v51 = vadd.f32 %v3584_v47, %v3583_v16 }
 0x37d   : > { %v3587_v14 = vadd.f32 %v3586_v35, %v3585_v51 }
 0x37f   : > { %3588 = vadd.xlane.f32.xlu0 %v3587_v14 }
 0x40c   : > { %v3589_v57 = vpop.xlane.xlu0 %3588 }
 0x40d   : > { %v3590_v26 = vrot.slane %v3589_v57, 4 }
 0x40f   : > { %v3591_v63 = vadd.f32 %v3590_v26, %v3589_v57 }
 0x411   : > { %v3592_v38 = vrot.slane %v3591_v63, 2 }
 0x413   : > { %v3593_v6 = vadd.f32 %v3592_v38, %v3591_v63 }
 0x415   : > { %v3594_v41 = vrot.slane %v3593_v6, 1 }
 0x417   : > { %v3595_v39 = vadd.f32 %v3594_v41, %v3593_v6 }
 0x419   : > { %4371 = vpush %v3595_v39 }
 0x44a   : > { %s4372_s18 = spop %4371 }
 0x44b   : > { %v3597_v19 = vstv %s4372_s18 }
 0x44c   : > { %3599 = vst.msk [vmem:[%s206_s17] sm:$0x1] %vm3598_vm14, %v3597_v19 }
 0x44d PF: > { %s15_s15 = sadd.s32 1, %s5678_s15  }
 0x44e   : > { %p12_p4 = scmp.ge.s32.totalorder %s15_s15, 4  }
 0x450   :  { %14 = sbr.rel (!%p12_p4) target bundleno = 1 (0x1), region = 74 }

// kernel: a_call__.22
= control target key start
LH: loop header
LB: loop body
LE: loop exit
PB: predicated region body
PF: predicated region fallthrough
CT: control target
= control target key end

     0   :  { %v442_v1 = vmov 0   ;;  %vm123_vm0 = vcmask 130048   ;;  %s585_s0 = inlined_call_operand.vmem [shape: bf16[32,144], index: 0, kind: input, shape index: {}]   ;;  %s586_s1 = inlined_call_operand.vmem [shape: bf16[32,144], index: 1, kind: input, shape index: {}]   ;;  %s587_s2 = inlined_call_operand.vmem [shape: bf16[144,32], index: 2, kind: input, shape index: {}]   ;;  %s588_s3 = inlined_call_operand.vmem [shape: f32[1,32], index: 3, kind: input, shape index: {}]   ;;  %s589_s4 = inlined_call_operand.vmem [shape: bf16[32,32], index: 4, kind: output, shape index: {0}]   ;;  %s590_s5 = inlined_call_operand.vmem [shape: bf16[32,32], index: 5, kind: output, shape index: {1}]   ;;  %s591_s6 = inlined_call_operand.hbm [shape: f32[1,1], index: 6, kind: output, shape index: {2}]  }
   0x1   :  { %v397_v0 = vld [vmem:[%s587_s2] sm:$0xff]   ;;  %130 = vmatprep.subr.bf16.mxu0 %v442_v1  ;;  %211 = vmatprep.subr.bf16.mxu1 %v442_v1  ;;  %v398_v2 = vld [vmem:[%s587_s2 + $0x8] sm:$0xff]   ;;  %v399_v3 = vld [vmem:[%s587_s2 + $0x10] sm:$0xff]  }
   0x2   :  { %131 = vmatpush1.bf16.msra.mxu0 %v397_v0  ;;  %212 = vmatpush1.bf16.msra.mxu1 %v397_v0  ;;  %v400_v4 = vld [vmem:[%s587_s2 + $0x18] sm:$0xff]   ;;  %v408_v5 = vld [vmem:[%s585_s0 + $0x4] ss:$8 sps:$4 sm:$0xff]  }
   0x3   :  { %132 = vmatprep.subr.bf16.mxu0 %v442_v1  ;;  %213 = vmatprep.subr.bf16.mxu1 %v442_v1  ;;  %v411_v6 = vld [vmem:[%s586_s1 + $0x4] ss:$8 sps:$4 sm:$0xff]  }
   0x4   :  { %369 = vmatprep.mubr.msk.bf16.mxu0 %vm123_vm0, %v408_v5  ;;  %375 = vmatprep.mubr.msk.bf16.mxu1 %vm123_vm0, %v411_v6  ;;  %v401_v7 = vld [vmem:[%s587_s2 + $0x20] sm:$0xff]  }
   0x6   :  { %133 = vmatpush1.bf16.msra.mxu0 %v398_v2  ;;  %214 = vmatpush1.bf16.msra.mxu1 %v398_v2 }
   0x7   :  { %134 = vmatprep.subr.bf16.mxu0 %v442_v1  ;;  %215 = vmatprep.subr.bf16.mxu1 %v442_v1 }
   0xa   :  { %135 = vmatpush1.bf16.msra.mxu0 %v399_v3  ;;  %216 = vmatpush1.bf16.msra.mxu1 %v399_v3 }
   0xb   :  { %136 = vmatprep.subr.bf16.mxu0 %v442_v1  ;;  %217 = vmatprep.subr.bf16.mxu1 %v442_v1 }
   0xe   :  { %137 = vmatpush1.bf16.msra.mxu0 %v400_v4  ;;  %218 = vmatpush1.bf16.msra.mxu1 %v400_v4 }
   0xf   :  { %12 = vsyncpa [#allocation3], 0  ;;  %138 = vmatprep.subr.bf16.mxu0 %v442_v1  ;;  %219 = vmatprep.subr.bf16.mxu1 %v442_v1  ;;  %v402_v8 = vld [vmem:[%s587_s2 + $0x28] sm:$0xff]   ;;  %v403_v9 = vld [vmem:[%s587_s2 + $0x30] sm:$0xff]   ;;  %vm308_vm1 = vcmask 257024   ;;  %vm272_vm2 = vcmask 261120  }
  0x10   :  { %v404_v10 = vld [vmem:[%s587_s2 + $0x38] sm:$0xff]   ;;  %v405_v11 = vld [vmem:[%s587_s2 + $0x40] sm:$0xff]   ;;  %vm290_vm3 = vcmask 0  }
  0x11   :  { %v406_v12 = vld [vmem:[%s585_s0] ss:$8 sps:$4 sm:$0xff]   ;;  %v412_v14 = vld [vmem:[%s585_s0 + $0x14] ss:$8 sps:$4 sm:$0xff]   ;;  %v416_v16 = vld [vmem:[%s585_s0 + $0x10] ss:$8 sps:$4 sm:$0xff]  }
  0x12   :  { %139 = vmatpush1.bf16.msra.mxu0 %v401_v7  ;;  %220 = vmatpush1.bf16.msra.mxu1 %v401_v7  ;;  %v409_v13 = vld [vmem:[%s586_s1] ss:$8 sps:$4 sm:$0xff]   ;;  %v414_v15 = vld [vmem:[%s586_s1 + $0x14] ss:$8 sps:$4 sm:$0xff]   ;;  %v417_v17 = vld [vmem:[%s586_s1 + $0x10] ss:$8 sps:$4 sm:$0xff]  }
  0x13   :  { %140 = vmatprep.subr.bf16.mxu0 %v442_v1  ;;  %221 = vmatprep.subr.bf16.mxu1 %v442_v1  ;;  %v355_v18 = vld [vmem:[%s588_s3] ss:$0 sm:$0xff] }
  0x16   :  { %141 = vmatpush1.bf16.msra.mxu0 %v402_v8  ;;  %222 = vmatpush1.bf16.msra.mxu1 %v402_v8 }
  0x17   :  { %142 = vmatprep.subr.bf16.mxu0 %v442_v1  ;;  %223 = vmatprep.subr.bf16.mxu1 %v442_v1 }
  0x1a   :  { %143 = vmatpush1.bf16.msra.mxu0 %v403_v9  ;;  %224 = vmatpush1.bf16.msra.mxu1 %v403_v9 }
  0x1b   :  { %144 = vmatprep.subr.bf16.mxu0 %v442_v1  ;;  %225 = vmatprep.subr.bf16.mxu1 %v442_v1 }
  0x1e   :  { %145 = vmatpush1.bf16.msra.mxu0 %v404_v10  ;;  %226 = vmatpush1.bf16.msra.mxu1 %v404_v10 }
  0x1f   :  { %146 = vmatprep.subr.bf16.mxu0 %v442_v1  ;;  %227 = vmatprep.subr.bf16.mxu1 %v442_v1 }
  0x22   :  { %147 = vmatpush1.bf16.msra.mxu0 %v405_v11  ;;  %228 = vmatpush1.bf16.msra.mxu1 %v405_v11 }
  0x25   :  { %163 = vmatmul.mubr.bf16.vlgmr.msra.gmra.mrb[0].mxu0 %v406_v12  ;;  %244 = vmatmul.mubr.bf16.vlgmr.msra.gmra.mrb[0].mxu1 %v409_v13 }
  0x26   :  { %370 = vmatprep.mubr.msk.bf16.mxu0 %vm123_vm0, %v412_v14  ;;  %376 = vmatprep.mubr.msk.bf16.mxu1 %vm123_vm0, %v414_v15 }
  0x2d   :  { %171 = vmatmul.mubr.bf16.gmra.mrb[4].mxu0 %v416_v16  ;;  %252 = vmatmul.mubr.bf16.gmra.mrb[4].mxu1 %v417_v17 }
  0xf8   :  { %v164_v19 = vpop.f32.mrb[0].mxu0  ;;  %v245_v20 = vpop.f32.mrb[0].mxu1 }
  0xf9   :  { %v165_v21 = vadd.f32 %v355_v18, %v164_v19  ;;  %v246_v22 = vadd.f32 %v355_v18, %v245_v20  ;;  %v166_v23 = vpop.f32.mrb[1].mxu0  ;;  %v247_v24 = vpop.f32.mrb[1].mxu1 }
  0xfa   :  { %v167_v25 = vpop.f32.mrb[2].mxu0  ;;  %v248_v26 = vpop.f32.mrb[2].mxu1 }
  0xfb   :  { %v179_v27 = vmax.f32 %v165_v21, 0.0  ;;  %v260_v28 = vmax.f32 %v246_v22, 0.0  ;;  %v168_v29 = vadd.f32 %v355_v18, %v167_v25  ;;  %v249_v30 = vadd.f32 %v355_v18, %v248_v26  ;;  %v169_v31 = vpop.f32.mrb[3].mxu0  ;;  %v250_v32 = vpop.f32.mrb[3].mxu1 }
  0xfd   :  { %v385_v33 = vpack.c.bf16 %v179_v27, %v179_v27  ;;  %v264_v34 = vsub.f32 %v179_v27, %v260_v28  ;;  %v389_v35 = vpack.c.bf16 %v260_v28, %v260_v28  ;;  %v180_v36 = vmax.f32 %v168_v29, 0.0 }
  0xfe   :  { %v261_v37 = vmax.f32 %v249_v30, 0.0 }
  0xff   :  { %309 = vst.msk [vmem:[%s589_s4] sm:$0xf] %vm308_vm1, %v385_v33  ;;  %329 = vst.msk [vmem:[%s590_s5] sm:$0xf] %vm308_vm1, %v389_v35  ;;  %v386_v38 = vpack.c.bf16 %v180_v36, %v180_v36  ;;  %v268_v39 = vand.u32 2147483647, %v264_v34 }
 0x100   :  { %v265_v40 = vsub.f32 %v180_v36, %v261_v37  ;;  %v390_v41 = vpack.c.bf16 %v261_v37, %v261_v37  ;;  %v172_v42 = vpop.f32.mrb[4].mxu0  ;;  %v253_v43 = vpop.f32.mrb[4].mxu1 }
 0x101   :  { %310 = vst.msk [vmem:[%s589_s4 + $0x4] sm:$0xf] %vm308_vm1, %v386_v38  ;;  %v173_v44 = vadd.f32 %v355_v18, %v172_v42  ;;  %v254_v45 = vadd.f32 %v355_v18, %v253_v43  ;;  %v174_v46 = vpop.f32.mrb[5].mxu0  ;;  %v255_v47 = vpop.f32.mrb[5].mxu1  ;;  %v273_v57 = vsel %vm272_vm2, %v268_v39, 0.0 }
 0x102   :  { %v269_v48 = vand.u32 2147483647, %v265_v40  ;;  %330 = vst.msk [vmem:[%s590_s5 + $0x4] sm:$0xf] %vm308_vm1, %v390_v41  ;;  %v175_v49 = vpop.f32.mrb[6].mxu0  ;;  %v256_v50 = vpop.f32.mrb[6].mxu1 }
 0x103   :  { %v181_v51 = vmax.f32 %v173_v44, 0.0  ;;  %v262_v52 = vmax.f32 %v254_v45, 0.0  ;;  %v176_v53 = vadd.f32 %v355_v18, %v175_v49  ;;  %v257_v54 = vadd.f32 %v355_v18, %v256_v50  ;;  %v177_v55 = vpop.f32.mrb[7].mxu0  ;;  %v258_v56 = vpop.f32.mrb[7].mxu1 }
 0x104   :  { %v274_v58 = vsel %vm272_vm2, %v269_v48, 0.0 }
 0x105   :  { %v387_v59 = vpack.c.bf16 %v181_v51, %v181_v51  ;;  %v266_v60 = vsub.f32 %v181_v51, %v262_v52  ;;  %v391_v61 = vpack.c.bf16 %v262_v52, %v262_v52  ;;  %v182_v62 = vmax.f32 %v176_v53, 0.0 }
 0x106   :  { %v263_v63 = vmax.f32 %v257_v54, 0.0  ;;  %v275_v0 = vadd.f32 %v274_v58, %v273_v57 }
 0x107   :  { %311 = vst.msk [vmem:[%s589_s4 + $0x8] sm:$0xf] %vm308_vm1, %v387_v59  ;;  %v270_v1 = vand.u32 2147483647, %v266_v60  ;;  %331 = vst.msk [vmem:[%s590_s5 + $0x8] sm:$0xf] %vm308_vm1, %v391_v61  ;;  %v388_v2 = vpack.c.bf16 %v182_v62, %v182_v62 }
 0x108   :  { %v267_v3 = vsub.f32 %v182_v62, %v263_v63  ;;  %v392_v4 = vpack.c.bf16 %v263_v63, %v263_v63 }
 0x109   :  { %312 = vst.msk [vmem:[%s589_s4 + $0xc] sm:$0xf] %vm308_vm1, %v388_v2  ;;  %v276_v5 = vsel %vm272_vm2, %v270_v1, 0.0  ;;  %s443_s4 = smov [#allocation2]  }
 0x10a   :  { %332 = vst.msk [vmem:[%s590_s5 + $0xc] sm:$0xf] %vm308_vm1, %v392_v4  ;;  %v271_v6 = vand.u32 2147483647, %v267_v3  ;;  %v277_v7 = vadd.f32 %v276_v5, %v275_v0  ;;  %s343_s21 = sshll.u32 %s443_s4, 4  ;;  %s344_s21 = int_to_ptr.vmem [resolvable:$true] %s343_s21 }
 0x10b   :  { %s418_s5 = scalar_lea.vmem %s344_s21, 16  ;;  %s422_s23 = scalar_lea.vmem %s344_s21, 32 }
 0x10c   :  { %v278_v8 = vsel %vm272_vm2, %v271_v6, 0.0  ;;  %p419_p0 = scmp.ne.s32.totalorder %s344_s21, %s418_s5  ;;  %p423_p1 = scmp.lt.s32.totalorder %s344_s21, %s344_s21 }
 0x10d   :  { %v279_v9 = vadd.f32 %v278_v8, %v277_v7  ;;  %p424_p2 = scmp.lt.s32.totalorder %s422_s23, %s418_s5 }
 0x10f   :  { %280 = vadd.xlane.f32.xlu0 %v279_v9  ;;  %p425_p3 = por %p424_p2, %p423_p1 }
 0x111   :  { %p426_p4 = pnand %p425_p3, %p419_p0 }
 0x19c   :  { %v281_v10 = vpop.xlane.xlu0 %280 }
 0x19d   :  { %v282_v11 = vrot.slane %v281_v10, 4 }
 0x19f   :  { %v283_v12 = vadd.f32 %v282_v11, %v281_v10 }
 0x1a1   :  { %v284_v13 = vrot.slane %v283_v12, 2 }
 0x1a3   :  { %v285_v14 = vadd.f32 %v284_v13, %v283_v12 }
 0x1a5   :  { %v286_v15 = vrot.slane %v285_v14, 1 }
 0x1a7   :  { %v287_v16 = vadd.f32 %v286_v15, %v285_v14 }
 0x1a9   :  { %393 = vpush %v287_v16 }
 0x1da   :  { %s394_s22 = spop %393 }
 0x1db   :  { %v289_v17 = vstv %s394_s22 }
 0x1dc   :  { %291 = vst.msk [vmem:[#allocation2] sm:$0x1] %vm290_vm3, %v289_v17 }
 0x1dd   :  { %429 = shalt.err (!%p426_p4)
}
 0x1de   :  { %s430_s26 = scalar_lea.hbm %s591_s6, 16 }
 0x1df   :  { %p431_p5 = scmp.ne.s32.totalorder %s591_s6, %s430_s26  ;;  %p434_p6 = scmp.lt.u32.totalorder %s430_s26, %s591_s6 }
 0x1e1   :  { %p436_p7 = pnand %p434_p6, %p431_p5 }
 0x1e3   :  { %439 = shalt.err (!%p436_p7)
}
 0x1e4   :  { %346 = dma.vmem_to_hbm [thread:$0]  %s344_s21, 16, %s591_s6, [#allocation3]  }
 0x1e5   :  { %440 = dma.done.wait [#allocation3], 16  }
 0x1e6   :  { %441 = vsyncadd [#allocation3], 4294967280 }
 0x1e7   :  { %354 = vsyncpa [#allocation3], 1 }

// kernel: squeeze.30
= control target key start
LH: loop header
LB: loop body
LE: loop exit
PB: predicated region body
PF: predicated region fallthrough
CT: control target
= control target key end

     0   :  { %vm195_vm0 = vcmask 261120   ;;  %v294_v40 = vmov 0.0   ;;  %s351_s0 = inlined_call_operand.vmem [shape: bf16[1,2,2,2,288], index: 0, kind: input, shape index: {}]   ;;  %s352_s1 = inlined_call_operand.vmem [shape: bf16[8,288], index: 1, kind: output, shape index: {}]  }
   0x1   :  { %v275_v0 = vld [vmem:[%s351_s0 + $0xb] sm:$0x1]  ;;  %v276_v1 = vld [vmem:[%s351_s0 + $0xa] sm:$0x1]  ;;  %v277_v2 = vld [vmem:[%s351_s0 + $0x9] sm:$0x1] }
   0x2   :  { %v17_v3 = vunpack.c.l.bf16 %v275_v0  ;;  %v33_v4 = vunpack.c.l.bf16 %v276_v1  ;;  %v49_v5 = vunpack.c.l.bf16 %v277_v2  ;;  %v278_v6 = vld [vmem:[%s351_s0 + $0x8] sm:$0x1]  ;;  %v279_v7 = vld [vmem:[%s351_s0 + $0x7] sm:$0x1]  ;;  %v280_v8 = vld [vmem:[%s351_s0 + $0x6] sm:$0x1] }
   0x3   :  { %v65_v9 = vunpack.c.l.bf16 %v278_v6  ;;  %v81_v10 = vunpack.c.l.bf16 %v279_v7  ;;  %v97_v11 = vunpack.c.l.bf16 %v280_v8  ;;  %v281_v12 = vld [vmem:[%s351_s0 + $0x5] sm:$0x1]  ;;  %v282_v13 = vld [vmem:[%s351_s0 + $0x4] sm:$0x1]  ;;  %v283_v14 = vld [vmem:[%s351_s0 + $0x3] sm:$0x1] }
   0x4   :  { %20 = vst [vmem:[#allocation1 + $0x58] sm:$0x3] %v17_v3  ;;  %36 = vst [vmem:[#allocation1 + $0x50] sm:$0x3] %v33_v4  ;;  %v113_v15 = vunpack.c.l.bf16 %v281_v12  ;;  %v129_v16 = vunpack.c.l.bf16 %v282_v13  ;;  %v145_v17 = vunpack.c.l.bf16 %v283_v14  ;;  %v284_v18 = vld [vmem:[%s351_s0 + $0x2] sm:$0x1] }
   0x5   :  { %52 = vst [vmem:[#allocation1 + $0x48] sm:$0x3] %v49_v5  ;;  %v285_v19 = vld [vmem:[%s351_s0 + $0x1] sm:$0x1]  ;;  %v189_v20 = vld [vmem:[%s351_s0] sm:$0x1]  ;;  %v161_v21 = vunpack.c.l.bf16 %v284_v18 }
   0x6   :  { %68 = vst [vmem:[#allocation1 + $0x40] sm:$0x3] %v65_v9  ;;  %84 = vst [vmem:[#allocation1 + $0x38] sm:$0x3] %v81_v10  ;;  %v176_v22 = vunpack.c.l.bf16 %v285_v19  ;;  %v190_v23 = vunpack.c.l.bf16 %v189_v20 }
   0x7   :  { %100 = vst [vmem:[#allocation1 + $0x30] sm:$0x3] %v97_v11  ;;  %116 = vst [vmem:[#allocation1 + $0x28] sm:$0x3] %v113_v15 }
   0x8   :  { %132 = vst [vmem:[#allocation1 + $0x20] sm:$0x3] %v129_v16  ;;  %148 = vst [vmem:[#allocation1 + $0x18] sm:$0x3] %v145_v17 }
   0x9   :  { %164 = vst [vmem:[#allocation1 + $0x10] sm:$0x3] %v161_v21  ;;  %179 = vst [vmem:[#allocation1 + $0x8] sm:$0x3] %v176_v22 }
   0xa   :  { %192 = vst [vmem:[#allocation1] sm:$0x3] %v190_v23 }
   0xb   :  { %v209_v24 = vld [vmem:[#allocation1 + $0x58] sm:$0x3]   ;;  %v240_v26 = vld [vmem:[#allocation1 + $0x50] sm:$0x3]  }
   0xc   :  { %v236_v25 = vld [vmem:[#allocation1 + $0x48] sm:$0x3]   ;;  %212 = vst.msk [vmem:[#allocation0 + $0x16] sm:$0x3] %vm195_vm0, %v209_v24   ;;  %242 = vst [vmem:[#allocation0 + $0xe] sm:$0x3] %v240_v26  }
   0xd   :  { %v204_v27 = vld [vmem:[#allocation1 + $0x40] sm:$0x3]   ;;  %v232_v29 = vld [vmem:[#allocation1 + $0x38] sm:$0x3]   ;;  %238 = vst [vmem:[#allocation0 + $0x6] sm:$0x3] %v236_v25  }
   0xe   :  { %v228_v28 = vld [vmem:[#allocation1 + $0x30] sm:$0x3]   ;;  %v199_v30 = vld [vmem:[#allocation1 + $0x28] sm:$0x3]   ;;  %207 = vst.msk [vmem:[#allocation0 + $0x14] sm:$0x3] %vm195_vm0, %v204_v27  }
   0xf   :  { %v220_v31 = vld [vmem:[#allocation1 + $0x18] sm:$0x3]   ;;  %v224_v32 = vld [vmem:[#allocation1 + $0x20] sm:$0x3]   ;;  %230 = vst [vmem:[#allocation0 + $0x4] sm:$0x3] %v228_v28  }
  0x10   :  { %234 = vst [vmem:[#allocation0 + $0xc] sm:$0x3] %v232_v29   ;;  %v194_v33 = vld [vmem:[#allocation1 + $0x10] sm:$0x3]   ;;  %202 = vst.msk [vmem:[#allocation0 + $0x12] sm:$0x3] %vm195_vm0, %v199_v30  }
  0x11   :  { %v213_v34 = vld [vmem:[#allocation1] sm:$0x3]   ;;  %v216_v35 = vld [vmem:[#allocation1 + $0x8] sm:$0x3]   ;;  %222 = vst [vmem:[#allocation0 + $0x2] sm:$0x3] %v220_v31  }
  0x12   :  { %226 = vst [vmem:[#allocation0 + $0xa] sm:$0x3] %v224_v32   ;;  %197 = vst.msk [vmem:[#allocation0 + $0x10] sm:$0x3] %vm195_vm0, %v194_v33  }
  0x13   :  { %214 = vst [vmem:[#allocation0] sm:$0x3] %v213_v34   ;;  %218 = vst [vmem:[#allocation0 + $0x8] sm:$0x3] %v216_v35  }
  0x19   :  { %v258_v38 = vld [vmem:[#allocation0 + $0x10] sm:$0xff] }
  0x1a   :  { %v247_v36 = vld [vmem:[#allocation0] sm:$0xff]  ;;  %v252_v37 = vld [vmem:[#allocation0 + $0x8] sm:$0xff]  ;;  %v259_v41 = vpack.c.bf16 %v294_v40, %v258_v38 }
  0x1b   :  { %v291_v39 = vpack.c.bf16 %v252_v37, %v247_v36 }
  0x1c   :  { %287 = vst [vmem:[%s352_s1 + $0x8] sm:$0xf] %v259_v41 }
  0x1d   :  { %292 = vst [vmem:[%s352_s1] sm:$0xff] %v291_v39  }

// kernel: a_call__.23
= control target key start
LH: loop header
LB: loop body
LE: loop exit
PB: predicated region body
PF: predicated region fallthrough
CT: control target
= control target key end

     0   :  { %v554_v1 = vmov 0.0   ;;  %vm555_vm0 = vmmov 0   ;;  %vm185_vm1 = vcmask 261120   ;;  %s694_s0 = inlined_call_operand.vmem [shape: bf16[8,288], index: 0, kind: input, shape index: {}]   ;;  %s695_s1 = inlined_call_operand.vmem [shape: bf16[8,288], index: 1, kind: input, shape index: {}]   ;;  %s696_s2 = inlined_call_operand.vmem [shape: bf16[288,32], index: 2, kind: input, shape index: {}]   ;;  %s697_s3 = inlined_call_operand.vmem [shape: f32[1,32], index: 3, kind: input, shape index: {}]   ;;  %s698_s4 = inlined_call_operand.vmem [shape: bf16[8,32], index: 4, kind: output, shape index: {0}]   ;;  %s699_s5 = inlined_call_operand.vmem [shape: bf16[8,32], index: 5, kind: output, shape index: {1}]   ;;  %s700_s6 = inlined_call_operand.hbm [shape: f32[1,1], index: 6, kind: output, shape index: {2}]  }
   0x1   :  { %v506_v0 = vld [vmem:[%s696_s2 + $0x40] sm:$0xff]   ;;  %485 = vmatprep.subr.bf16.mxu1 %v554_v1  ;;  %489 = vmatprep.mubr.msk.bf16.mxu1 %vm555_vm0, %v554_v1  ;;  %v509_v4 = vld [vmem:[%s696_s2 + $0x48] sm:$0xff]   ;;  %v513_v8 = vld [vmem:[%s696_s2 + $0x50] sm:$0xff]  }
   0x2   :  { %v599_v2 = vld [vmem:[%s696_s2 + $0x80] sm:$0xff]   ;;  %435 = vmatprep.subr.bf16.mxu0 %v506_v0  ;;  %v510_v5 = vld [vmem:[%s696_s2 + $0x88] sm:$0xff]   ;;  %v514_v9 = vld [vmem:[%s696_s2 + $0x10] sm:$0xff]  }
   0x3   :  { %v508_v3 = vld [vmem:[%s696_s2] sm:$0xff]   ;;  %486 = vmatpush3.bf16.msra.mxu1 %v599_v2  ;;  %v511_v6 = vld [vmem:[%s696_s2 + $0x8] sm:$0xff]   ;;  %v515_v10 = vld [vmem:[%s696_s2 + $0x58] sm:$0xff]  }
   0x4   :  { %436 = vmatpush3.bf16.msra.mxu0 %v508_v3  ;;  %487 = vmatprep.subr.bf16.mxu1 %v554_v1  ;;  %v512_v7 = vld [vmem:[%s694_s0 + $0x8] ss:$0 sps:$4 sm:$0xff]   ;;  %v516_v11 = vld [vmem:[%s696_s2 + $0x18] sm:$0xff]   ;;  %v517_v12 = vld [vmem:[%s696_s2 + $0x60] sm:$0xff]  }
   0x5   :  { %437 = vmatprep.subr.bf16.mxu0 %v509_v4  ;;  %v518_v13 = vld [vmem:[%s696_s2 + $0x20] sm:$0xff]   ;;  %v519_v14 = vld [vmem:[%s696_s2 + $0x68] sm:$0xff]  }
   0x6   :  { %v59_v15 = vld [vmem:[%s694_s0] sm:$0xff]  ;;  %v520_v18 = vld [vmem:[%s696_s2 + $0x28] sm:$0xff]  }
   0x7   :  { %488 = vmatpush3.bf16.msra.mxu1 %v510_v5  ;;  %v410_v16 = vcombine.high %v59_v15, %v59_v15  ;;  %v270_v17 = vld [vmem:[%s695_s1] sm:$0xff] }
   0x8   :  { %438 = vmatpush3.bf16.msra.mxu0 %v511_v6  ;;  %460 = vmatprep.subr.bf16.mxu1 %v506_v0  ;;  %v432_v19 = vcombine.high %v270_v17, %v270_v17 }
   0x9   :  { %439 = vmatprep.subr.bf16.mxu0 %v513_v8 }
   0xa   :  { %490 = vmatmul.mubr.msk.bf16.vlgmr.msra.gmra.mrb[0].mxu1 %vm185_vm1, %v512_v7 }
   0xb   :  { %461 = vmatpush3.bf16.msra.mxu1 %v508_v3 }
   0xc   :  { %440 = vmatpush3.bf16.msra.mxu0 %v514_v9  ;;  %462 = vmatprep.subr.bf16.mxu1 %v509_v4 }
   0xd   :  { %441 = vmatprep.subr.bf16.mxu0 %v515_v10 }
   0xf   :  { %463 = vmatpush3.bf16.msra.mxu1 %v511_v6 }
  0x10   :  { %442 = vmatpush3.bf16.msra.mxu0 %v516_v11  ;;  %464 = vmatprep.subr.bf16.mxu1 %v513_v8 }
  0x11   :  { %443 = vmatprep.subr.bf16.mxu0 %v517_v12 }
  0x13   :  { %465 = vmatpush3.bf16.msra.mxu1 %v514_v9 }
  0x14   :  { %444 = vmatpush3.bf16.msra.mxu0 %v518_v13  ;;  %466 = vmatprep.subr.bf16.mxu1 %v515_v10 }
  0x15   :  { %12 = vsyncpa [#allocation3], 0  ;;  %445 = vmatprep.subr.bf16.mxu0 %v519_v14  ;;  %v521_v20 = vld [vmem:[%s696_s2 + $0x70] sm:$0xff]   ;;  %221 = vmatprep.mubr.bf16.mxu0 %v410_v16  ;;  %v523_v22 = vld [vmem:[%s696_s2 + $0x78] sm:$0xff]   ;;  %v409_v24 = vcombine.low %v59_v15, %v59_v15  ;;  %v431_v25 = vcombine.low %v270_v17, %v270_v17  ;;  %vm382_vm2 = vcmask 257024   ;;  %vm379_vm3 = vcmask 0  }
  0x16   :  { %317 = vmatprep.mubr.bf16.mxu1 %v432_v19  ;;  %v522_v21 = vld [vmem:[%s696_s2 + $0x30] sm:$0xff]   ;;  %v524_v23 = vld [vmem:[%s696_s2 + $0x38] sm:$0xff]   ;;  %v529_v26 = vld [vmem:[%s695_s1 + $0x8] ss:$0 sps:$4 sm:$0xff]  }
  0x17   :  { %467 = vmatpush3.bf16.msra.mxu1 %v516_v11  ;;  %v408_v32 = vld [vmem:[%s697_s3] ss:$0 sm:$0xff] }
  0x18   :  { %446 = vmatpush3.bf16.msra.mxu0 %v520_v18  ;;  %468 = vmatprep.subr.bf16.mxu1 %v517_v12 }
  0x19   :  { %447 = vmatprep.subr.bf16.mxu0 %v521_v20 }
  0x1b   :  { %469 = vmatpush3.bf16.msra.mxu1 %v518_v13 }
  0x1c   :  { %448 = vmatpush3.bf16.msra.mxu0 %v522_v21  ;;  %470 = vmatprep.subr.bf16.mxu1 %v519_v14 }
  0x1d   :  { %449 = vmatprep.subr.bf16.mxu0 %v523_v22 }
  0x1f   :  { %471 = vmatpush3.bf16.msra.mxu1 %v520_v18 }
  0x20   :  { %450 = vmatpush3.bf16.msra.mxu0 %v524_v23  ;;  %472 = vmatprep.subr.bf16.mxu1 %v521_v20 }
  0x21   :  { %493 = vmatprep.subr.bf16.mxu0 %v554_v1 }
  0x23   :  { %222 = vmatmul.mubr.bf16.vlgmr.msra.gmra.mrb[0].mxu0 %v409_v24  ;;  %473 = vmatpush3.bf16.msra.mxu1 %v522_v21 }
  0x24   :  { %494 = vmatpush3.bf16.msra.mxu0 %v599_v2  ;;  %474 = vmatprep.subr.bf16.mxu1 %v523_v22 }
  0x25   :  { %495 = vmatprep.subr.bf16.mxu0 %v554_v1  ;;  %497 = vmatprep.mubr.msk.bf16.mxu0 %vm555_vm0, %v554_v1 }
  0x27   :  { %475 = vmatpush3.bf16.msra.mxu1 %v524_v23 }
  0x28   :  { %496 = vmatpush3.bf16.msra.mxu0 %v510_v5 }
  0x2a   :  { %318 = vmatmul.mubr.bf16.vlgmr.msra.gmra.mrb[4].mxu1 %v431_v25 }
  0x2b   :  { %498 = vmatmul.mubr.msk.bf16.vlgmr.msra.gmra.mrb[4].mxu0 %vm185_vm1, %v529_v26 }
  0xdd   :  { %v263_v27 = vpop.f32.mrb[0].mxu1 }
  0xde   :  { %v491_v28 = vpop.f32.mrb[1].mxu1 }
  0xdf   :  { %v266_v29 = vpop.f32.mrb[2].mxu1 }
  0xe0   :  { %v492_v30 = vpop.f32.mrb[3].mxu1 }
  0xf6   :  { %v451_v31 = vpop.f32.mrb[0].mxu0 }
  0xf7   :  { %v452_v33 = vpop.f32.mrb[1].mxu0 }
  0xf8   :  { %v453_v34 = vadd.f32 %v452_v33, %v451_v31  ;;  %v454_v35 = vpop.f32.mrb[2].mxu0 }
  0xf9   :  { %v455_v36 = vpop.f32.mrb[3].mxu0 }
  0xfa   :  { %v224_v37 = vadd.f32 %v453_v34, %v408_v32 }
  0xfc   :  { %v264_v38 = vadd.f32 %v263_v27, %v224_v37 }
  0xfd   :  { %v476_v39 = vpop.f32.mrb[4].mxu1 }
  0xfe   :  { %v477_v40 = vpop.f32.mrb[5].mxu1  ;;  %v359_v41 = vpop.f32.mrb[4].mxu0  ;;  %v269_v42 = vmax.f32 %v264_v38, 0.0 }
  0xff   :  { %v478_v43 = vadd.f32 %v477_v40, %v476_v39  ;;  %v479_v44 = vpop.f32.mrb[6].mxu1  ;;  %v499_v45 = vpop.f32.mrb[5].mxu0 }
 0x100   :  { %v480_v46 = vpop.f32.mrb[7].mxu1  ;;  %v362_v47 = vpop.f32.mrb[6].mxu0  ;;  %v381_v48 = vpack.c.bf16 %v269_v42, %v269_v42 }
 0x101   :  { %v320_v49 = vadd.f32 %v478_v43, %v408_v32  ;;  %v500_v50 = vpop.f32.mrb[7].mxu0 }
 0x102   :  { %383 = vst.msk [vmem:[%s698_s4] sm:$0xf] %vm382_vm2, %v381_v48  ;;  %s556_s4 = smov [#allocation2]  }
 0x103   :  { %v360_v51 = vadd.f32 %v359_v41, %v320_v49  ;;  %s396_s19 = sshll.u32 %s556_s4, 4  ;;  %s397_s19 = int_to_ptr.vmem [resolvable:$true] %s396_s19 }
 0x104   :  { %s534_s21 = scalar_lea.vmem %s397_s19, 32  ;;  %p535_p1 = scmp.lt.s32.totalorder %s397_s19, %s397_s19 }
 0x105   :  { %v365_v52 = vmax.f32 %v360_v51, 0.0 }
 0x107   :  { %v384_v53 = vpack.c.bf16 %v365_v52, %v365_v52  ;;  %v366_v54 = vsub.f32 %v269_v42, %v365_v52 }
 0x109   :  { %385 = vst.msk [vmem:[%s699_s5] sm:$0xf] %vm382_vm2, %v384_v53  ;;  %v367_v55 = vand.u32 2147483647, %v366_v54  ;;  %s530_s5 = scalar_lea.vmem %s397_s19, 16 }
 0x10a   :  { %p531_p0 = scmp.ne.s32.totalorder %s397_s19, %s530_s5  ;;  %p536_p2 = scmp.lt.s32.totalorder %s534_s21, %s530_s5 }
 0x10b   :  { %v368_v56 = vsel %vm185_vm1, %v367_v55, 0.0 }
 0x10c   :  { %369 = vadd.xlane.f32.xlu0 %v368_v56  ;;  %p537_p3 = por %p536_p2, %p535_p1 }
 0x10e   :  { %p538_p4 = pnand %p537_p3, %p531_p0 }
 0x199   :  { %v370_v57 = vpop.xlane.xlu0 %369 }
 0x19a   :  { %v371_v58 = vrot.slane %v370_v57, 4 }
 0x19c   :  { %v372_v59 = vadd.f32 %v371_v58, %v370_v57 }
 0x19e   :  { %v373_v60 = vrot.slane %v372_v59, 2 }
 0x1a0   :  { %v374_v61 = vadd.f32 %v373_v60, %v372_v59 }
 0x1a2   :  { %v375_v62 = vrot.slane %v374_v61, 1 }
 0x1a4   :  { %v376_v63 = vadd.f32 %v375_v62, %v374_v61 }
 0x1a6   :  { %501 = vpush %v376_v63 }
 0x1d7   :  { %s502_s20 = spop %501 }
 0x1d8   :  { %v378_v0 = vstv %s502_s20 }
 0x1d9   :  { %380 = vst.msk [vmem:[#allocation2] sm:$0x1] %vm379_vm3, %v378_v0 }
 0x1da   :  { %541 = shalt.err (!%p538_p4)
}
 0x1db   :  { %s542_s24 = scalar_lea.hbm %s700_s6, 16 }
 0x1dc   :  { %p543_p5 = scmp.ne.s32.totalorder %s700_s6, %s542_s24  ;;  %p546_p6 = scmp.lt.u32.totalorder %s542_s24, %s700_s6 }
 0x1de   :  { %p548_p7 = pnand %p546_p6, %p543_p5 }
 0x1e0   :  { %551 = shalt.err (!%p548_p7)
}
 0x1e1   :  { %399 = dma.vmem_to_hbm [thread:$0]  %s397_s19, 16, %s700_s6, [#allocation3]  }
 0x1e2   :  { %552 = dma.done.wait [#allocation3], 16  }
 0x1e3   :  { %553 = vsyncadd [#allocation3], 4294967280 }
 0x1e4   :  { %407 = vsyncpa [#allocation3], 1 }

// kernel: a_call__.24
= control target key start
LH: loop header
LB: loop body
LE: loop exit
PB: predicated region body
PF: predicated region fallthrough
CT: control target
= control target key end

     0   :  { %12 = vsyncpa [#allocation3], 0  ;;  %v644_v1 = vmov 0.0   ;;  %vm645_vm0 = vmmov 0   ;;  %v79_v6 = vlaneseq  ;;  %v646_v10 = vmov 1966171168   ;;  %s804_s0 = inlined_call_operand.vmem [shape: bf16[2,288], index: 0, kind: input, shape index: {}]   ;;  %s805_s1 = inlined_call_operand.vmem [shape: bf16[2,288], index: 1, kind: input, shape index: {}]   ;;  %s806_s2 = inlined_call_operand.vmem [shape: bf16[288,32], index: 2, kind: input, shape index: {}]   ;;  %s807_s3 = inlined_call_operand.vmem [shape: f32[1,32], index: 3, kind: input, shape index: {}]   ;;  %s808_s4 = inlined_call_operand.hbm [shape: bf16[2,32], index: 4, kind: output, shape index: {0}]   ;;  %s809_s5 = inlined_call_operand.hbm [shape: bf16[2,32], index: 5, kind: output, shape index: {1}]   ;;  %s810_s6 = inlined_call_operand.hbm [shape: f32[1,1], index: 6, kind: output, shape index: {2}]  }
   0x1   :  { %v556_v0 = vld [vmem:[%s806_s2 + $0x40] sm:$0xff]   ;;  %532 = vmatprep.subr.bf16.mxu1 %v644_v1  ;;  %536 = vmatprep.mubr.msk.bf16.mxu1 %vm645_vm0, %v644_v1  ;;  %v559_v4 = vld [vmem:[%s806_s2 + $0x48] sm:$0xff]   ;;  %v562_v8 = vld [vmem:[%s806_s2 + $0x50] sm:$0xff]   ;;  %v77_v11 = vunpack.c.l.s4 %v646_v10  ;;  %vm201_vm1 = vcmask 261120  }
   0x2   :  { %v692_v2 = vld [vmem:[%s806_s2 + $0x80] sm:$0xff]   ;;  %482 = vmatprep.subr.bf16.mxu0 %v556_v0  ;;  %v707_v5 = vld [vmem:[%s806_s2 + $0x88] sm:$0xff]   ;;  %v80_v12 = vshrl.u32 %v79_v6, 7  ;;  %v563_v13 = vld [vmem:[%s806_s2 + $0x10] sm:$0xff]  }
   0x3   :  { %v558_v3 = vld [vmem:[%s806_s2] sm:$0xff]   ;;  %533 = vmatpush3.bf16.msra.mxu1 %v692_v2  ;;  %v561_v7 = vld [vmem:[%s806_s2 + $0x8] sm:$0xff]   ;;  %v564_v14 = vld [vmem:[%s806_s2 + $0x58] sm:$0xff]   ;;  %v78_v15 = vunpack.c.0.s8 %v77_v11 }
   0x4   :  { %483 = vmatpush3.bf16.msra.mxu0 %v558_v3  ;;  %534 = vmatprep.subr.bf16.mxu1 %v644_v1  ;;  %v460_v9 = vld.sshfl [vmem:[%s804_s0] sm:$0x13 pattern:$0x75316420]  ;;  %v565_v18 = vld [vmem:[%s806_s2 + $0x18] sm:$0xff]   ;;  %v568_v24 = vld [vmem:[%s806_s2 + $0x68] sm:$0xff]  }
   0x5   :  { %484 = vmatprep.subr.bf16.mxu0 %v559_v4  ;;  %v75_v16 = vcombine.high %v460_v9, %v460_v9  ;;  %v81_v17 = vsub.s32 %v78_v15, %v80_v12  ;;  %v566_v19 = vld [vmem:[%s806_s2 + $0x60] sm:$0xff]  }
   0x6   :  { %v567_v23 = vld [vmem:[%s806_s2 + $0x20] sm:$0xff]  }
   0x7   :  { %535 = vmatpush3.bf16.msra.mxu1 %v707_v5  ;;  %v82_v20 = vrot.slane %v460_v9, %v81_v17  ;;  %v89_v21 = vrot.slane %v75_v16, %v81_v17  ;;  %v480_v25 = vld.sshfl [vmem:[%s805_s1] sm:$0x13 pattern:$0x75316420] }
   0x8   :  { %485 = vmatpush3.bf16.msra.mxu0 %v561_v7  ;;  %507 = vmatprep.subr.bf16.mxu1 %v556_v0 }
   0x9   :  { %486 = vmatprep.subr.bf16.mxu0 %v562_v8  ;;  %v90_v22 = vcombine.high %v82_v20, %v82_v20  ;;  %237 = vmatprep.mubr.bf16.mxu0 %v89_v21 }
   0xb   :  { %537 = vmatmul.mubr.msk.bf16.vlgmr.msra.gmra.mrb[0].mxu1 %vm201_vm1, %v90_v22 }
   0xc   :  { %487 = vmatpush3.bf16.msra.mxu0 %v563_v13  ;;  %508 = vmatpush3.bf16.msra.mxu1 %v558_v3 }
   0xd   :  { %488 = vmatprep.subr.bf16.mxu0 %v564_v14 }
  0x10   :  { %489 = vmatpush3.bf16.msra.mxu0 %v565_v18 }
  0x11   :  { %490 = vmatprep.subr.bf16.mxu0 %v566_v19 }
  0x12   :  { %13 = vsyncpa [#allocation5], 0  ;;  %509 = vmatprep.subr.bf16.mxu1 %v559_v4  ;;  %v569_v26 = vld [vmem:[%s806_s2 + $0x28] sm:$0xff]   ;;  %v295_v27 = vcombine.high %v480_v25, %v480_v25  ;;  %v570_v28 = vld [vmem:[%s806_s2 + $0x70] sm:$0xff]   ;;  %v302_v33 = vrot.slane %v480_v25, %v81_v17  ;;  %vm414_vm2 = vcmask 253952   ;;  %vm399_vm3 = vcmask 254976  }
  0x13   :  { %510 = vmatpush3.bf16.msra.mxu1 %v561_v7  ;;  %v571_v30 = vld [vmem:[%s806_s2 + $0x30] sm:$0xff]   ;;  %v572_v31 = vld [vmem:[%s806_s2 + $0x78] sm:$0xff]   ;;  %v459_v40 = vld [vmem:[%s807_s3] ss:$0 sm:$0xff]  ;;  %s647_s3 = smov [#allocation4]   ;;  %s648_s13 = smov [#allocation2]  }
  0x14   :  { %491 = vmatpush3.bf16.msra.mxu0 %v567_v23  ;;  %v309_v29 = vrot.slane %v295_v27, %v81_v17  ;;  %511 = vmatprep.subr.bf16.mxu1 %v562_v8  ;;  %v573_v32 = vld [vmem:[%s806_s2 + $0x38] sm:$0xff]   ;;  %v310_v34 = vcombine.high %v302_v33, %v302_v33  ;;  %s434_s12 = sshll.u32 %s647_s3, 4  ;;  %s424_s14 = sshll.u32 %s648_s13, 4  ;;  %s435_s12 = int_to_ptr.vmem [resolvable:$true] %s434_s12  ;;  %s425_s14 = int_to_ptr.vmem [resolvable:$true] %s424_s14 }
  0x15   :  { %492 = vmatprep.subr.bf16.mxu0 %v568_v24  ;;  %s574_s15 = scalar_lea.vmem %s435_s12, 16  ;;  %s578_s16 = scalar_lea.vmem %s435_s12, 32 }
  0x16   :  { %348 = vmatprep.mubr.bf16.mxu1 %v309_v29  ;;  %p575_p0 = scmp.ne.s32.totalorder %s435_s12, %s574_s15  ;;  %p579_p1 = scmp.lt.s32.totalorder %s435_s12, %s435_s12 }
  0x17   :  { %512 = vmatpush3.bf16.msra.mxu1 %v563_v13  ;;  %p580_p2 = scmp.lt.s32.totalorder %s578_s16, %s574_s15 }
  0x18   :  { %493 = vmatpush3.bf16.msra.mxu0 %v569_v26  ;;  %513 = vmatprep.subr.bf16.mxu1 %v564_v14 }
  0x19   :  { %494 = vmatprep.subr.bf16.mxu0 %v570_v28  ;;  %p581_p3 = por %p580_p2, %p579_p1 }
  0x1b   :  { %514 = vmatpush3.bf16.msra.mxu1 %v565_v18  ;;  %p582_p4 = pnand %p581_p3, %p575_p0 }
  0x1c   :  { %495 = vmatpush3.bf16.msra.mxu0 %v571_v30  ;;  %515 = vmatprep.subr.bf16.mxu1 %v566_v19 }
  0x1d   :  { %496 = vmatprep.subr.bf16.mxu0 %v572_v31 }
  0x1f   :  { %516 = vmatpush3.bf16.msra.mxu1 %v567_v23 }
  0x20   :  { %497 = vmatpush3.bf16.msra.mxu0 %v573_v32  ;;  %517 = vmatprep.subr.bf16.mxu1 %v568_v24 }
  0x21   :  { %540 = vmatprep.subr.bf16.mxu0 %v644_v1 }
  0x23   :  { %238 = vmatmul.mubr.bf16.vlgmr.msra.gmra.mrb[0].mxu0 %v82_v20  ;;  %518 = vmatpush3.bf16.msra.mxu1 %v569_v26 }
  0x24   :  { %541 = vmatpush3.bf16.msra.mxu0 %v692_v2  ;;  %544 = vmatprep.mubr.msk.bf16.mxu0 %vm645_vm0, %v644_v1 }
  0x25   :  { %542 = vmatprep.subr.bf16.mxu0 %v644_v1  ;;  %519 = vmatprep.subr.bf16.mxu1 %v570_v28 }
  0x27   :  { %520 = vmatpush3.bf16.msra.mxu1 %v571_v30 }
  0x28   :  { %543 = vmatpush3.bf16.msra.mxu0 %v707_v5  ;;  %521 = vmatprep.subr.bf16.mxu1 %v572_v31 }
  0x2b   :  { %545 = vmatmul.mubr.msk.bf16.vlgmr.msra.gmra.mrb[4].mxu0 %vm201_vm1, %v310_v34  ;;  %522 = vmatpush3.bf16.msra.mxu1 %v573_v32 }
  0x2e   :  { %349 = vmatmul.mubr.bf16.vlgmr.msra.gmra.mrb[4].mxu1 %v302_v33 }
  0xde   :  { %v279_v35 = vpop.f32.mrb[0].mxu1 }
  0xdf   :  { %v538_v36 = vpop.f32.mrb[1].mxu1 }
  0xe0   :  { %v282_v37 = vpop.f32.mrb[2].mxu1 }
  0xe1   :  { %v539_v38 = vpop.f32.mrb[3].mxu1 }
  0xf6   :  { %v498_v39 = vpop.f32.mrb[0].mxu0 }
  0xf7   :  { %v499_v41 = vpop.f32.mrb[1].mxu0 }
  0xf8   :  { %v500_v42 = vadd.f32 %v499_v41, %v498_v39  ;;  %v501_v43 = vpop.f32.mrb[2].mxu0 }
  0xf9   :  { %v502_v44 = vpop.f32.mrb[3].mxu0 }
  0xfa   :  { %v240_v45 = vadd.f32 %v500_v42, %v459_v40 }
  0xfc   :  { %v280_v46 = vadd.f32 %v279_v35, %v240_v45 }
  0xfe   :  { %v390_v47 = vpop.f32.mrb[4].mxu0  ;;  %v285_v48 = vmax.f32 %v280_v46, 0.0 }
  0xff   :  { %v546_v49 = vpop.f32.mrb[5].mxu0 }
 0x100   :  { %v393_v50 = vpop.f32.mrb[6].mxu0  ;;  %v413_v51 = vpack.c.bf16 %v285_v48, %v285_v48 }
 0x101   :  { %v547_v52 = vpop.f32.mrb[7].mxu0  ;;  %v523_v53 = vpop.f32.mrb[4].mxu1 }
 0x102   :  { %415 = vst.msk [vmem:[#allocation2] sm:$0x1] %vm414_vm2, %v413_v51  ;;  %v524_v54 = vpop.f32.mrb[5].mxu1 }
 0x103   :  { %v525_v55 = vadd.f32 %v524_v54, %v523_v53  ;;  %v526_v56 = vpop.f32.mrb[6].mxu1 }
 0x104   :  { %v527_v57 = vpop.f32.mrb[7].mxu1 }
 0x105   :  { %v351_v58 = vadd.f32 %v525_v55, %v459_v40 }
 0x107   :  { %v391_v59 = vadd.f32 %v390_v47, %v351_v58 }
 0x109   :  { %v396_v60 = vmax.f32 %v391_v59, 0.0 }
 0x10b   :  { %v416_v61 = vpack.c.bf16 %v396_v60, %v396_v60  ;;  %v397_v62 = vsub.f32 %v285_v48, %v396_v60 }
 0x10d   :  { %v398_v63 = vand.u32 2147483647, %v397_v62  ;;  %417 = vst.msk [vmem:[#allocation4] sm:$0x1] %vm414_vm2, %v416_v61 }
 0x10f   :  { %v400_v0 = vsel %vm399_vm3, %v398_v63, 0.0 }
 0x110   :  { %401 = vadd.xlane.f32.xlu0 %v400_v0 }
 0x111   :  { %585 = shalt.err (!%p582_p4)
}
 0x112   :  { %s586_s18 = scalar_lea.hbm %s809_s5, 16 }
 0x113   :  { %p587_p5 = scmp.ne.s32.totalorder %s809_s5, %s586_s18  ;;  %p590_p6 = scmp.lt.u32.totalorder %s586_s18, %s809_s5 }
 0x115   :  { %p592_p7 = pnand %p590_p6, %p587_p5 }
 0x117   :  { %595 = shalt.err (!%p592_p7)
}
 0x118   :  { %437 = dma.vmem_to_hbm [thread:$0]  %s435_s12, 16, %s809_s5, [#allocation5]  }
 0x119   :  { %s596_s25 = scalar_lea.vmem %s425_s14, 16  ;;  %s600_s26 = scalar_lea.vmem %s425_s14, 32 }
 0x11a   :  { %p597_p8 = scmp.ne.s32.totalorder %s425_s14, %s596_s25  ;;  %p601_p9 = scmp.lt.s32.totalorder %s425_s14, %s425_s14 }
 0x11b   :  { %p602_p10 = scmp.lt.s32.totalorder %s600_s26, %s596_s25 }
 0x11d   :  { %p603_p11 = por %p602_p10, %p601_p9 }
 0x11f   :  { %p604_p12 = pnand %p603_p11, %p597_p8 }
 0x121   :  { %607 = shalt.err (!%p604_p12)
}
 0x122   :  { %s608_s29 = scalar_lea.hbm %s808_s4, 16 }
 0x123   :  { %p609_p13 = scmp.ne.s32.totalorder %s808_s4, %s608_s29  ;;  %p612_p0 = scmp.lt.u32.totalorder %s608_s29, %s808_s4 }
 0x125   :  { %p614_p1 = pnand %p612_p0, %p609_p13 }
 0x127   :  { %617 = shalt.err (!%p614_p1)
}
 0x128   :  { %427 = dma.vmem_to_hbm [thread:$0]  %s425_s14, 16, %s808_s4, [#allocation3]   ;;  %vm411_vm4 = vcmask 0  }
 0x129   :  { %s649_s10 = smov [#allocation6]  }
 0x12a   :  { %s444_s2 = sshll.u32 %s649_s10, 4  ;;  %s445_s2 = int_to_ptr.vmem [resolvable:$true] %s444_s2 }
 0x12b   :  { %s618_s3 = scalar_lea.vmem %s445_s2, 16  ;;  %s622_s12 = scalar_lea.vmem %s445_s2, 32 }
 0x12c   :  { %p619_p2 = scmp.ne.s32.totalorder %s445_s2, %s618_s3  ;;  %p623_p3 = scmp.lt.s32.totalorder %s445_s2, %s445_s2 }
 0x12d   :  { %p624_p4 = scmp.lt.s32.totalorder %s622_s12, %s618_s3 }
 0x12f   :  { %p625_p5 = por %p624_p4, %p623_p3 }
 0x131   :  { %p626_p6 = pnand %p625_p5, %p619_p2 }
 0x19d   :  { %v402_v1 = vpop.xlane.xlu0 %401 }
 0x19e   :  { %v403_v2 = vrot.slane %v402_v1, 4 }
 0x1a0   :  { %v404_v3 = vadd.f32 %v403_v2, %v402_v1 }
 0x1a2   :  { %v405_v4 = vrot.slane %v404_v3, 2 }
 0x1a4   :  { %v406_v5 = vadd.f32 %v405_v4, %v404_v3 }
 0x1a6   :  { %v407_v6 = vrot.slane %v406_v5, 1 }
 0x1a8   :  { %v408_v7 = vadd.f32 %v407_v6, %v406_v5 }
 0x1aa   :  { %548 = vpush %v408_v7 }
 0x1db   :  { %s549_s11 = spop %548 }
 0x1dc   :  { %v410_v8 = vstv %s549_s11 }
 0x1dd   :  { %412 = vst.msk [vmem:[#allocation6] sm:$0x1] %vm411_vm4, %v410_v8 }
 0x1de   :  { %629 = shalt.err (!%p626_p6)
}
 0x1df   :  { %s630_s14 = scalar_lea.hbm %s810_s6, 16 }
 0x1e0   :  { %p631_p7 = scmp.ne.s32.totalorder %s810_s6, %s630_s14  ;;  %p634_p8 = scmp.lt.u32.totalorder %s630_s14, %s810_s6 }
 0x1e2   :  { %p636_p9 = pnand %p634_p8, %p631_p7 }
 0x1e4   :  { %639 = shalt.err (!%p636_p9)
}
 0x1e5   :  { %447 = dma.vmem_to_hbm [thread:$0]  %s445_s2, 16, %s810_s6, [#allocation5]  }
 0x1e6   :  { %640 = dma.done.wait [#allocation3], 16  }
 0x1e7   :  { %641 = vsyncadd [#allocation3], 4294967280 }
 0x1e8   :  { %642 = dma.done.wait [#allocation5], 32  }
 0x1e9   :  { %643 = vsyncadd [#allocation5], 4294967264 }
 0x1ea   :  { %457 = vsyncpa [#allocation3], 1 }
 0x1eb   :  { %458 = vsyncpa [#allocation5], 1 }

// kernel: a_call__.26
= control target key start
LH: loop header
LB: loop body
LE: loop exit
PB: predicated region body
PF: predicated region fallthrough
CT: control target
= control target key end

     0   :  { %s114_s0 = inlined_call_operand.vmem [shape: f32[16,128], index: 0, kind: input, shape index: {}]   ;;  %s115_s1 = inlined_call_operand.vmem [shape: f32[16,128], index: 1, kind: input, shape index: {}]   ;;  %s116_s2 = inlined_call_operand.hbm [shape: f32[1,1,1], index: 2, kind: output, shape index: {}]  }
   0x1   :  { %v12_v0 = vld [vmem:[%s114_s0] sm:$0xff]  ;;  %v13_v1 = vld [vmem:[%s114_s0 + $0x8] sm:$0xff] }
   0x2   :  { %v14_v2 = vld [vmem:[%s115_s1] sm:$0xff]  ;;  %v15_v3 = vld [vmem:[%s115_s1 + $0x8] sm:$0xff] }
   0x3   :  { %v16_v4 = vsub.f32 %v12_v0, %v14_v2 }
   0x4   :  { %7 = vsyncpa [#allocation3], 0  ;;  %v17_v5 = vsub.f32 %v13_v1, %v15_v3  ;;  %s74_s0 = smov [#allocation2]   ;;  %vm31_vm0 = vcmask 0  }
   0x5   :  { %v18_v6 = vand.u32 2147483647, %v16_v4  ;;  %s39_s17 = sshll.u32 %s74_s0, 4  ;;  %s40_s17 = int_to_ptr.vmem [resolvable:$true] %s39_s17 }
   0x6   :  { %v19_v7 = vand.u32 2147483647, %v17_v5  ;;  %s50_s1 = scalar_lea.vmem %s40_s17, 16  ;;  %s54_s19 = scalar_lea.vmem %s40_s17, 32 }
   0x7   :  { %p51_p0 = scmp.ne.s32.totalorder %s40_s17, %s50_s1  ;;  %p55_p1 = scmp.lt.s32.totalorder %s40_s17, %s40_s17 }
   0x8   :  { %v20_v8 = vadd.f32 %v19_v7, %v18_v6  ;;  %p56_p2 = scmp.lt.s32.totalorder %s54_s19, %s50_s1 }
   0xa   :  { %21 = vadd.xlane.f32.xlu0 %v20_v8  ;;  %p57_p3 = por %p56_p2, %p55_p1 }
   0xc   :  { %p58_p4 = pnand %p57_p3, %p51_p0 }
  0x97   :  { %v22_v9 = vpop.xlane.xlu0 %21 }
  0x98   :  { %v23_v10 = vrot.slane %v22_v9, 4 }
  0x9a   :  { %v24_v11 = vadd.f32 %v23_v10, %v22_v9 }
  0x9c   :  { %v25_v12 = vrot.slane %v24_v11, 2 }
  0x9e   :  { %v26_v13 = vadd.f32 %v25_v12, %v24_v11 }
  0xa0   :  { %v27_v14 = vrot.slane %v26_v13, 1 }
  0xa2   :  { %v28_v15 = vadd.f32 %v27_v14, %v26_v13 }
  0xa4   :  { %47 = vpush %v28_v15 }
  0xd5   :  { %s48_s18 = spop %47 }
  0xd6   :  { %v30_v16 = vstv %s48_s18 }
  0xd7   :  { %32 = vst.msk [vmem:[#allocation2] sm:$0x1] %vm31_vm0, %v30_v16 }
  0xd8   :  { %61 = shalt.err (!%p58_p4)
}
  0xd9   :  { %s62_s22 = scalar_lea.hbm %s116_s2, 16 }
  0xda   :  { %p63_p5 = scmp.ne.s32.totalorder %s116_s2, %s62_s22  ;;  %p66_p6 = scmp.lt.u32.totalorder %s62_s22, %s116_s2 }
  0xdc   :  { %p68_p7 = pnand %p66_p6, %p63_p5 }
  0xde   :  { %71 = shalt.err (!%p68_p7)
}
  0xdf   :  { %42 = dma.vmem_to_hbm [thread:$0]  %s40_s17, 16, %s116_s2, [#allocation3]  }
  0xe0   :  { %72 = dma.done.wait [#allocation3], 16  }
  0xe1   :  { %73 = vsyncadd [#allocation3], 4294967280 }
  0xe2   :  { %46 = vsyncpa [#allocation3], 1 }

// kernel: a_call__.25
= control target key start
LH: loop header
LB: loop body
LE: loop exit
PB: predicated region body
PF: predicated region fallthrough
CT: control target
= control target key end

     0   :  { %s136_s0 = inlined_call_operand.vmem [shape: f32[32,128], index: 0, kind: input, shape index: {}]   ;;  %s137_s1 = inlined_call_operand.vmem [shape: f32[32,128], index: 1, kind: input, shape index: {}]   ;;  %s138_s2 = inlined_call_operand.hbm [shape: f32[1,1,1], index: 2, kind: output, shape index: {}]  }
   0x1   :  { %v12_v0 = vld [vmem:[%s136_s0] sm:$0xff]  ;;  %v13_v1 = vld [vmem:[%s136_s0 + $0x8] sm:$0xff]  ;;  %v14_v2 = vld [vmem:[%s136_s0 + $0x10] sm:$0xff] }
   0x2   :  { %v15_v3 = vld [vmem:[%s136_s0 + $0x18] sm:$0xff]  ;;  %v16_v4 = vld [vmem:[%s137_s1] sm:$0xff]  ;;  %v17_v5 = vld [vmem:[%s137_s1 + $0x8] sm:$0xff] }
   0x3   :  { %v18_v6 = vld [vmem:[%s137_s1 + $0x10] sm:$0xff]  ;;  %v19_v7 = vld [vmem:[%s137_s1 + $0x18] sm:$0xff]  ;;  %v20_v8 = vsub.f32 %v12_v0, %v16_v4  ;;  %v21_v9 = vsub.f32 %v13_v1, %v17_v5 }
   0x4   :  { %7 = vsyncpa [#allocation3], 0  ;;  %v22_v10 = vsub.f32 %v14_v2, %v18_v6  ;;  %v23_v11 = vsub.f32 %v15_v3, %v19_v7  ;;  %s84_s0 = smov [#allocation2]   ;;  %vm41_vm0 = vcmask 0  }
   0x5   :  { %v24_v12 = vand.u32 2147483647, %v20_v8  ;;  %v25_v13 = vand.u32 2147483647, %v21_v9  ;;  %s49_s1 = sshll.u32 %s84_s0, 4  ;;  %s50_s1 = int_to_ptr.vmem [resolvable:$true] %s49_s1 }
   0x6   :  { %v26_v14 = vand.u32 2147483647, %v22_v10  ;;  %v27_v15 = vand.u32 2147483647, %v23_v11  ;;  %s60_s26 = scalar_lea.vmem %s50_s1, 16  ;;  %s64_s27 = scalar_lea.vmem %s50_s1, 32 }
   0x7   :  { %v28_v16 = vadd.f32 %v25_v13, %v24_v12  ;;  %p61_p0 = scmp.ne.s32.totalorder %s50_s1, %s60_s26  ;;  %p65_p1 = scmp.lt.s32.totalorder %s50_s1, %s50_s1 }
   0x8   :  { %p66_p2 = scmp.lt.s32.totalorder %s64_s27, %s60_s26 }
   0x9   :  { %v29_v17 = vadd.f32 %v28_v16, %v26_v14 }
   0xa   :  { %p67_p3 = por %p66_p2, %p65_p1 }
   0xb   :  { %v30_v18 = vadd.f32 %v29_v17, %v27_v15 }
   0xc   :  { %p68_p4 = pnand %p67_p3, %p61_p0 }
   0xd   :  { %31 = vadd.xlane.f32.xlu0 %v30_v18 }
  0x9a   :  { %v32_v19 = vpop.xlane.xlu0 %31 }
  0x9b   :  { %v33_v20 = vrot.slane %v32_v19, 4 }
  0x9d   :  { %v34_v21 = vadd.f32 %v33_v20, %v32_v19 }
  0x9f   :  { %v35_v22 = vrot.slane %v34_v21, 2 }
  0xa1   :  { %v36_v23 = vadd.f32 %v35_v22, %v34_v21 }
  0xa3   :  { %v37_v24 = vrot.slane %v36_v23, 1 }
  0xa5   :  { %v38_v25 = vadd.f32 %v37_v24, %v36_v23 }
  0xa7   :  { %57 = vpush %v38_v25 }
  0xd8   :  { %s58_s25 = spop %57 }
  0xd9   :  { %v40_v26 = vstv %s58_s25 }
  0xda   :  { %42 = vst.msk [vmem:[#allocation2] sm:$0x1] %vm41_vm0, %v40_v26 }
  0xdb   :  { %71 = shalt.err (!%p68_p4)
}
  0xdc   :  { %s72_s30 = scalar_lea.hbm %s138_s2, 16 }
  0xdd   :  { %p73_p5 = scmp.ne.s32.totalorder %s138_s2, %s72_s30  ;;  %p76_p6 = scmp.lt.u32.totalorder %s72_s30, %s138_s2 }
  0xdf   :  { %p78_p7 = pnand %p76_p6, %p73_p5 }
  0xe1   :  { %81 = shalt.err (!%p78_p7)
}
  0xe2   :  { %52 = dma.vmem_to_hbm [thread:$0]  %s50_s1, 16, %s138_s2, [#allocation3]  }
  0xe3   :  { %82 = dma.done.wait [#allocation3], 16  }
  0xe4   :  { %83 = vsyncadd [#allocation3], 4294967280 }
  0xe5   :  { %56 = vsyncpa [#allocation3], 1 }

// kernel: a_call__.27
= control target key start
LH: loop header
LB: loop body
LE: loop exit
PB: predicated region body
PF: predicated region fallthrough
CT: control target
= control target key end

     0   :  { %s103_s0 = inlined_call_operand.vmem [shape: f32[8,128], index: 0, kind: input, shape index: {}]   ;;  %s104_s1 = inlined_call_operand.vmem [shape: f32[8,128], index: 1, kind: input, shape index: {}]   ;;  %s105_s2 = inlined_call_operand.hbm [shape: f32[1,1,1], index: 2, kind: output, shape index: {}]  }
   0x1   :  { %v12_v0 = vld [vmem:[%s103_s0] sm:$0xff] }
   0x2   :  { %v13_v1 = vld [vmem:[%s104_s1] sm:$0xff] }
   0x3   :  { %7 = vsyncpa [#allocation3], 0  ;;  %v14_v2 = vsub.f32 %v12_v0, %v13_v1  ;;  %s69_s13 = smov [#allocation2]   ;;  %vm26_vm0 = vcmask 0  }
   0x4   :  { %s34_s14 = sshll.u32 %s69_s13, 4  ;;  %s35_s14 = int_to_ptr.vmem [resolvable:$true] %s34_s14 }
   0x5   :  { %v15_v3 = vand.u32 2147483647, %v14_v2  ;;  %s45_s1 = scalar_lea.vmem %s35_s14, 16  ;;  %s49_s15 = scalar_lea.vmem %s35_s14, 32 }
   0x6   :  { %p46_p0 = scmp.ne.s32.totalorder %s35_s14, %s45_s1  ;;  %p50_p1 = scmp.lt.s32.totalorder %s35_s14, %s35_s14 }
   0x7   :  { %16 = vadd.xlane.f32.xlu0 %v15_v3  ;;  %p51_p2 = scmp.lt.s32.totalorder %s49_s15, %s45_s1 }
   0x9   :  { %p52_p3 = por %p51_p2, %p50_p1 }
   0xb   :  { %p53_p4 = pnand %p52_p3, %p46_p0 }
  0x94   :  { %v17_v4 = vpop.xlane.xlu0 %16 }
  0x95   :  { %v18_v5 = vrot.slane %v17_v4, 4 }
  0x97   :  { %v19_v6 = vadd.f32 %v18_v5, %v17_v4 }
  0x99   :  { %v20_v7 = vrot.slane %v19_v6, 2 }
  0x9b   :  { %v21_v8 = vadd.f32 %v20_v7, %v19_v6 }
  0x9d   :  { %v22_v9 = vrot.slane %v21_v8, 1 }
  0x9f   :  { %v23_v10 = vadd.f32 %v22_v9, %v21_v8 }
  0xa1   :  { %42 = vpush %v23_v10 }
  0xd2   :  { %s43_s0 = spop %42 }
  0xd3   :  { %v25_v11 = vstv %s43_s0 }
  0xd4   :  { %27 = vst.msk [vmem:[#allocation2] sm:$0x1] %vm26_vm0, %v25_v11 }
  0xd5   :  { %56 = shalt.err (!%p53_p4)
}
  0xd6   :  { %s57_s18 = scalar_lea.hbm %s105_s2, 16 }
  0xd7   :  { %p58_p5 = scmp.ne.s32.totalorder %s105_s2, %s57_s18  ;;  %p61_p6 = scmp.lt.u32.totalorder %s57_s18, %s105_s2 }
  0xd9   :  { %p63_p7 = pnand %p61_p6, %p58_p5 }
  0xdb   :  { %66 = shalt.err (!%p63_p7)
}
  0xdc   :  { %37 = dma.vmem_to_hbm [thread:$0]  %s35_s14, 16, %s105_s2, [#allocation3]  }
  0xdd   :  { %67 = dma.done.wait [#allocation3], 16  }
  0xde   :  { %68 = vsyncadd [#allocation3], 4294967280 }
  0xdf   :  { %41 = vsyncpa [#allocation3], 1 }

// kernel: a_call__.28
= control target key start
LH: loop header
LB: loop body
LE: loop exit
PB: predicated region body
PF: predicated region fallthrough
CT: control target
= control target key end

     0   :  { %s89_s0 = inlined_call_operand.vmem [shape: f32[8,128], index: 0, kind: input, shape index: {}]   ;;  %s90_s1 = inlined_call_operand.hbm [shape: f32[1,1,1], index: 1, kind: output, shape index: {}]  }
   0x1   :  { %v9_v0 = vld [vmem:[%s89_s0] sm:$0xff] }
   0x2   :  { %6 = vsyncpa [#allocation3], 0  ;;  %10 = vadd.xlane.f32.xlu0 %v9_v0  ;;  %s63_s8 = smov [#allocation2]   ;;  %vm20_vm0 = vcmask 0  }
   0x3   :  { %s28_s9 = sshll.u32 %s63_s8, 4  ;;  %s29_s9 = int_to_ptr.vmem [resolvable:$true] %s28_s9 }
   0x4   :  { %s39_s11 = scalar_lea.vmem %s29_s9, 16  ;;  %s43_s0 = scalar_lea.vmem %s29_s9, 32 }
   0x5   :  { %p40_p0 = scmp.ne.s32.totalorder %s29_s9, %s39_s11  ;;  %p44_p1 = scmp.lt.s32.totalorder %s29_s9, %s29_s9 }
   0x6   :  { %p45_p2 = scmp.lt.s32.totalorder %s43_s0, %s39_s11 }
   0x8   :  { %p46_p3 = por %p45_p2, %p44_p1 }
   0xa   :  { %p47_p4 = pnand %p46_p3, %p40_p0 }
  0x8f   :  { %v11_v1 = vpop.xlane.xlu0 %10 }
  0x90   :  { %v12_v2 = vrot.slane %v11_v1, 4 }
  0x92   :  { %v13_v3 = vadd.f32 %v12_v2, %v11_v1 }
  0x94   :  { %v14_v4 = vrot.slane %v13_v3, 2 }
  0x96   :  { %v15_v5 = vadd.f32 %v14_v4, %v13_v3 }
  0x98   :  { %v16_v6 = vrot.slane %v15_v5, 1 }
  0x9a   :  { %v17_v7 = vadd.f32 %v16_v6, %v15_v5 }
  0x9c   :  { %36 = vpush %v17_v7 }
  0xcd   :  { %s37_s10 = spop %36 }
  0xce   :  { %v19_v8 = vstv %s37_s10 }
  0xcf   :  { %21 = vst.msk [vmem:[#allocation2] sm:$0x1] %vm20_vm0, %v19_v8 }
  0xd0   :  { %50 = shalt.err (!%p47_p4)
}
  0xd1   :  { %s51_s14 = scalar_lea.hbm %s90_s1, 16 }
  0xd2   :  { %p52_p5 = scmp.ne.s32.totalorder %s90_s1, %s51_s14  ;;  %p55_p6 = scmp.lt.u32.totalorder %s51_s14, %s90_s1 }
  0xd4   :  { %p57_p7 = pnand %p55_p6, %p52_p5 }
  0xd6   :  { %60 = shalt.err (!%p57_p7)
}
  0xd7   :  { %31 = dma.vmem_to_hbm [thread:$0]  %s29_s9, 16, %s90_s1, [#allocation3]  }
  0xd8   :  { %61 = dma.done.wait [#allocation3], 16  }
  0xd9   :  { %62 = vsyncadd [#allocation3], 4294967280 }
  0xda   :  { %35 = vsyncpa [#allocation3], 1 }

// kernel: a_call__.29
= control target key start
LH: loop header
LB: loop body
LE: loop exit
PB: predicated region body
PF: predicated region fallthrough
CT: control target
= control target key end

     0   :  { %s309_s9 = smov 0   ;;  %s334_s0 = inlined_call_operand.vmem [shape: f32[2,8,512], index: 0, kind: input, shape index: {}]   ;;  %s335_s1 = inlined_call_operand.vmem [shape: f32[2,1,512], index: 1, kind: input, shape index: {}]   ;;  %s336_s2 = inlined_call_operand.vmem [shape: f32[2,1,1], index: 2, kind: output, shape index: {}]  }
   0x1 LB: > { %s265_s10 = sadd.s32 4294967295, %s292_s9   ;;  %p269_p0 = scmp.ge.s32.totalorder %s292_s9, 1  ;;  %s292_s9 = sphi %s309_s9, %s12_s9  }
   0x2   : > { %p121_p1 = scmp.lt.s32.totalorder %s292_s9, 3 }
   0x4   : > { %p122_p2 = pnand %p269_p0, %p121_p1 }
   0x5   : > { %p145_p3 = scmp.lt.s32.totalorder (!%p122_p2), %s265_s10, 1  ;;  %v163_v0 = vlaneseq (!%p122_p2)  ;;  %vm204_vm0 = vcmask (!%p122_p2), 0  }
   0x6   : > { %125 = sbr.rel (%p122_p2) target bundleno = 236 (0xec), region = 28 }
   0x7   : > { %v164_v1 = vshrl.u32 (!%p122_p2), %v163_v0, 7 }
   0x9   : > { %v165_v2 = vsub.s32 (!%p122_p2), 0, %v164_v1  ;;  %v169_v3 = vsub.s32 (!%p122_p2), 1, %v164_v1  ;;  %v173_v4 = vsub.s32 (!%p122_p2), 2, %v164_v1  ;;  %v177_v5 = vsub.s32 (!%p122_p2), 3, %v164_v1 }
   0xd   : > { %s338_s10 = smov (!%p145_p3, %s265_s10), 1 }
   0xe   : > { %s275_s11 = sshll.u32 %s338_s10, 5  ;;  %s272_s12 = sshll.u32 %s338_s10, 2 }
   0xf   : > { %s149_s15 = scalar_lea.vmem %s334_s0, %s275_s11  ;;  %s153_s18 = scalar_lea.vmem %s335_s1, %s272_s12 }
  0x10   : > { %v157_v6 = vld [vmem:[%s149_s15] sm:$0xff]  ;;  %v158_v7 = vld [vmem:[%s149_s15 + $0x8] sm:$0xff]  ;;  %v159_v8 = vld [vmem:[%s149_s15 + $0x10] sm:$0xff]  ;;  %s156_s21 = scalar_lea.vmem %s336_s2, %s338_s10 }
  0x11   : > { %v160_v9 = vld [vmem:[%s149_s15 + $0x18] sm:$0xff]  ;;  %v161_v10 = vld [vmem:[%s153_s18] sm:$0xf] }
  0x12   : > { %v166_v11 = vrot.slane %v161_v10, %v165_v2  ;;  %v170_v12 = vrot.slane %v161_v10, %v169_v3  ;;  %v174_v13 = vrot.slane %v161_v10, %v173_v4  ;;  %v178_v14 = vrot.slane %v161_v10, %v177_v5 }
  0x14   : > { %v183_v15 = vsub.f32 %v157_v6, %v166_v11  ;;  %v184_v16 = vsub.f32 %v158_v7, %v170_v12  ;;  %v185_v17 = vsub.f32 %v159_v8, %v174_v13  ;;  %v186_v18 = vsub.f32 %v160_v9, %v178_v14 }
  0x16   : > { %v187_v19 = vand.u32 2147483647, %v183_v15  ;;  %v188_v20 = vand.u32 2147483647, %v184_v16  ;;  %v189_v21 = vand.u32 2147483647, %v185_v17 }
  0x17   : > { %v190_v22 = vand.u32 2147483647, %v186_v18 }
  0x18   : > { %v191_v23 = vadd.f32 %v188_v20, %v187_v19 }
  0x1a   : > { %v192_v24 = vadd.f32 %v191_v23, %v189_v21 }
  0x1c   : > { %v193_v25 = vadd.f32 %v192_v24, %v190_v22 }
  0x1e   : > { %194 = vadd.xlane.f32.xlu0 %v193_v25 }
  0xab   : > { %v195_v26 = vpop.xlane.xlu0 %194 }
  0xac   : > { %v196_v27 = vrot.slane %v195_v26, 4 }
  0xae   : > { %v197_v28 = vadd.f32 %v196_v27, %v195_v26 }
  0xb0   : > { %v198_v29 = vrot.slane %v197_v28, 2 }
  0xb2   : > { %v199_v30 = vadd.f32 %v198_v29, %v197_v28 }
  0xb4   : > { %v200_v31 = vrot.slane %v199_v30, 1 }
  0xb6   : > { %v201_v32 = vadd.f32 %v200_v31, %v199_v30 }
  0xb8   : > { %276 = vpush %v201_v32 }
  0xe9   : > { %s277_s22 = spop %276 }
  0xea   : > { %v203_v33 = vstv %s277_s22 }
  0xeb   : > { %205 = vst.msk [vmem:[%s156_s21] sm:$0x1] %vm204_vm0, %v203_v33 }
  0xec PF: > { %s12_s9 = sadd.s32 1, %s292_s9  }
  0xed   : > { %p9_p4 = scmp.ge.s32.totalorder %s12_s9, 4  }
  0xef   :  { %11 = sbr.rel (!%p9_p4) target bundleno = 1 (0x1), region = 61 }

</bundles_post_ra>
